<compile_context>
chip_gen: v6e
topology: v6e:2x2x1
jax: 0.10.0
libtpu: 0.0.40
codegen_flags: <defaults>
</compile_context>

<pallas_src>
import functools

import jax
import jax.numpy as jnp
from jax.experimental import pallas as pl
from jax.experimental.pallas import tpu as pltpu


_HP = 128          # lane-padded hidden size per gate (real GRU hidden = 25)
_HIDDEN = 25       # real hidden size (num_hidden_layer_gru in the PyTorch module)
_FEAT = 512        # feature-extractor output channels (GRU input_size)


# ----------------------------- fused whole-network kernel -----------------------------

def _mouse_net_kernel(
    x_ref,                                   # [B, L, Cin]   channels-last input
    c1w_ref, c1b_ref,                        # [7, Cin, 64], [1, 64]      stem conv
    raw_ref, rab_ref,                        # [3, 64, 64],  [1, 64]      residual conv a
    rbw_ref, rbb_ref,                        # [3, 64, 64],  [1, 64]      residual conv b
    pjw_ref, pjb_ref,                        # [64, 512],    [1, 512]     1x1 projection
    wi0_ref, wi12_ref,                       # [512, 3*HP],  [2, HP, 3*HP]  GRU input weights
    wh_ref, bi_ref, bh_ref,                  # [3, HP, 3*HP],[3, 1, 3*HP],[3, 1, 3*HP]
    fcw_ref, fcb_ref,                        # [HP, 2],      [1, 2]       fc2
    out_ref,                                 # [B, 2]
    xp, h1p, h2p, xseq, seq_a, seq_b,        # VMEM scratch
    *, B, L, Cin, L1, L2, HP,
):
    f32 = jnp.float32
    T = L2
    K1, P1 = 7, 3          # stem conv: kernel 7, pad 3, stride 2
    PP = 1                 # maxpool: kernel 3, pad 1, stride 2
    KR, PR = 3, 1          # residual convs: kernel 3, pad 1, stride 1
    Lf1 = L + 2 * P1 - K1 + 1        # stride-1 stem-conv output length
    Lf2 = L1 + 2 * PP - 3 + 1        # stride-1 maxpool output length

    # Row-selection matrices implementing the stride-2 downsample as a tiny matmul
    # (keeps every load contiguous; no strided slices inside the kernel).
    def downsample_matrix(rows_out, rows_in):
        r = jax.lax.broadcasted_iota(jnp.int32, (rows_out, rows_in), 0)
        c = jax.lax.broadcasted_iota(jnp.int32, (rows_out, rows_in), 1)
        return (c == 2 * r).astype(f32)

    sel1 = downsample_matrix(L1, Lf1)
    sel2 = downsample_matrix(L2, Lf2)

    # Initialize the pad rows of the padded scratch buffers once (reused per batch elem).
    xp[0:P1, :] = jnp.zeros((P1, Cin), f32)
    xp[P1 + L:P1 + L + P1, :] = jnp.zeros((P1, Cin), f32)
    neg = jnp.full((PP, 64), -1e30, f32)     # maxpool padding value
    h1p[0:PP, :] = neg
    h1p[PP + L1:PP + L1 + PP, :] = neg
    h2p[0:PR, :] = jnp.zeros((PR, 64), f32)
    h2p[PR + L2:PR + L2 + PR, :] = jnp.zeros((PR, 64), f32)

    c1b = c1b_ref[...]
    rab = rab_ref[...]
    rbb = rbb_ref[...]
    pjw = pjw_ref[...]
    pjb = pjb_ref[...]

    # ----- feature extractor (approximate resnet50_1d), per batch element -----
    for b in range(B):
        xp[P1:P1 + L, :] = x_ref[b]                                   # [L, Cin] into padded buf

        # stem conv (k=7, stride=2, pad=3) + ReLU: stride-1 taps, then row-select
        acc = jnp.dot(xp[0:Lf1, :], c1w_ref[0], preferred_element_type=f32)
        for k in range(1, K1):
            acc += jnp.dot(xp[k:k + Lf1, :], c1w_ref[k], preferred_element_type=f32)
        full1 = jnp.maximum(acc + c1b, 0.0)                           # [Lf1, 64]
        h1 = jnp.dot(sel1, full1, preferred_element_type=f32)         # [L1, 64]

        # maxpool (k=3, stride=2, pad=1): stride-1 window max, then row-select
        h1p[PP:PP + L1, :] = h1
        fullp = jnp.maximum(jnp.maximum(h1p[0:Lf2, :], h1p[1:1 + Lf2, :]),
                            h1p[2:2 + Lf2, :])                        # [Lf2, 64]
        h2 = jnp.dot(sel2, fullp, preferred_element_type=f32)         # [L2, 64]

        # residual block: conv3 -> ReLU -> conv3 -> (+skip) -> ReLU (skip fused in epilogue)
        h2p[PR:PR + L2, :] = h2
        acc = jnp.dot(h2p[0:L2, :], raw_ref[0], preferred_element_type=f32)
        for k in range(1, KR):
            acc += jnp.dot(h2p[k:k + L2, :], raw_ref[k], preferred_element_type=f32)
        r1 = jnp.maximum(acc + rab, 0.0)

        h2p[PR:PR + L2, :] = r1
        acc = jnp.dot(h2p[0:L2, :], rbw_ref[0], preferred_element_type=f32)
        for k in range(1, KR):
            acc += jnp.dot(h2p[k:k + L2, :], rbw_ref[k], preferred_element_type=f32)
        h3 = jnp.maximum(acc + rbb + h2, 0.0)                         # fused residual + ReLU

        # 1x1 projection to 512 channels + ReLU
        h4 = jnp.maximum(jnp.dot(h3, pjw, preferred_element_type=f32) + pjb, 0.0)   # [T, 512]

        # scatter into the time-major flat sequence buffer [T*B, 512] (lane-dense rows)
        for t in range(T):
            row = t * B + b
            xseq[row:row + 1, :] = h4[t:t + 1, :]

    # ----- 3-layer GRU (gate blocks lane-padded to HP) + fc2, fully fused -----
    def gru_layer(x_flat, wi, layer, seq_out):
        # fused input-gate projection for the whole layer: [T*B, I] @ [I, 3*HP]
        gi = jnp.dot(x_flat, wi, preferred_element_type=f32) + bi_ref[layer]   # [T*B, 3*HP]
        whl = wh_ref[layer]                                                    # [HP, 3*HP]
        bhl = jnp.broadcast_to(bh_ref[layer], (B, 3 * HP))                     # hoisted broadcast
        h = jnp.zeros((B, HP), f32)
        for t in range(T):                                                     # fully unrolled
            gi_t = gi[t * B:(t + 1) * B, :]                                    # [B, 3*HP]
            gh = jnp.dot(h, whl, preferred_element_type=f32) + bhl
            r = jax.nn.sigmoid(gi_t[:, 0:HP] + gh[:, 0:HP])
            z = jax.nn.sigmoid(gi_t[:, HP:2 * HP] + gh[:, HP:2 * HP])
            # PyTorch GRU: n = tanh(W_in x + b_in + r * (W_hn h + b_hn))
            n = jnp.tanh(gi_t[:, 2 * HP:] + r * gh[:, 2 * HP:])
            h = (1.0 - z) * n + z * h
            if seq_out is not None:
                seq_out[t * B:(t + 1) * B, :] = h
        return h

    gru_layer(xseq[...], wi0_ref[...], 0, seq_a)                    # layer 0: input 512
    gru_layer(seq_a[...], wi12_ref[0], 1, seq_b)                    # layer 1
    h_last = gru_layer(seq_b[...], wi12_ref[1], 2, None)            # layer 2: only final h

    # fc2 fused into the epilogue; only the last time step of the top layer is needed.
    out_ref[...] = (jnp.dot(h_last, fcw_ref[...], preferred_element_type=f32)
                    + fcb_ref[...]).astype(out_ref.dtype)


# ----------------------------- parameters -----------------------------

def _uniform(key, shape, bound):
    return jax.random.uniform(key, shape, jnp.float32, -bound, bound)


def _pad_gate_cols(w, hidden, hp):
    """[I, 3, hidden] -> [I, 3*hp]: each gate block lane-padded with zeros."""
    i = w.shape[0]
    out = jnp.zeros((i, 3, hp), jnp.float32).at[:, :, :hidden].set(w)
    return out.reshape(i, 3 * hp)


def _pad_rows(w, rows):
    return jnp.zeros((rows, w.shape[1]), w.dtype).at[:w.shape[0]].set(w)


def init_params(key, num_features=11, hidden=_HIDDEN, feat_dim=_FEAT, hp=_HP):
    ks = iter(jax.random.split(key, 32))

    def u(shape, bound):
        return _uniform(next(ks), shape, bound)

    p = {}

    # approximate resnet50_1d feature extractor; conv weights stored kernel-ready [K, Cin, Cout]
    # (PyTorch [Cout, Cin, K] would convert via transpose(2, 1, 0)).
    def conv_p(cin, cout, k):
        bound = 1.0 / float((cin * k) ** 0.5)
        return u((k, cin, cout), bound), u((1, cout), bound)

    p["c1w"], p["c1b"] = conv_p(num_features, 64, 7)
    p["raw"], p["rab"] = conv_p(64, 64, 3)
    p["rbw"], p["rbb"] = conv_p(64, 64, 3)
    pjw, p["pjb"] = conv_p(64, feat_dim, 1)
    p["pjw"] = pjw.reshape(64, feat_dim)

    # 3-layer GRU, PyTorch gate order (r | z | n); each gate block lane-padded to hp and
    # padded rows/cols/bias lanes set to zero so padded hidden lanes stay exactly 0.
    bound = 1.0 / float(hidden ** 0.5)
    p["wi0"] = _pad_gate_cols(u((feat_dim, 3, hidden), bound), hidden, hp)         # [512, 3*HP]
    p["wi12"] = jnp.stack(
        [_pad_rows(_pad_gate_cols(u((hidden, 3, hidden), bound), hidden, hp), hp)
         for _ in range(2)])                                                        # [2, HP, 3*HP]
    p["wh"] = jnp.stack(
        [_pad_rows(_pad_gate_cols(u((hidden, 3, hidden), bound), hidden, hp), hp)
         for _ in range(3)])                                                        # [3, HP, 3*HP]

    def bias3():
        b = jnp.zeros((3, hp), jnp.float32).at[:, :hidden].set(u((3, hidden), bound))
        return b.reshape(1, 3 * hp)

    p["bi"] = jnp.stack([bias3() for _ in range(3)])                                # [3, 1, 3*HP]
    p["bh"] = jnp.stack([bias3() for _ in range(3)])

    # fc2: Linear(hidden, 2), rows lane-padded to HP (fused into the kernel epilogue)
    p["fcw"] = _pad_rows(u((hidden, 2), bound), hp)                                 # [HP, 2]
    p["fcb"] = u((1, 2), bound)
    return p


# ----------------------------- forward pass -----------------------------

def mouse_net_forward(params, x):
    """x: [B, num_features, L] -> logits [B, 2].  One fused Pallas kernel."""
    B, Cin, L = x.shape
    x_cl = jnp.transpose(x, (0, 2, 1))                 # the single wrapper-side XLA op

    L1 = (L + 2 * 3 - 7) // 2 + 1                      # stem conv output length
    L2 = (L1 + 2 * 1 - 3) // 2 + 1                     # maxpool output length (= GRU seq len T)
    T = L2
    HP = _HP

    kernel = functools.partial(_mouse_net_kernel, B=B, L=L, Cin=Cin, L1=L1, L2=L2, HP=HP)

    return pl.pallas_call(
        kernel,
        out_shape=jax.ShapeDtypeStruct((B, 2), jnp.float32),
        # no grid: every (tiny) operand is a single whole-array VMEM block
        scratch_shapes=[
            pltpu.VMEM((L + 6, Cin), jnp.float32),     # padded stem-conv input
            pltpu.VMEM((L1 + 2, 64), jnp.float32),     # padded maxpool input
            pltpu.VMEM((L2 + 2, 64), jnp.float32),     # padded residual-conv input
            pltpu.VMEM((T * B, _FEAT), jnp.float32),   # time-major feature sequence
            pltpu.VMEM((T * B, HP), jnp.float32),      # GRU layer-0 hidden sequence
            pltpu.VMEM((T * B, HP), jnp.float32),      # GRU layer-1 hidden sequence
        ],
        compiler_params=pltpu.CompilerParams(vmem_limit_bytes=32 * 1024 * 1024),
    )(x_cl,
      params["c1w"], params["c1b"],
      params["raw"], params["rab"],
      params["rbw"], params["rbb"],
      params["pjw"], params["pjb"],
      params["wi0"], params["wi12"], params["wh"], params["bi"], params["bh"],
      params["fcw"], params["fcb"])


# ----------------------------- main -----------------------------

if __name__ == "__main__":
    key = jax.random.PRNGKey(0)
    pkey, xkey = jax.random.split(key)

    batch, num_features, seq_len = 2, 11, 16
    params = init_params(pkey, num_features=num_features)
    x = jax.random.normal(xkey, (batch, num_features, seq_len), jnp.float32)

    out = jax.jit(mouse_net_forward)(params, x)
    out = jax.block_until_ready(out)

    assert out.shape == (batch, 2), out.shape
    assert bool(jnp.all(jnp.isfinite(out)))
    print("KERNEL_OK")
</pallas_src>

<mosaic_0001>
module attributes {stable_mosaic.version = 11 : i64} {
  func.func @_mouse_net_kernel(%arg0: memref<2x16x11xf32, #tpu.memory_space<vmem>>, %arg1: memref<7x11x64xf32, #tpu.memory_space<vmem>>, %arg2: memref<1x64xf32, #tpu.memory_space<vmem>>, %arg3: memref<3x64x64xf32, #tpu.memory_space<vmem>>, %arg4: memref<1x64xf32, #tpu.memory_space<vmem>>, %arg5: memref<3x64x64xf32, #tpu.memory_space<vmem>>, %arg6: memref<1x64xf32, #tpu.memory_space<vmem>>, %arg7: memref<64x512xf32, #tpu.memory_space<vmem>>, %arg8: memref<1x512xf32, #tpu.memory_space<vmem>>, %arg9: memref<512x384xf32, #tpu.memory_space<vmem>>, %arg10: memref<2x128x384xf32, #tpu.memory_space<vmem>>, %arg11: memref<3x128x384xf32, #tpu.memory_space<vmem>>, %arg12: memref<3x1x384xf32, #tpu.memory_space<vmem>>, %arg13: memref<3x1x384xf32, #tpu.memory_space<vmem>>, %arg14: memref<128x2xf32, #tpu.memory_space<vmem>>, %arg15: memref<1x2xf32, #tpu.memory_space<vmem>>, %arg16: memref<2x2xf32, #tpu.memory_space<vmem>>, %arg17: memref<22x11xf32, #tpu.memory_space<vmem>>, %arg18: memref<10x64xf32, #tpu.memory_space<vmem>>, %arg19: memref<6x64xf32, #tpu.memory_space<vmem>>, %arg20: memref<8x512xf32, #tpu.memory_space<vmem>>, %arg21: memref<8x128xf32, #tpu.memory_space<vmem>>, %arg22: memref<8x128xf32, #tpu.memory_space<vmem>>) attributes {dimension_semantics = [], scalar_prefetch = 0 : i64, scratch_operands = 6 : i64, tpu.core_type = #tpu.core_type<tc>} {
    %0 = tpu.iota {dimensions = array<i32: 0>} : vector<8x16xi32>
    %1 = tpu.iota {dimensions = array<i32: 1>} : vector<8x16xi32>
    %c2_i32 = arith.constant 2 : i32
    %2 = vector.broadcast %c2_i32 : i32 to vector<8x16xi32>
    %3 = arith.muli %2, %0 : vector<8x16xi32>
    %4 = arith.cmpi eq, %1, %3 : vector<8x16xi32>
    %5 = arith.extui %4 : vector<8x16xi1> to vector<8x16xi32>
    %6 = arith.sitofp %5 : vector<8x16xi32> to vector<8x16xf32>
    %7 = tpu.iota {dimensions = array<i32: 0>} : vector<4x8xi32>
    %8 = tpu.iota {dimensions = array<i32: 1>} : vector<4x8xi32>
    %c2_i32_0 = arith.constant 2 : i32
    %9 = vector.broadcast %c2_i32_0 : i32 to vector<4x8xi32>
    %10 = arith.muli %9, %7 : vector<4x8xi32>
    %11 = arith.cmpi eq, %8, %10 : vector<4x8xi32>
    %12 = arith.extui %11 : vector<4x8xi1> to vector<4x8xi32>
    %13 = arith.sitofp %12 : vector<4x8xi32> to vector<4x8xf32>
    %cst = arith.constant 0.000000e+00 : f32
    %14 = vector.broadcast %cst : f32 to vector<3x11xf32>
    %c0 = arith.constant 0 : index
    %c0_1 = arith.constant 0 : index
    %15 = vector.load %arg17[%c0, %c0_1] : memref<22x11xf32, #tpu.memory_space<vmem>>, vector<3x11xf32>
    tpu.vector_store %arg17[%c0, %c0_1], %14 {strides = array<i32>} : memref<22x11xf32, #tpu.memory_space<vmem>>, vector<3x11xf32>,
    %cst_2 = arith.constant 0.000000e+00 : f32
    %16 = vector.broadcast %cst_2 : f32 to vector<3x11xf32>
    %c19 = arith.constant 19 : index
    %c0_3 = arith.constant 0 : index
    %17 = vector.load %arg17[%c19, %c0_3] : memref<22x11xf32, #tpu.memory_space<vmem>>, vector<3x11xf32>
    tpu.vector_store %arg17[%c19, %c0_3], %16 {strides = array<i32>} : memref<22x11xf32, #tpu.memory_space<vmem>>, vector<3x11xf32>,
    %cst_4 = arith.constant -1.000000e+30 : f32
    %18 = vector.broadcast %cst_4 : f32 to vector<1x64xf32>
    %c0_5 = arith.constant 0 : index
    %c0_6 = arith.constant 0 : index
    %19 = vector.load %arg18[%c0_5, %c0_6] : memref<10x64xf32, #tpu.memory_space<vmem>>, vector<1x64xf32>
    tpu.vector_store %arg18[%c0_5, %c0_6], %18 {strides = array<i32>} : memref<10x64xf32, #tpu.memory_space<vmem>>, vector<1x64xf32>,
    %c9 = arith.constant 9 : index
    %c0_7 = arith.constant 0 : index
    %20 = vector.load %arg18[%c9, %c0_7] : memref<10x64xf32, #tpu.memory_space<vmem>>, vector<1x64xf32>
    tpu.vector_store %arg18[%c9, %c0_7], %18 {strides = array<i32>} : memref<10x64xf32, #tpu.memory_space<vmem>>, vector<1x64xf32>,
    %cst_8 = arith.constant 0.000000e+00 : f32
    %21 = vector.broadcast %cst_8 : f32 to vector<1x64xf32>
    %c0_9 = arith.constant 0 : index
    %c0_10 = arith.constant 0 : index
    %22 = vector.load %arg19[%c0_9, %c0_10] : memref<6x64xf32, #tpu.memory_space<vmem>>, vector<1x64xf32>
    tpu.vector_store %arg19[%c0_9, %c0_10], %21 {strides = array<i32>} : memref<6x64xf32, #tpu.memory_space<vmem>>, vector<1x64xf32>,
    %cst_11 = arith.constant 0.000000e+00 : f32
    %23 = vector.broadcast %cst_11 : f32 to vector<1x64xf32>
    %c5 = arith.constant 5 : index
    %c0_12 = arith.constant 0 : index
    %24 = vector.load %arg19[%c5, %c0_12] : memref<6x64xf32, #tpu.memory_space<vmem>>, vector<1x64xf32>
    tpu.vector_store %arg19[%c5, %c0_12], %23 {strides = array<i32>} : memref<6x64xf32, #tpu.memory_space<vmem>>, vector<1x64xf32>,
    %c0_13 = arith.constant 0 : index
    %c0_14 = arith.constant 0 : index
    %25 = vector.load %arg2[%c0_13, %c0_14] : memref<1x64xf32, #tpu.memory_space<vmem>>, vector<1x64xf32>
    %c0_15 = arith.constant 0 : index
    %c0_16 = arith.constant 0 : index
    %26 = vector.load %arg4[%c0_15, %c0_16] : memref<1x64xf32, #tpu.memory_space<vmem>>, vector<1x64xf32>
    %c0_17 = arith.constant 0 : index
    %c0_18 = arith.constant 0 : index
    %27 = vector.load %arg6[%c0_17, %c0_18] : memref<1x64xf32, #tpu.memory_space<vmem>>, vector<1x64xf32>
    %c0_19 = arith.constant 0 : index
    %c0_20 = arith.constant 0 : index
    %28 = vector.load %arg7[%c0_19, %c0_20] : memref<64x512xf32, #tpu.memory_space<vmem>>, vector<64x512xf32>
    %c0_21 = arith.constant 0 : index
    %c0_22 = arith.constant 0 : index
    %29 = vector.load %arg8[%c0_21, %c0_22] : memref<1x512xf32, #tpu.memory_space<vmem>>, vector<1x512xf32>
    %c0_23 = arith.constant 0 : index
    %c0_24 = arith.constant 0 : index
    %c0_25 = arith.constant 0 : index
    %30 = vector.load %arg0[%c0_23, %c0_24, %c0_25] : memref<2x16x11xf32, #tpu.memory_space<vmem>>, vector<1x16x11xf32>
    %31 = vector.shape_cast %30 : vector<1x16x11xf32> to vector<16x11xf32>
    %c3 = arith.constant 3 : index
    %c0_26 = arith.constant 0 : index
    %32 = vector.load %arg17[%c3, %c0_26] : memref<22x11xf32, #tpu.memory_space<vmem>>, vector<16x11xf32>
    tpu.vector_store %arg17[%c3, %c0_26], %31 {strides = array<i32>} : memref<22x11xf32, #tpu.memory_space<vmem>>, vector<16x11xf32>,
    %c0_27 = arith.constant 0 : index
    %c0_28 = arith.constant 0 : index
    %33 = vector.load %arg17[%c0_27, %c0_28] : memref<22x11xf32, #tpu.memory_space<vmem>>, vector<16x11xf32>
    %c0_29 = arith.constant 0 : index
    %c0_30 = arith.constant 0 : index
    %c0_31 = arith.constant 0 : index
    %34 = vector.load %arg1[%c0_29, %c0_30, %c0_31] : memref<7x11x64xf32, #tpu.memory_space<vmem>>, vector<1x11x64xf32>
    %35 = vector.shape_cast %34 : vector<1x11x64xf32> to vector<11x64xf32>
    %cst_32 = arith.constant dense<0.000000e+00> : vector<16x64xf32>
    %36 = tpu.matmul %33, %35, %cst_32 {dimension_numbers = #tpu.dot_dimension_numbers<[1], [0], [0], [1], [0, 0, 1, 1], [], []>} : vector<16x11xf32>, vector<11x64xf32>, vector<16x64xf32> -> vector<16x64xf32>
    %c1 = arith.constant 1 : index
    %c0_33 = arith.constant 0 : index
    %37 = vector.load %arg17[%c1, %c0_33] : memref<22x11xf32, #tpu.memory_space<vmem>>, vector<16x11xf32>
    %c1_34 = arith.constant 1 : index
    %c0_35 = arith.constant 0 : index
    %c0_36 = arith.constant 0 : index
    %38 = vector.load %arg1[%c1_34, %c0_35, %c0_36] : memref<7x11x64xf32, #tpu.memory_space<vmem>>, vector<1x11x64xf32>
    %39 = vector.shape_cast %38 : vector<1x11x64xf32> to vector<11x64xf32>
    %cst_37 = arith.constant dense<0.000000e+00> : vector<16x64xf32>
    %40 = tpu.matmul %37, %39, %cst_37 {dimension_numbers = #tpu.dot_dimension_numbers<[1], [0], [0], [1], [0, 0, 1, 1], [], []>} : vector<16x11xf32>, vector<11x64xf32>, vector<16x64xf32> -> vector<16x64xf32>
    %41 = arith.addf %36, %40 : vector<16x64xf32>
    %c2 = arith.constant 2 : index
    %c0_38 = arith.constant 0 : index
    %42 = vector.load %arg17[%c2, %c0_38] : memref<22x11xf32, #tpu.memory_space<vmem>>, vector<16x11xf32>
    %c2_39 = arith.constant 2 : index
    %c0_40 = arith.constant 0 : index
    %c0_41 = arith.constant 0 : index
    %43 = vector.load %arg1[%c2_39, %c0_40, %c0_41] : memref<7x11x64xf32, #tpu.memory_space<vmem>>, vector<1x11x64xf32>
    %44 = vector.shape_cast %43 : vector<1x11x64xf32> to vector<11x64xf32>
    %cst_42 = arith.constant dense<0.000000e+00> : vector<16x64xf32>
    %45 = tpu.matmul %42, %44, %cst_42 {dimension_numbers = #tpu.dot_dimension_numbers<[1], [0], [0], [1], [0, 0, 1, 1], [], []>} : vector<16x11xf32>, vector<11x64xf32>, vector<16x64xf32> -> vector<16x64xf32>
    %46 = arith.addf %41, %45 : vector<16x64xf32>
    %c3_43 = arith.constant 3 : index
    %c0_44 = arith.constant 0 : index
    %47 = vector.load %arg17[%c3_43, %c0_44] : memref<22x11xf32, #tpu.memory_space<vmem>>, vector<16x11xf32>
    %c3_45 = arith.constant 3 : index
    %c0_46 = arith.constant 0 : index
    %c0_47 = arith.constant 0 : index
    %48 = vector.load %arg1[%c3_45, %c0_46, %c0_47] : memref<7x11x64xf32, #tpu.memory_space<vmem>>, vector<1x11x64xf32>
    %49 = vector.shape_cast %48 : vector<1x11x64xf32> to vector<11x64xf32>
    %cst_48 = arith.constant dense<0.000000e+00> : vector<16x64xf32>
    %50 = tpu.matmul %47, %49, %cst_48 {dimension_numbers = #tpu.dot_dimension_numbers<[1], [0], [0], [1], [0, 0, 1, 1], [], []>} : vector<16x11xf32>, vector<11x64xf32>, vector<16x64xf32> -> vector<16x64xf32>
    %51 = arith.addf %46, %50 : vector<16x64xf32>
    %c4 = arith.constant 4 : index
    %c0_49 = arith.constant 0 : index
    %52 = vector.load %arg17[%c4, %c0_49] : memref<22x11xf32, #tpu.memory_space<vmem>>, vector<16x11xf32>
    %c4_50 = arith.constant 4 : index
    %c0_51 = arith.constant 0 : index
    %c0_52 = arith.constant 0 : index
    %53 = vector.load %arg1[%c4_50, %c0_51, %c0_52] : memref<7x11x64xf32, #tpu.memory_space<vmem>>, vector<1x11x64xf32>
    %54 = vector.shape_cast %53 : vector<1x11x64xf32> to vector<11x64xf32>
    %cst_53 = arith.constant dense<0.000000e+00> : vector<16x64xf32>
    %55 = tpu.matmul %52, %54, %cst_53 {dimension_numbers = #tpu.dot_dimension_numbers<[1], [0], [0], [1], [0, 0, 1, 1], [], []>} : vector<16x11xf32>, vector<11x64xf32>, vector<16x64xf32> -> vector<16x64xf32>
    %56 = arith.addf %51, %55 : vector<16x64xf32>
    %c5_54 = arith.constant 5 : index
    %c0_55 = arith.constant 0 : index
    %57 = vector.load %arg17[%c5_54, %c0_55] : memref<22x11xf32, #tpu.memory_space<vmem>>, vector<16x11xf32>
    %c5_56 = arith.constant 5 : index
    %c0_57 = arith.constant 0 : index
    %c0_58 = arith.constant 0 : index
    %58 = vector.load %arg1[%c5_56, %c0_57, %c0_58] : memref<7x11x64xf32, #tpu.memory_space<vmem>>, vector<1x11x64xf32>
    %59 = vector.shape_cast %58 : vector<1x11x64xf32> to vector<11x64xf32>
    %cst_59 = arith.constant dense<0.000000e+00> : vector<16x64xf32>
    %60 = tpu.matmul %57, %59, %cst_59 {dimension_numbers = #tpu.dot_dimension_numbers<[1], [0], [0], [1], [0, 0, 1, 1], [], []>} : vector<16x11xf32>, vector<11x64xf32>, vector<16x64xf32> -> vector<16x64xf32>
    %61 = arith.addf %56, %60 : vector<16x64xf32>
    %c6 = arith.constant 6 : index
    %c0_60 = arith.constant 0 : index
    %62 = vector.load %arg17[%c6, %c0_60] : memref<22x11xf32, #tpu.memory_space<vmem>>, vector<16x11xf32>
    %c6_61 = arith.constant 6 : index
    %c0_62 = arith.constant 0 : index
    %c0_63 = arith.constant 0 : index
    %63 = vector.load %arg1[%c6_61, %c0_62, %c0_63] : memref<7x11x64xf32, #tpu.memory_space<vmem>>, vector<1x11x64xf32>
    %64 = vector.shape_cast %63 : vector<1x11x64xf32> to vector<11x64xf32>
    %cst_64 = arith.constant dense<0.000000e+00> : vector<16x64xf32>
    %65 = tpu.matmul %62, %64, %cst_64 {dimension_numbers = #tpu.dot_dimension_numbers<[1], [0], [0], [1], [0, 0, 1, 1], [], []>} : vector<16x11xf32>, vector<11x64xf32>, vector<16x64xf32> -> vector<16x64xf32>
    %66 = arith.addf %61, %65 : vector<16x64xf32>
    %67 = vector.broadcast %25 : vector<1x64xf32> to vector<16x64xf32>
    %68 = arith.addf %66, %67 : vector<16x64xf32>
    %cst_65 = arith.constant 0.000000e+00 : f32
    %69 = vector.broadcast %cst_65 : f32 to vector<16x64xf32>
    %70 = arith.maximumf %68, %69 : vector<16x64xf32>
    %cst_66 = arith.constant dense<0.000000e+00> : vector<8x64xf32>
    %71 = tpu.matmul %6, %70, %cst_66 {dimension_numbers = #tpu.dot_dimension_numbers<[1], [0], [0], [1], [0, 0, 1, 1], [], []>} : vector<8x16xf32>, vector<16x64xf32>, vector<8x64xf32> -> vector<8x64xf32>
    %c1_67 = arith.constant 1 : index
    %c0_68 = arith.constant 0 : index
    %72 = vector.load %arg18[%c1_67, %c0_68] : memref<10x64xf32, #tpu.memory_space<vmem>>, vector<8x64xf32>
    tpu.vector_store %arg18[%c1_67, %c0_68], %71 {strides = array<i32>} : memref<10x64xf32, #tpu.memory_space<vmem>>, vector<8x64xf32>,
    %c0_69 = arith.constant 0 : index
    %c0_70 = arith.constant 0 : index
    %73 = vector.load %arg18[%c0_69, %c0_70] : memref<10x64xf32, #tpu.memory_space<vmem>>, vector<8x64xf32>
    %c1_71 = arith.constant 1 : index
    %c0_72 = arith.constant 0 : index
    %74 = vector.load %arg18[%c1_71, %c0_72] : memref<10x64xf32, #tpu.memory_space<vmem>>, vector<8x64xf32>
    %75 = arith.maximumf %73, %74 : vector<8x64xf32>
    %c2_73 = arith.constant 2 : index
    %c0_74 = arith.constant 0 : index
    %76 = vector.load %arg18[%c2_73, %c0_74] : memref<10x64xf32, #tpu.memory_space<vmem>>, vector<8x64xf32>
    %77 = arith.maximumf %75, %76 : vector<8x64xf32>
    %cst_75 = arith.constant dense<0.000000e+00> : vector<4x64xf32>
    %78 = tpu.matmul %13, %77, %cst_75 {dimension_numbers = #tpu.dot_dimension_numbers<[1], [0], [0], [1], [0, 0, 1, 1], [], []>} : vector<4x8xf32>, vector<8x64xf32>, vector<4x64xf32> -> vector<4x64xf32>
    %c1_76 = arith.constant 1 : index
    %c0_77 = arith.constant 0 : index
    %79 = vector.load %arg19[%c1_76, %c0_77] : memref<6x64xf32, #tpu.memory_space<vmem>>, vector<4x64xf32>
    tpu.vector_store %arg19[%c1_76, %c0_77], %78 {strides = array<i32>} : memref<6x64xf32, #tpu.memory_space<vmem>>, vector<4x64xf32>,
    %c0_78 = arith.constant 0 : index
    %c0_79 = arith.constant 0 : index
    %80 = vector.load %arg19[%c0_78, %c0_79] : memref<6x64xf32, #tpu.memory_space<vmem>>, vector<4x64xf32>
    %c0_80 = arith.constant 0 : index
    %c0_81 = arith.constant 0 : index
    %c0_82 = arith.constant 0 : index
    %81 = vector.load %arg3[%c0_80, %c0_81, %c0_82] : memref<3x64x64xf32, #tpu.memory_space<vmem>>, vector<1x64x64xf32>
    %82 = vector.shape_cast %81 : vector<1x64x64xf32> to vector<64x64xf32>
    %cst_83 = arith.constant dense<0.000000e+00> : vector<4x64xf32>
    %83 = tpu.matmul %80, %82, %cst_83 {dimension_numbers = #tpu.dot_dimension_numbers<[1], [0], [0], [1], [0, 0, 1, 1], [], []>} : vector<4x64xf32>, vector<64x64xf32>, vector<4x64xf32> -> vector<4x64xf32>
    %c1_84 = arith.constant 1 : index
    %c0_85 = arith.constant 0 : index
    %84 = vector.load %arg19[%c1_84, %c0_85] : memref<6x64xf32, #tpu.memory_space<vmem>>, vector<4x64xf32>
    %c1_86 = arith.constant 1 : index
    %c0_87 = arith.constant 0 : index
    %c0_88 = arith.constant 0 : index
    %85 = vector.load %arg3[%c1_86, %c0_87, %c0_88] : memref<3x64x64xf32, #tpu.memory_space<vmem>>, vector<1x64x64xf32>
    %86 = vector.shape_cast %85 : vector<1x64x64xf32> to vector<64x64xf32>
    %cst_89 = arith.constant dense<0.000000e+00> : vector<4x64xf32>
    %87 = tpu.matmul %84, %86, %cst_89 {dimension_numbers = #tpu.dot_dimension_numbers<[1], [0], [0], [1], [0, 0, 1, 1], [], []>} : vector<4x64xf32>, vector<64x64xf32>, vector<4x64xf32> -> vector<4x64xf32>
    %88 = arith.addf %83, %87 : vector<4x64xf32>
    %c2_90 = arith.constant 2 : index
    %c0_91 = arith.constant 0 : index
    %89 = vector.load %arg19[%c2_90, %c0_91] : memref<6x64xf32, #tpu.memory_space<vmem>>, vector<4x64xf32>
    %c2_92 = arith.constant 2 : index
    %c0_93 = arith.constant 0 : index
    %c0_94 = arith.constant 0 : index
    %90 = vector.load %arg3[%c2_92, %c0_93, %c0_94] : memref<3x64x64xf32, #tpu.memory_space<vmem>>, vector<1x64x64xf32>
    %91 = vector.shape_cast %90 : vector<1x64x64xf32> to vector<64x64xf32>
    %cst_95 = arith.constant dense<0.000000e+00> : vector<4x64xf32>
    %92 = tpu.matmul %89, %91, %cst_95 {dimension_numbers = #tpu.dot_dimension_numbers<[1], [0], [0], [1], [0, 0, 1, 1], [], []>} : vector<4x64xf32>, vector<64x64xf32>, vector<4x64xf32> -> vector<4x64xf32>
    %93 = arith.addf %88, %92 : vector<4x64xf32>
    %94 = vector.broadcast %26 : vector<1x64xf32> to vector<4x64xf32>
    %95 = arith.addf %93, %94 : vector<4x64xf32>
    %cst_96 = arith.constant 0.000000e+00 : f32
    %96 = vector.broadcast %cst_96 : f32 to vector<4x64xf32>
    %97 = arith.maximumf %95, %96 : vector<4x64xf32>
    %c1_97 = arith.constant 1 : index
    %c0_98 = arith.constant 0 : index
    %98 = vector.load %arg19[%c1_97, %c0_98] : memref<6x64xf32, #tpu.memory_space<vmem>>, vector<4x64xf32>
    tpu.vector_store %arg19[%c1_97, %c0_98], %97 {strides = array<i32>} : memref<6x64xf32, #tpu.memory_space<vmem>>, vector<4x64xf32>,
    %c0_99 = arith.constant 0 : index
    %c0_100 = arith.constant 0 : index
    %99 = vector.load %arg19[%c0_99, %c0_100] : memref<6x64xf32, #tpu.memory_space<vmem>>, vector<4x64xf32>
    %c0_101 = arith.constant 0 : index
    %c0_102 = arith.constant 0 : index
    %c0_103 = arith.constant 0 : index
    %100 = vector.load %arg5[%c0_101, %c0_102, %c0_103] : memref<3x64x64xf32, #tpu.memory_space<vmem>>, vector<1x64x64xf32>
    %101 = vector.shape_cast %100 : vector<1x64x64xf32> to vector<64x64xf32>
    %cst_104 = arith.constant dense<0.000000e+00> : vector<4x64xf32>
    %102 = tpu.matmul %99, %101, %cst_104 {dimension_numbers = #tpu.dot_dimension_numbers<[1], [0], [0], [1], [0, 0, 1, 1], [], []>} : vector<4x64xf32>, vector<64x64xf32>, vector<4x64xf32> -> vector<4x64xf32>
    %c1_105 = arith.constant 1 : index
    %c0_106 = arith.constant 0 : index
    %103 = vector.load %arg19[%c1_105, %c0_106] : memref<6x64xf32, #tpu.memory_space<vmem>>, vector<4x64xf32>
    %c1_107 = arith.constant 1 : index
    %c0_108 = arith.constant 0 : index
    %c0_109 = arith.constant 0 : index
    %104 = vector.load %arg5[%c1_107, %c0_108, %c0_109] : memref<3x64x64xf32, #tpu.memory_space<vmem>>, vector<1x64x64xf32>
    %105 = vector.shape_cast %104 : vector<1x64x64xf32> to vector<64x64xf32>
    %cst_110 = arith.constant dense<0.000000e+00> : vector<4x64xf32>
    %106 = tpu.matmul %103, %105, %cst_110 {dimension_numbers = #tpu.dot_dimension_numbers<[1], [0], [0], [1], [0, 0, 1, 1], [], []>} : vector<4x64xf32>, vector<64x64xf32>, vector<4x64xf32> -> vector<4x64xf32>
    %107 = arith.addf %102, %106 : vector<4x64xf32>
    %c2_111 = arith.constant 2 : index
    %c0_112 = arith.constant 0 : index
    %108 = vector.load %arg19[%c2_111, %c0_112] : memref<6x64xf32, #tpu.memory_space<vmem>>, vector<4x64xf32>
    %c2_113 = arith.constant 2 : index
    %c0_114 = arith.constant 0 : index
    %c0_115 = arith.constant 0 : index
    %109 = vector.load %arg5[%c2_113, %c0_114, %c0_115] : memref<3x64x64xf32, #tpu.memory_space<vmem>>, vector<1x64x64xf32>
    %110 = vector.shape_cast %109 : vector<1x64x64xf32> to vector<64x64xf32>
    %cst_116 = arith.constant dense<0.000000e+00> : vector<4x64xf32>
    %111 = tpu.matmul %108, %110, %cst_116 {dimension_numbers = #tpu.dot_dimension_numbers<[1], [0], [0], [1], [0, 0, 1, 1], [], []>} : vector<4x64xf32>, vector<64x64xf32>, vector<4x64xf32> -> vector<4x64xf32>
    %112 = arith.addf %107, %111 : vector<4x64xf32>
    %113 = vector.broadcast %27 : vector<1x64xf32> to vector<4x64xf32>
    %114 = arith.addf %112, %113 : vector<4x64xf32>
    %115 = arith.addf %114, %78 : vector<4x64xf32>
    %cst_117 = arith.constant 0.000000e+00 : f32
    %116 = vector.broadcast %cst_117 : f32 to vector<4x64xf32>
    %117 = arith.maximumf %115, %116 : vector<4x64xf32>
    %cst_118 = arith.constant dense<0.000000e+00> : vector<4x512xf32>
    %118 = tpu.matmul %117, %28, %cst_118 {dimension_numbers = #tpu.dot_dimension_numbers<[1], [0], [0], [1], [0, 0, 1, 1], [], []>} : vector<4x64xf32>, vector<64x512xf32>, vector<4x512xf32> -> vector<4x512xf32>
    %119 = vector.broadcast %29 : vector<1x512xf32> to vector<4x512xf32>
    %120 = arith.addf %118, %119 : vector<4x512xf32>
    %cst_119 = arith.constant 0.000000e+00 : f32
    %121 = vector.broadcast %cst_119 : f32 to vector<4x512xf32>
    %122 = arith.maximumf %120, %121 : vector<4x512xf32>
    %123 = vector.extract_strided_slice %122 {offsets = [0, 0], sizes = [1, 512], strides = [1, 1]} : vector<4x512xf32> to vector<1x512xf32>
    %c0_120 = arith.constant 0 : index
    %c0_121 = arith.constant 0 : index
    %124 = vector.load %arg20[%c0_120, %c0_121] : memref<8x512xf32, #tpu.memory_space<vmem>>, vector<1x512xf32>
    tpu.vector_store %arg20[%c0_120, %c0_121], %123 {strides = array<i32>} : memref<8x512xf32, #tpu.memory_space<vmem>>, vector<1x512xf32>,
    %125 = vector.extract_strided_slice %122 {offsets = [1, 0], sizes = [1, 512], strides = [1, 1]} : vector<4x512xf32> to vector<1x512xf32>
    %c2_122 = arith.constant 2 : index
    %c0_123 = arith.constant 0 : index
    %126 = vector.load %arg20[%c2_122, %c0_123] : memref<8x512xf32, #tpu.memory_space<vmem>>, vector<1x512xf32>
    tpu.vector_store %arg20[%c2_122, %c0_123], %125 {strides = array<i32>} : memref<8x512xf32, #tpu.memory_space<vmem>>, vector<1x512xf32>,
    %127 = vector.extract_strided_slice %122 {offsets = [2, 0], sizes = [1, 512], strides = [1, 1]} : vector<4x512xf32> to vector<1x512xf32>
    %c4_124 = arith.constant 4 : index
    %c0_125 = arith.constant 0 : index
    %128 = vector.load %arg20[%c4_124, %c0_125] : memref<8x512xf32, #tpu.memory_space<vmem>>, vector<1x512xf32>
    tpu.vector_store %arg20[%c4_124, %c0_125], %127 {strides = array<i32>} : memref<8x512xf32, #tpu.memory_space<vmem>>, vector<1x512xf32>,
    %129 = vector.extract_strided_slice %122 {offsets = [3, 0], sizes = [1, 512], strides = [1, 1]} : vector<4x512xf32> to vector<1x512xf32>
    %c6_126 = arith.constant 6 : index
    %c0_127 = arith.constant 0 : index
    %130 = vector.load %arg20[%c6_126, %c0_127] : memref<8x512xf32, #tpu.memory_space<vmem>>, vector<1x512xf32>
    tpu.vector_store %arg20[%c6_126, %c0_127], %129 {strides = array<i32>} : memref<8x512xf32, #tpu.memory_space<vmem>>, vector<1x512xf32>,
    %c1_128 = arith.constant 1 : index
    %c0_129 = arith.constant 0 : index
    %c0_130 = arith.constant 0 : index
    %131 = vector.load %arg0[%c1_128, %c0_129, %c0_130] : memref<2x16x11xf32, #tpu.memory_space<vmem>>, vector<1x16x11xf32>
    %132 = vector.shape_cast %131 : vector<1x16x11xf32> to vector<16x11xf32>
    %c3_131 = arith.constant 3 : index
    %c0_132 = arith.constant 0 : index
    %133 = vector.load %arg17[%c3_131, %c0_132] : memref<22x11xf32, #tpu.memory_space<vmem>>, vector<16x11xf32>
    tpu.vector_store %arg17[%c3_131, %c0_132], %132 {strides = array<i32>} : memref<22x11xf32, #tpu.memory_space<vmem>>, vector<16x11xf32>,
    %c0_133 = arith.constant 0 : index
    %c0_134 = arith.constant 0 : index
    %134 = vector.load %arg17[%c0_133, %c0_134] : memref<22x11xf32, #tpu.memory_space<vmem>>, vector<16x11xf32>
    %c0_135 = arith.constant 0 : index
    %c0_136 = arith.constant 0 : index
    %c0_137 = arith.constant 0 : index
    %135 = vector.load %arg1[%c0_135, %c0_136, %c0_137] : memref<7x11x64xf32, #tpu.memory_space<vmem>>, vector<1x11x64xf32>
    %136 = vector.shape_cast %135 : vector<1x11x64xf32> to vector<11x64xf32>
    %cst_138 = arith.constant dense<0.000000e+00> : vector<16x64xf32>
    %137 = tpu.matmul %134, %136, %cst_138 {dimension_numbers = #tpu.dot_dimension_numbers<[1], [0], [0], [1], [0, 0, 1, 1], [], []>} : vector<16x11xf32>, vector<11x64xf32>, vector<16x64xf32> -> vector<16x64xf32>
    %c1_139 = arith.constant 1 : index
    %c0_140 = arith.constant 0 : index
    %138 = vector.load %arg17[%c1_139, %c0_140] : memref<22x11xf32, #tpu.memory_space<vmem>>, vector<16x11xf32>
    %c1_141 = arith.constant 1 : index
    %c0_142 = arith.constant 0 : index
    %c0_143 = arith.constant 0 : index
    %139 = vector.load %arg1[%c1_141, %c0_142, %c0_143] : memref<7x11x64xf32, #tpu.memory_space<vmem>>, vector<1x11x64xf32>
    %140 = vector.shape_cast %139 : vector<1x11x64xf32> to vector<11x64xf32>
    %cst_144 = arith.constant dense<0.000000e+00> : vector<16x64xf32>
    %141 = tpu.matmul %138, %140, %cst_144 {dimension_numbers = #tpu.dot_dimension_numbers<[1], [0], [0], [1], [0, 0, 1, 1], [], []>} : vector<16x11xf32>, vector<11x64xf32>, vector<16x64xf32> -> vector<16x64xf32>
    %142 = arith.addf %137, %141 : vector<16x64xf32>
    %c2_145 = arith.constant 2 : index
    %c0_146 = arith.constant 0 : index
    %143 = vector.load %arg17[%c2_145, %c0_146] : memref<22x11xf32, #tpu.memory_space<vmem>>, vector<16x11xf32>
    %c2_147 = arith.constant 2 : index
    %c0_148 = arith.constant 0 : index
    %c0_149 = arith.constant 0 : index
    %144 = vector.load %arg1[%c2_147, %c0_148, %c0_149] : memref<7x11x64xf32, #tpu.memory_space<vmem>>, vector<1x11x64xf32>
    %145 = vector.shape_cast %144 : vector<1x11x64xf32> to vector<11x64xf32>
    %cst_150 = arith.constant dense<0.000000e+00> : vector<16x64xf32>
    %146 = tpu.matmul %143, %145, %cst_150 {dimension_numbers = #tpu.dot_dimension_numbers<[1], [0], [0], [1], [0, 0, 1, 1], [], []>} : vector<16x11xf32>, vector<11x64xf32>, vector<16x64xf32> -> vector<16x64xf32>
    %147 = arith.addf %142, %146 : vector<16x64xf32>
    %c3_151 = arith.constant 3 : index
    %c0_152 = arith.constant 0 : index
    %148 = vector.load %arg17[%c3_151, %c0_152] : memref<22x11xf32, #tpu.memory_space<vmem>>, vector<16x11xf32>
    %c3_153 = arith.constant 3 : index
    %c0_154 = arith.constant 0 : index
    %c0_155 = arith.constant 0 : index
    %149 = vector.load %arg1[%c3_153, %c0_154, %c0_155] : memref<7x11x64xf32, #tpu.memory_space<vmem>>, vector<1x11x64xf32>
    %150 = vector.shape_cast %149 : vector<1x11x64xf32> to vector<11x64xf32>
    %cst_156 = arith.constant dense<0.000000e+00> : vector<16x64xf32>
    %151 = tpu.matmul %148, %150, %cst_156 {dimension_numbers = #tpu.dot_dimension_numbers<[1], [0], [0], [1], [0, 0, 1, 1], [], []>} : vector<16x11xf32>, vector<11x64xf32>, vector<16x64xf32> -> vector<16x64xf32>
    %152 = arith.addf %147, %151 : vector<16x64xf32>
    %c4_157 = arith.constant 4 : index
    %c0_158 = arith.constant 0 : index
    %153 = vector.load %arg17[%c4_157, %c0_158] : memref<22x11xf32, #tpu.memory_space<vmem>>, vector<16x11xf32>
    %c4_159 = arith.constant 4 : index
    %c0_160 = arith.constant 0 : index
    %c0_161 = arith.constant 0 : index
    %154 = vector.load %arg1[%c4_159, %c0_160, %c0_161] : memref<7x11x64xf32, #tpu.memory_space<vmem>>, vector<1x11x64xf32>
    %155 = vector.shape_cast %154 : vector<1x11x64xf32> to vector<11x64xf32>
    %cst_162 = arith.constant dense<0.000000e+00> : vector<16x64xf32>
    %156 = tpu.matmul %153, %155, %cst_162 {dimension_numbers = #tpu.dot_dimension_numbers<[1], [0], [0], [1], [0, 0, 1, 1], [], []>} : vector<16x11xf32>, vector<11x64xf32>, vector<16x64xf32> -> vector<16x64xf32>
    %157 = arith.addf %152, %156 : vector<16x64xf32>
    %c5_163 = arith.constant 5 : index
    %c0_164 = arith.constant 0 : index
    %158 = vector.load %arg17[%c5_163, %c0_164] : memref<22x11xf32, #tpu.memory_space<vmem>>, vector<16x11xf32>
    %c5_165 = arith.constant 5 : index
    %c0_166 = arith.constant 0 : index
    %c0_167 = arith.constant 0 : index
    %159 = vector.load %arg1[%c5_165, %c0_166, %c0_167] : memref<7x11x64xf32, #tpu.memory_space<vmem>>, vector<1x11x64xf32>
    %160 = vector.shape_cast %159 : vector<1x11x64xf32> to vector<11x64xf32>
    %cst_168 = arith.constant dense<0.000000e+00> : vector<16x64xf32>
    %161 = tpu.matmul %158, %160, %cst_168 {dimension_numbers = #tpu.dot_dimension_numbers<[1], [0], [0], [1], [0, 0, 1, 1], [], []>} : vector<16x11xf32>, vector<11x64xf32>, vector<16x64xf32> -> vector<16x64xf32>
    %162 = arith.addf %157, %161 : vector<16x64xf32>
    %c6_169 = arith.constant 6 : index
    %c0_170 = arith.constant 0 : index
    %163 = vector.load %arg17[%c6_169, %c0_170] : memref<22x11xf32, #tpu.memory_space<vmem>>, vector<16x11xf32>
    %c6_171 = arith.constant 6 : index
    %c0_172 = arith.constant 0 : index
    %c0_173 = arith.constant 0 : index
    %164 = vector.load %arg1[%c6_171, %c0_172, %c0_173] : memref<7x11x64xf32, #tpu.memory_space<vmem>>, vector<1x11x64xf32>
    %165 = vector.shape_cast %164 : vector<1x11x64xf32> to vector<11x64xf32>
    %cst_174 = arith.constant dense<0.000000e+00> : vector<16x64xf32>
    %166 = tpu.matmul %163, %165, %cst_174 {dimension_numbers = #tpu.dot_dimension_numbers<[1], [0], [0], [1], [0, 0, 1, 1], [], []>} : vector<16x11xf32>, vector<11x64xf32>, vector<16x64xf32> -> vector<16x64xf32>
    %167 = arith.addf %162, %166 : vector<16x64xf32>
    %168 = vector.broadcast %25 : vector<1x64xf32> to vector<16x64xf32>
    %169 = arith.addf %167, %168 : vector<16x64xf32>
    %cst_175 = arith.constant 0.000000e+00 : f32
    %170 = vector.broadcast %cst_175 : f32 to vector<16x64xf32>
    %171 = arith.maximumf %169, %170 : vector<16x64xf32>
    %cst_176 = arith.constant dense<0.000000e+00> : vector<8x64xf32>
    %172 = tpu.matmul %6, %171, %cst_176 {dimension_numbers = #tpu.dot_dimension_numbers<[1], [0], [0], [1], [0, 0, 1, 1], [], []>} : vector<8x16xf32>, vector<16x64xf32>, vector<8x64xf32> -> vector<8x64xf32>
    %c1_177 = arith.constant 1 : index
    %c0_178 = arith.constant 0 : index
    %173 = vector.load %arg18[%c1_177, %c0_178] : memref<10x64xf32, #tpu.memory_space<vmem>>, vector<8x64xf32>
    tpu.vector_store %arg18[%c1_177, %c0_178], %172 {strides = array<i32>} : memref<10x64xf32, #tpu.memory_space<vmem>>, vector<8x64xf32>,
    %c0_179 = arith.constant 0 : index
    %c0_180 = arith.constant 0 : index
    %174 = vector.load %arg18[%c0_179, %c0_180] : memref<10x64xf32, #tpu.memory_space<vmem>>, vector<8x64xf32>
    %c1_181 = arith.constant 1 : index
    %c0_182 = arith.constant 0 : index
    %175 = vector.load %arg18[%c1_181, %c0_182] : memref<10x64xf32, #tpu.memory_space<vmem>>, vector<8x64xf32>
    %176 = arith.maximumf %174, %175 : vector<8x64xf32>
    %c2_183 = arith.constant 2 : index
    %c0_184 = arith.constant 0 : index
    %177 = vector.load %arg18[%c2_183, %c0_184] : memref<10x64xf32, #tpu.memory_space<vmem>>, vector<8x64xf32>
    %178 = arith.maximumf %176, %177 : vector<8x64xf32>
    %cst_185 = arith.constant dense<0.000000e+00> : vector<4x64xf32>
    %179 = tpu.matmul %13, %178, %cst_185 {dimension_numbers = #tpu.dot_dimension_numbers<[1], [0], [0], [1], [0, 0, 1, 1], [], []>} : vector<4x8xf32>, vector<8x64xf32>, vector<4x64xf32> -> vector<4x64xf32>
    %c1_186 = arith.constant 1 : index
    %c0_187 = arith.constant 0 : index
    %180 = vector.load %arg19[%c1_186, %c0_187] : memref<6x64xf32, #tpu.memory_space<vmem>>, vector<4x64xf32>
    tpu.vector_store %arg19[%c1_186, %c0_187], %179 {strides = array<i32>} : memref<6x64xf32, #tpu.memory_space<vmem>>, vector<4x64xf32>,
    %c0_188 = arith.constant 0 : index
    %c0_189 = arith.constant 0 : index
    %181 = vector.load %arg19[%c0_188, %c0_189] : memref<6x64xf32, #tpu.memory_space<vmem>>, vector<4x64xf32>
    %c0_190 = arith.constant 0 : index
    %c0_191 = arith.constant 0 : index
    %c0_192 = arith.constant 0 : index
    %182 = vector.load %arg3[%c0_190, %c0_191, %c0_192] : memref<3x64x64xf32, #tpu.memory_space<vmem>>, vector<1x64x64xf32>
    %183 = vector.shape_cast %182 : vector<1x64x64xf32> to vector<64x64xf32>
    %cst_193 = arith.constant dense<0.000000e+00> : vector<4x64xf32>
    %184 = tpu.matmul %181, %183, %cst_193 {dimension_numbers = #tpu.dot_dimension_numbers<[1], [0], [0], [1], [0, 0, 1, 1], [], []>} : vector<4x64xf32>, vector<64x64xf32>, vector<4x64xf32> -> vector<4x64xf32>
    %c1_194 = arith.constant 1 : index
    %c0_195 = arith.constant 0 : index
    %185 = vector.load %arg19[%c1_194, %c0_195] : memref<6x64xf32, #tpu.memory_space<vmem>>, vector<4x64xf32>
    %c1_196 = arith.constant 1 : index
    %c0_197 = arith.constant 0 : index
    %c0_198 = arith.constant 0 : index
    %186 = vector.load %arg3[%c1_196, %c0_197, %c0_198] : memref<3x64x64xf32, #tpu.memory_space<vmem>>, vector<1x64x64xf32>
    %187 = vector.shape_cast %186 : vector<1x64x64xf32> to vector<64x64xf32>
    %cst_199 = arith.constant dense<0.000000e+00> : vector<4x64xf32>
    %188 = tpu.matmul %185, %187, %cst_199 {dimension_numbers = #tpu.dot_dimension_numbers<[1], [0], [0], [1], [0, 0, 1, 1], [], []>} : vector<4x64xf32>, vector<64x64xf32>, vector<4x64xf32> -> vector<4x64xf32>
    %189 = arith.addf %184, %188 : vector<4x64xf32>
    %c2_200 = arith.constant 2 : index
    %c0_201 = arith.constant 0 : index
    %190 = vector.load %arg19[%c2_200, %c0_201] : memref<6x64xf32, #tpu.memory_space<vmem>>, vector<4x64xf32>
    %c2_202 = arith.constant 2 : index
    %c0_203 = arith.constant 0 : index
    %c0_204 = arith.constant 0 : index
    %191 = vector.load %arg3[%c2_202, %c0_203, %c0_204] : memref<3x64x64xf32, #tpu.memory_space<vmem>>, vector<1x64x64xf32>
    %192 = vector.shape_cast %191 : vector<1x64x64xf32> to vector<64x64xf32>
    %cst_205 = arith.constant dense<0.000000e+00> : vector<4x64xf32>
    %193 = tpu.matmul %190, %192, %cst_205 {dimension_numbers = #tpu.dot_dimension_numbers<[1], [0], [0], [1], [0, 0, 1, 1], [], []>} : vector<4x64xf32>, vector<64x64xf32>, vector<4x64xf32> -> vector<4x64xf32>
    %194 = arith.addf %189, %193 : vector<4x64xf32>
    %195 = vector.broadcast %26 : vector<1x64xf32> to vector<4x64xf32>
    %196 = arith.addf %194, %195 : vector<4x64xf32>
    %cst_206 = arith.constant 0.000000e+00 : f32
    %197 = vector.broadcast %cst_206 : f32 to vector<4x64xf32>
    %198 = arith.maximumf %196, %197 : vector<4x64xf32>
    %c1_207 = arith.constant 1 : index
    %c0_208 = arith.constant 0 : index
    %199 = vector.load %arg19[%c1_207, %c0_208] : memref<6x64xf32, #tpu.memory_space<vmem>>, vector<4x64xf32>
    tpu.vector_store %arg19[%c1_207, %c0_208], %198 {strides = array<i32>} : memref<6x64xf32, #tpu.memory_space<vmem>>, vector<4x64xf32>,
    %c0_209 = arith.constant 0 : index
    %c0_210 = arith.constant 0 : index
    %200 = vector.load %arg19[%c0_209, %c0_210] : memref<6x64xf32, #tpu.memory_space<vmem>>, vector<4x64xf32>
    %c0_211 = arith.constant 0 : index
    %c0_212 = arith.constant 0 : index
    %c0_213 = arith.constant 0 : index
    %201 = vector.load %arg5[%c0_211, %c0_212, %c0_213] : memref<3x64x64xf32, #tpu.memory_space<vmem>>, vector<1x64x64xf32>
    %202 = vector.shape_cast %201 : vector<1x64x64xf32> to vector<64x64xf32>
    %cst_214 = arith.constant dense<0.000000e+00> : vector<4x64xf32>
    %203 = tpu.matmul %200, %202, %cst_214 {dimension_numbers = #tpu.dot_dimension_numbers<[1], [0], [0], [1], [0, 0, 1, 1], [], []>} : vector<4x64xf32>, vector<64x64xf32>, vector<4x64xf32> -> vector<4x64xf32>
    %c1_215 = arith.constant 1 : index
    %c0_216 = arith.constant 0 : index
    %204 = vector.load %arg19[%c1_215, %c0_216] : memref<6x64xf32, #tpu.memory_space<vmem>>, vector<4x64xf32>
    %c1_217 = arith.constant 1 : index
    %c0_218 = arith.constant 0 : index
    %c0_219 = arith.constant 0 : index
    %205 = vector.load %arg5[%c1_217, %c0_218, %c0_219] : memref<3x64x64xf32, #tpu.memory_space<vmem>>, vector<1x64x64xf32>
    %206 = vector.shape_cast %205 : vector<1x64x64xf32> to vector<64x64xf32>
    %cst_220 = arith.constant dense<0.000000e+00> : vector<4x64xf32>
    %207 = tpu.matmul %204, %206, %cst_220 {dimension_numbers = #tpu.dot_dimension_numbers<[1], [0], [0], [1], [0, 0, 1, 1], [], []>} : vector<4x64xf32>, vector<64x64xf32>, vector<4x64xf32> -> vector<4x64xf32>
    %208 = arith.addf %203, %207 : vector<4x64xf32>
    %c2_221 = arith.constant 2 : index
    %c0_222 = arith.constant 0 : index
    %209 = vector.load %arg19[%c2_221, %c0_222] : memref<6x64xf32, #tpu.memory_space<vmem>>, vector<4x64xf32>
    %c2_223 = arith.constant 2 : index
    %c0_224 = arith.constant 0 : index
    %c0_225 = arith.constant 0 : index
    %210 = vector.load %arg5[%c2_223, %c0_224, %c0_225] : memref<3x64x64xf32, #tpu.memory_space<vmem>>, vector<1x64x64xf32>
    %211 = vector.shape_cast %210 : vector<1x64x64xf32> to vector<64x64xf32>
    %cst_226 = arith.constant dense<0.000000e+00> : vector<4x64xf32>
    %212 = tpu.matmul %209, %211, %cst_226 {dimension_numbers = #tpu.dot_dimension_numbers<[1], [0], [0], [1], [0, 0, 1, 1], [], []>} : vector<4x64xf32>, vector<64x64xf32>, vector<4x64xf32> -> vector<4x64xf32>
    %213 = arith.addf %208, %212 : vector<4x64xf32>
    %214 = vector.broadcast %27 : vector<1x64xf32> to vector<4x64xf32>
    %215 = arith.addf %213, %214 : vector<4x64xf32>
    %216 = arith.addf %215, %179 : vector<4x64xf32>
    %cst_227 = arith.constant 0.000000e+00 : f32
    %217 = vector.broadcast %cst_227 : f32 to vector<4x64xf32>
    %218 = arith.maximumf %216, %217 : vector<4x64xf32>
    %cst_228 = arith.constant dense<0.000000e+00> : vector<4x512xf32>
    %219 = tpu.matmul %218, %28, %cst_228 {dimension_numbers = #tpu.dot_dimension_numbers<[1], [0], [0], [1], [0, 0, 1, 1], [], []>} : vector<4x64xf32>, vector<64x512xf32>, vector<4x512xf32> -> vector<4x512xf32>
    %220 = vector.broadcast %29 : vector<1x512xf32> to vector<4x512xf32>
    %221 = arith.addf %219, %220 : vector<4x512xf32>
    %cst_229 = arith.constant 0.000000e+00 : f32
    %222 = vector.broadcast %cst_229 : f32 to vector<4x512xf32>
    %223 = arith.maximumf %221, %222 : vector<4x512xf32>
    %224 = vector.extract_strided_slice %223 {offsets = [0, 0], sizes = [1, 512], strides = [1, 1]} : vector<4x512xf32> to vector<1x512xf32>
    %c1_230 = arith.constant 1 : index
    %c0_231 = arith.constant 0 : index
    %225 = vector.load %arg20[%c1_230, %c0_231] : memref<8x512xf32, #tpu.memory_space<vmem>>, vector<1x512xf32>
    tpu.vector_store %arg20[%c1_230, %c0_231], %224 {strides = array<i32>} : memref<8x512xf32, #tpu.memory_space<vmem>>, vector<1x512xf32>,
    %226 = vector.extract_strided_slice %223 {offsets = [1, 0], sizes = [1, 512], strides = [1, 1]} : vector<4x512xf32> to vector<1x512xf32>
    %c3_232 = arith.constant 3 : index
    %c0_233 = arith.constant 0 : index
    %227 = vector.load %arg20[%c3_232, %c0_233] : memref<8x512xf32, #tpu.memory_space<vmem>>, vector<1x512xf32>
    tpu.vector_store %arg20[%c3_232, %c0_233], %226 {strides = array<i32>} : memref<8x512xf32, #tpu.memory_space<vmem>>, vector<1x512xf32>,
    %228 = vector.extract_strided_slice %223 {offsets = [2, 0], sizes = [1, 512], strides = [1, 1]} : vector<4x512xf32> to vector<1x512xf32>
    %c5_234 = arith.constant 5 : index
    %c0_235 = arith.constant 0 : index
    %229 = vector.load %arg20[%c5_234, %c0_235] : memref<8x512xf32, #tpu.memory_space<vmem>>, vector<1x512xf32>
    tpu.vector_store %arg20[%c5_234, %c0_235], %228 {strides = array<i32>} : memref<8x512xf32, #tpu.memory_space<vmem>>, vector<1x512xf32>,
    %230 = vector.extract_strided_slice %223 {offsets = [3, 0], sizes = [1, 512], strides = [1, 1]} : vector<4x512xf32> to vector<1x512xf32>
    %c7 = arith.constant 7 : index
    %c0_236 = arith.constant 0 : index
    %231 = vector.load %arg20[%c7, %c0_236] : memref<8x512xf32, #tpu.memory_space<vmem>>, vector<1x512xf32>
    tpu.vector_store %arg20[%c7, %c0_236], %230 {strides = array<i32>} : memref<8x512xf32, #tpu.memory_space<vmem>>, vector<1x512xf32>,
    %c0_237 = arith.constant 0 : index
    %c0_238 = arith.constant 0 : index
    %232 = vector.load %arg20[%c0_237, %c0_238] : memref<8x512xf32, #tpu.memory_space<vmem>>, vector<8x512xf32>
    %c0_239 = arith.constant 0 : index
    %c0_240 = arith.constant 0 : index
    %233 = vector.load %arg9[%c0_239, %c0_240] : memref<512x384xf32, #tpu.memory_space<vmem>>, vector<512x384xf32>
    %cst_241 = arith.constant dense<0.000000e+00> : vector<8x384xf32>
    %234 = tpu.matmul %232, %233, %cst_241 {dimension_numbers = #tpu.dot_dimension_numbers<[1], [0], [0], [1], [0, 0, 1, 1], [], []>} : vector<8x512xf32>, vector<512x384xf32>, vector<8x384xf32> -> vector<8x384xf32>
    %c0_242 = arith.constant 0 : index
    %c0_243 = arith.constant 0 : index
    %c0_244 = arith.constant 0 : index
    %235 = vector.load %arg12[%c0_242, %c0_243, %c0_244] : memref<3x1x384xf32, #tpu.memory_space<vmem>>, vector<1x1x384xf32>
    %236 = vector.shape_cast %235 : vector<1x1x384xf32> to vector<1x384xf32>
    %237 = vector.broadcast %236 : vector<1x384xf32> to vector<8x384xf32>
    %238 = arith.addf %234, %237 : vector<8x384xf32>
    %c0_245 = arith.constant 0 : index
    %c0_246 = arith.constant 0 : index
    %c0_247 = arith.constant 0 : index
    %239 = vector.load %arg11[%c0_245, %c0_246, %c0_247] : memref<3x128x384xf32, #tpu.memory_space<vmem>>, vector<1x128x384xf32>
    %240 = vector.shape_cast %239 : vector<1x128x384xf32> to vector<128x384xf32>
    %c0_248 = arith.constant 0 : index
    %c0_249 = arith.constant 0 : index
    %c0_250 = arith.constant 0 : index
    %241 = vector.load %arg13[%c0_248, %c0_249, %c0_250] : memref<3x1x384xf32, #tpu.memory_space<vmem>>, vector<1x1x384xf32>
    %242 = vector.shape_cast %241 : vector<1x1x384xf32> to vector<1x384xf32>
    %243 = vector.shape_cast %242 : vector<1x384xf32> to vector<1x384xf32>
    %244 = vector.broadcast %243 : vector<1x384xf32> to vector<2x384xf32>
    %cst_251 = arith.constant 0.000000e+00 : f32
    %245 = vector.broadcast %cst_251 : f32 to vector<2x128xf32>
    %246 = vector.extract_strided_slice %238 {offsets = [0, 0], sizes = [2, 384], strides = [1, 1]} : vector<8x384xf32> to vector<2x384xf32>
    %cst_252 = arith.constant dense<0.000000e+00> : vector<2x384xf32>
    %247 = tpu.matmul %245, %240, %cst_252 {dimension_numbers = #tpu.dot_dimension_numbers<[1], [0], [0], [1], [0, 0, 1, 1], [], []>} : vector<2x128xf32>, vector<128x384xf32>, vector<2x384xf32> -> vector<2x384xf32>
    %248 = arith.addf %247, %244 : vector<2x384xf32>
    %249 = vector.extract_strided_slice %246 {offsets = [0, 0], sizes = [2, 128], strides = [1, 1]} : vector<2x384xf32> to vector<2x128xf32>
    %250 = vector.extract_strided_slice %248 {offsets = [0, 0], sizes = [2, 128], strides = [1, 1]} : vector<2x384xf32> to vector<2x128xf32>
    %251 = arith.addf %249, %250 : vector<2x128xf32>
    %252 = arith.negf %251 : vector<2x128xf32>
    %253 = math.exp %252 : vector<2x128xf32>
    %cst_253 = arith.constant 1.000000e+00 : f32
    %254 = vector.broadcast %cst_253 : f32 to vector<2x128xf32>
    %255 = arith.addf %254, %253 : vector<2x128xf32>
    %256 = arith.divf %254, %255 : vector<2x128xf32>
    %257 = vector.extract_strided_slice %246 {offsets = [0, 128], sizes = [2, 128], strides = [1, 1]} : vector<2x384xf32> to vector<2x128xf32>
    %258 = vector.extract_strided_slice %248 {offsets = [0, 128], sizes = [2, 128], strides = [1, 1]} : vector<2x384xf32> to vector<2x128xf32>
    %259 = arith.addf %257, %258 : vector<2x128xf32>
    %260 = arith.negf %259 : vector<2x128xf32>
    %261 = math.exp %260 : vector<2x128xf32>
    %cst_254 = arith.constant 1.000000e+00 : f32
    %262 = vector.broadcast %cst_254 : f32 to vector<2x128xf32>
    %263 = arith.addf %262, %261 : vector<2x128xf32>
    %264 = arith.divf %262, %263 : vector<2x128xf32>
    %265 = vector.extract_strided_slice %246 {offsets = [0, 256], sizes = [2, 128], strides = [1, 1]} : vector<2x384xf32> to vector<2x128xf32>
    %266 = vector.extract_strided_slice %248 {offsets = [0, 256], sizes = [2, 128], strides = [1, 1]} : vector<2x384xf32> to vector<2x128xf32>
    %267 = arith.mulf %256, %266 : vector<2x128xf32>
    %268 = arith.addf %265, %267 : vector<2x128xf32>
    %269 = math.tanh %268 : vector<2x128xf32>
    %cst_255 = arith.constant 1.000000e+00 : f32
    %270 = vector.broadcast %cst_255 : f32 to vector<2x128xf32>
    %271 = arith.subf %270, %264 : vector<2x128xf32>
    %272 = arith.mulf %271, %269 : vector<2x128xf32>
    %273 = arith.mulf %264, %245 : vector<2x128xf32>
    %274 = arith.addf %272, %273 : vector<2x128xf32>
    %c0_256 = arith.constant 0 : index
    %c0_257 = arith.constant 0 : index
    %275 = vector.load %arg21[%c0_256, %c0_257] : memref<8x128xf32, #tpu.memory_space<vmem>>, vector<2x128xf32>
    tpu.vector_store %arg21[%c0_256, %c0_257], %274 {strides = array<i32>} : memref<8x128xf32, #tpu.memory_space<vmem>>, vector<2x128xf32>,
    %276 = vector.extract_strided_slice %238 {offsets = [2, 0], sizes = [2, 384], strides = [1, 1]} : vector<8x384xf32> to vector<2x384xf32>
    %cst_258 = arith.constant dense<0.000000e+00> : vector<2x384xf32>
    %277 = tpu.matmul %274, %240, %cst_258 {dimension_numbers = #tpu.dot_dimension_numbers<[1], [0], [0], [1], [0, 0, 1, 1], [], []>} : vector<2x128xf32>, vector<128x384xf32>, vector<2x384xf32> -> vector<2x384xf32>
    %278 = arith.addf %277, %244 : vector<2x384xf32>
    %279 = vector.extract_strided_slice %276 {offsets = [0, 0], sizes = [2, 128], strides = [1, 1]} : vector<2x384xf32> to vector<2x128xf32>
    %280 = vector.extract_strided_slice %278 {offsets = [0, 0], sizes = [2, 128], strides = [1, 1]} : vector<2x384xf32> to vector<2x128xf32>
    %281 = arith.addf %279, %280 : vector<2x128xf32>
    %282 = arith.negf %281 : vector<2x128xf32>
    %283 = math.exp %282 : vector<2x128xf32>
    %cst_259 = arith.constant 1.000000e+00 : f32
    %284 = vector.broadcast %cst_259 : f32 to vector<2x128xf32>
    %285 = arith.addf %284, %283 : vector<2x128xf32>
    %286 = arith.divf %284, %285 : vector<2x128xf32>
    %287 = vector.extract_strided_slice %276 {offsets = [0, 128], sizes = [2, 128], strides = [1, 1]} : vector<2x384xf32> to vector<2x128xf32>
    %288 = vector.extract_strided_slice %278 {offsets = [0, 128], sizes = [2, 128], strides = [1, 1]} : vector<2x384xf32> to vector<2x128xf32>
    %289 = arith.addf %287, %288 : vector<2x128xf32>
    %290 = arith.negf %289 : vector<2x128xf32>
    %291 = math.exp %290 : vector<2x128xf32>
    %cst_260 = arith.constant 1.000000e+00 : f32
    %292 = vector.broadcast %cst_260 : f32 to vector<2x128xf32>
    %293 = arith.addf %292, %291 : vector<2x128xf32>
    %294 = arith.divf %292, %293 : vector<2x128xf32>
    %295 = vector.extract_strided_slice %276 {offsets = [0, 256], sizes = [2, 128], strides = [1, 1]} : vector<2x384xf32> to vector<2x128xf32>
    %296 = vector.extract_strided_slice %278 {offsets = [0, 256], sizes = [2, 128], strides = [1, 1]} : vector<2x384xf32> to vector<2x128xf32>
    %297 = arith.mulf %286, %296 : vector<2x128xf32>
    %298 = arith.addf %295, %297 : vector<2x128xf32>
    %299 = math.tanh %298 : vector<2x128xf32>
    %cst_261 = arith.constant 1.000000e+00 : f32
    %300 = vector.broadcast %cst_261 : f32 to vector<2x128xf32>
    %301 = arith.subf %300, %294 : vector<2x128xf32>
    %302 = arith.mulf %301, %299 : vector<2x128xf32>
    %303 = arith.mulf %294, %274 : vector<2x128xf32>
    %304 = arith.addf %302, %303 : vector<2x128xf32>
    %c2_262 = arith.constant 2 : index
    %c0_263 = arith.constant 0 : index
    %305 = vector.load %arg21[%c2_262, %c0_263] : memref<8x128xf32, #tpu.memory_space<vmem>>, vector<2x128xf32>
    tpu.vector_store %arg21[%c2_262, %c0_263], %304 {strides = array<i32>} : memref<8x128xf32, #tpu.memory_space<vmem>>, vector<2x128xf32>,
    %306 = vector.extract_strided_slice %238 {offsets = [4, 0], sizes = [2, 384], strides = [1, 1]} : vector<8x384xf32> to vector<2x384xf32>
    %cst_264 = arith.constant dense<0.000000e+00> : vector<2x384xf32>
    %307 = tpu.matmul %304, %240, %cst_264 {dimension_numbers = #tpu.dot_dimension_numbers<[1], [0], [0], [1], [0, 0, 1, 1], [], []>} : vector<2x128xf32>, vector<128x384xf32>, vector<2x384xf32> -> vector<2x384xf32>
    %308 = arith.addf %307, %244 : vector<2x384xf32>
    %309 = vector.extract_strided_slice %306 {offsets = [0, 0], sizes = [2, 128], strides = [1, 1]} : vector<2x384xf32> to vector<2x128xf32>
    %310 = vector.extract_strided_slice %308 {offsets = [0, 0], sizes = [2, 128], strides = [1, 1]} : vector<2x384xf32> to vector<2x128xf32>
    %311 = arith.addf %309, %310 : vector<2x128xf32>
    %312 = arith.negf %311 : vector<2x128xf32>
    %313 = math.exp %312 : vector<2x128xf32>
    %cst_265 = arith.constant 1.000000e+00 : f32
    %314 = vector.broadcast %cst_265 : f32 to vector<2x128xf32>
    %315 = arith.addf %314, %313 : vector<2x128xf32>
    %316 = arith.divf %314, %315 : vector<2x128xf32>
    %317 = vector.extract_strided_slice %306 {offsets = [0, 128], sizes = [2, 128], strides = [1, 1]} : vector<2x384xf32> to vector<2x128xf32>
    %318 = vector.extract_strided_slice %308 {offsets = [0, 128], sizes = [2, 128], strides = [1, 1]} : vector<2x384xf32> to vector<2x128xf32>
    %319 = arith.addf %317, %318 : vector<2x128xf32>
    %320 = arith.negf %319 : vector<2x128xf32>
    %321 = math.exp %320 : vector<2x128xf32>
    %cst_266 = arith.constant 1.000000e+00 : f32
    %322 = vector.broadcast %cst_266 : f32 to vector<2x128xf32>
    %323 = arith.addf %322, %321 : vector<2x128xf32>
    %324 = arith.divf %322, %323 : vector<2x128xf32>
    %325 = vector.extract_strided_slice %306 {offsets = [0, 256], sizes = [2, 128], strides = [1, 1]} : vector<2x384xf32> to vector<2x128xf32>
    %326 = vector.extract_strided_slice %308 {offsets = [0, 256], sizes = [2, 128], strides = [1, 1]} : vector<2x384xf32> to vector<2x128xf32>
    %327 = arith.mulf %316, %326 : vector<2x128xf32>
    %328 = arith.addf %325, %327 : vector<2x128xf32>
    %329 = math.tanh %328 : vector<2x128xf32>
    %cst_267 = arith.constant 1.000000e+00 : f32
    %330 = vector.broadcast %cst_267 : f32 to vector<2x128xf32>
    %331 = arith.subf %330, %324 : vector<2x128xf32>
    %332 = arith.mulf %331, %329 : vector<2x128xf32>
    %333 = arith.mulf %324, %304 : vector<2x128xf32>
    %334 = arith.addf %332, %333 : vector<2x128xf32>
    %c4_268 = arith.constant 4 : index
    %c0_269 = arith.constant 0 : index
    %335 = vector.load %arg21[%c4_268, %c0_269] : memref<8x128xf32, #tpu.memory_space<vmem>>, vector<2x128xf32>
    tpu.vector_store %arg21[%c4_268, %c0_269], %334 {strides = array<i32>} : memref<8x128xf32, #tpu.memory_space<vmem>>, vector<2x128xf32>,
    %336 = vector.extract_strided_slice %238 {offsets = [6, 0], sizes = [2, 384], strides = [1, 1]} : vector<8x384xf32> to vector<2x384xf32>
    %cst_270 = arith.constant dense<0.000000e+00> : vector<2x384xf32>
    %337 = tpu.matmul %334, %240, %cst_270 {dimension_numbers = #tpu.dot_dimension_numbers<[1], [0], [0], [1], [0, 0, 1, 1], [], []>} : vector<2x128xf32>, vector<128x384xf32>, vector<2x384xf32> -> vector<2x384xf32>
    %338 = arith.addf %337, %244 : vector<2x384xf32>
    %339 = vector.extract_strided_slice %336 {offsets = [0, 0], sizes = [2, 128], strides = [1, 1]} : vector<2x384xf32> to vector<2x128xf32>
    %340 = vector.extract_strided_slice %338 {offsets = [0, 0], sizes = [2, 128], strides = [1, 1]} : vector<2x384xf32> to vector<2x128xf32>
    %341 = arith.addf %339, %340 : vector<2x128xf32>
    %342 = arith.negf %341 : vector<2x128xf32>
    %343 = math.exp %342 : vector<2x128xf32>
    %cst_271 = arith.constant 1.000000e+00 : f32
    %344 = vector.broadcast %cst_271 : f32 to vector<2x128xf32>
    %345 = arith.addf %344, %343 : vector<2x128xf32>
    %346 = arith.divf %344, %345 : vector<2x128xf32>
    %347 = vector.extract_strided_slice %336 {offsets = [0, 128], sizes = [2, 128], strides = [1, 1]} : vector<2x384xf32> to vector<2x128xf32>
    %348 = vector.extract_strided_slice %338 {offsets = [0, 128], sizes = [2, 128], strides = [1, 1]} : vector<2x384xf32> to vector<2x128xf32>
    %349 = arith.addf %347, %348 : vector<2x128xf32>
    %350 = arith.negf %349 : vector<2x128xf32>
    %351 = math.exp %350 : vector<2x128xf32>
    %cst_272 = arith.constant 1.000000e+00 : f32
    %352 = vector.broadcast %cst_272 : f32 to vector<2x128xf32>
    %353 = arith.addf %352, %351 : vector<2x128xf32>
    %354 = arith.divf %352, %353 : vector<2x128xf32>
    %355 = vector.extract_strided_slice %336 {offsets = [0, 256], sizes = [2, 128], strides = [1, 1]} : vector<2x384xf32> to vector<2x128xf32>
    %356 = vector.extract_strided_slice %338 {offsets = [0, 256], sizes = [2, 128], strides = [1, 1]} : vector<2x384xf32> to vector<2x128xf32>
    %357 = arith.mulf %346, %356 : vector<2x128xf32>
    %358 = arith.addf %355, %357 : vector<2x128xf32>
    %359 = math.tanh %358 : vector<2x128xf32>
    %cst_273 = arith.constant 1.000000e+00 : f32
    %360 = vector.broadcast %cst_273 : f32 to vector<2x128xf32>
    %361 = arith.subf %360, %354 : vector<2x128xf32>
    %362 = arith.mulf %361, %359 : vector<2x128xf32>
    %363 = arith.mulf %354, %334 : vector<2x128xf32>
    %364 = arith.addf %362, %363 : vector<2x128xf32>
    %c6_274 = arith.constant 6 : index
    %c0_275 = arith.constant 0 : index
    %365 = vector.load %arg21[%c6_274, %c0_275] : memref<8x128xf32, #tpu.memory_space<vmem>>, vector<2x128xf32>
    tpu.vector_store %arg21[%c6_274, %c0_275], %364 {strides = array<i32>} : memref<8x128xf32, #tpu.memory_space<vmem>>, vector<2x128xf32>,
    %c0_276 = arith.constant 0 : index
    %c0_277 = arith.constant 0 : index
    %366 = vector.load %arg21[%c0_276, %c0_277] : memref<8x128xf32, #tpu.memory_space<vmem>>, vector<8x128xf32>
    %c0_278 = arith.constant 0 : index
    %c0_279 = arith.constant 0 : index
    %c0_280 = arith.constant 0 : index
    %367 = vector.load %arg10[%c0_278, %c0_279, %c0_280] : memref<2x128x384xf32, #tpu.memory_space<vmem>>, vector<1x128x384xf32>
    %368 = vector.shape_cast %367 : vector<1x128x384xf32> to vector<128x384xf32>
    %cst_281 = arith.constant dense<0.000000e+00> : vector<8x384xf32>
    %369 = tpu.matmul %366, %368, %cst_281 {dimension_numbers = #tpu.dot_dimension_numbers<[1], [0], [0], [1], [0, 0, 1, 1], [], []>} : vector<8x128xf32>, vector<128x384xf32>, vector<8x384xf32> -> vector<8x384xf32>
    %c1_282 = arith.constant 1 : index
    %c0_283 = arith.constant 0 : index
    %c0_284 = arith.constant 0 : index
    %370 = vector.load %arg12[%c1_282, %c0_283, %c0_284] : memref<3x1x384xf32, #tpu.memory_space<vmem>>, vector<1x1x384xf32>
    %371 = vector.shape_cast %370 : vector<1x1x384xf32> to vector<1x384xf32>
    %372 = vector.broadcast %371 : vector<1x384xf32> to vector<8x384xf32>
    %373 = arith.addf %369, %372 : vector<8x384xf32>
    %c1_285 = arith.constant 1 : index
    %c0_286 = arith.constant 0 : index
    %c0_287 = arith.constant 0 : index
    %374 = vector.load %arg11[%c1_285, %c0_286, %c0_287] : memref<3x128x384xf32, #tpu.memory_space<vmem>>, vector<1x128x384xf32>
    %375 = vector.shape_cast %374 : vector<1x128x384xf32> to vector<128x384xf32>
    %c1_288 = arith.constant 1 : index
    %c0_289 = arith.constant 0 : index
    %c0_290 = arith.constant 0 : index
    %376 = vector.load %arg13[%c1_288, %c0_289, %c0_290] : memref<3x1x384xf32, #tpu.memory_space<vmem>>, vector<1x1x384xf32>
    %377 = vector.shape_cast %376 : vector<1x1x384xf32> to vector<1x384xf32>
    %378 = vector.shape_cast %377 : vector<1x384xf32> to vector<1x384xf32>
    %379 = vector.broadcast %378 : vector<1x384xf32> to vector<2x384xf32>
    %cst_291 = arith.constant 0.000000e+00 : f32
    %380 = vector.broadcast %cst_291 : f32 to vector<2x128xf32>
    %381 = vector.extract_strided_slice %373 {offsets = [0, 0], sizes = [2, 384], strides = [1, 1]} : vector<8x384xf32> to vector<2x384xf32>
    %cst_292 = arith.constant dense<0.000000e+00> : vector<2x384xf32>
    %382 = tpu.matmul %380, %375, %cst_292 {dimension_numbers = #tpu.dot_dimension_numbers<[1], [0], [0], [1], [0, 0, 1, 1], [], []>} : vector<2x128xf32>, vector<128x384xf32>, vector<2x384xf32> -> vector<2x384xf32>
    %383 = arith.addf %382, %379 : vector<2x384xf32>
    %384 = vector.extract_strided_slice %381 {offsets = [0, 0], sizes = [2, 128], strides = [1, 1]} : vector<2x384xf32> to vector<2x128xf32>
    %385 = vector.extract_strided_slice %383 {offsets = [0, 0], sizes = [2, 128], strides = [1, 1]} : vector<2x384xf32> to vector<2x128xf32>
    %386 = arith.addf %384, %385 : vector<2x128xf32>
    %387 = arith.negf %386 : vector<2x128xf32>
    %388 = math.exp %387 : vector<2x128xf32>
    %cst_293 = arith.constant 1.000000e+00 : f32
    %389 = vector.broadcast %cst_293 : f32 to vector<2x128xf32>
    %390 = arith.addf %389, %388 : vector<2x128xf32>
    %391 = arith.divf %389, %390 : vector<2x128xf32>
    %392 = vector.extract_strided_slice %381 {offsets = [0, 128], sizes = [2, 128], strides = [1, 1]} : vector<2x384xf32> to vector<2x128xf32>
    %393 = vector.extract_strided_slice %383 {offsets = [0, 128], sizes = [2, 128], strides = [1, 1]} : vector<2x384xf32> to vector<2x128xf32>
    %394 = arith.addf %392, %393 : vector<2x128xf32>
    %395 = arith.negf %394 : vector<2x128xf32>
    %396 = math.exp %395 : vector<2x128xf32>
    %cst_294 = arith.constant 1.000000e+00 : f32
    %397 = vector.broadcast %cst_294 : f32 to vector<2x128xf32>
    %398 = arith.addf %397, %396 : vector<2x128xf32>
    %399 = arith.divf %397, %398 : vector<2x128xf32>
    %400 = vector.extract_strided_slice %381 {offsets = [0, 256], sizes = [2, 128], strides = [1, 1]} : vector<2x384xf32> to vector<2x128xf32>
    %401 = vector.extract_strided_slice %383 {offsets = [0, 256], sizes = [2, 128], strides = [1, 1]} : vector<2x384xf32> to vector<2x128xf32>
    %402 = arith.mulf %391, %401 : vector<2x128xf32>
    %403 = arith.addf %400, %402 : vector<2x128xf32>
    %404 = math.tanh %403 : vector<2x128xf32>
    %cst_295 = arith.constant 1.000000e+00 : f32
    %405 = vector.broadcast %cst_295 : f32 to vector<2x128xf32>
    %406 = arith.subf %405, %399 : vector<2x128xf32>
    %407 = arith.mulf %406, %404 : vector<2x128xf32>
    %408 = arith.mulf %399, %380 : vector<2x128xf32>
    %409 = arith.addf %407, %408 : vector<2x128xf32>
    %c0_296 = arith.constant 0 : index
    %c0_297 = arith.constant 0 : index
    %410 = vector.load %arg22[%c0_296, %c0_297] : memref<8x128xf32, #tpu.memory_space<vmem>>, vector<2x128xf32>
    tpu.vector_store %arg22[%c0_296, %c0_297], %409 {strides = array<i32>} : memref<8x128xf32, #tpu.memory_space<vmem>>, vector<2x128xf32>,
    %411 = vector.extract_strided_slice %373 {offsets = [2, 0], sizes = [2, 384], strides = [1, 1]} : vector<8x384xf32> to vector<2x384xf32>
    %cst_298 = arith.constant dense<0.000000e+00> : vector<2x384xf32>
    %412 = tpu.matmul %409, %375, %cst_298 {dimension_numbers = #tpu.dot_dimension_numbers<[1], [0], [0], [1], [0, 0, 1, 1], [], []>} : vector<2x128xf32>, vector<128x384xf32>, vector<2x384xf32> -> vector<2x384xf32>
    %413 = arith.addf %412, %379 : vector<2x384xf32>
    %414 = vector.extract_strided_slice %411 {offsets = [0, 0], sizes = [2, 128], strides = [1, 1]} : vector<2x384xf32> to vector<2x128xf32>
    %415 = vector.extract_strided_slice %413 {offsets = [0, 0], sizes = [2, 128], strides = [1, 1]} : vector<2x384xf32> to vector<2x128xf32>
    %416 = arith.addf %414, %415 : vector<2x128xf32>
    %417 = arith.negf %416 : vector<2x128xf32>
    %418 = math.exp %417 : vector<2x128xf32>
    %cst_299 = arith.constant 1.000000e+00 : f32
    %419 = vector.broadcast %cst_299 : f32 to vector<2x128xf32>
    %420 = arith.addf %419, %418 : vector<2x128xf32>
    %421 = arith.divf %419, %420 : vector<2x128xf32>
    %422 = vector.extract_strided_slice %411 {offsets = [0, 128], sizes = [2, 128], strides = [1, 1]} : vector<2x384xf32> to vector<2x128xf32>
    %423 = vector.extract_strided_slice %413 {offsets = [0, 128], sizes = [2, 128], strides = [1, 1]} : vector<2x384xf32> to vector<2x128xf32>
    %424 = arith.addf %422, %423 : vector<2x128xf32>
    %425 = arith.negf %424 : vector<2x128xf32>
    %426 = math.exp %425 : vector<2x128xf32>
    %cst_300 = arith.constant 1.000000e+00 : f32
    %427 = vector.broadcast %cst_300 : f32 to vector<2x128xf32>
    %428 = arith.addf %427, %426 : vector<2x128xf32>
    %429 = arith.divf %427, %428 : vector<2x128xf32>
    %430 = vector.extract_strided_slice %411 {offsets = [0, 256], sizes = [2, 128], strides = [1, 1]} : vector<2x384xf32> to vector<2x128xf32>
    %431 = vector.extract_strided_slice %413 {offsets = [0, 256], sizes = [2, 128], strides = [1, 1]} : vector<2x384xf32> to vector<2x128xf32>
    %432 = arith.mulf %421, %431 : vector<2x128xf32>
    %433 = arith.addf %430, %432 : vector<2x128xf32>
    %434 = math.tanh %433 : vector<2x128xf32>
    %cst_301 = arith.constant 1.000000e+00 : f32
    %435 = vector.broadcast %cst_301 : f32 to vector<2x128xf32>
    %436 = arith.subf %435, %429 : vector<2x128xf32>
    %437 = arith.mulf %436, %434 : vector<2x128xf32>
    %438 = arith.mulf %429, %409 : vector<2x128xf32>
    %439 = arith.addf %437, %438 : vector<2x128xf32>
    %c2_302 = arith.constant 2 : index
    %c0_303 = arith.constant 0 : index
    %440 = vector.load %arg22[%c2_302, %c0_303] : memref<8x128xf32, #tpu.memory_space<vmem>>, vector<2x128xf32>
    tpu.vector_store %arg22[%c2_302, %c0_303], %439 {strides = array<i32>} : memref<8x128xf32, #tpu.memory_space<vmem>>, vector<2x128xf32>,
    %441 = vector.extract_strided_slice %373 {offsets = [4, 0], sizes = [2, 384], strides = [1, 1]} : vector<8x384xf32> to vector<2x384xf32>
    %cst_304 = arith.constant dense<0.000000e+00> : vector<2x384xf32>
    %442 = tpu.matmul %439, %375, %cst_304 {dimension_numbers = #tpu.dot_dimension_numbers<[1], [0], [0], [1], [0, 0, 1, 1], [], []>} : vector<2x128xf32>, vector<128x384xf32>, vector<2x384xf32> -> vector<2x384xf32>
    %443 = arith.addf %442, %379 : vector<2x384xf32>
    %444 = vector.extract_strided_slice %441 {offsets = [0, 0], sizes = [2, 128], strides = [1, 1]} : vector<2x384xf32> to vector<2x128xf32>
    %445 = vector.extract_strided_slice %443 {offsets = [0, 0], sizes = [2, 128], strides = [1, 1]} : vector<2x384xf32> to vector<2x128xf32>
    %446 = arith.addf %444, %445 : vector<2x128xf32>
    %447 = arith.negf %446 : vector<2x128xf32>
    %448 = math.exp %447 : vector<2x128xf32>
    %cst_305 = arith.constant 1.000000e+00 : f32
    %449 = vector.broadcast %cst_305 : f32 to vector<2x128xf32>
    %450 = arith.addf %449, %448 : vector<2x128xf32>
    %451 = arith.divf %449, %450 : vector<2x128xf32>
    %452 = vector.extract_strided_slice %441 {offsets = [0, 128], sizes = [2, 128], strides = [1, 1]} : vector<2x384xf32> to vector<2x128xf32>
    %453 = vector.extract_strided_slice %443 {offsets = [0, 128], sizes = [2, 128], strides = [1, 1]} : vector<2x384xf32> to vector<2x128xf32>
    %454 = arith.addf %452, %453 : vector<2x128xf32>
    %455 = arith.negf %454 : vector<2x128xf32>
    %456 = math.exp %455 : vector<2x128xf32>
    %cst_306 = arith.constant 1.000000e+00 : f32
    %457 = vector.broadcast %cst_306 : f32 to vector<2x128xf32>
    %458 = arith.addf %457, %456 : vector<2x128xf32>
    %459 = arith.divf %457, %458 : vector<2x128xf32>
    %460 = vector.extract_strided_slice %441 {offsets = [0, 256], sizes = [2, 128], strides = [1, 1]} : vector<2x384xf32> to vector<2x128xf32>
    %461 = vector.extract_strided_slice %443 {offsets = [0, 256], sizes = [2, 128], strides = [1, 1]} : vector<2x384xf32> to vector<2x128xf32>
    %462 = arith.mulf %451, %461 : vector<2x128xf32>
    %463 = arith.addf %460, %462 : vector<2x128xf32>
    %464 = math.tanh %463 : vector<2x128xf32>
    %cst_307 = arith.constant 1.000000e+00 : f32
    %465 = vector.broadcast %cst_307 : f32 to vector<2x128xf32>
    %466 = arith.subf %465, %459 : vector<2x128xf32>
    %467 = arith.mulf %466, %464 : vector<2x128xf32>
    %468 = arith.mulf %459, %439 : vector<2x128xf32>
    %469 = arith.addf %467, %468 : vector<2x128xf32>
    %c4_308 = arith.constant 4 : index
    %c0_309 = arith.constant 0 : index
    %470 = vector.load %arg22[%c4_308, %c0_309] : memref<8x128xf32, #tpu.memory_space<vmem>>, vector<2x128xf32>
    tpu.vector_store %arg22[%c4_308, %c0_309], %469 {strides = array<i32>} : memref<8x128xf32, #tpu.memory_space<vmem>>, vector<2x128xf32>,
    %471 = vector.extract_strided_slice %373 {offsets = [6, 0], sizes = [2, 384], strides = [1, 1]} : vector<8x384xf32> to vector<2x384xf32>
    %cst_310 = arith.constant dense<0.000000e+00> : vector<2x384xf32>
    %472 = tpu.matmul %469, %375, %cst_310 {dimension_numbers = #tpu.dot_dimension_numbers<[1], [0], [0], [1], [0, 0, 1, 1], [], []>} : vector<2x128xf32>, vector<128x384xf32>, vector<2x384xf32> -> vector<2x384xf32>
    %473 = arith.addf %472, %379 : vector<2x384xf32>
    %474 = vector.extract_strided_slice %471 {offsets = [0, 0], sizes = [2, 128], strides = [1, 1]} : vector<2x384xf32> to vector<2x128xf32>
    %475 = vector.extract_strided_slice %473 {offsets = [0, 0], sizes = [2, 128], strides = [1, 1]} : vector<2x384xf32> to vector<2x128xf32>
    %476 = arith.addf %474, %475 : vector<2x128xf32>
    %477 = arith.negf %476 : vector<2x128xf32>
    %478 = math.exp %477 : vector<2x128xf32>
    %cst_311 = arith.constant 1.000000e+00 : f32
    %479 = vector.broadcast %cst_311 : f32 to vector<2x128xf32>
    %480 = arith.addf %479, %478 : vector<2x128xf32>
    %481 = arith.divf %479, %480 : vector<2x128xf32>
    %482 = vector.extract_strided_slice %471 {offsets = [0, 128], sizes = [2, 128], strides = [1, 1]} : vector<2x384xf32> to vector<2x128xf32>
    %483 = vector.extract_strided_slice %473 {offsets = [0, 128], sizes = [2, 128], strides = [1, 1]} : vector<2x384xf32> to vector<2x128xf32>
    %484 = arith.addf %482, %483 : vector<2x128xf32>
    %485 = arith.negf %484 : vector<2x128xf32>
    %486 = math.exp %485 : vector<2x128xf32>
    %cst_312 = arith.constant 1.000000e+00 : f32
    %487 = vector.broadcast %cst_312 : f32 to vector<2x128xf32>
    %488 = arith.addf %487, %486 : vector<2x128xf32>
    %489 = arith.divf %487, %488 : vector<2x128xf32>
    %490 = vector.extract_strided_slice %471 {offsets = [0, 256], sizes = [2, 128], strides = [1, 1]} : vector<2x384xf32> to vector<2x128xf32>
    %491 = vector.extract_strided_slice %473 {offsets = [0, 256], sizes = [2, 128], strides = [1, 1]} : vector<2x384xf32> to vector<2x128xf32>
    %492 = arith.mulf %481, %491 : vector<2x128xf32>
    %493 = arith.addf %490, %492 : vector<2x128xf32>
    %494 = math.tanh %493 : vector<2x128xf32>
    %cst_313 = arith.constant 1.000000e+00 : f32
    %495 = vector.broadcast %cst_313 : f32 to vector<2x128xf32>
    %496 = arith.subf %495, %489 : vector<2x128xf32>
    %497 = arith.mulf %496, %494 : vector<2x128xf32>
    %498 = arith.mulf %489, %469 : vector<2x128xf32>
    %499 = arith.addf %497, %498 : vector<2x128xf32>
    %c6_314 = arith.constant 6 : index
    %c0_315 = arith.constant 0 : index
    %500 = vector.load %arg22[%c6_314, %c0_315] : memref<8x128xf32, #tpu.memory_space<vmem>>, vector<2x128xf32>
    tpu.vector_store %arg22[%c6_314, %c0_315], %499 {strides = array<i32>} : memref<8x128xf32, #tpu.memory_space<vmem>>, vector<2x128xf32>,
    %c0_316 = arith.constant 0 : index
    %c0_317 = arith.constant 0 : index
    %501 = vector.load %arg22[%c0_316, %c0_317] : memref<8x128xf32, #tpu.memory_space<vmem>>, vector<8x128xf32>
    %c1_318 = arith.constant 1 : index
    %c0_319 = arith.constant 0 : index
    %c0_320 = arith.constant 0 : index
    %502 = vector.load %arg10[%c1_318, %c0_319, %c0_320] : memref<2x128x384xf32, #tpu.memory_space<vmem>>, vector<1x128x384xf32>
    %503 = vector.shape_cast %502 : vector<1x128x384xf32> to vector<128x384xf32>
    %cst_321 = arith.constant dense<0.000000e+00> : vector<8x384xf32>
    %504 = tpu.matmul %501, %503, %cst_321 {dimension_numbers = #tpu.dot_dimension_numbers<[1], [0], [0], [1], [0, 0, 1, 1], [], []>} : vector<8x128xf32>, vector<128x384xf32>, vector<8x384xf32> -> vector<8x384xf32>
    %c2_322 = arith.constant 2 : index
    %c0_323 = arith.constant 0 : index
    %c0_324 = arith.constant 0 : index
    %505 = vector.load %arg12[%c2_322, %c0_323, %c0_324] : memref<3x1x384xf32, #tpu.memory_space<vmem>>, vector<1x1x384xf32>
    %506 = vector.shape_cast %505 : vector<1x1x384xf32> to vector<1x384xf32>
    %507 = vector.broadcast %506 : vector<1x384xf32> to vector<8x384xf32>
    %508 = arith.addf %504, %507 : vector<8x384xf32>
    %c2_325 = arith.constant 2 : index
    %c0_326 = arith.constant 0 : index
    %c0_327 = arith.constant 0 : index
    %509 = vector.load %arg11[%c2_325, %c0_326, %c0_327] : memref<3x128x384xf32, #tpu.memory_space<vmem>>, vector<1x128x384xf32>
    %510 = vector.shape_cast %509 : vector<1x128x384xf32> to vector<128x384xf32>
    %c2_328 = arith.constant 2 : index
    %c0_329 = arith.constant 0 : index
    %c0_330 = arith.constant 0 : index
    %511 = vector.load %arg13[%c2_328, %c0_329, %c0_330] : memref<3x1x384xf32, #tpu.memory_space<vmem>>, vector<1x1x384xf32>
    %512 = vector.shape_cast %511 : vector<1x1x384xf32> to vector<1x384xf32>
    %513 = vector.shape_cast %512 : vector<1x384xf32> to vector<1x384xf32>
    %514 = vector.broadcast %513 : vector<1x384xf32> to vector<2x384xf32>
    %cst_331 = arith.constant 0.000000e+00 : f32
    %515 = vector.broadcast %cst_331 : f32 to vector<2x128xf32>
    %516 = vector.extract_strided_slice %508 {offsets = [0, 0], sizes = [2, 384], strides = [1, 1]} : vector<8x384xf32> to vector<2x384xf32>
    %cst_332 = arith.constant dense<0.000000e+00> : vector<2x384xf32>
    %517 = tpu.matmul %515, %510, %cst_332 {dimension_numbers = #tpu.dot_dimension_numbers<[1], [0], [0], [1], [0, 0, 1, 1], [], []>} : vector<2x128xf32>, vector<128x384xf32>, vector<2x384xf32> -> vector<2x384xf32>
    %518 = arith.addf %517, %514 : vector<2x384xf32>
    %519 = vector.extract_strided_slice %516 {offsets = [0, 0], sizes = [2, 128], strides = [1, 1]} : vector<2x384xf32> to vector<2x128xf32>
    %520 = vector.extract_strided_slice %518 {offsets = [0, 0], sizes = [2, 128], strides = [1, 1]} : vector<2x384xf32> to vector<2x128xf32>
    %521 = arith.addf %519, %520 : vector<2x128xf32>
    %522 = arith.negf %521 : vector<2x128xf32>
    %523 = math.exp %522 : vector<2x128xf32>
    %cst_333 = arith.constant 1.000000e+00 : f32
    %524 = vector.broadcast %cst_333 : f32 to vector<2x128xf32>
    %525 = arith.addf %524, %523 : vector<2x128xf32>
    %526 = arith.divf %524, %525 : vector<2x128xf32>
    %527 = vector.extract_strided_slice %516 {offsets = [0, 128], sizes = [2, 128], strides = [1, 1]} : vector<2x384xf32> to vector<2x128xf32>
    %528 = vector.extract_strided_slice %518 {offsets = [0, 128], sizes = [2, 128], strides = [1, 1]} : vector<2x384xf32> to vector<2x128xf32>
    %529 = arith.addf %527, %528 : vector<2x128xf32>
    %530 = arith.negf %529 : vector<2x128xf32>
    %531 = math.exp %530 : vector<2x128xf32>
    %cst_334 = arith.constant 1.000000e+00 : f32
    %532 = vector.broadcast %cst_334 : f32 to vector<2x128xf32>
    %533 = arith.addf %532, %531 : vector<2x128xf32>
    %534 = arith.divf %532, %533 : vector<2x128xf32>
    %535 = vector.extract_strided_slice %516 {offsets = [0, 256], sizes = [2, 128], strides = [1, 1]} : vector<2x384xf32> to vector<2x128xf32>
    %536 = vector.extract_strided_slice %518 {offsets = [0, 256], sizes = [2, 128], strides = [1, 1]} : vector<2x384xf32> to vector<2x128xf32>
    %537 = arith.mulf %526, %536 : vector<2x128xf32>
    %538 = arith.addf %535, %537 : vector<2x128xf32>
    %539 = math.tanh %538 : vector<2x128xf32>
    %cst_335 = arith.constant 1.000000e+00 : f32
    %540 = vector.broadcast %cst_335 : f32 to vector<2x128xf32>
    %541 = arith.subf %540, %534 : vector<2x128xf32>
    %542 = arith.mulf %541, %539 : vector<2x128xf32>
    %543 = arith.mulf %534, %515 : vector<2x128xf32>
    %544 = arith.addf %542, %543 : vector<2x128xf32>
    %545 = vector.extract_strided_slice %508 {offsets = [2, 0], sizes = [2, 384], strides = [1, 1]} : vector<8x384xf32> to vector<2x384xf32>
    %cst_336 = arith.constant dense<0.000000e+00> : vector<2x384xf32>
    %546 = tpu.matmul %544, %510, %cst_336 {dimension_numbers = #tpu.dot_dimension_numbers<[1], [0], [0], [1], [0, 0, 1, 1], [], []>} : vector<2x128xf32>, vector<128x384xf32>, vector<2x384xf32> -> vector<2x384xf32>
    %547 = arith.addf %546, %514 : vector<2x384xf32>
    %548 = vector.extract_strided_slice %545 {offsets = [0, 0], sizes = [2, 128], strides = [1, 1]} : vector<2x384xf32> to vector<2x128xf32>
    %549 = vector.extract_strided_slice %547 {offsets = [0, 0], sizes = [2, 128], strides = [1, 1]} : vector<2x384xf32> to vector<2x128xf32>
    %550 = arith.addf %548, %549 : vector<2x128xf32>
    %551 = arith.negf %550 : vector<2x128xf32>
    %552 = math.exp %551 : vector<2x128xf32>
    %cst_337 = arith.constant 1.000000e+00 : f32
    %553 = vector.broadcast %cst_337 : f32 to vector<2x128xf32>
    %554 = arith.addf %553, %552 : vector<2x128xf32>
    %555 = arith.divf %553, %554 : vector<2x128xf32>
    %556 = vector.extract_strided_slice %545 {offsets = [0, 128], sizes = [2, 128], strides = [1, 1]} : vector<2x384xf32> to vector<2x128xf32>
    %557 = vector.extract_strided_slice %547 {offsets = [0, 128], sizes = [2, 128], strides = [1, 1]} : vector<2x384xf32> to vector<2x128xf32>
    %558 = arith.addf %556, %557 : vector<2x128xf32>
    %559 = arith.negf %558 : vector<2x128xf32>
    %560 = math.exp %559 : vector<2x128xf32>
    %cst_338 = arith.constant 1.000000e+00 : f32
    %561 = vector.broadcast %cst_338 : f32 to vector<2x128xf32>
    %562 = arith.addf %561, %560 : vector<2x128xf32>
    %563 = arith.divf %561, %562 : vector<2x128xf32>
    %564 = vector.extract_strided_slice %545 {offsets = [0, 256], sizes = [2, 128], strides = [1, 1]} : vector<2x384xf32> to vector<2x128xf32>
    %565 = vector.extract_strided_slice %547 {offsets = [0, 256], sizes = [2, 128], strides = [1, 1]} : vector<2x384xf32> to vector<2x128xf32>
    %566 = arith.mulf %555, %565 : vector<2x128xf32>
    %567 = arith.addf %564, %566 : vector<2x128xf32>
    %568 = math.tanh %567 : vector<2x128xf32>
    %cst_339 = arith.constant 1.000000e+00 : f32
    %569 = vector.broadcast %cst_339 : f32 to vector<2x128xf32>
    %570 = arith.subf %569, %563 : vector<2x128xf32>
    %571 = arith.mulf %570, %568 : vector<2x128xf32>
    %572 = arith.mulf %563, %544 : vector<2x128xf32>
    %573 = arith.addf %571, %572 : vector<2x128xf32>
    %574 = vector.extract_strided_slice %508 {offsets = [4, 0], sizes = [2, 384], strides = [1, 1]} : vector<8x384xf32> to vector<2x384xf32>
    %cst_340 = arith.constant dense<0.000000e+00> : vector<2x384xf32>
    %575 = tpu.matmul %573, %510, %cst_340 {dimension_numbers = #tpu.dot_dimension_numbers<[1], [0], [0], [1], [0, 0, 1, 1], [], []>} : vector<2x128xf32>, vector<128x384xf32>, vector<2x384xf32> -> vector<2x384xf32>
    %576 = arith.addf %575, %514 : vector<2x384xf32>
    %577 = vector.extract_strided_slice %574 {offsets = [0, 0], sizes = [2, 128], strides = [1, 1]} : vector<2x384xf32> to vector<2x128xf32>
    %578 = vector.extract_strided_slice %576 {offsets = [0, 0], sizes = [2, 128], strides = [1, 1]} : vector<2x384xf32> to vector<2x128xf32>
    %579 = arith.addf %577, %578 : vector<2x128xf32>
    %580 = arith.negf %579 : vector<2x128xf32>
    %581 = math.exp %580 : vector<2x128xf32>
    %cst_341 = arith.constant 1.000000e+00 : f32
    %582 = vector.broadcast %cst_341 : f32 to vector<2x128xf32>
    %583 = arith.addf %582, %581 : vector<2x128xf32>
    %584 = arith.divf %582, %583 : vector<2x128xf32>
    %585 = vector.extract_strided_slice %574 {offsets = [0, 128], sizes = [2, 128], strides = [1, 1]} : vector<2x384xf32> to vector<2x128xf32>
    %586 = vector.extract_strided_slice %576 {offsets = [0, 128], sizes = [2, 128], strides = [1, 1]} : vector<2x384xf32> to vector<2x128xf32>
    %587 = arith.addf %585, %586 : vector<2x128xf32>
    %588 = arith.negf %587 : vector<2x128xf32>
    %589 = math.exp %588 : vector<2x128xf32>
    %cst_342 = arith.constant 1.000000e+00 : f32
    %590 = vector.broadcast %cst_342 : f32 to vector<2x128xf32>
    %591 = arith.addf %590, %589 : vector<2x128xf32>
    %592 = arith.divf %590, %591 : vector<2x128xf32>
    %593 = vector.extract_strided_slice %574 {offsets = [0, 256], sizes = [2, 128], strides = [1, 1]} : vector<2x384xf32> to vector<2x128xf32>
    %594 = vector.extract_strided_slice %576 {offsets = [0, 256], sizes = [2, 128], strides = [1, 1]} : vector<2x384xf32> to vector<2x128xf32>
    %595 = arith.mulf %584, %594 : vector<2x128xf32>
    %596 = arith.addf %593, %595 : vector<2x128xf32>
    %597 = math.tanh %596 : vector<2x128xf32>
    %cst_343 = arith.constant 1.000000e+00 : f32
    %598 = vector.broadcast %cst_343 : f32 to vector<2x128xf32>
    %599 = arith.subf %598, %592 : vector<2x128xf32>
    %600 = arith.mulf %599, %597 : vector<2x128xf32>
    %601 = arith.mulf %592, %573 : vector<2x128xf32>
    %602 = arith.addf %600, %601 : vector<2x128xf32>
    %603 = vector.extract_strided_slice %508 {offsets = [6, 0], sizes = [2, 384], strides = [1, 1]} : vector<8x384xf32> to vector<2x384xf32>
    %cst_344 = arith.constant dense<0.000000e+00> : vector<2x384xf32>
    %604 = tpu.matmul %602, %510, %cst_344 {dimension_numbers = #tpu.dot_dimension_numbers<[1], [0], [0], [1], [0, 0, 1, 1], [], []>} : vector<2x128xf32>, vector<128x384xf32>, vector<2x384xf32> -> vector<2x384xf32>
    %605 = arith.addf %604, %514 : vector<2x384xf32>
    %606 = vector.extract_strided_slice %603 {offsets = [0, 0], sizes = [2, 128], strides = [1, 1]} : vector<2x384xf32> to vector<2x128xf32>
    %607 = vector.extract_strided_slice %605 {offsets = [0, 0], sizes = [2, 128], strides = [1, 1]} : vector<2x384xf32> to vector<2x128xf32>
    %608 = arith.addf %606, %607 : vector<2x128xf32>
    %609 = arith.negf %608 : vector<2x128xf32>
    %610 = math.exp %609 : vector<2x128xf32>
    %cst_345 = arith.constant 1.000000e+00 : f32
    %611 = vector.broadcast %cst_345 : f32 to vector<2x128xf32>
    %612 = arith.addf %611, %610 : vector<2x128xf32>
    %613 = arith.divf %611, %612 : vector<2x128xf32>
    %614 = vector.extract_strided_slice %603 {offsets = [0, 128], sizes = [2, 128], strides = [1, 1]} : vector<2x384xf32> to vector<2x128xf32>
    %615 = vector.extract_strided_slice %605 {offsets = [0, 128], sizes = [2, 128], strides = [1, 1]} : vector<2x384xf32> to vector<2x128xf32>
    %616 = arith.addf %614, %615 : vector<2x128xf32>
    %617 = arith.negf %616 : vector<2x128xf32>
    %618 = math.exp %617 : vector<2x128xf32>
    %cst_346 = arith.constant 1.000000e+00 : f32
    %619 = vector.broadcast %cst_346 : f32 to vector<2x128xf32>
    %620 = arith.addf %619, %618 : vector<2x128xf32>
    %621 = arith.divf %619, %620 : vector<2x128xf32>
    %622 = vector.extract_strided_slice %603 {offsets = [0, 256], sizes = [2, 128], strides = [1, 1]} : vector<2x384xf32> to vector<2x128xf32>
    %623 = vector.extract_strided_slice %605 {offsets = [0, 256], sizes = [2, 128], strides = [1, 1]} : vector<2x384xf32> to vector<2x128xf32>
    %624 = arith.mulf %613, %623 : vector<2x128xf32>
    %625 = arith.addf %622, %624 : vector<2x128xf32>
    %626 = math.tanh %625 : vector<2x128xf32>
    %cst_347 = arith.constant 1.000000e+00 : f32
    %627 = vector.broadcast %cst_347 : f32 to vector<2x128xf32>
    %628 = arith.subf %627, %621 : vector<2x128xf32>
    %629 = arith.mulf %628, %626 : vector<2x128xf32>
    %630 = arith.mulf %621, %602 : vector<2x128xf32>
    %631 = arith.addf %629, %630 : vector<2x128xf32>
    %c0_348 = arith.constant 0 : index
    %c0_349 = arith.constant 0 : index
    %632 = vector.load %arg14[%c0_348, %c0_349] : memref<128x2xf32, #tpu.memory_space<vmem>>, vector<128x2xf32>
    %cst_350 = arith.constant dense<0.000000e+00> : vector<2x2xf32>
    %633 = tpu.matmul %631, %632, %cst_350 {dimension_numbers = #tpu.dot_dimension_numbers<[1], [0], [0], [1], [0, 0, 1, 1], [], []>} : vector<2x128xf32>, vector<128x2xf32>, vector<2x2xf32> -> vector<2x2xf32>
    %c0_351 = arith.constant 0 : index
    %c0_352 = arith.constant 0 : index
    %634 = vector.load %arg15[%c0_351, %c0_352] : memref<1x2xf32, #tpu.memory_space<vmem>>, vector<1x2xf32>
    %635 = vector.broadcast %634 : vector<1x2xf32> to vector<2x2xf32>
    %636 = arith.addf %633, %635 : vector<2x2xf32>
    %c0_353 = arith.constant 0 : index
    %c0_354 = arith.constant 0 : index
    %637 = vector.load %arg16[%c0_353, %c0_354] : memref<2x2xf32, #tpu.memory_space<vmem>>, vector<2x2xf32>
    tpu.vector_store %arg16[%c0_353, %c0_354], %636 {strides = array<i32>} : memref<2x2xf32, #tpu.memory_space<vmem>>, vector<2x2xf32>,
    return
  }
}

</mosaic_0001>

<bundles_post_ra>
// kernel: mouse_net_forward.1
= control target key start
LH: loop header
LB: loop body
LE: loop exit
PB: predicated region body
PF: predicated region fallthrough
CT: control target
= control target key end

     0   :  { %s10657_s0 = inlined_call_operand.vmem [shape: f32[2,16,11], index: 0, kind: input, shape index: {}]   ;;  %s10658_s1 = inlined_call_operand.vmem [shape: f32[7,11,64], index: 1, kind: input, shape index: {}]   ;;  %s10659_s2 = inlined_call_operand.vmem [shape: f32[1,64], index: 2, kind: input, shape index: {}]   ;;  %s10660_s3 = inlined_call_operand.hbm [shape: f32[3,64,64], index: 3, kind: input, shape index: {}]   ;;  %s10661_s4 = inlined_call_operand.vmem [shape: f32[1,64], index: 4, kind: input, shape index: {}]   ;;  %s10662_s5 = inlined_call_operand.hbm [shape: f32[3,64,64], index: 5, kind: input, shape index: {}]   ;;  %s10663_s6 = inlined_call_operand.vmem [shape: f32[1,64], index: 6, kind: input, shape index: {}]   ;;  %s10664_s7 = inlined_call_operand.vmem [shape: f32[64,512], index: 7, kind: input, shape index: {}]   ;;  %s10665_s8 = inlined_call_operand.vmem [shape: f32[1,512], index: 8, kind: input, shape index: {}]   ;;  %s10666_s9 = inlined_call_operand.hbm [shape: f32[512,384], index: 9, kind: input, shape index: {}]   ;;  %s10667_s10 = inlined_call_operand.hbm [shape: f32[2,128,384], index: 10, kind: input, shape index: {}]   ;;  %s10668_s11 = inlined_call_operand.hbm [shape: f32[3,128,384], index: 11, kind: input, shape index: {}]   ;;  %s10669_s12 = inlined_call_operand.vmem [shape: f32[3,1,384], index: 12, kind: input, shape index: {}]   ;;  %s10670_s13 = inlined_call_operand.vmem [shape: f32[3,1,384], index: 13, kind: input, shape index: {}]   ;;  %s10671_s14 = inlined_call_operand.vmem [shape: f32[128,2], index: 14, kind: input, shape index: {}]   ;;  %s10672_s15 = inlined_call_operand.vmem [shape: f32[1,2], index: 15, kind: input, shape index: {}]   ;;  %s10673_s16 = inlined_call_operand.hbm [shape: f32[2,2], index: 16, kind: output, shape index: {}]  }
   0x1   :  { %10795 = sst [smem:[#allocation73_spill]] %s10657_s0 }
   0x2   :  { %21 = vsyncpa [#allocation9], 0 }
   0x3   :  { %22 = vsyncpa [#allocation12], 0 }
   0x4   :  { %23 = vsyncpa [#allocation15], 0 }
   0x5   :  { %24 = vsyncpa [#allocation10], 0  ;;  %s8261_s21 = smov [#allocation11]  }
   0x6   :  { %s50_s22 = sshll.u32 %s8261_s21, 4  ;;  %s51_s22 = int_to_ptr.vmem [resolvable:$true] %s50_s22 }
   0x7   :  { %s8141_s23 = scalar_lea.vmem %s51_s22, 3072  ;;  %p8146_p1 = scmp.lt.s32.totalorder %s51_s22, %s51_s22 }
   0x8   :  { %p8142_p0 = scmp.ne.s32.totalorder %s51_s22, %s8141_s23  ;;  %p8147_p2 = scmp.lt.s32.totalorder %s8141_s23, %s8141_s23 }
   0xa   :  { %p8148_p3 = por %p8147_p2, %p8146_p1 }
   0xc   :  { %p8149_p4 = pnand %p8148_p3, %p8142_p0 }
   0xe   :  { %8152 = shalt.err (!%p8149_p4)
}
   0xf   :  { %s8262_s24 = smov 128   ;;  %s8263_s25 = smov 8  }
  0x10   :  { %56 = dma.hbm_to_vmem [thread:$0]  %s10662_s5, 3072, %s51_s22, [#allocation12], %s8262_s24, %s8262_s24, %s8263_s25  }
  0x11   :  { %s8264_s28 = smov [#allocation14]   ;;  %s8265_s30 = smov [#allocation8]  }
  0x12   :  { %s80_s29 = sshll.u32 %s8264_s28, 4  ;;  %s36_s0 = sshll.u32 %s8265_s30, 4  ;;  %s81_s29 = int_to_ptr.vmem [resolvable:$true] %s80_s29  ;;  %s37_s0 = int_to_ptr.vmem [resolvable:$true] %s36_s0 }
  0x13   :  { %s8161_s17 = scalar_lea.vmem %s81_s29, 12288  ;;  %p8166_p6 = scmp.lt.s32.totalorder %s81_s29, %s81_s29 }
  0x14   :  { %p8162_p5 = scmp.ne.s32.totalorder %s81_s29, %s8161_s17  ;;  %p8167_p7 = scmp.lt.s32.totalorder %s8161_s17, %s8161_s17 }
  0x16   :  { %p8168_p8 = por %p8167_p7, %p8166_p6 }
  0x18   :  { %p8169_p9 = pnand %p8168_p8, %p8162_p5 }
  0x1a   :  { %8172 = shalt.err (!%p8169_p9)
}
  0x1b   :  { %s8266_s18 = smov 384   ;;  %s8267_s19 = smov 24  }
  0x1c   :  { %86 = dma.hbm_to_vmem [thread:$0]  %s10667_s10, 12288, %s81_s29, [#allocation15], %s8266_s18, %s8266_s18, %s8267_s19  }
  0x1d   :  { %s8181_s5 = scalar_lea.vmem %s37_s0, 3072  ;;  %p8186_p11 = scmp.lt.s32.totalorder %s37_s0, %s37_s0 }
  0x1e   :  { %p8182_p10 = scmp.ne.s32.totalorder %s37_s0, %s8181_s5  ;;  %p8187_p12 = scmp.lt.s32.totalorder %s8181_s5, %s8181_s5 }
  0x20   :  { %p8188_p13 = por %p8187_p12, %p8186_p11 }
  0x22   :  { %p8189_p0 = pnand %p8188_p13, %p8182_p10 }
  0x24   :  { %8192 = shalt.err (!%p8189_p0)
}
  0x25   :  { %42 = dma.hbm_to_vmem [thread:$0]  %s10660_s3, 3072, %s37_s0, [#allocation9], %s8262_s24, %s8262_s24, %s8263_s25  }
  0x26   :  { %s8268_s26 = smov [#allocation13]   ;;  %s8269_s28 = smov [#allocation16]  }
  0x27   :  { %s68_s27 = sshll.u32 %s8268_s26, 4  ;;  %s92_s30 = sshll.u32 %s8269_s28, 4  ;;  %s69_s27 = int_to_ptr.vmem [resolvable:$true] %s68_s27  ;;  %s93_s30 = int_to_ptr.vmem [resolvable:$true] %s92_s30 }
  0x28   :  { %s8201_s17 = scalar_lea.vmem %s69_s27, 24576  ;;  %p8206_p2 = scmp.lt.s32.totalorder %s69_s27, %s69_s27 }
  0x29   :  { %p8202_p1 = scmp.ne.s32.totalorder %s69_s27, %s8201_s17  ;;  %p8207_p3 = scmp.lt.s32.totalorder %s8201_s17, %s8201_s17 }
  0x2b   :  { %p8208_p4 = por %p8207_p3, %p8206_p2 }
  0x2d   :  { %p8209_p5 = pnand %p8208_p4, %p8202_p1 }
  0x2f   :  { %8212 = shalt.err (!%p8209_p5)
}
  0x30   :  { %74 = dma.hbm_to_vmem [thread:$0]  %s10666_s9, 24576, %s69_s27, [#allocation12], %s8266_s18, %s8266_s18, %s8267_s19  }
  0x31   :  { %s8221_s3 = scalar_lea.vmem %s93_s30, 18432  ;;  %p8226_p7 = scmp.lt.s32.totalorder %s93_s30, %s93_s30 }
  0x32   :  { %p8222_p6 = scmp.ne.s32.totalorder %s93_s30, %s8221_s3  ;;  %p8227_p8 = scmp.lt.s32.totalorder %s8221_s3, %s8221_s3 }
  0x34   :  { %p8228_p9 = por %p8227_p8, %p8226_p7 }
  0x36   :  { %p8229_p10 = pnand %p8228_p9, %p8222_p6 }
  0x38   :  { %8232 = shalt.err (!%p8229_p10)
}
  0x39   :  { %98 = dma.hbm_to_vmem [thread:$0]  %s10668_s11, 18432, %s93_s30, [#allocation15], %s8266_s18, %s8266_s18, %s8267_s19  }
  0x3a   :  { %8253 = dma.done.wait [#allocation9], 3072  }
  0x3b   :  { %8254 = vsyncadd [#allocation9], 4294964224 }
  0x3c   :  { %8255 = dma.done.wait [#allocation12], 27648  }
  0x3d   :  { %8256 = vsyncadd [#allocation12], 4294939648 }
  0x3e   :  { %8257 = dma.done.wait [#allocation15], 30720  }
  0x3f   :  { %8258 = vsyncadd [#allocation15], 4294936576  ;;  %vm130_vm0 = vcmask 83968   ;;  %v10676_v0 = vmov 0.0   ;;  %vm194_vm1 = vcmask 1042432   ;;  %vm176_vm2 = vcmask 89088  }
  0x40   :  { %131 = vst.msk [vmem:[#allocation2] sm:$0x7] %vm130_vm0, %v10676_v0  ;;  %132 = vst.msk [vmem:[#allocation2 + $0x13] sm:$0x7] %vm130_vm0, %v10676_v0  ;;  %v6506_v1 = vld [vmem:[%s10658_s1 + $0x18] sm:$0x7]  ;;  %v10675_v44 = vlaneseq }
  0x41   :  { %v182_v2 = vld [vmem:[%s10658_s1 + $0x8] sm:$0x7]  ;;  %v8395_v3 = vld [vmem:[%s10658_s1 + $0x10] sm:$0xff]  ;;  %7124 = vmatprep.subr.msk.mxu0 %vm194_vm1, %v6506_v1  ;;  %v8402_v4 = vld [vmem:[%s10658_s1] sm:$0xff]  ;;  %s10796_s26 = sld [smem:[#allocation73_spill]]  ;;  %vm8271_vm3 = vmmov 0  }
  0x42   :  { %7131 = vmatprep.subr.msk.mxu1 %vm194_vm1, %v182_v2  ;;  %7125 = vmatpush3.msk.msra.mxu0 %vm194_vm1, %v6506_v1  ;;  %v6514_v7 = vld [vmem:[%s10658_s1 + $0x28] sm:$0x7]  ;;  %v6519_v8 = vld [vmem:[%s10658_s1 + $0x38] sm:$0x7]  ;;  %v8431_v13 = vld [vmem:[%s10658_s1 + $0x20] sm:$0xff]  ;;  %v8499_v49 = vshrl.u32 %v10675_v44, 7 }
  0x43   :  { %7132 = vmatpush3.msk.msra.mxu1 %vm194_vm1, %v182_v2  ;;  %7126 = vmatprep.subr.mxu0 %v8395_v3  ;;  %v8436_v14 = vld [vmem:[%s10658_s1 + $0x30] sm:$0xff]  ;;  %v6524_v19 = vld [vmem:[%s10658_s1 + $0x48] sm:$0x7]  ;;  %v6529_v20 = vld [vmem:[%s10658_s1 + $0x58] sm:$0x7]  ;;  %v125_v57 = vand.u32 127, %v10675_v44 }
  0x44   :  { %7133 = vmatprep.subr.mxu1 %v8402_v4  ;;  %7127 = vmatpush3.msra.mxu0 %v8395_v3  ;;  %v8459_v21 = vld [vmem:[%s10658_s1 + $0x40] sm:$0xff]  ;;  %v8464_v22 = vld [vmem:[%s10658_s1 + $0x50] sm:$0xff]  ;;  %v6534_v27 = vld [vmem:[%s10658_s1 + $0x68] sm:$0x7]  ;;  %v126_v58 = vmul.u32 2, %v8499_v49  ;;  %vm822_vm5 = vcmask 130048  }
  0x45   :  { %7134 = vmatpush3.msra.mxu1 %v8402_v4  ;;  %7138 = vmatprep.subr.msk.mxu0 %vm194_vm1, %v6514_v7  ;;  %v8484_v29 = vld [vmem:[%s10658_s1 + $0x60] sm:$0xff]  ;;  %vm133_vm6 = vcmask 516096   ;;  %vm896_vm7 = vcmask 523264   ;;  %vm903_vm8 = vcmask 64512   ;;  %vm976_vm9 = vcmask 519168   ;;  %v8706_v44 = vld [vmem:[#allocation11 + $0xb8] sm:$0xff] }
  0x46   :  { %7145 = vmatprep.subr.msk.mxu1 %vm194_vm1, %v6519_v8  ;;  %v8504_v55 = vld [vmem:[%s10659_s2] ss:$0 sm:$0xff]  ;;  %vm127_vm4 = vcmp.eq.s32.totalorder %v125_v57, %v126_v58  ;;  %136 = vst.msk [vmem:[#allocation4] sm:$0x1] %vm133_vm6, %v10676_v0  ;;  %137 = vst.msk [vmem:[#allocation4 + $0x5] sm:$0x1] %vm133_vm6, %v10676_v0 }
  0x47   :  { %v174_v5 = vld [vmem:[%s10796_s26] sm:$0xff]  ;;  %v175_v6 = vld [vmem:[%s10796_s26 + $0x8] sm:$0xff]  ;;  %10800 = vst [vmem:[#allocation25_spill] sm:$0xff] %v8706_v44  ;;  %s8274_s19 = smov [#allocation17]   ;;  %vm6485_vm11 = vcmask 9216  }
  0x48   :  { %177 = vst.msk [vmem:[#allocation2 + $0x3] sm:$0xff] %vm176_vm2, %v174_v5  ;;  %178 = vst.msk [vmem:[#allocation2 + $0xb] sm:$0xff] %vm176_vm2, %v175_v6  ;;  %v8511_v5 = vsel %vm127_vm4, 1.0, %v10676_v0  ;;  %v8272_v6 = vmov -1e+30   ;;  %v8659_v57 = vld [vmem:[#allocation11 + $0x60] sm:$0xff] }
  0x49   :  { %134 = vst.msk [vmem:[#allocation3] sm:$0x1] %vm133_vm6, %v8272_v6  ;;  %135 = vst.msk [vmem:[#allocation3 + $0x9] sm:$0x1] %vm133_vm6, %v8272_v6  ;;  %v8663_v58 = vld [vmem:[#allocation11 + $0x20] sm:$0xff]  ;;  %s6493_s21 = sshll.u32 %s8274_s19, 4  ;;  %s6494_s21 = int_to_ptr.vmem [resolvable:$true] %s6493_s21 }
  0x4a   :  { %v8691_v6 = vld [vmem:[#allocation11] sm:$0xff]  ;;  %s8233_s5 = scalar_lea.vmem %s6494_s21, 32  ;;  %p8238_p12 = scmp.lt.s32.totalorder %s6494_s21, %s6494_s21 }
  0x4b   :  { %10798 = vst [vmem:[#allocation23_spill] sm:$0xff] %v8691_v6  ;;  %p8234_p11 = scmp.ne.s32.totalorder %s6494_s21, %s8233_s5  ;;  %p8239_p13 = scmp.lt.s32.totalorder %s8233_s5, %s8233_s5 }
  0x4d   :  { %p8240_p0 = por %p8239_p13, %p8238_p12 }
  0x4f   :  { %v183_v9 = vld [vmem:[#allocation2 + $0x1] sm:$0xff]  ;;  %v184_v11 = vld [vmem:[#allocation2 + $0x9] sm:$0xff]  ;;  %p8241_p1 = pnand %p8240_p0, %p8234_p11 }
  0x50   :  { %v179_v10 = vld [vmem:[#allocation2] sm:$0xff]  ;;  %7128 = vmatprep.mubr.msk.f32.mxu0 %vm176_vm2, %v183_v9  ;;  %v180_v12 = vld [vmem:[#allocation2 + $0x8] sm:$0xff] }
  0x51   :  { %7135 = vmatprep.mubr.msk.f32.mxu1 %vm176_vm2, %v179_v10  ;;  %7129 = vmatmul.mubr.msk.f32.vlgmr.msra.gmra.mxu0 %vm176_vm2, %v184_v11  ;;  %v357_v15 = vld [vmem:[#allocation2 + $0x2] sm:$0xff]  ;;  %v358_v17 = vld [vmem:[#allocation2 + $0xa] sm:$0xff] }
  0x52   :  { %7136 = vmatmul.mubr.msk.f32.vlgmr.msra.gmra.mxu1 %vm176_vm2, %v180_v12  ;;  %7139 = vmatpush3.msk.msra.mxu0 %vm194_vm1, %v6514_v7  ;;  %v448_v16 = vld [vmem:[#allocation2 + $0x3] sm:$0xff]  ;;  %v449_v18 = vld [vmem:[#allocation2 + $0xb] sm:$0xff]  ;;  %v8521_v7 = vld [vmem:[#allocation8 + $0x78] sm:$0xff] }
  0x53   :  { %7146 = vmatpush3.msk.msra.mxu1 %vm194_vm1, %v6519_v8  ;;  %7140 = vmatprep.subr.mxu0 %v8431_v13  ;;  %v539_v23 = vld [vmem:[#allocation2 + $0x4] sm:$0xff]  ;;  %v540_v25 = vld [vmem:[#allocation2 + $0xc] sm:$0xff] }
  0x54   :  { %7147 = vmatprep.subr.mxu1 %v8436_v14  ;;  %7141 = vmatpush3.msra.mxu0 %v8431_v13  ;;  %v630_v24 = vld [vmem:[#allocation2 + $0x5] sm:$0xff]  ;;  %v631_v26 = vld [vmem:[#allocation2 + $0xd] sm:$0xff] }
  0x55   :  { %7142 = vmatprep.mubr.msk.f32.mxu0 %vm176_vm2, %v357_v15  ;;  %7148 = vmatpush3.msra.mxu1 %v8436_v14  ;;  %v721_v28 = vld [vmem:[#allocation2 + $0x6] sm:$0xff]  ;;  %v722_v30 = vld [vmem:[#allocation2 + $0xe] sm:$0xff] }
  0x56   :  { %7149 = vmatprep.mubr.msk.f32.mxu1 %vm176_vm2, %v448_v16  ;;  %7143 = vmatmul.mubr.msk.f32.vlgmr.msra.gmra.mxu0 %vm176_vm2, %v358_v17  ;;  %v8523_v8 = vld [vmem:[#allocation8 + $0x70] sm:$0xff]  ;;  %v8527_v9 = vld [vmem:[#allocation8 + $0x68] sm:$0xff]  ;;  %v8531_v10 = vld [vmem:[#allocation8 + $0x60] sm:$0xff] }
  0x57   :  { %7150 = vmatmul.mubr.msk.f32.vlgmr.msra.gmra.mxu1 %vm176_vm2, %v449_v18  ;;  %7152 = vmatprep.subr.msk.mxu0 %vm194_vm1, %v6524_v19 }
  0x58   :  { %7159 = vmatprep.subr.msk.mxu1 %vm194_vm1, %v6529_v20  ;;  %7153 = vmatpush3.msk.msra.mxu0 %vm194_vm1, %v6524_v19 }
  0x59   :  { %7160 = vmatpush3.msk.msra.mxu1 %vm194_vm1, %v6529_v20  ;;  %7154 = vmatprep.subr.mxu0 %v8459_v21  ;;  %v8543_v20 = vld [vmem:[#allocation8 + $0x58] sm:$0xff] }
  0x5a   :  { %7161 = vmatprep.subr.mxu1 %v8464_v22  ;;  %7155 = vmatpush3.msra.mxu0 %v8459_v21 }
  0x5b   :  { %7156 = vmatprep.mubr.msk.f32.mxu0 %vm176_vm2, %v539_v23  ;;  %7162 = vmatpush3.msra.mxu1 %v8464_v22  ;;  %v8547_v23 = vld [vmem:[#allocation8 + $0x50] sm:$0xff] }
  0x5c   :  { %7163 = vmatprep.mubr.msk.f32.mxu1 %vm176_vm2, %v630_v24  ;;  %7157 = vmatmul.mubr.msk.f32.vlgmr.msra.gmra.mxu0 %vm176_vm2, %v540_v25  ;;  %v8549_v24 = vld [vmem:[#allocation8 + $0x48] sm:$0xff]  ;;  %v8553_v25 = vld [vmem:[#allocation8 + $0x40] sm:$0xff] }
  0x5d   :  { %7164 = vmatmul.mubr.msk.f32.vlgmr.msra.gmra.mxu1 %vm176_vm2, %v631_v26  ;;  %7166 = vmatprep.subr.msk.mxu0 %vm194_vm1, %v6534_v27 }
  0x5e   :  { %7170 = vmatprep.mubr.msk.f32.mxu0 %vm176_vm2, %v721_v28  ;;  %7167 = vmatpush3.msk.msra.mxu0 %vm194_vm1, %v6534_v27  ;;  %v8563_v28 = vld [vmem:[#allocation8 + $0x38] sm:$0xff] }
  0x5f   :  { %7173 = vmatprep.subr.mxu1 %v10676_v0  ;;  %7168 = vmatprep.subr.mxu0 %v8484_v29 }
  0x60   :  { %7169 = vmatpush3.msra.mxu0 %v8484_v29  ;;  %7177 = vmatprep.mubr.msk.f32.mxu1 %vm8271_vm3, %v10676_v0 }
  0x61   :  { %7171 = vmatmul.mubr.msk.f32.vlgmr.msra.gmra.mxu0 %vm176_vm2, %v722_v30  ;;  %7180 = vmatprep.subr.mxu0 %v10676_v0 }
  0x62   :  { %7182 = vmatprep.mubr.msk.f32.mxu0 %vm8271_vm3, %v10676_v0 }
 0x111   :  { %v7130_v31 = vpop.f32.mrf.mxu0 }
 0x112   :  { %v7137_v32 = vpop.f32.mrf.mxu1 }
 0x113   :  { %v264_v33 = vpop.f32.mrf.mxu0  ;;  %v354_v35 = vadd.f32 %v7137_v32, %v7130_v31  ;;  %v8566_v31 = vld [vmem:[#allocation8 + $0x30] sm:$0xff]  ;;  %v8572_v32 = vld [vmem:[#allocation8 + $0x28] sm:$0xff] }
 0x114   :  { %v348_v34 = vpop.f32.mrf.mxu1 }
 0x115   :  { %v349_v38 = vadd.f32 %v348_v34, %v264_v33  ;;  %v8576_v33 = vld [vmem:[#allocation8 + $0x20] sm:$0xff]  ;;  %v8580_v34 = vld [vmem:[#allocation8 + $0x18] sm:$0xff] }
 0x116   :  { %v7144_v36 = vpop.f32.mrf.mxu0 }
 0x117   :  { %v7151_v37 = vpop.f32.mrf.mxu1  ;;  %v447_v39 = vadd.f32 %v7144_v36, %v354_v35  ;;  %v8584_v35 = vld [vmem:[#allocation8 + $0x10] sm:$0xff]  ;;  %v8588_v36 = vld [vmem:[#allocation8 + $0x8] sm:$0xff] }
 0x118   :  { %v437_v40 = vpop.f32.mrf.mxu0 }
 0x119   :  { %v528_v41 = vpop.f32.mrf.mxu1  ;;  %v538_v42 = vadd.f32 %v7151_v37, %v447_v39  ;;  %v446_v43 = vadd.f32 %v437_v40, %v349_v38  ;;  %v8592_v37 = vld [vmem:[#allocation8] sm:$0xff]  ;;  %v8596_v38 = vld [vmem:[#allocation8 + $0xb8] sm:$0xff]  ;;  %v8601_v40 = vld [vmem:[#allocation8 + $0xb0] sm:$0xff] }
 0x11b   :  { %v537_v45 = vadd.f32 %v528_v41, %v446_v43  ;;  %v8607_v41 = vld [vmem:[#allocation8 + $0xa8] sm:$0xff]  ;;  %v8615_v43 = vld [vmem:[#allocation8 + $0x98] sm:$0xff] }
 0x11c   :  { %v7158_v46 = vpop.f32.mrf.mxu0 }
 0x11d   :  { %v7165_v47 = vpop.f32.mrf.mxu1  ;;  %v629_v48 = vadd.f32 %v7158_v46, %v538_v42  ;;  %v8611_v42 = vld [vmem:[#allocation8 + $0xa0] sm:$0xff]  ;;  %v8623_v46 = vld [vmem:[#allocation8 + $0x88] sm:$0xff] }
 0x11e   :  { %v619_v50 = vpop.f32.mrf.mxu0 }
 0x11f   :  { %v720_v51 = vadd.f32 %v7165_v47, %v629_v48  ;;  %v628_v52 = vadd.f32 %v619_v50, %v537_v45  ;;  %v710_v53 = vpop.f32.mrf.mxu1  ;;  %v8619_v45 = vld [vmem:[#allocation8 + $0x90] sm:$0xff]  ;;  %v8627_v47 = vld [vmem:[#allocation8 + $0x80] sm:$0xff]  ;;  %v8636_v50 = vld [vmem:[#allocation11 + $0x78] sm:$0xff] }
 0x121   :  { %v719_v54 = vadd.f32 %v710_v53, %v628_v52  ;;  %v7172_v56 = vpop.f32.mrf.mxu0  ;;  %v8643_v52 = vld [vmem:[#allocation11 + $0x70] sm:$0xff] }
 0x122   :  { %v811_v59 = vadd.f32 %v7172_v56, %v720_v51  ;;  %v8640_v51 = vld [vmem:[#allocation11 + $0x38] sm:$0xff]  ;;  %v8647_v53 = vld [vmem:[#allocation11 + $0x30] sm:$0xff]  ;;  %v8655_v56 = vld [vmem:[#allocation11 + $0x28] sm:$0xff] }
 0x123   :  { %v801_v60 = vpop.f32.mrf.mxu0 }
 0x124   :  { %v819_v61 = vadd.f32 %v8504_v55, %v811_v59  ;;  %v810_v62 = vadd.f32 %v801_v60, %v719_v54  ;;  %v8651_v54 = vld [vmem:[#allocation11 + $0x68] sm:$0xff]  ;;  %v8667_v59 = vld [vmem:[#allocation11 + $0x58] sm:$0xff] }
 0x125   :  { %v8671_v60 = vld [vmem:[#allocation11 + $0x18] sm:$0xff] }
 0x126   :  { %v821_v63 = vmax.f32 %v819_v61, 0.0  ;;  %v818_v1 = vadd.f32 %v8504_v55, %v810_v62  ;;  %v8673_v61 = vld [vmem:[#allocation11 + $0x50] sm:$0xff] }
 0x127   :  { %v8675_v62 = vld [vmem:[#allocation11 + $0x10] sm:$0xff] }
 0x128   :  { %v820_v2 = vmax.f32 %v818_v1, 0.0  ;;  %7174 = vmatpush3.msra.mxu1 %v821_v63  ;;  %v8679_v63 = vld [vmem:[#allocation11 + $0x48] sm:$0xff] }
 0x129   :  { %7175 = vmatprep.subr.mxu1 %v10676_v0  ;;  %v8683_v1 = vld [vmem:[#allocation11 + $0x8] sm:$0xff] }
 0x12a   :  { %7176 = vmatpush3.msra.mxu1 %v820_v2  ;;  %10797 = vst [vmem:[#allocation22_spill] sm:$0xff] %v8683_v1  ;;  %v8687_v2 = vld [vmem:[#allocation11 + $0x40] sm:$0xff] }
 0x12b   :  { %7178 = vmatmul.mubr.msk.f32.vlgmr.msra.gmra.mxu1 %vm822_vm5, %v8511_v5  ;;  %7185 = vmatprep.subr.mxu1 %v10676_v0 }
 0x12c   :  { %7201 = vmatprep.mubr.msk.f32.mxu1 %vm8271_vm3, %v10676_v0  ;;  %7186 = vmatpush3.msra.mxu1 %v8521_v7 }
 0x12d   :  { %7187 = vmatprep.subr.mxu1 %v10676_v0 }
 0x12e   :  { %7188 = vmatpush3.msra.mxu1 %v8523_v8 }
 0x12f   :  { %7189 = vmatprep.subr.mxu1 %v10676_v0 }
 0x130   :  { %7190 = vmatpush3.msra.mxu1 %v8527_v9 }
 0x131   :  { %7191 = vmatprep.subr.mxu1 %v10676_v0 }
 0x132   :  { %7192 = vmatpush3.msra.mxu1 %v8531_v10 }
 0x133   :  { %7193 = vmatprep.subr.mxu1 %v10676_v0 }
 0x134   :  { %7194 = vmatpush3.msra.mxu1 %v8543_v20 }
 0x135   :  { %7195 = vmatprep.subr.mxu1 %v10676_v0 }
 0x136   :  { %7196 = vmatpush3.msra.mxu1 %v8547_v23 }
 0x137   :  { %7197 = vmatprep.subr.mxu1 %v10676_v0 }
 0x138   :  { %7198 = vmatpush3.msra.mxu1 %v8549_v24 }
 0x139   :  { %7199 = vmatprep.subr.mxu1 %v10676_v0 }
 0x13a   :  { %7200 = vmatpush3.msra.mxu1 %v8553_v25 }
 0x13b   :  { %7204 = vmatprep.subr.mxu1 %v10676_v0 }
 0x1eb   :  { %v892_v11 = vpop.f32.mrf.mxu1 }
 0x1ec   :  { %897 = vst.msk [vmem:[#allocation3 + $0x1] sm:$0xff] %vm896_vm7, %v892_v11 }
 0x1ed   :  { %v7179_v12 = vpop.f32.mrf.mxu1 }
 0x1f3   :  { %v898_v15 = vld [vmem:[#allocation3] sm:$0xff] }
 0x1f4   :  { %v899_v16 = vld [vmem:[#allocation3 + $0x1] sm:$0xff] }
 0x1f5   :  { %v900_v17 = vmax.f32 %v898_v15, %v899_v16  ;;  %v901_v18 = vld [vmem:[#allocation3 + $0x2] sm:$0xff] }
 0x1f7   :  { %v902_v19 = vmax.f32 %v900_v17, %v901_v18  ;;  %v8702_v18 = vld [vmem:[%s10661_s4] ss:$0 sm:$0xff] }
 0x1f8   :  { %10799 = vst [vmem:[#allocation24_spill] sm:$0xff] %v8702_v18 }
 0x1f9   :  { %7181 = vmatpush3.msra.mxu0 %v902_v19 }
 0x1fa   :  { %7183 = vmatmul.mubr.msk.f32.vlgmr.msra.gmra.mxu0 %vm903_vm8, %v8511_v5  ;;  %7242 = vmatprep.subr.mxu0 %v10676_v0 }
 0x1fb   :  { %7258 = vmatprep.mubr.msk.f32.mxu0 %vm8271_vm3, %v10676_v0  ;;  %7243 = vmatpush3.msra.mxu0 %v8636_v50 }
 0x1fc   :  { %7244 = vmatprep.subr.mxu0 %v10676_v0 }
 0x1fd   :  { %7245 = vmatpush3.msra.mxu0 %v8643_v52 }
 0x1fe   :  { %7246 = vmatprep.subr.mxu0 %v10676_v0 }
 0x1ff   :  { %7247 = vmatpush3.msra.mxu0 %v8651_v54 }
 0x200   :  { %7248 = vmatprep.subr.mxu0 %v10676_v0 }
 0x201   :  { %7249 = vmatpush3.msra.mxu0 %v8659_v57 }
 0x202   :  { %7250 = vmatprep.subr.mxu0 %v10676_v0 }
 0x203   :  { %7251 = vmatpush3.msra.mxu0 %v8667_v59 }
 0x204   :  { %7252 = vmatprep.subr.mxu0 %v10676_v0 }
 0x205   :  { %7253 = vmatpush3.msra.mxu0 %v8673_v61 }
 0x206   :  { %7254 = vmatprep.subr.mxu0 %v10676_v0 }
 0x207   :  { %7255 = vmatpush3.msra.mxu0 %v8679_v63 }
 0x208   :  { %7256 = vmatprep.subr.mxu0 %v10676_v0 }
 0x209   :  { %7257 = vmatpush3.msra.mxu0 %v8687_v2 }
 0x20a   :  { %7280 = vmatprep.subr.mxu0 %v10676_v0 }
 0x2ba   :  { %v8559_v26 = vpop.f32.mrf.mxu0 }
 0x2bb   :  { %977 = vst.msk [vmem:[#allocation4 + $0x1] sm:$0xf] %vm976_vm9, %v8559_v26 }
 0x2bc   :  { %v7184_v27 = vpop.f32.mrf.mxu0 }
 0x2c2   :  { %v987_v30 = vld [vmem:[#allocation4 + $0x1] sm:$0xf] }
 0x2c3   :  { %7202 = vmatmul.mubr.msk.f32.vlgmr.msra.gmra.mxu1 %vm896_vm7, %v987_v30  ;;  %v978_v39 = vld [vmem:[#allocation4] sm:$0xf] }
 0x2c4   :  { %7205 = vmatpush3.msra.mxu1 %v8563_v28  ;;  %7220 = vmatprep.mubr.msk.f32.mxu1 %vm8271_vm3, %v10676_v0  ;;  %v1143_v48 = vld [vmem:[#allocation4 + $0x2] sm:$0xf] }
 0x2c5   :  { %7206 = vmatprep.subr.mxu1 %v10676_v0 }
 0x2c6   :  { %7207 = vmatpush3.msra.mxu1 %v8566_v31 }
 0x2c7   :  { %7208 = vmatprep.subr.mxu1 %v10676_v0 }
 0x2c8   :  { %7209 = vmatpush3.msra.mxu1 %v8572_v32 }
 0x2c9   :  { %7210 = vmatprep.subr.mxu1 %v10676_v0 }
 0x2ca   :  { %7211 = vmatpush3.msra.mxu1 %v8576_v33 }
 0x2cb   :  { %7212 = vmatprep.subr.mxu1 %v10676_v0 }
 0x2cc   :  { %7213 = vmatpush3.msra.mxu1 %v8580_v34 }
 0x2cd   :  { %7214 = vmatprep.subr.mxu1 %v10676_v0 }
 0x2ce   :  { %7215 = vmatpush3.msra.mxu1 %v8584_v35 }
 0x2cf   :  { %7216 = vmatprep.subr.mxu1 %v10676_v0 }
 0x2d0   :  { %7217 = vmatpush3.msra.mxu1 %v8588_v36 }
 0x2d1   :  { %7218 = vmatprep.subr.mxu1 %v10676_v0 }
 0x2d2   :  { %7219 = vmatpush3.msra.mxu1 %v8592_v37 }
 0x2d3   :  { %7221 = vmatmul.mubr.msk.f32.vlgmr.msra.gmra.mxu1 %vm896_vm7, %v978_v39  ;;  %7223 = vmatprep.subr.mxu1 %v10676_v0 }
 0x2d4   :  { %7224 = vmatpush3.msra.mxu1 %v8596_v38  ;;  %7239 = vmatprep.mubr.msk.f32.mxu1 %vm8271_vm3, %v10676_v0 }
 0x2d5   :  { %7225 = vmatprep.subr.mxu1 %v10676_v0 }
 0x2d6   :  { %7226 = vmatpush3.msra.mxu1 %v8601_v40 }
 0x2d7   :  { %7227 = vmatprep.subr.mxu1 %v10676_v0 }
 0x2d8   :  { %7228 = vmatpush3.msra.mxu1 %v8607_v41 }
 0x2d9   :  { %7229 = vmatprep.subr.mxu1 %v10676_v0 }
 0x2da   :  { %7230 = vmatpush3.msra.mxu1 %v8611_v42 }
 0x2db   :  { %7231 = vmatprep.subr.mxu1 %v10676_v0 }
 0x2dc   :  { %7232 = vmatpush3.msra.mxu1 %v8615_v43 }
 0x2dd   :  { %7233 = vmatprep.subr.mxu1 %v10676_v0 }
 0x2de   :  { %7234 = vmatpush3.msra.mxu1 %v8619_v45 }
 0x2df   :  { %7235 = vmatprep.subr.mxu1 %v10676_v0 }
 0x2e0   :  { %7236 = vmatpush3.msra.mxu1 %v8623_v46 }
 0x2e1   :  { %7237 = vmatprep.subr.mxu1 %v10676_v0 }
 0x2e2   :  { %7238 = vmatpush3.msra.mxu1 %v8627_v47 }
 0x2e3   :  { %7240 = vmatmul.mubr.msk.f32.vlgmr.msra.gmra.mxu1 %vm896_vm7, %v1143_v48  ;;  %7261 = vmatprep.subr.mxu1 %v10676_v0 }
 0x2e4   :  { %7277 = vmatprep.mubr.msk.f32.mxu1 %vm8271_vm3, %v10676_v0  ;;  %7262 = vmatpush3.msra.mxu1 %v8640_v51 }
 0x2e5   :  { %7263 = vmatprep.subr.mxu1 %v10676_v0 }
 0x2e6   :  { %7264 = vmatpush3.msra.mxu1 %v8647_v53 }
 0x2e7   :  { %7265 = vmatprep.subr.mxu1 %v10676_v0 }
 0x2e8   :  { %7266 = vmatpush3.msra.mxu1 %v8655_v56 }
 0x2e9   :  { %7267 = vmatprep.subr.mxu1 %v10676_v0 }
 0x2ea   :  { %7268 = vmatpush3.msra.mxu1 %v8663_v58 }
 0x2eb   :  { %7269 = vmatprep.subr.mxu1 %v10676_v0 }
 0x2ec   :  { %7270 = vmatpush3.msra.mxu1 %v8671_v60 }
 0x2ed   :  { %7271 = vmatprep.subr.mxu1 %v10676_v0 }
 0x2ee   :  { %7272 = vmatpush3.msra.mxu1 %v8675_v62 }
 0x2ef   :  { %7273 = vmatprep.subr.mxu1 %v10676_v0 }
 0x2f0   :  { %7274 = vmatpush3.msra.mxu1 %v8683_v1 }
 0x2f1   :  { %7275 = vmatprep.subr.mxu1 %v10676_v0 }
 0x2f2   :  { %7276 = vmatpush3.msra.mxu1 %v8691_v6 }
 0x383   :  { %v1066_v11 = vpop.f32.mrf.mxu1 }
 0x385   :  { %v7203_v12 = vpop.f32.mrf.mxu1 }
 0x393   :  { %v1139_v15 = vpop.f32.mrf.mxu1 }
 0x394   :  { %v1140_v17 = vadd.f32 %v1139_v15, %v1066_v11  ;;  %v8710_v11 = vld [vmem:[#allocation11 + $0xb0] sm:$0xff]  ;;  %v10802_v15 = vmov 0.0  }
 0x395   :  { %v7222_v16 = vpop.f32.mrf.mxu1  ;;  %10801 = vst [vmem:[#allocation26_spill] sm:$0xff] %v8710_v11 }
 0x396   :  { %v8716_v16 = vld [vmem:[#allocation11 + $0xa8] sm:$0xff] }
 0x397   :  { %10803 = vst [vmem:[#allocation27_spill] sm:$0xff] %v8716_v16 }
 0x3a3   :  { %v1222_v19 = vpop.f32.mrf.mxu1 }
 0x3a4   :  { %v1226_v27 = vadd.f32 %v1222_v19, %v1140_v17  ;;  %v8725_v17 = vld [vmem:[#allocation11 + $0x98] sm:$0xff]  ;;  %v8729_v19 = vld [vmem:[#allocation11 + $0x90] sm:$0xff] }
 0x3a5   :  { %v7241_v30 = vpop.f32.mrf.mxu1  ;;  %10805 = vst [vmem:[#allocation29_spill] sm:$0xff] %v8725_v17  ;;  %10806 = vst [vmem:[#allocation30_spill] sm:$0xff] %v8729_v19 }
 0x3a6   :  { %v1233_v39 = vadd.f32 %v8702_v18, %v1226_v27  ;;  %v8733_v27 = vld [vmem:[#allocation11 + $0x88] sm:$0xff]  ;;  %v8737_v30 = vld [vmem:[#allocation11 + $0x80] sm:$0xff] }
 0x3a7   :  { %10807 = vst [vmem:[#allocation31_spill] sm:$0xff] %v8733_v27  ;;  %10808 = vst [vmem:[#allocation32_spill] sm:$0xff] %v8737_v30 }
 0x3a8   :  { %v1234_v48 = vmax.f32 %v1233_v39, 0.0 }
 0x3aa   :  { %1235 = vst.msk [vmem:[#allocation4 + $0x1] sm:$0xf] %vm976_vm9, %v1234_v48  ;;  %v8747_v48 = vld [vmem:[%s10664_s7 + $0xe8] sm:$0xff] }
 0x3ab   :  { %10809 = vst [vmem:[#allocation33_spill] sm:$0xff] %v8747_v48  ;;  %1534 = vmatprep.subr.mxu1 %v8747_v48 }
 0x3b1   :  { %v1245_v0 = vld [vmem:[#allocation4 + $0x1] sm:$0xf] }
 0x3b2   :  { %v1236_v12 = vld [vmem:[#allocation4] sm:$0xf]  ;;  %7259 = vmatmul.mubr.msk.f32.vlgmr.msra.gmra.mxu0 %vm896_vm7, %v1245_v0  ;;  %v8721_v0 = vld [vmem:[#allocation11 + $0xa0] sm:$0xff] }
 0x3b3   :  { %7278 = vmatmul.mubr.msk.f32.vlgmr.msra.gmra.mxu1 %vm896_vm7, %v1236_v12  ;;  %7281 = vmatpush3.msra.mxu0 %v8706_v44  ;;  %10804 = vst [vmem:[#allocation28_spill] sm:$0xff] %v8721_v0  ;;  %v1401_v39 = vld [vmem:[#allocation4 + $0x2] sm:$0xf]  ;;  %v8752_v12 = vld [vmem:[%s10664_s7 + $0xf8] sm:$0xff] }
 0x3b4   :  { %7296 = vmatprep.mubr.msk.f32.mxu0 %vm8271_vm3, %v10802_v15  ;;  %7282 = vmatprep.subr.mxu0 %v10802_v15  ;;  %10810 = vst [vmem:[#allocation34_spill] sm:$0xff] %v8752_v12 }
 0x3b5   :  { %1582 = vmatprep.mubr.f32.mxu1 %v10802_v15  ;;  %7283 = vmatpush3.msra.mxu0 %v8710_v11  ;;  %v8808_v11 = vld [vmem:[%s10664_s7 + $0xb0] sm:$0xff] }
 0x3b6   :  { %7284 = vmatprep.subr.mxu0 %v10802_v15  ;;  %10820 = vst [vmem:[#allocation44_spill] sm:$0xff] %v8808_v11 }
 0x3b7   :  { %7285 = vmatpush3.msra.mxu0 %v8716_v16  ;;  %v8803_v16 = vld [vmem:[%s10664_s7 + $0xa0] sm:$0xff] }
 0x3b8   :  { %7286 = vmatprep.subr.mxu0 %v10802_v15  ;;  %10819 = vst [vmem:[#allocation43_spill] sm:$0xff] %v8803_v16 }
 0x3b9   :  { %7287 = vmatpush3.msra.mxu0 %v8721_v0  ;;  %v8791_v0 = vld [vmem:[%s10664_s7 + $0xa8] sm:$0xff] }
 0x3ba   :  { %7288 = vmatprep.subr.mxu0 %v10802_v15  ;;  %10817 = vst [vmem:[#allocation41_spill] sm:$0xff] %v8791_v0 }
 0x3bb   :  { %7289 = vmatpush3.msra.mxu0 %v8725_v17  ;;  %v8786_v17 = vld [vmem:[%s10664_s7 + $0xd0] sm:$0xff] }
 0x3bc   :  { %7290 = vmatprep.subr.mxu0 %v10802_v15  ;;  %10816 = vst [vmem:[#allocation40_spill] sm:$0xff] %v8786_v17 }
 0x3bd   :  { %7291 = vmatpush3.msra.mxu0 %v8729_v19  ;;  %v8774_v19 = vld [vmem:[%s10664_s7 + $0xd8] sm:$0xff] }
 0x3be   :  { %7292 = vmatprep.subr.mxu0 %v10802_v15  ;;  %10814 = vst [vmem:[#allocation38_spill] sm:$0xff] %v8774_v19 }
 0x3bf   :  { %7293 = vmatpush3.msra.mxu0 %v8733_v27  ;;  %v8757_v27 = vld [vmem:[%s10664_s7 + $0xe0] sm:$0xff] }
 0x3c0   :  { %7294 = vmatprep.subr.mxu0 %v10802_v15  ;;  %10811 = vst [vmem:[#allocation35_spill] sm:$0xff] %v8757_v27  ;;  %1535 = vmatpush1.msra.mxu1 %v8757_v27 }
 0x3c1   :  { %7295 = vmatpush3.msra.mxu0 %v8737_v30  ;;  %v8769_v30 = vld [vmem:[%s10664_s7 + $0xc8] sm:$0xff] }
 0x3c2   :  { %7297 = vmatmul.mubr.msk.f32.vlgmr.msra.gmra.mxu0 %vm896_vm7, %v1401_v39  ;;  %1605 = vmatprep.subr.mxu0 %v8752_v12  ;;  %v8764_v39 = vld [vmem:[%s10664_s7 + $0xf0] sm:$0xff]  ;;  %10813 = vst [vmem:[#allocation37_spill] sm:$0xff] %v8769_v30  ;;  %v8781_v12 = vld [vmem:[%s10664_s7 + $0xc0] sm:$0xff] }
 0x3c3   :  { %1653 = vmatprep.mubr.f32.mxu0 %v10802_v15  ;;  %10812 = vst [vmem:[#allocation36_spill] sm:$0xff] %v8764_v39  ;;  %1606 = vmatpush1.msra.mxu0 %v8764_v39  ;;  %10815 = vst [vmem:[#allocation39_spill] sm:$0xff] %v8781_v12  ;;  %v8798_v39 = vld [vmem:[%s10664_s7 + $0xb8] sm:$0xff] }
 0x3c4   :  { %1536 = vmatprep.subr.mxu1 %v8769_v30  ;;  %1607 = vmatprep.subr.mxu0 %v8774_v19  ;;  %10818 = vst [vmem:[#allocation42_spill] sm:$0xff] %v8798_v39  ;;  %v8815_v19 = vld [vmem:[%s10664_s7 + $0x88] sm:$0xff]  ;;  %v8820_v30 = vld [vmem:[%s10664_s7 + $0x98] sm:$0xff] }
 0x3c5   :  { %1537 = vmatpush1.msra.mxu1 %v8781_v12  ;;  %1608 = vmatpush1.msra.mxu0 %v8786_v17  ;;  %10821 = vst [vmem:[#allocation45_spill] sm:$0xff] %v8815_v19  ;;  %10822 = vst [vmem:[#allocation46_spill] sm:$0xff] %v8820_v30  ;;  %v8831_v17 = vld [vmem:[%s10664_s7 + $0x80] sm:$0xff]  ;;  %v8836_v12 = vld [vmem:[%s10664_s7 + $0x90] sm:$0xff] }
 0x3c6   :  { %1538 = vmatprep.subr.mxu1 %v8791_v0  ;;  %1609 = vmatprep.subr.mxu0 %v8798_v39  ;;  %10823 = vst [vmem:[#allocation47_spill] sm:$0xff] %v8831_v17  ;;  %10824 = vst [vmem:[#allocation48_spill] sm:$0xff] %v8836_v12  ;;  %v8855_v39 = vld [vmem:[%s10664_s7 + $0x60] sm:$0xff] }
 0x3c7   :  { %1539 = vmatpush1.msra.mxu1 %v8803_v16  ;;  %1610 = vmatpush1.msra.mxu0 %v8808_v11  ;;  %v8843_v11 = vld [vmem:[%s10664_s7 + $0x68] sm:$0xff]  ;;  %10827 = vst [vmem:[#allocation51_spill] sm:$0xff] %v8855_v39 }
 0x3c8   :  { %1540 = vmatprep.subr.mxu1 %v8815_v19  ;;  %1611 = vmatprep.subr.mxu0 %v8820_v30  ;;  %10825 = vst [vmem:[#allocation49_spill] sm:$0xff] %v8843_v11  ;;  %v8848_v30 = vld [vmem:[%s10664_s7 + $0x78] sm:$0xff] }
 0x3c9   :  { %1541 = vmatpush1.msra.mxu1 %v8831_v17  ;;  %1612 = vmatpush1.msra.mxu0 %v8836_v12  ;;  %10826 = vst [vmem:[#allocation50_spill] sm:$0xff] %v8848_v30  ;;  %v8860_v12 = vld [vmem:[%s10664_s7 + $0x70] sm:$0xff]  ;;  %v6552_v19 = vld [vmem:[%s10796_s26 + $0x18] sm:$0xff] }
 0x3ca   :  { %1542 = vmatprep.subr.mxu1 %v8843_v11  ;;  %1613 = vmatprep.subr.mxu0 %v8848_v30  ;;  %10828 = vst [vmem:[#allocation52_spill] sm:$0xff] %v8860_v12  ;;  %v8867_v11 = vld [vmem:[%s10664_s7 + $0x48] sm:$0xff]  ;;  %v8872_v30 = vld [vmem:[%s10664_s7 + $0x58] sm:$0xff]  ;;  %v6551_v17 = vld [vmem:[%s10796_s26 + $0x10] sm:$0xff] }
 0x3cb   :  { %1543 = vmatpush1.msra.mxu1 %v8855_v39  ;;  %1614 = vmatpush1.msra.mxu0 %v8860_v12  ;;  %10829 = vst [vmem:[#allocation53_spill] sm:$0xff] %v8867_v11  ;;  %10830 = vst [vmem:[#allocation54_spill] sm:$0xff] %v8872_v30  ;;  %v8879_v39 = vld [vmem:[%s10664_s7 + $0x40] sm:$0xff]  ;;  %v8884_v12 = vld [vmem:[%s10664_s7 + $0x50] sm:$0xff] }
 0x3cc   :  { %1544 = vmatprep.subr.mxu1 %v8867_v11  ;;  %1615 = vmatprep.subr.mxu0 %v8872_v30  ;;  %10831 = vst [vmem:[#allocation55_spill] sm:$0xff] %v8879_v39  ;;  %10832 = vst [vmem:[#allocation56_spill] sm:$0xff] %v8884_v12  ;;  %v8894_v30 = vld [vmem:[%s10664_s7 + $0x28] sm:$0xff]  ;;  %v8899_v11 = vld [vmem:[%s10664_s7 + $0x38] sm:$0xff] }
 0x3cd   :  { %1545 = vmatpush1.msra.mxu1 %v8879_v39  ;;  %1616 = vmatpush1.msra.mxu0 %v8884_v12  ;;  %10833 = vst [vmem:[#allocation57_spill] sm:$0xff] %v8894_v30  ;;  %10834 = vst [vmem:[#allocation58_spill] sm:$0xff] %v8899_v11  ;;  %v8907_v12 = vld [vmem:[%s10664_s7 + $0x20] sm:$0xff]  ;;  %v8912_v39 = vld [vmem:[%s10664_s7 + $0x30] sm:$0xff] }
 0x3ce   :  { %1724 = vst.msk [vmem:[#allocation2 + $0x3] sm:$0xff] %vm176_vm2, %v6551_v17  ;;  %1546 = vmatprep.subr.mxu1 %v8894_v30  ;;  %1617 = vmatprep.subr.mxu0 %v8899_v11  ;;  %10835 = vst [vmem:[#allocation59_spill] sm:$0xff] %v8907_v12  ;;  %v8922_v17 = vld [vmem:[%s10664_s7 + $0x8] sm:$0xff]  ;;  %v8927_v11 = vld [vmem:[%s10664_s7 + $0x18] sm:$0xff] }
 0x3cf   :  { %10836 = vst [vmem:[#allocation60_spill] sm:$0xff] %v8912_v39  ;;  %1547 = vmatpush1.msra.mxu1 %v8907_v12  ;;  %1618 = vmatpush1.msra.mxu0 %v8912_v39  ;;  %10837 = vst [vmem:[#allocation61_spill] sm:$0xff] %v8922_v17  ;;  %v8935_v39 = vld [vmem:[%s10664_s7] sm:$0xff]  ;;  %v8940_v12 = vld [vmem:[%s10664_s7 + $0x10] sm:$0xff] }
 0x3d0   :  { %10838 = vst [vmem:[#allocation62_spill] sm:$0xff] %v8927_v11  ;;  %1725 = vst.msk [vmem:[#allocation2 + $0xb] sm:$0xff] %vm176_vm2, %v6552_v19  ;;  %1548 = vmatprep.subr.mxu1 %v8922_v17  ;;  %1619 = vmatprep.subr.mxu0 %v8927_v11  ;;  %v6554_v19 = vld [vmem:[%s10658_s1 + $0x18] sm:$0x7]  ;;  %v1729_v11 = vld [vmem:[%s10658_s1 + $0x8] sm:$0x7] }
 0x3d1   :  { %10839 = vst [vmem:[#allocation63_spill] sm:$0xff] %v8935_v39  ;;  %10840 = vst [vmem:[#allocation64_spill] sm:$0xff] %v8940_v12  ;;  %1549 = vmatpush1.msra.mxu1 %v8935_v39  ;;  %1620 = vmatpush1.msra.mxu0 %v8940_v12  ;;  %v8955_v12 = vld [vmem:[%s10663_s6] ss:$0 sm:$0xff] }
 0x3d2   :  { %7299 = vmatprep.subr.msk.mxu1 %vm194_vm1, %v6554_v19  ;;  %7306 = vmatprep.subr.msk.mxu0 %vm194_vm1, %v1729_v11  ;;  %10841 = vst [vmem:[#allocation65_spill] sm:$0xff] %v8955_v12 }
 0x472   :  { %v1324_v17 = vpop.f32.mrf.mxu0 }
 0x473   :  { %v1397_v30 = vpop.f32.mrf.mxu1 }
 0x474   :  { %v7260_v16 = vpop.f32.mrf.mxu0  ;;  %v1398_v27 = vadd.f32 %v1397_v30, %v1324_v17  ;;  %v6577_v30 = vld [vmem:[%s10658_s1 + $0x58] sm:$0x7]  ;;  %v6582_v17 = vld [vmem:[%s10658_s1 + $0x68] sm:$0x7] }
 0x475   :  { %v7279_v0 = vpop.f32.mrf.mxu1  ;;  %v1730_v16 = vld [vmem:[#allocation2 + $0x1] sm:$0xff] }
 0x476   :  { %v1726_v0 = vld [vmem:[#allocation2] sm:$0xff] }
 0x482   :  { %v1480_v39 = vpop.f32.mrf.mxu0 }
 0x483   :  { %v1484_v44 = vadd.f32 %v1480_v39, %v1398_v27  ;;  %v1727_v27 = vld [vmem:[#allocation2 + $0x8] sm:$0xff] }
 0x484   :  { %v7298_v18 = vpop.f32.mrf.mxu0  ;;  %v2173_v39 = vld [vmem:[#allocation2 + $0xd] sm:$0xff] }
 0x485   :  { %v1491_v48 = vadd.f32 %v8955_v12, %v1484_v44  ;;  %v1731_v18 = vld [vmem:[#allocation2 + $0x9] sm:$0xff] }
 0x486   :  { %v6562_v44 = vld [vmem:[%s10658_s1 + $0x28] sm:$0x7] }
 0x487   :  { %v1492_v6 = vadd.f32 %v1491_v48, %v8559_v26  ;;  %v6567_v26 = vld [vmem:[%s10658_s1 + $0x38] sm:$0x7]  ;;  %v2172_v48 = vld [vmem:[#allocation2 + $0x5] sm:$0xff] }
 0x489   :  { %v1493_v1 = vmax.f32 %v1492_v6, 0.0  ;;  %v1993_v6 = vld [vmem:[#allocation2 + $0xb] sm:$0xff] }
 0x48b   :  { %6549 = vmatmul.mubr.msk.f32.vlgmr.msra.gmra.mxu1 %vm896_vm7, %v1493_v1  ;;  %6550 = vmatmul.mubr.msk.f32.vlgmr.msra.gmra.mxu0 %vm896_vm7, %v1493_v1  ;;  %v1992_v1 = vld [vmem:[#allocation2 + $0x3] sm:$0xff] }
 0x48c   :  { %7300 = vmatpush3.msk.msra.mxu1 %vm194_vm1, %v6554_v19  ;;  %7307 = vmatpush3.msk.msra.mxu0 %vm194_vm1, %v1729_v11  ;;  %v6572_v11 = vld [vmem:[%s10658_s1 + $0x48] sm:$0x7] }
 0x48d   :  { %7301 = vmatprep.subr.mxu1 %v8395_v3  ;;  %7308 = vmatprep.subr.mxu0 %v8402_v4  ;;  %v2262_v19 = vld [vmem:[#allocation2 + $0x6] sm:$0xff] }
 0x48e   :  { %7302 = vmatpush3.msra.mxu1 %v8395_v3  ;;  %7303 = vmatprep.mubr.msk.f32.mxu1 %vm176_vm2, %v1730_v16  ;;  %v1902_v3 = vld [vmem:[#allocation2 + $0x2] sm:$0xff]  ;;  %v9026_v16 = vsub.s32 2, %v8499_v49 }
 0x48f   :  { %7309 = vmatpush3.msra.mxu0 %v8402_v4  ;;  %7310 = vmatprep.mubr.msk.f32.mxu0 %vm176_vm2, %v1726_v0  ;;  %v1903_v4 = vld [vmem:[#allocation2 + $0xa] sm:$0xff]  ;;  %v173_v0 = vld [vmem:[%s10665_s8] sm:$0xf] }
 0x490   :  { %7304 = vmatmul.mubr.msk.f32.vlgmr.msra.gmra.mxu1 %vm176_vm2, %v1731_v18  ;;  %7311 = vmatmul.mubr.msk.f32.vlgmr.msra.gmra.mxu0 %vm176_vm2, %v1727_v27  ;;  %10843 = vst [vmem:[#allocation67_spill] sm:$0xff] %v9026_v16  ;;  %v9032_v18 = vsub.s32 1, %v8499_v49  ;;  %v8273_v27 = vmov 1966171168  }
 0x491   :  { %7313 = vmatprep.subr.msk.mxu1 %vm194_vm1, %v6562_v44  ;;  %7320 = vmatprep.subr.msk.mxu0 %vm194_vm1, %v6567_v26 }
 0x492   :  { %7314 = vmatpush3.msk.msra.mxu1 %vm194_vm1, %v6562_v44  ;;  %7321 = vmatpush3.msk.msra.mxu0 %vm194_vm1, %v6567_v26  ;;  %10844 = vst [vmem:[#allocation68_spill] sm:$0xff] %v9032_v18  ;;  %v1671_v44 = vunpack.c.l.s4 %v8273_v27 }
 0x493   :  { %7315 = vmatprep.subr.mxu1 %v8431_v13  ;;  %7322 = vmatprep.subr.mxu0 %v8436_v14 }
 0x494   :  { %7316 = vmatpush3.msra.mxu1 %v8431_v13  ;;  %7317 = vmatprep.mubr.msk.f32.mxu1 %vm176_vm2, %v1902_v3  ;;  %v2082_v13 = vld [vmem:[#allocation2 + $0x4] sm:$0xff]  ;;  %v9039_v3 = vrot.slane %v173_v0, %v9026_v16 }
 0x495   :  { %7323 = vmatpush3.msra.mxu0 %v8436_v14  ;;  %7324 = vmatprep.mubr.msk.f32.mxu0 %vm176_vm2, %v1992_v1  ;;  %v2083_v14 = vld [vmem:[#allocation2 + $0xc] sm:$0xff]  ;;  %v9042_v1 = vrot.slane %v173_v0, %v9032_v18 }
 0x496   :  { %7318 = vmatmul.mubr.msk.f32.vlgmr.msra.gmra.mxu1 %vm176_vm2, %v1903_v4  ;;  %7325 = vmatmul.mubr.msk.f32.vlgmr.msra.gmra.mxu0 %vm176_vm2, %v1993_v6  ;;  %10846 = vst [vmem:[#allocation70_spill] sm:$0xff] %v9039_v3  ;;  %v1672_v6 = vunpack.c.0.s8 %v1671_v44 }
 0x497   :  { %7327 = vmatprep.subr.msk.mxu1 %vm194_vm1, %v6572_v11  ;;  %7334 = vmatprep.subr.msk.mxu0 %vm194_vm1, %v6577_v30  ;;  %10847 = vst [vmem:[#allocation71_spill] sm:$0xff] %v9042_v1 }
 0x498   :  { %7328 = vmatpush3.msk.msra.mxu1 %vm194_vm1, %v6572_v11  ;;  %7335 = vmatpush3.msk.msra.mxu0 %vm194_vm1, %v6577_v30 }
 0x499   :  { %7329 = vmatprep.subr.mxu1 %v8459_v21  ;;  %7336 = vmatprep.subr.mxu0 %v8464_v22 }
 0x49a   :  { %7330 = vmatpush3.msra.mxu1 %v8459_v21  ;;  %7331 = vmatprep.mubr.msk.f32.mxu1 %vm176_vm2, %v2082_v13  ;;  %v2263_v21 = vld [vmem:[#allocation2 + $0xe] sm:$0xff] }
 0x49b   :  { %7337 = vmatpush3.msra.mxu0 %v8464_v22  ;;  %7338 = vmatprep.mubr.msk.f32.mxu0 %vm176_vm2, %v2172_v48  ;;  %v9023_v22 = vsub.s32 0, %v8499_v49 }
 0x49c   :  { %7332 = vmatmul.mubr.msk.f32.vlgmr.msra.gmra.mxu1 %vm176_vm2, %v2083_v14  ;;  %7339 = vmatmul.mubr.msk.f32.vlgmr.msra.gmra.mxu0 %vm176_vm2, %v2173_v39 }
 0x49d   :  { %7341 = vmatprep.subr.msk.mxu1 %vm194_vm1, %v6582_v17  ;;  %7345 = vmatprep.mubr.msk.f32.mxu1 %vm176_vm2, %v2262_v19  ;;  %10842 = vst [vmem:[#allocation66_spill] sm:$0xff] %v9023_v22  ;;  %v9036_v26 = vrot.slane %v173_v0, %v9023_v22 }
 0x49e   :  { %7342 = vmatpush3.msk.msra.mxu1 %vm194_vm1, %v6582_v17  ;;  %7348 = vmatprep.subr.mxu0 %v10802_v15 }
 0x49f   :  { %7343 = vmatprep.subr.mxu1 %v8484_v29  ;;  %7352 = vmatprep.mubr.msk.f32.mxu0 %vm8271_vm3, %v10802_v15  ;;  %10845 = vst [vmem:[#allocation69_spill] sm:$0xff] %v9036_v26 }
 0x4a0   :  { %7344 = vmatpush3.msra.mxu1 %v8484_v29  ;;  %v1509_v29 = vsub.s32 3, %v8499_v49 }
 0x4a1   :  { %7346 = vmatmul.mubr.msk.f32.vlgmr.msra.gmra.mxu1 %vm176_vm2, %v2263_v21  ;;  %7355 = vmatprep.subr.mxu1 %v10802_v15  ;;  %v9051_v21 = vsub.s32 %v1672_v6, %v8499_v49  ;;  %v10849_v6 = vlaneseq }
 0x4a2   :  { %7357 = vmatprep.mubr.msk.f32.mxu1 %vm8271_vm3, %v10802_v15  ;;  %v9044_v4 = vrot.slane %v173_v0, %v1509_v29 }
 0x4a3   :  { %vm9056_vm10 = vcmp.lt.s32.totalorder %v10849_v6, 512 }
 0x4a4   :  { %10848 = vst [vmem:[#allocation72_spill] sm:$0xff] %v9044_v4 }
 0x54b   :  { %v1584_v11 = vpop.f32.mrf.mxu1  ;;  %v1655_v30 = vpop.f32.mrf.mxu0 }
 0x54c   :  { %v1585_v13 = vadd.f32 %v1584_v11, %v9036_v26  ;;  %v1656_v48 = vadd.f32 %v1655_v30, %v9039_v3 }
 0x54d   :  { %v1586_v14 = vpop.f32.mrf.mxu1  ;;  %v1657_v39 = vpop.f32.mrf.mxu0 }
 0x54e   :  { %v1587_v17 = vadd.f32 %v1586_v14, %v9042_v1  ;;  %v1658_v19 = vadd.f32 %v1657_v39, %v9044_v4  ;;  %v1660_v27 = vmax.f32 %v1585_v13, 0.0  ;;  %v1662_v16 = vmax.f32 %v1656_v48, 0.0  ;;  %v3254_v13 = vld [vmem:[#allocation13 + $0x160] sm:$0xff] }
 0x550   :  { %v1661_v0 = vmax.f32 %v1587_v17, 0.0  ;;  %v1663_v29 = vmax.f32 %v1658_v19, 0.0  ;;  %v7305_v44 = vpop.f32.mrf.mxu1  ;;  %v7312_v18 = vpop.f32.mrf.mxu0 }
 0x551   :  { %v1899_v14 = vadd.f32 %v7312_v18, %v7305_v44 }
 0x552   :  { %v1668_v22 = vcombine.low %v1660_v27, %v1661_v0  ;;  %v1669_v12 = vcombine.low %v1662_v16, %v1663_v29  ;;  %v1809_v11 = vpop.f32.mrf.mxu1  ;;  %v1893_v26 = vpop.f32.mrf.mxu0 }
 0x553   :  { %v1894_v48 = vadd.f32 %v1893_v26, %v1809_v11 }
 0x554   :  { %v1676_v30 = vrot.slane %v1668_v22, %v9051_v21  ;;  %v1683_v3 = vrot.slane %v1669_v12, %v9051_v21 }
 0x556   :  { %v1684_v1 = vcombine.low %v1676_v30, %v1683_v3  ;;  %v1699_v39 = vcombine.high %v1676_v30, %v1683_v3  ;;  %v7319_v4 = vpop.f32.mrf.mxu1  ;;  %v7326_v49 = vpop.f32.mrf.mxu0 }
 0x557   :  { %v1991_v17 = vadd.f32 %v7319_v4, %v1899_v14 }
 0x558   :  { %v1691_v16 = vrot.slane %v1684_v1, %v9051_v21  ;;  %v1706_v19 = vrot.slane %v1699_v39, %v9051_v21  ;;  %v1981_v27 = vpop.f32.mrf.mxu1  ;;  %v2071_v22 = vpop.f32.mrf.mxu0 }
 0x559   :  { %v2081_v0 = vadd.f32 %v7326_v49, %v1991_v17  ;;  %v1990_v12 = vadd.f32 %v1981_v27, %v1894_v48 }
 0x55a   :  { %1697 = vst.msk [vmem:[#allocation5] ss:$8 sm:$0xf] %vm9056_vm10, %v1691_v16  ;;  %1709 = vst.msk [vmem:[#allocation5 + $0x2] ss:$8 sm:$0xf] %vm9056_vm10, %v1706_v19  ;;  %v1711_v18 = vcombine.high %v1691_v16, %v1691_v16  ;;  %v1716_v3 = vcombine.high %v1706_v19, %v1706_v19 }
 0x55b   :  { %v2080_v29 = vadd.f32 %v2071_v22, %v1990_v12  ;;  %v10869_v12 = vld [vmem:[#allocation51_spill] sm:$0xff] }
 0x55c   :  { %1714 = vst.msk [vmem:[#allocation5 + $0x4] ss:$8 sm:$0xf] %vm9056_vm10, %v1711_v18  ;;  %1719 = vst.msk [vmem:[#allocation5 + $0x6] ss:$8 sm:$0xf] %vm9056_vm10, %v1716_v3  ;;  %v7333_v26 = vpop.f32.mrf.mxu1  ;;  %v7340_v1 = vpop.f32.mrf.mxu0 }
 0x55d   :  { %v2171_v4 = vadd.f32 %v7333_v26, %v2081_v0  ;;  %v10870_v18 = vld [vmem:[#allocation30_spill] sm:$0xff]  ;;  %v10871_v3 = vld [vmem:[#allocation53_spill] sm:$0xff]  ;;  %v10873_v26 = vld [vmem:[#allocation31_spill] sm:$0xff] }
 0x55e   :  { %v2161_v44 = vpop.f32.mrf.mxu1  ;;  %v2251_v14 = vpop.f32.mrf.mxu0 }
 0x55f   :  { %v2261_v11 = vadd.f32 %v7340_v1, %v2171_v4  ;;  %v2170_v30 = vadd.f32 %v2161_v44, %v2080_v29  ;;  %v10872_v29 = vld [vmem:[#allocation55_spill] sm:$0xff]  ;;  %v10874_v1 = vld [vmem:[#allocation57_spill] sm:$0xff]  ;;  %v10876_v44 = vld [vmem:[#allocation32_spill] sm:$0xff] }
 0x560   :  { %v10875_v4 = vld [vmem:[#allocation59_spill] sm:$0xff] }
 0x561   :  { %v2260_v39 = vadd.f32 %v2251_v14, %v2170_v30  ;;  %v7347_v49 = vpop.f32.mrf.mxu1  ;;  %v10877_v30 = vld [vmem:[#allocation61_spill] sm:$0xff]  ;;  %v10878_v14 = vld [vmem:[#allocation34_spill] sm:$0xff] }
 0x562   :  { %v2351_v6 = vadd.f32 %v7347_v49, %v2261_v11  ;;  %v10880_v49 = vld [vmem:[#allocation63_spill] sm:$0xff] }
 0x563   :  { %v2341_v48 = vpop.f32.mrf.mxu1 }
 0x564   :  { %v2353_v17 = vadd.f32 %v8504_v55, %v2351_v6  ;;  %v2350_v16 = vadd.f32 %v2341_v48, %v2260_v39  ;;  %v10879_v39 = vld [vmem:[#allocation36_spill] sm:$0xff]  ;;  %v10881_v6 = vld [vmem:[#allocation38_spill] sm:$0xff] }
 0x565   :  { %v10882_v48 = vld [vmem:[#allocation40_spill] sm:$0xff] }
 0x566   :  { %v2355_v19 = vmax.f32 %v2353_v17, 0.0  ;;  %v2352_v27 = vadd.f32 %v8504_v55, %v2350_v16  ;;  %v10883_v17 = vld [vmem:[#allocation42_spill] sm:$0xff]  ;;  %v10884_v16 = vld [vmem:[#allocation44_spill] sm:$0xff] }
 0x568   :  { %v2354_v22 = vmax.f32 %v2352_v27, 0.0  ;;  %7349 = vmatpush3.msra.mxu0 %v2355_v19  ;;  %v10885_v19 = vld [vmem:[#allocation46_spill] sm:$0xff]  ;;  %v10886_v27 = vld [vmem:[#allocation48_spill] sm:$0xff] }
 0x569   :  { %7350 = vmatprep.subr.mxu0 %v10802_v15 }
 0x56a   :  { %7351 = vmatpush3.msra.mxu0 %v2354_v22  ;;  %v10887_v22 = vld [vmem:[#allocation50_spill] sm:$0xff] }
 0x56b   :  { %7353 = vmatmul.mubr.msk.f32.vlgmr.msra.gmra.mxu0 %vm822_vm5, %v8511_v5  ;;  %7360 = vmatprep.subr.mxu0 %v10802_v15 }
 0x56c   :  { %7361 = vmatpush3.msra.mxu0 %v8521_v7  ;;  %7376 = vmatprep.mubr.msk.f32.mxu0 %vm8271_vm3, %v10802_v15 }
 0x56d   :  { %7362 = vmatprep.subr.mxu0 %v10802_v15 }
 0x56e   :  { %7363 = vmatpush3.msra.mxu0 %v8523_v8 }
 0x56f   :  { %7364 = vmatprep.subr.mxu0 %v10802_v15 }
 0x570   :  { %7365 = vmatpush3.msra.mxu0 %v8527_v9 }
 0x571   :  { %7366 = vmatprep.subr.mxu0 %v10802_v15 }
 0x572   :  { %7367 = vmatpush3.msra.mxu0 %v8531_v10 }
 0x573   :  { %7368 = vmatprep.subr.mxu0 %v10802_v15 }
 0x574   :  { %7369 = vmatpush3.msra.mxu0 %v8543_v20 }
 0x575   :  { %7370 = vmatprep.subr.mxu0 %v10802_v15 }
 0x576   :  { %7371 = vmatpush3.msra.mxu0 %v8547_v23 }
 0x577   :  { %7372 = vmatprep.subr.mxu0 %v10802_v15 }
 0x578   :  { %7373 = vmatpush3.msra.mxu0 %v8549_v24 }
 0x579   :  { %7374 = vmatprep.subr.mxu0 %v10802_v15 }
 0x57a   :  { %7375 = vmatpush3.msra.mxu0 %v8553_v25 }
 0x57b   :  { %7398 = vmatprep.subr.mxu0 %v10802_v15 }
 0x62b   :  { %v2422_v55 = vpop.f32.mrf.mxu0 }
 0x62c   :  { %2426 = vst.msk [vmem:[#allocation3 + $0x1] sm:$0xff] %vm896_vm7, %v2422_v55  ;;  %v10888_v55 = vld [vmem:[#allocation52_spill] sm:$0xff] }
 0x62d   :  { %v7354_v7 = vpop.f32.mrf.mxu0 }
 0x62e   :  { %v10889_v7 = vld [vmem:[#allocation54_spill] sm:$0xff] }
 0x633   :  { %v2427_v8 = vld [vmem:[#allocation3] sm:$0xff] }
 0x634   :  { %v2428_v9 = vld [vmem:[#allocation3 + $0x1] sm:$0xff] }
 0x635   :  { %v2429_v10 = vmax.f32 %v2427_v8, %v2428_v9  ;;  %v2430_v20 = vld [vmem:[#allocation3 + $0x2] sm:$0xff]  ;;  %v10890_v8 = vld [vmem:[#allocation56_spill] sm:$0xff]  ;;  %v10891_v9 = vld [vmem:[#allocation58_spill] sm:$0xff] }
 0x637   :  { %v2431_v0 = vmax.f32 %v2429_v10, %v2430_v20  ;;  %v10892_v10 = vld [vmem:[#allocation60_spill] sm:$0xff]  ;;  %v10893_v20 = vld [vmem:[#allocation62_spill] sm:$0xff] }
 0x639   :  { %7356 = vmatpush3.msra.mxu1 %v2431_v0  ;;  %v10894_v0 = vld [vmem:[#allocation64_spill] sm:$0xff] }
 0x63a   :  { %7358 = vmatmul.mubr.msk.f32.vlgmr.msra.gmra.mxu1 %vm903_vm8, %v8511_v5  ;;  %7379 = vmatprep.subr.mxu1 %v10802_v15 }
 0x63b   :  { %7380 = vmatpush3.msra.mxu1 %v8563_v28  ;;  %7395 = vmatprep.mubr.msk.f32.mxu1 %vm8271_vm3, %v10802_v15 }
 0x63c   :  { %7381 = vmatprep.subr.mxu1 %v10802_v15 }
 0x63d   :  { %7382 = vmatpush3.msra.mxu1 %v8566_v31  ;;  %v10852_v31 = vld [vmem:[#allocation22_spill] sm:$0xff] }
 0x63e   :  { %7383 = vmatprep.subr.mxu1 %v10802_v15 }
 0x63f   :  { %7384 = vmatpush3.msra.mxu1 %v8572_v32  ;;  %v10853_v32 = vld [vmem:[#allocation23_spill] sm:$0xff] }
 0x640   :  { %7385 = vmatprep.subr.mxu1 %v10802_v15 }
 0x641   :  { %7386 = vmatpush3.msra.mxu1 %v8576_v33  ;;  %v10854_v33 = vld [vmem:[#allocation33_spill] sm:$0xff] }
 0x642   :  { %7387 = vmatprep.subr.mxu1 %v10802_v15 }
 0x643   :  { %7388 = vmatpush3.msra.mxu1 %v8580_v34 }
 0x644   :  { %7389 = vmatprep.subr.mxu1 %v10802_v15 }
 0x645   :  { %7390 = vmatpush3.msra.mxu1 %v8584_v35 }
 0x646   :  { %7391 = vmatprep.subr.mxu1 %v10802_v15 }
 0x647   :  { %7392 = vmatpush3.msra.mxu1 %v8588_v36 }
 0x648   :  { %7393 = vmatprep.subr.mxu1 %v10802_v15 }
 0x649   :  { %7394 = vmatpush3.msra.mxu1 %v8592_v37 }
 0x64a   :  { %7417 = vmatprep.subr.mxu1 %v10802_v15 }
 0x6fa   :  { %v9116_v5 = vpop.f32.mrf.mxu1 }
 0x6fb   :  { %2502 = vst.msk [vmem:[#allocation4 + $0x1] sm:$0xf] %vm976_vm9, %v9116_v5 }
 0x6fc   :  { %v7359_v23 = vpop.f32.mrf.mxu1 }
 0x6fd   :  { %v3256_v23 = vld [vmem:[#allocation13 + $0x170] sm:$0xff] }
 0x702   :  { %v2512_v24 = vld [vmem:[#allocation4 + $0x1] sm:$0xf] }
 0x703   :  { %v2503_v25 = vld [vmem:[#allocation4] sm:$0xf]  ;;  %7377 = vmatmul.mubr.msk.f32.vlgmr.msra.gmra.mxu0 %vm896_vm7, %v2512_v24  ;;  %v3352_v24 = vld [vmem:[#allocation13 + $0x470] sm:$0xff] }
 0x704   :  { %7396 = vmatmul.mubr.msk.f32.vlgmr.msra.gmra.mxu1 %vm896_vm7, %v2503_v25  ;;  %7399 = vmatpush3.msra.mxu0 %v8596_v38  ;;  %v2667_v28 = vld [vmem:[#allocation4 + $0x2] sm:$0xf] }
 0x705   :  { %7414 = vmatprep.mubr.msk.f32.mxu0 %vm8271_vm3, %v10802_v15  ;;  %7400 = vmatprep.subr.mxu0 %v10802_v15 }
 0x706   :  { %7418 = vmatpush3.msra.mxu1 %v8636_v50  ;;  %7401 = vmatpush3.msra.mxu0 %v8601_v40 }
 0x707   :  { %7419 = vmatprep.subr.mxu1 %v10802_v15  ;;  %7402 = vmatprep.subr.mxu0 %v10802_v15 }
 0x708   :  { %7420 = vmatpush3.msra.mxu1 %v8643_v52  ;;  %7403 = vmatpush3.msra.mxu0 %v8607_v41  ;;  %v10857_v52 = vld [vmem:[#allocation35_spill] sm:$0xff] }
 0x709   :  { %7421 = vmatprep.subr.mxu1 %v10802_v15  ;;  %7404 = vmatprep.subr.mxu0 %v10802_v15 }
 0x70a   :  { %7422 = vmatpush3.msra.mxu1 %v8651_v54  ;;  %7405 = vmatpush3.msra.mxu0 %v8611_v42  ;;  %v10859_v54 = vld [vmem:[#allocation37_spill] sm:$0xff] }
 0x70b   :  { %7423 = vmatprep.subr.mxu1 %v10802_v15  ;;  %7406 = vmatprep.subr.mxu0 %v10802_v15 }
 0x70c   :  { %7424 = vmatpush3.msra.mxu1 %v8659_v57  ;;  %7407 = vmatpush3.msra.mxu0 %v8615_v43  ;;  %v10855_v43 = vld [vmem:[#allocation24_spill] sm:$0xff]  ;;  %v10861_v57 = vld [vmem:[#allocation27_spill] sm:$0xff] }
 0x70d   :  { %7425 = vmatprep.subr.mxu1 %v10802_v15  ;;  %7408 = vmatprep.subr.mxu0 %v10802_v15 }
 0x70e   :  { %7426 = vmatpush3.msra.mxu1 %v8667_v59  ;;  %7409 = vmatpush3.msra.mxu0 %v8619_v45  ;;  %v10863_v59 = vld [vmem:[#allocation43_spill] sm:$0xff] }
 0x70f   :  { %7427 = vmatprep.subr.mxu1 %v10802_v15  ;;  %7410 = vmatprep.subr.mxu0 %v10802_v15 }
 0x710   :  { %7428 = vmatpush3.msra.mxu1 %v8673_v61  ;;  %7411 = vmatpush3.msra.mxu0 %v8623_v46  ;;  %v10865_v61 = vld [vmem:[#allocation45_spill] sm:$0xff] }
 0x711   :  { %7429 = vmatprep.subr.mxu1 %v10802_v15  ;;  %7412 = vmatprep.subr.mxu0 %v10802_v15 }
 0x712   :  { %7430 = vmatpush3.msra.mxu1 %v8679_v63  ;;  %7413 = vmatpush3.msra.mxu0 %v8627_v47  ;;  %v10867_v63 = vld [vmem:[#allocation29_spill] sm:$0xff] }
 0x713   :  { %7431 = vmatprep.subr.mxu1 %v10802_v15  ;;  %7415 = vmatmul.mubr.msk.f32.vlgmr.msra.gmra.mxu0 %vm896_vm7, %v2667_v28 }
 0x714   :  { %7436 = vmatprep.subr.mxu0 %v10802_v15  ;;  %7432 = vmatpush3.msra.mxu1 %v8687_v2  ;;  %v10868_v2 = vld [vmem:[#allocation49_spill] sm:$0xff] }
 0x715   :  { %7437 = vmatpush3.msra.mxu0 %v8640_v51  ;;  %7433 = vmatprep.mubr.msk.f32.mxu1 %vm8271_vm3, %v10802_v15  ;;  %v10856_v51 = vld [vmem:[#allocation25_spill] sm:$0xff] }
 0x716   :  { %7438 = vmatprep.subr.mxu0 %v10802_v15  ;;  %7452 = vmatprep.mubr.msk.f32.mxu0 %vm8271_vm3, %v10802_v15 }
 0x717   :  { %7439 = vmatpush3.msra.mxu0 %v8647_v53  ;;  %7455 = vmatprep.subr.mxu1 %v10802_v15  ;;  %v10858_v53 = vld [vmem:[#allocation26_spill] sm:$0xff] }
 0x718   :  { %7440 = vmatprep.subr.mxu0 %v10802_v15 }
 0x719   :  { %7441 = vmatpush3.msra.mxu0 %v8655_v56  ;;  %v10860_v56 = vld [vmem:[#allocation39_spill] sm:$0xff] }
 0x71a   :  { %7442 = vmatprep.subr.mxu0 %v10802_v15 }
 0x71b   :  { %7443 = vmatpush3.msra.mxu0 %v8663_v58  ;;  %v10862_v58 = vld [vmem:[#allocation41_spill] sm:$0xff] }
 0x71c   :  { %7444 = vmatprep.subr.mxu0 %v10802_v15 }
 0x71d   :  { %7445 = vmatpush3.msra.mxu0 %v8671_v60  ;;  %v10864_v60 = vld [vmem:[#allocation28_spill] sm:$0xff] }
 0x71e   :  { %7446 = vmatprep.subr.mxu0 %v10802_v15 }
 0x71f   :  { %7447 = vmatpush3.msra.mxu0 %v8675_v62  ;;  %v10866_v62 = vld [vmem:[#allocation47_spill] sm:$0xff] }
 0x720   :  { %7448 = vmatprep.subr.mxu0 %v10802_v15 }
 0x721   :  { %7449 = vmatpush3.msra.mxu0 %v10852_v31 }
 0x722   :  { %7450 = vmatprep.subr.mxu0 %v10802_v15 }
 0x723   :  { %7451 = vmatpush3.msra.mxu0 %v10853_v32 }
 0x724   :  { %3022 = vmatprep.subr.mxu0 %v10854_v33 }
 0x7c3   :  { %v2590_v34 = vpop.f32.mrf.mxu0 }
 0x7c4   :  { %v2663_v35 = vpop.f32.mrf.mxu1 }
 0x7c5   :  { %v7378_v36 = vpop.f32.mrf.mxu0  ;;  %v2664_v38 = vadd.f32 %v2663_v35, %v2590_v34 }
 0x7c6   :  { %v7397_v37 = vpop.f32.mrf.mxu1 }
 0x7c7   :  { %v10895_v37 = vld [vmem:[#allocation65_spill] sm:$0xff] }
 0x7d3   :  { %v2745_v40 = vpop.f32.mrf.mxu0 }
 0x7d4   :  { %v2749_v41 = vadd.f32 %v2745_v40, %v2664_v38 }
 0x7d5   :  { %v7416_v42 = vpop.f32.mrf.mxu0 }
 0x7d6   :  { %v2750_v45 = vadd.f32 %v10855_v43, %v2749_v41  ;;  %v3255_v42 = vld [vmem:[#allocation13 + $0x168] sm:$0xff] }
 0x7d7   :  { %v3351_v43 = vld [vmem:[#allocation13 + $0x468] sm:$0xff] }
 0x7d8   :  { %v2751_v46 = vmax.f32 %v2750_v45, 0.0  ;;  %v3253_v45 = vld [vmem:[#allocation13 + $0x158] sm:$0xff] }
 0x7da   :  { %2752 = vst.msk [vmem:[#allocation4 + $0x1] sm:$0xf] %vm976_vm9, %v2751_v46  ;;  %v3349_v46 = vld [vmem:[#allocation13 + $0x458] sm:$0xff] }
 0x7e1   :  { %v2762_v47 = vld [vmem:[#allocation4 + $0x1] sm:$0xf] }
 0x7e2   :  { %v2753_v50 = vld [vmem:[#allocation4] sm:$0xf]  ;;  %7434 = vmatmul.mubr.msk.f32.vlgmr.msra.gmra.mxu1 %vm896_vm7, %v2762_v47  ;;  %v3252_v47 = vld [vmem:[#allocation13 + $0x150] sm:$0xff] }
 0x7e3   :  { %7453 = vmatmul.mubr.msk.f32.vlgmr.msra.gmra.mxu0 %vm896_vm7, %v2753_v50  ;;  %7456 = vmatpush3.msra.mxu1 %v10856_v51  ;;  %v2917_v11 = vld [vmem:[#allocation4 + $0x2] sm:$0xf]  ;;  %v3348_v50 = vld [vmem:[#allocation13 + $0x450] sm:$0xff]  ;;  %v3250_v51 = vld [vmem:[#allocation13 + $0x140] sm:$0xff] }
 0x7e4   :  { %7471 = vmatprep.mubr.msk.f32.mxu1 %vm8271_vm3, %v10802_v15  ;;  %7457 = vmatprep.subr.mxu1 %v10802_v15 }
 0x7e5   :  { %3023 = vmatpush1.msra.mxu0 %v10857_v52  ;;  %7458 = vmatpush3.msra.mxu1 %v10858_v53  ;;  %v3346_v52 = vld [vmem:[#allocation13 + $0x440] sm:$0xff]  ;;  %v3249_v53 = vld [vmem:[#allocation13 + $0x138] sm:$0xff] }
 0x7e6   :  { %3024 = vmatprep.subr.mxu0 %v10859_v54  ;;  %7459 = vmatprep.subr.mxu1 %v10802_v15  ;;  %v3345_v54 = vld [vmem:[#allocation13 + $0x438] sm:$0xff] }
 0x7e7   :  { %3025 = vmatpush1.msra.mxu0 %v10860_v56  ;;  %7460 = vmatpush3.msra.mxu1 %v10861_v57  ;;  %v3343_v56 = vld [vmem:[#allocation13 + $0x428] sm:$0xff]  ;;  %v3246_v57 = vld [vmem:[#allocation13 + $0x120] sm:$0xff] }
 0x7e8   :  { %3026 = vmatprep.subr.mxu0 %v10862_v58  ;;  %7461 = vmatprep.subr.mxu1 %v10802_v15  ;;  %v3342_v58 = vld [vmem:[#allocation13 + $0x420] sm:$0xff] }
 0x7e9   :  { %3027 = vmatpush1.msra.mxu0 %v10863_v59  ;;  %7462 = vmatpush3.msra.mxu1 %v10864_v60  ;;  %v3244_v59 = vld [vmem:[#allocation13 + $0x110] sm:$0xff] }
 0x7ea   :  { %3028 = vmatprep.subr.mxu0 %v10865_v61  ;;  %7463 = vmatprep.subr.mxu1 %v10802_v15  ;;  %v3340_v60 = vld [vmem:[#allocation13 + $0x410] sm:$0xff]  ;;  %v3243_v61 = vld [vmem:[#allocation13 + $0x108] sm:$0xff] }
 0x7eb   :  { %3029 = vmatpush1.msra.mxu0 %v10866_v62  ;;  %7464 = vmatpush3.msra.mxu1 %v10867_v63  ;;  %v3339_v62 = vld [vmem:[#allocation13 + $0x408] sm:$0xff]  ;;  %v3241_v63 = vld [vmem:[#allocation13 + $0xf8] sm:$0xff] }
 0x7ec   :  { %3030 = vmatprep.subr.mxu0 %v10868_v2  ;;  %7465 = vmatprep.subr.mxu1 %v10802_v15  ;;  %v3337_v2 = vld [vmem:[#allocation13 + $0x3f8] sm:$0xff] }
 0x7ed   :  { %3031 = vmatpush1.msra.mxu0 %v10869_v12  ;;  %7466 = vmatpush3.msra.mxu1 %v10870_v18  ;;  %v3240_v12 = vld [vmem:[#allocation13 + $0xf0] sm:$0xff] }
 0x7ee   :  { %3032 = vmatprep.subr.mxu0 %v10871_v3  ;;  %7467 = vmatprep.subr.mxu1 %v10802_v15  ;;  %v3336_v18 = vld [vmem:[#allocation13 + $0x3f0] sm:$0xff]  ;;  %v3238_v3 = vld [vmem:[#allocation13 + $0xe0] sm:$0xff] }
 0x7ef   :  { %3033 = vmatpush1.msra.mxu0 %v10872_v29  ;;  %7468 = vmatpush3.msra.mxu1 %v10873_v26  ;;  %v3334_v29 = vld [vmem:[#allocation13 + $0x3e0] sm:$0xff]  ;;  %v3237_v26 = vld [vmem:[#allocation13 + $0xd8] sm:$0xff] }
 0x7f0   :  { %3034 = vmatprep.subr.mxu0 %v10874_v1  ;;  %7469 = vmatprep.subr.mxu1 %v10802_v15  ;;  %v3333_v1 = vld [vmem:[#allocation13 + $0x3d8] sm:$0xff] }
 0x7f1   :  { %3035 = vmatpush1.msra.mxu0 %v10875_v4  ;;  %7470 = vmatpush3.msra.mxu1 %v10876_v44  ;;  %v3235_v4 = vld [vmem:[#allocation13 + $0xc8] sm:$0xff] }
 0x7f2   :  { %3036 = vmatprep.subr.mxu0 %v10877_v30  ;;  %7472 = vmatmul.mubr.msk.f32.vlgmr.msra.gmra.mxu1 %vm896_vm7, %v2917_v11  ;;  %v3331_v44 = vld [vmem:[#allocation13 + $0x3c8] sm:$0xff]  ;;  %v3234_v11 = vld [vmem:[#allocation13 + $0xc0] sm:$0xff] }
 0x7f3   :  { %3093 = vmatprep.subr.mxu1 %v10878_v14  ;;  %3037 = vmatpush1.msra.mxu0 %v10880_v49  ;;  %v3330_v30 = vld [vmem:[#allocation13 + $0x3c0] sm:$0xff]  ;;  %v3232_v14 = vld [vmem:[#allocation13 + $0xb0] sm:$0xff]  ;;  %v3231_v49 = vld [vmem:[#allocation13 + $0xa8] sm:$0xff] }
 0x7f4   :  { %3094 = vmatpush1.msra.mxu1 %v10879_v39  ;;  %3070 = vmatprep.mubr.f32.mxu0 %v10802_v15  ;;  %v3328_v39 = vld [vmem:[#allocation13 + $0x3b0] sm:$0xff] }
 0x7f5   :  { %3095 = vmatprep.subr.mxu1 %v10881_v6  ;;  %3141 = vmatprep.mubr.f32.mxu1 %v10802_v15  ;;  %v3327_v6 = vld [vmem:[#allocation13 + $0x3a8] sm:$0xff] }
 0x7f6   :  { %3096 = vmatpush1.msra.mxu1 %v10882_v48  ;;  %3419 = vmatprep.subr.mxu0 %v3256_v23  ;;  %v3229_v48 = vld [vmem:[#allocation13 + $0x98] sm:$0xff]  ;;  %v3316_v23 = vld [vmem:[#allocation13 + $0x350] sm:$0xff] }
 0x7f7   :  { %3097 = vmatprep.subr.mxu1 %v10883_v17  ;;  %v3325_v17 = vld [vmem:[#allocation13 + $0x398] sm:$0xff] }
 0x7f8   :  { %3098 = vmatpush1.msra.mxu1 %v10884_v16  ;;  %v3228_v16 = vld [vmem:[#allocation13 + $0x90] sm:$0xff] }
 0x7f9   :  { %3099 = vmatprep.subr.mxu1 %v10885_v19  ;;  %v3324_v19 = vld [vmem:[#allocation13 + $0x390] sm:$0xff] }
 0x7fa   :  { %3100 = vmatpush1.msra.mxu1 %v10886_v27  ;;  %v3226_v27 = vld [vmem:[#allocation13 + $0x80] sm:$0xff] }
 0x7fb   :  { %3101 = vmatprep.subr.mxu1 %v10887_v22  ;;  %v3322_v22 = vld [vmem:[#allocation13 + $0x380] sm:$0xff] }
 0x7fc   :  { %3102 = vmatpush1.msra.mxu1 %v10888_v55  ;;  %v3225_v55 = vld [vmem:[#allocation13 + $0x78] sm:$0xff] }
 0x7fd   :  { %3103 = vmatprep.subr.mxu1 %v10889_v7  ;;  %v3321_v7 = vld [vmem:[#allocation13 + $0x378] sm:$0xff] }
 0x7fe   :  { %3104 = vmatpush1.msra.mxu1 %v10890_v8  ;;  %v3223_v8 = vld [vmem:[#allocation13 + $0x68] sm:$0xff] }
 0x7ff   :  { %3105 = vmatprep.subr.mxu1 %v10891_v9  ;;  %v3319_v9 = vld [vmem:[#allocation13 + $0x368] sm:$0xff] }
 0x800   :  { %3106 = vmatpush1.msra.mxu1 %v10892_v10  ;;  %v3222_v10 = vld [vmem:[#allocation13 + $0x60] sm:$0xff] }
 0x801   :  { %3107 = vmatprep.subr.mxu1 %v10893_v20  ;;  %v3318_v20 = vld [vmem:[#allocation13 + $0x360] sm:$0xff] }
 0x802   :  { %3108 = vmatpush1.msra.mxu1 %v10894_v0  ;;  %v3220_v0 = vld [vmem:[#allocation13 + $0x50] sm:$0xff] }
 0x803   :  { %3490 = vmatprep.subr.mxu1 %v3352_v24  ;;  %v3219_v24 = vld [vmem:[#allocation13 + $0x48] sm:$0xff] }
 0x8a2   :  { %v2840_v25 = vpop.f32.mrf.mxu1 }
 0x8a3   :  { %v2913_v28 = vpop.f32.mrf.mxu0 }
 0x8a4   :  { %v7435_v31 = vpop.f32.mrf.mxu1  ;;  %v2914_v33 = vadd.f32 %v2913_v28, %v2840_v25  ;;  %v3315_v25 = vld [vmem:[#allocation13 + $0x348] sm:$0xff]  ;;  %v3217_v28 = vld [vmem:[#allocation13 + $0x38] sm:$0xff] }
 0x8a5   :  { %v7454_v32 = vpop.f32.mrf.mxu0  ;;  %v3313_v31 = vld [vmem:[#allocation13 + $0x338] sm:$0xff] }
 0x8a6   :  { %v3216_v32 = vld [vmem:[#allocation13 + $0x30] sm:$0xff] }
 0x8b2   :  { %v2995_v34 = vpop.f32.mrf.mxu1 }
 0x8b3   :  { %v2999_v35 = vadd.f32 %v2995_v34, %v2914_v33  ;;  %v3312_v33 = vld [vmem:[#allocation13 + $0x330] sm:$0xff]  ;;  %v3214_v34 = vld [vmem:[#allocation13 + $0x20] sm:$0xff] }
 0x8b4   :  { %v7473_v36 = vpop.f32.mrf.mxu1 }
 0x8b5   :  { %v3000_v38 = vadd.f32 %v10895_v37, %v2999_v35  ;;  %v3310_v35 = vld [vmem:[#allocation13 + $0x320] sm:$0xff]  ;;  %v3213_v36 = vld [vmem:[#allocation13 + $0x18] sm:$0xff] }
 0x8b6   :  { %v3309_v37 = vld [vmem:[#allocation13 + $0x318] sm:$0xff] }
 0x8b7   :  { %v3001_v40 = vadd.f32 %v3000_v38, %v9116_v5  ;;  %v3247_v5 = vld [vmem:[#allocation13 + $0x128] sm:$0xff] }
 0x8b8   :  { %v3211_v38 = vld [vmem:[#allocation13 + $0x8] sm:$0xff] }
 0x8b9   :  { %v3002_v41 = vmax.f32 %v3001_v40, 0.0  ;;  %v3307_v40 = vld [vmem:[#allocation13 + $0x308] sm:$0xff] }
 0x8bb   :  { %6594 = vmatmul.mubr.msk.f32.vlgmr.msra.gmra.mxu0 %vm896_vm7, %v3002_v41  ;;  %6595 = vmatmul.mubr.msk.f32.vlgmr.msra.gmra.mxu1 %vm896_vm7, %v3002_v41  ;;  %v3210_v41 = vld [vmem:[#allocation13] sm:$0xff] }
 0x8bc   :  { %3420 = vmatpush1.msra.mxu0 %v3255_v42  ;;  %3491 = vmatpush1.msra.mxu1 %v3351_v43  ;;  %v3306_v42 = vld [vmem:[#allocation13 + $0x300] sm:$0xff]  ;;  %v3304_v43 = vld [vmem:[#allocation13 + $0x2f0] sm:$0xff] }
 0x8bd   :  { %3421 = vmatprep.subr.mxu0 %v3253_v45  ;;  %3492 = vmatprep.subr.mxu1 %v3349_v46  ;;  %v3400_v45 = vld [vmem:[#allocation13 + $0x5f0] sm:$0xff]  ;;  %v3303_v46 = vld [vmem:[#allocation13 + $0x2e8] sm:$0xff] }
 0x8be   :  { %3422 = vmatpush1.msra.mxu0 %v3252_v47  ;;  %3493 = vmatpush1.msra.mxu1 %v3348_v50  ;;  %v3399_v47 = vld [vmem:[#allocation13 + $0x5e8] sm:$0xff]  ;;  %v3301_v50 = vld [vmem:[#allocation13 + $0x2d8] sm:$0xff] }
 0x8bf   :  { %3423 = vmatprep.subr.mxu0 %v3250_v51  ;;  %3494 = vmatprep.subr.mxu1 %v3346_v52  ;;  %v3397_v51 = vld [vmem:[#allocation13 + $0x5d8] sm:$0xff]  ;;  %v3300_v52 = vld [vmem:[#allocation13 + $0x2d0] sm:$0xff] }
 0x8c0   :  { %3424 = vmatpush1.msra.mxu0 %v3249_v53  ;;  %3495 = vmatpush1.msra.mxu1 %v3345_v54  ;;  %v3396_v53 = vld [vmem:[#allocation13 + $0x5d0] sm:$0xff]  ;;  %v3298_v54 = vld [vmem:[#allocation13 + $0x2c0] sm:$0xff] }
 0x8c1   :  { %3425 = vmatprep.subr.mxu0 %v3247_v5  ;;  %3496 = vmatprep.subr.mxu1 %v3343_v56  ;;  %v3394_v5 = vld [vmem:[#allocation13 + $0x5c0] sm:$0xff]  ;;  %v3297_v56 = vld [vmem:[#allocation13 + $0x2b8] sm:$0xff] }
 0x8c2   :  { %3426 = vmatpush1.msra.mxu0 %v3246_v57  ;;  %3497 = vmatpush1.msra.mxu1 %v3342_v58  ;;  %v3393_v57 = vld [vmem:[#allocation13 + $0x5b8] sm:$0xff]  ;;  %v3295_v58 = vld [vmem:[#allocation13 + $0x2a8] sm:$0xff] }
 0x8c3   :  { %3427 = vmatprep.subr.mxu0 %v3244_v59  ;;  %3498 = vmatprep.subr.mxu1 %v3340_v60  ;;  %v3391_v59 = vld [vmem:[#allocation13 + $0x5a8] sm:$0xff]  ;;  %v3294_v60 = vld [vmem:[#allocation13 + $0x2a0] sm:$0xff] }
 0x8c4   :  { %3428 = vmatpush1.msra.mxu0 %v3243_v61  ;;  %3499 = vmatpush1.msra.mxu1 %v3339_v62  ;;  %v3390_v61 = vld [vmem:[#allocation13 + $0x5a0] sm:$0xff]  ;;  %v3292_v62 = vld [vmem:[#allocation13 + $0x290] sm:$0xff] }
 0x8c5   :  { %3429 = vmatprep.subr.mxu0 %v3241_v63  ;;  %3500 = vmatprep.subr.mxu1 %v3337_v2  ;;  %v3388_v63 = vld [vmem:[#allocation13 + $0x590] sm:$0xff]  ;;  %v3291_v2 = vld [vmem:[#allocation13 + $0x288] sm:$0xff] }
 0x8c6   :  { %3430 = vmatpush1.msra.mxu0 %v3240_v12  ;;  %3501 = vmatpush1.msra.mxu1 %v3336_v18  ;;  %v3387_v12 = vld [vmem:[#allocation13 + $0x588] sm:$0xff]  ;;  %v3289_v18 = vld [vmem:[#allocation13 + $0x278] sm:$0xff] }
 0x8c7   :  { %3431 = vmatprep.subr.mxu0 %v3238_v3  ;;  %3502 = vmatprep.subr.mxu1 %v3334_v29  ;;  %v3385_v3 = vld [vmem:[#allocation13 + $0x578] sm:$0xff]  ;;  %v3288_v29 = vld [vmem:[#allocation13 + $0x270] sm:$0xff] }
 0x8c8   :  { %3432 = vmatpush1.msra.mxu0 %v3237_v26  ;;  %3503 = vmatpush1.msra.mxu1 %v3333_v1  ;;  %v3384_v26 = vld [vmem:[#allocation13 + $0x570] sm:$0xff]  ;;  %v3286_v1 = vld [vmem:[#allocation13 + $0x260] sm:$0xff] }
 0x8c9   :  { %3433 = vmatprep.subr.mxu0 %v3235_v4  ;;  %3504 = vmatprep.subr.mxu1 %v3331_v44  ;;  %v3382_v4 = vld [vmem:[#allocation13 + $0x560] sm:$0xff]  ;;  %v3285_v44 = vld [vmem:[#allocation13 + $0x258] sm:$0xff] }
 0x8ca   :  { %3434 = vmatpush1.msra.mxu0 %v3234_v11  ;;  %3505 = vmatpush1.msra.mxu1 %v3330_v30  ;;  %v3381_v11 = vld [vmem:[#allocation13 + $0x558] sm:$0xff]  ;;  %v3283_v30 = vld [vmem:[#allocation13 + $0x248] sm:$0xff] }
 0x8cb   :  { %3435 = vmatprep.subr.mxu0 %v3232_v14  ;;  %3506 = vmatprep.subr.mxu1 %v3328_v39  ;;  %v3379_v14 = vld [vmem:[#allocation13 + $0x548] sm:$0xff]  ;;  %v3282_v39 = vld [vmem:[#allocation13 + $0x240] sm:$0xff] }
 0x8cc   :  { %3436 = vmatpush1.msra.mxu0 %v3231_v49  ;;  %3507 = vmatpush1.msra.mxu1 %v3327_v6  ;;  %v3378_v49 = vld [vmem:[#allocation13 + $0x540] sm:$0xff]  ;;  %v3280_v6 = vld [vmem:[#allocation13 + $0x230] sm:$0xff] }
 0x8cd   :  { %3437 = vmatprep.subr.mxu0 %v3229_v48  ;;  %3508 = vmatprep.subr.mxu1 %v3325_v17  ;;  %v3376_v48 = vld [vmem:[#allocation13 + $0x530] sm:$0xff]  ;;  %v3279_v17 = vld [vmem:[#allocation13 + $0x228] sm:$0xff] }
 0x8ce   :  { %3438 = vmatpush1.msra.mxu0 %v3228_v16  ;;  %3509 = vmatpush1.msra.mxu1 %v3324_v19  ;;  %v3375_v16 = vld [vmem:[#allocation13 + $0x528] sm:$0xff]  ;;  %v3277_v19 = vld [vmem:[#allocation13 + $0x218] sm:$0xff] }
 0x8cf   :  { %3439 = vmatprep.subr.mxu0 %v3226_v27  ;;  %3510 = vmatprep.subr.mxu1 %v3322_v22  ;;  %v3373_v27 = vld [vmem:[#allocation13 + $0x518] sm:$0xff]  ;;  %v3276_v22 = vld [vmem:[#allocation13 + $0x210] sm:$0xff] }
 0x8d0   :  { %3440 = vmatpush1.msra.mxu0 %v3225_v55  ;;  %3511 = vmatpush1.msra.mxu1 %v3321_v7  ;;  %v3372_v55 = vld [vmem:[#allocation13 + $0x510] sm:$0xff]  ;;  %v3274_v7 = vld [vmem:[#allocation13 + $0x200] sm:$0xff] }
 0x8d1   :  { %3441 = vmatprep.subr.mxu0 %v3223_v8  ;;  %3512 = vmatprep.subr.mxu1 %v3319_v9  ;;  %v3370_v8 = vld [vmem:[#allocation13 + $0x500] sm:$0xff]  ;;  %v3273_v9 = vld [vmem:[#allocation13 + $0x1f8] sm:$0xff] }
 0x8d2   :  { %3442 = vmatpush1.msra.mxu0 %v3222_v10  ;;  %3513 = vmatpush1.msra.mxu1 %v3318_v20  ;;  %v3369_v10 = vld [vmem:[#allocation13 + $0x4f8] sm:$0xff]  ;;  %v3271_v20 = vld [vmem:[#allocation13 + $0x1e8] sm:$0xff] }
 0x8d3   :  { %3443 = vmatprep.subr.mxu0 %v3220_v0  ;;  %3514 = vmatprep.subr.mxu1 %v3316_v23  ;;  %v3367_v0 = vld [vmem:[#allocation13 + $0x4e8] sm:$0xff]  ;;  %v3270_v23 = vld [vmem:[#allocation13 + $0x1e0] sm:$0xff] }
 0x8d4   :  { %3444 = vmatpush1.msra.mxu0 %v3219_v24  ;;  %3515 = vmatpush1.msra.mxu1 %v3315_v25  ;;  %v3366_v24 = vld [vmem:[#allocation13 + $0x4e0] sm:$0xff]  ;;  %v3268_v25 = vld [vmem:[#allocation13 + $0x1d0] sm:$0xff] }
 0x8d5   :  { %3445 = vmatprep.subr.mxu0 %v3217_v28  ;;  %3516 = vmatprep.subr.mxu1 %v3313_v31  ;;  %v3364_v28 = vld [vmem:[#allocation13 + $0x4d0] sm:$0xff]  ;;  %v3267_v31 = vld [vmem:[#allocation13 + $0x1c8] sm:$0xff] }
 0x8d6   :  { %3446 = vmatpush1.msra.mxu0 %v3216_v32  ;;  %3517 = vmatpush1.msra.mxu1 %v3312_v33  ;;  %v3363_v32 = vld [vmem:[#allocation13 + $0x4c8] sm:$0xff]  ;;  %v3265_v33 = vld [vmem:[#allocation13 + $0x1b8] sm:$0xff] }
 0x8d7   :  { %3447 = vmatprep.subr.mxu0 %v3214_v34  ;;  %3518 = vmatprep.subr.mxu1 %v3310_v35  ;;  %v3361_v34 = vld [vmem:[#allocation13 + $0x4b8] sm:$0xff]  ;;  %v3264_v35 = vld [vmem:[#allocation13 + $0x1b0] sm:$0xff] }
 0x8d8   :  { %3448 = vmatpush1.msra.mxu0 %v3213_v36  ;;  %3519 = vmatpush1.msra.mxu1 %v3309_v37  ;;  %v3360_v36 = vld [vmem:[#allocation13 + $0x4b0] sm:$0xff]  ;;  %v3262_v37 = vld [vmem:[#allocation13 + $0x1a0] sm:$0xff] }
 0x8d9   :  { %3449 = vmatprep.subr.mxu0 %v3211_v38  ;;  %3520 = vmatprep.subr.mxu1 %v3307_v40  ;;  %v3358_v38 = vld [vmem:[#allocation13 + $0x4a0] sm:$0xff]  ;;  %v3261_v40 = vld [vmem:[#allocation13 + $0x198] sm:$0xff] }
 0x8da   :  { %3450 = vmatpush1.msra.mxu0 %v3210_v41  ;;  %3521 = vmatpush1.msra.mxu1 %v3306_v42  ;;  %v3357_v41 = vld [vmem:[#allocation13 + $0x498] sm:$0xff]  ;;  %v3259_v42 = vld [vmem:[#allocation13 + $0x188] sm:$0xff] }
 0x8db   :  { %3451 = vmatprep.subr.mxu0 %v3304_v43  ;;  %3522 = vmatprep.subr.mxu1 %v3400_v45  ;;  %v3355_v43 = vld [vmem:[#allocation13 + $0x488] sm:$0xff]  ;;  %v3258_v45 = vld [vmem:[#allocation13 + $0x180] sm:$0xff] }
 0x8dc   :  { %3452 = vmatpush2.msra.mxu0 %v3303_v46  ;;  %3523 = vmatpush2.msra.mxu1 %v3399_v47  ;;  %v3354_v46 = vld [vmem:[#allocation13 + $0x480] sm:$0xff]  ;;  %v3305_v47 = vld [vmem:[#allocation13 + $0x2f8] sm:$0xff] }
 0x8dd   :  { %3453 = vmatprep.subr.mxu0 %v3301_v50  ;;  %3524 = vmatprep.subr.mxu1 %v3397_v51  ;;  %v3401_v50 = vld [vmem:[#allocation13 + $0x5f8] sm:$0xff] }
 0x8de   :  { %3454 = vmatpush2.msra.mxu0 %v3300_v52  ;;  %3525 = vmatpush2.msra.mxu1 %v3396_v53  ;;  %v10896_v53 = vld [vmem:[#allocation69_spill] sm:$0xff] }
 0x8df   :  { %3455 = vmatprep.subr.mxu0 %v3298_v54  ;;  %3526 = vmatprep.subr.mxu1 %v3394_v5  ;;  %v10897_v5 = vld [vmem:[#allocation70_spill] sm:$0xff] }
 0x8e0   :  { %3456 = vmatpush2.msra.mxu0 %v3297_v56  ;;  %3527 = vmatpush2.msra.mxu1 %v3393_v57 }
 0x8e1   :  { %3457 = vmatprep.subr.mxu0 %v3295_v58  ;;  %3528 = vmatprep.subr.mxu1 %v3391_v59  ;;  %v10898_v59 = vld [vmem:[#allocation71_spill] sm:$0xff] }
 0x8e2   :  { %3458 = vmatpush2.msra.mxu0 %v3294_v60  ;;  %3529 = vmatpush2.msra.mxu1 %v3390_v61  ;;  %v10899_v61 = vld [vmem:[#allocation72_spill] sm:$0xff] }
 0x8e3   :  { %3459 = vmatprep.subr.mxu0 %v3292_v62  ;;  %3530 = vmatprep.subr.mxu1 %v3388_v63 }
 0x8e4   :  { %3460 = vmatpush2.msra.mxu0 %v3291_v2  ;;  %3531 = vmatpush2.msra.mxu1 %v3387_v12 }
 0x8e5   :  { %3461 = vmatprep.subr.mxu0 %v3289_v18  ;;  %3532 = vmatprep.subr.mxu1 %v3385_v3 }
 0x8e6   :  { %3462 = vmatpush2.msra.mxu0 %v3288_v29  ;;  %3533 = vmatpush2.msra.mxu1 %v3384_v26 }
 0x8e7   :  { %3463 = vmatprep.subr.mxu0 %v3286_v1  ;;  %3534 = vmatprep.subr.mxu1 %v3382_v4 }
 0x8e8   :  { %3464 = vmatpush2.msra.mxu0 %v3285_v44  ;;  %3535 = vmatpush2.msra.mxu1 %v3381_v11 }
 0x8e9   :  { %3465 = vmatprep.subr.mxu0 %v3283_v30  ;;  %3536 = vmatprep.subr.mxu1 %v3379_v14 }
 0x8ea   :  { %3466 = vmatpush2.msra.mxu0 %v3282_v39  ;;  %3537 = vmatpush2.msra.mxu1 %v3378_v49  ;;  %v3257_v49 = vld [vmem:[#allocation13 + $0x178] sm:$0xff] }
 0x8eb   :  { %3467 = vmatprep.subr.mxu0 %v3280_v6  ;;  %3538 = vmatprep.subr.mxu1 %v3376_v48  ;;  %v3353_v6 = vld [vmem:[#allocation13 + $0x478] sm:$0xff] }
 0x8ec   :  { %3468 = vmatpush2.msra.mxu0 %v3279_v17  ;;  %3539 = vmatpush2.msra.mxu1 %v3375_v16 }
 0x8ed   :  { %3469 = vmatprep.subr.mxu0 %v3277_v19  ;;  %3540 = vmatprep.subr.mxu1 %v3373_v27  ;;  %v3302_v19 = vld [vmem:[#allocation13 + $0x2e0] sm:$0xff] }
 0x8ee   :  { %3470 = vmatpush2.msra.mxu0 %v3276_v22  ;;  %3541 = vmatpush2.msra.mxu1 %v3372_v55  ;;  %v3398_v27 = vld [vmem:[#allocation13 + $0x5e0] sm:$0xff]  ;;  %v3299_v55 = vld [vmem:[#allocation13 + $0x2c8] sm:$0xff] }
 0x8ef   :  { %3471 = vmatprep.subr.mxu0 %v3274_v7  ;;  %3542 = vmatprep.subr.mxu1 %v3370_v8  ;;  %v3350_v22 = vld [vmem:[#allocation13 + $0x460] sm:$0xff]  ;;  %v3395_v7 = vld [vmem:[#allocation13 + $0x5c8] sm:$0xff] }
 0x8f0   :  { %3472 = vmatpush2.msra.mxu0 %v3273_v9  ;;  %3543 = vmatpush2.msra.mxu1 %v3369_v10  ;;  %v3251_v8 = vld [vmem:[#allocation13 + $0x148] sm:$0xff]  ;;  %v3296_v10 = vld [vmem:[#allocation13 + $0x2b0] sm:$0xff] }
 0x8f1   :  { %3473 = vmatprep.subr.mxu0 %v3271_v20  ;;  %3544 = vmatprep.subr.mxu1 %v3367_v0  ;;  %v3347_v9 = vld [vmem:[#allocation13 + $0x448] sm:$0xff]  ;;  %v3392_v20 = vld [vmem:[#allocation13 + $0x5b0] sm:$0xff] }
 0x8f2   :  { %3474 = vmatpush2.msra.mxu0 %v3270_v23  ;;  %3545 = vmatpush2.msra.mxu1 %v3366_v24  ;;  %v3248_v0 = vld [vmem:[#allocation13 + $0x130] sm:$0xff]  ;;  %v3293_v24 = vld [vmem:[#allocation13 + $0x298] sm:$0xff] }
 0x8f3   :  { %3475 = vmatprep.subr.mxu0 %v3268_v25  ;;  %3546 = vmatprep.subr.mxu1 %v3364_v28  ;;  %v3344_v23 = vld [vmem:[#allocation13 + $0x430] sm:$0xff]  ;;  %v3389_v25 = vld [vmem:[#allocation13 + $0x598] sm:$0xff] }
 0x8f4   :  { %3476 = vmatpush2.msra.mxu0 %v3267_v31  ;;  %3547 = vmatpush2.msra.mxu1 %v3363_v32  ;;  %v3245_v28 = vld [vmem:[#allocation13 + $0x118] sm:$0xff]  ;;  %v3290_v32 = vld [vmem:[#allocation13 + $0x280] sm:$0xff] }
 0x8f5   :  { %3477 = vmatprep.subr.mxu0 %v3265_v33  ;;  %3548 = vmatprep.subr.mxu1 %v3361_v34  ;;  %v3341_v31 = vld [vmem:[#allocation13 + $0x418] sm:$0xff]  ;;  %v3386_v33 = vld [vmem:[#allocation13 + $0x580] sm:$0xff] }
 0x8f6   :  { %3478 = vmatpush2.msra.mxu0 %v3264_v35  ;;  %3549 = vmatpush2.msra.mxu1 %v3360_v36  ;;  %v3242_v34 = vld [vmem:[#allocation13 + $0x100] sm:$0xff]  ;;  %v3287_v36 = vld [vmem:[#allocation13 + $0x268] sm:$0xff] }
 0x8f7   :  { %3479 = vmatprep.subr.mxu0 %v3262_v37  ;;  %3550 = vmatprep.subr.mxu1 %v3358_v38  ;;  %v3338_v35 = vld [vmem:[#allocation13 + $0x400] sm:$0xff]  ;;  %v3383_v37 = vld [vmem:[#allocation13 + $0x568] sm:$0xff] }
 0x8f8   :  { %3480 = vmatpush2.msra.mxu0 %v3261_v40  ;;  %3551 = vmatpush2.msra.mxu1 %v3357_v41  ;;  %v3239_v38 = vld [vmem:[#allocation13 + $0xe8] sm:$0xff]  ;;  %v3284_v41 = vld [vmem:[#allocation13 + $0x250] sm:$0xff] }
 0x8f9   :  { %3481 = vmatprep.subr.mxu0 %v3259_v42  ;;  %3552 = vmatprep.subr.mxu1 %v3355_v43  ;;  %v3335_v40 = vld [vmem:[#allocation13 + $0x3e8] sm:$0xff]  ;;  %v3380_v42 = vld [vmem:[#allocation13 + $0x550] sm:$0xff] }
 0x8fa   :  { %3482 = vmatpush2.msra.mxu0 %v3258_v45  ;;  %3553 = vmatpush2.msra.mxu1 %v3354_v46  ;;  %v3236_v43 = vld [vmem:[#allocation13 + $0xd0] sm:$0xff]  ;;  %v3281_v46 = vld [vmem:[#allocation13 + $0x238] sm:$0xff] }
 0x8fb   :  { %6799 = vmatprep.subr.mxu0 %v3305_v47  ;;  %6834 = vmatprep.subr.mxu1 %v3401_v50  ;;  %v3332_v45 = vld [vmem:[#allocation13 + $0x3d0] sm:$0xff]  ;;  %v3377_v47 = vld [vmem:[#allocation13 + $0x538] sm:$0xff] }
 0x8fc   :  { %v3233_v50 = vld [vmem:[#allocation13 + $0xb8] sm:$0xff] }
 0x97b   :  { %v3072_v51 = vpop.f32.mrf.mxu0  ;;  %v3143_v52 = vpop.f32.mrf.mxu1 }
 0x97c   :  { %v3073_v54 = vadd.f32 %v3072_v51, %v10896_v53  ;;  %v3144_v56 = vadd.f32 %v3143_v52, %v10897_v5  ;;  %v3329_v51 = vld [vmem:[#allocation13 + $0x3b8] sm:$0xff]  ;;  %v3278_v52 = vld [vmem:[#allocation13 + $0x220] sm:$0xff] }
 0x97d   :  { %v3074_v57 = vpop.f32.mrf.mxu0  ;;  %v3145_v58 = vpop.f32.mrf.mxu1  ;;  %v3374_v53 = vld [vmem:[#allocation13 + $0x520] sm:$0xff] }
 0x97e   :  { %v3075_v60 = vadd.f32 %v3074_v57, %v10898_v59  ;;  %v3146_v62 = vadd.f32 %v3145_v58, %v10899_v61  ;;  %v3148_v63 = vmax.f32 %v3073_v54, 0.0  ;;  %v3150_v2 = vmax.f32 %v3144_v56, 0.0  ;;  %v3230_v54 = vld [vmem:[#allocation13 + $0xa0] sm:$0xff]  ;;  %v3275_v56 = vld [vmem:[#allocation13 + $0x208] sm:$0xff]  ;;  %v3368_v61 = vld [vmem:[#allocation13 + $0x4f0] sm:$0xff] }
 0x97f   :  { %v3326_v5 = vld [vmem:[#allocation13 + $0x3a0] sm:$0xff]  ;;  %v3371_v57 = vld [vmem:[#allocation13 + $0x508] sm:$0xff] }
 0x980   :  { %v3149_v12 = vmax.f32 %v3075_v60, 0.0  ;;  %v3151_v18 = vmax.f32 %v3146_v62, 0.0  ;;  %v3227_v58 = vld [vmem:[#allocation13 + $0x88] sm:$0xff]  ;;  %v3272_v60 = vld [vmem:[#allocation13 + $0x1f0] sm:$0xff] }
 0x981   :  { %v3323_v59 = vld [vmem:[#allocation13 + $0x388] sm:$0xff]  ;;  %v3224_v62 = vld [vmem:[#allocation13 + $0x70] sm:$0xff] }
 0x982   :  { %v3156_v3 = vcombine.low %v3148_v63, %v3149_v12  ;;  %v3157_v29 = vcombine.low %v3150_v2, %v3151_v18  ;;  %v3320_v63 = vld [vmem:[#allocation13 + $0x370] sm:$0xff]  ;;  %v3269_v2 = vld [vmem:[#allocation13 + $0x1d8] sm:$0xff] }
 0x983   :  { %v3365_v12 = vld [vmem:[#allocation13 + $0x4d8] sm:$0xff] }
 0x984   :  { %v3164_v26 = vrot.slane %v3156_v3, %v9051_v21  ;;  %v3171_v1 = vrot.slane %v3157_v29, %v9051_v21  ;;  %v3221_v18 = vld [vmem:[#allocation13 + $0x58] sm:$0xff]  ;;  %v3266_v29 = vld [vmem:[#allocation13 + $0x1c0] sm:$0xff] }
 0x985   :  { %v3317_v3 = vld [vmem:[#allocation13 + $0x358] sm:$0xff] }
 0x986   :  { %v3172_v4 = vcombine.low %v3164_v26, %v3171_v1  ;;  %v3184_v44 = vcombine.high %v3164_v26, %v3171_v1  ;;  %v3362_v26 = vld [vmem:[#allocation13 + $0x4c0] sm:$0xff] }
 0x987   :  { %v3218_v1 = vld [vmem:[#allocation13 + $0x40] sm:$0xff] }
 0x988   :  { %v3179_v11 = vrot.slane %v3172_v4, %v9051_v21  ;;  %v3191_v30 = vrot.slane %v3184_v44, %v9051_v21  ;;  %v3314_v4 = vld [vmem:[#allocation13 + $0x340] sm:$0xff]  ;;  %v3263_v44 = vld [vmem:[#allocation13 + $0x1a8] sm:$0xff] }
 0x98a   :  { %3182 = vst.msk [vmem:[#allocation5 + $0x1] ss:$8 sm:$0xf] %vm9056_vm10, %v3179_v11  ;;  %3194 = vst.msk [vmem:[#allocation5 + $0x3] ss:$8 sm:$0xf] %vm9056_vm10, %v3191_v30  ;;  %v3196_v14 = vcombine.high %v3179_v11, %v3179_v11  ;;  %v3201_v39 = vcombine.high %v3191_v30, %v3191_v30 }
 0x98b   :  { %v3359_v11 = vld [vmem:[#allocation13 + $0x4a8] sm:$0xff] }
 0x98c   :  { %3199 = vst.msk [vmem:[#allocation5 + $0x5] ss:$8 sm:$0xf] %vm9056_vm10, %v3196_v14  ;;  %3204 = vst.msk [vmem:[#allocation5 + $0x7] ss:$8 sm:$0xf] %vm9056_vm10, %v3201_v39 }
 0x98d   :  { %v3215_v30 = vld [vmem:[#allocation13 + $0x28] sm:$0xff]  ;;  %v3260_v39 = vld [vmem:[#allocation13 + $0x190] sm:$0xff] }
 0x98e   :  { %v3311_v14 = vld [vmem:[#allocation13 + $0x328] sm:$0xff] }
 0x993   :  { %v3207_v48 = vld [vmem:[#allocation5 + $0x8] sm:$0xff]  ;;  %v3209_v17 = vld [vmem:[#allocation5 + $0x18] sm:$0xff]  ;;  %v9252_v16 = vld [vmem:[#allocation5] sm:$0xff] }
 0x994   :  { %3483 = vmatprep.mubr.f32.mxu0 %v3207_v48  ;;  %3554 = vmatprep.mubr.f32.mxu1 %v3209_v17  ;;  %v9254_v21 = vld [vmem:[#allocation5 + $0x10] sm:$0xff] }
 0x995   :  { %3484 = vmatmul.mubr.f32.vlgmr.msra.gmra.mxu0 %v9252_v16  ;;  %3555 = vmatmul.mubr.f32.vlgmr.msra.gmra.mxu1 %v9254_v21 }
 0x996   :  { %6800 = vmatpush3.msra.mxu0 %v3257_v49  ;;  %6835 = vmatpush3.msra.mxu1 %v3353_v6  ;;  %v3356_v49 = vld [vmem:[#allocation13 + $0x490] sm:$0xff] }
 0x997   :  { %6801 = vmatprep.subr.mxu0 %v3302_v19  ;;  %3625 = vmatprep.mubr.f32.mxu0 %v3207_v48  ;;  %v3212_v6 = vld [vmem:[#allocation13 + $0x10] sm:$0xff]  ;;  %v9260_v19 = vld [vmem:[#allocation16 + $0x168] sm:$0xff] }
 0x998   :  { %6836 = vmatprep.subr.mxu1 %v3398_v27  ;;  %3695 = vmatprep.mubr.f32.mxu1 %v3209_v17  ;;  %v3308_v48 = vld [vmem:[#allocation13 + $0x310] sm:$0xff]  ;;  %v9264_v27 = vld [vmem:[#allocation16 + $0x158] sm:$0xff] }
 0x999   :  { %6802 = vmatpush3.msra.mxu0 %v3254_v13  ;;  %6837 = vmatpush3.msra.mxu1 %v3350_v22  ;;  %v9258_v17 = vld [vmem:[#allocation16 + $0x170] sm:$0xff]  ;;  %v9266_v13 = vld [vmem:[#allocation16 + $0x178] sm:$0xff] }
 0x99a   :  { %6803 = vmatprep.subr.mxu0 %v3299_v55  ;;  %6838 = vmatprep.subr.mxu1 %v3395_v7  ;;  %10900 = vst [vmem:[#allocation22_spill] sm:$0xff] %v9258_v17  ;;  %v9269_v22 = vld [vmem:[#allocation16 + $0x150] sm:$0xff]  ;;  %v9273_v55 = vld [vmem:[#allocation16 + $0x140] sm:$0xff] }
 0x99b   :  { %6804 = vmatpush3.msra.mxu0 %v3251_v8  ;;  %6839 = vmatpush3.msra.mxu1 %v3347_v9  ;;  %v9276_v7 = vld [vmem:[#allocation16 + $0x160] sm:$0xff]  ;;  %v9286_v8 = vld [vmem:[#allocation16 + $0x148] sm:$0xff] }
 0x99c   :  { %6805 = vmatprep.subr.mxu0 %v3296_v10  ;;  %6840 = vmatprep.subr.mxu1 %v3392_v20  ;;  %v9289_v9 = vld [vmem:[#allocation16 + $0x120] sm:$0xff]  ;;  %v9293_v10 = vld [vmem:[#allocation16 + $0x110] sm:$0xff] }
 0x99d   :  { %6806 = vmatpush3.msra.mxu0 %v3248_v0  ;;  %6841 = vmatpush3.msra.mxu1 %v3344_v23  ;;  %v9296_v20 = vld [vmem:[#allocation16 + $0x130] sm:$0xff]  ;;  %v9299_v0 = vld [vmem:[#allocation16 + $0x108] sm:$0xff]  ;;  %v9303_v23 = vld [vmem:[#allocation16 + $0xf8] sm:$0xff] }
 0x99e   :  { %6807 = vmatprep.subr.mxu0 %v3293_v24  ;;  %6842 = vmatprep.subr.mxu1 %v3389_v25  ;;  %v9306_v24 = vld [vmem:[#allocation16 + $0x118] sm:$0xff]  ;;  %v9309_v25 = vld [vmem:[#allocation16 + $0xf0] sm:$0xff] }
 0x99f   :  { %6808 = vmatpush3.msra.mxu0 %v3245_v28  ;;  %6843 = vmatpush3.msra.mxu1 %v3341_v31  ;;  %v9313_v28 = vld [vmem:[#allocation16 + $0xe0] sm:$0xff] }
 0x9a0   :  { %6809 = vmatprep.subr.mxu0 %v3290_v32  ;;  %6844 = vmatprep.subr.mxu1 %v3386_v33  ;;  %v9316_v31 = vld [vmem:[#allocation16 + $0x100] sm:$0xff]  ;;  %v9319_v32 = vld [vmem:[#allocation16 + $0xd8] sm:$0xff]  ;;  %v9323_v33 = vld [vmem:[#allocation16 + $0xc8] sm:$0xff] }
 0x9a1   :  { %6810 = vmatpush3.msra.mxu0 %v3242_v34  ;;  %6845 = vmatpush3.msra.mxu1 %v3338_v35  ;;  %v9326_v34 = vld [vmem:[#allocation16 + $0xe8] sm:$0xff]  ;;  %v9329_v35 = vld [vmem:[#allocation16 + $0xc0] sm:$0xff] }
 0x9a2   :  { %6811 = vmatprep.subr.mxu0 %v3287_v36  ;;  %6846 = vmatprep.subr.mxu1 %v3383_v37  ;;  %v9333_v36 = vld [vmem:[#allocation16 + $0xb0] sm:$0xff] }
 0x9a3   :  { %6812 = vmatpush3.msra.mxu0 %v3239_v38  ;;  %6847 = vmatpush3.msra.mxu1 %v3335_v40  ;;  %v9336_v37 = vld [vmem:[#allocation16 + $0xd0] sm:$0xff]  ;;  %v9339_v38 = vld [vmem:[#allocation16 + $0xa8] sm:$0xff]  ;;  %v9343_v40 = vld [vmem:[#allocation16 + $0x98] sm:$0xff] }
 0x9a4   :  { %6813 = vmatprep.subr.mxu0 %v3284_v41  ;;  %6848 = vmatprep.subr.mxu1 %v3380_v42  ;;  %v9346_v41 = vld [vmem:[#allocation16 + $0xb8] sm:$0xff]  ;;  %v9349_v42 = vld [vmem:[#allocation16 + $0x90] sm:$0xff] }
 0x9a5   :  { %6814 = vmatpush3.msra.mxu0 %v3236_v43  ;;  %6849 = vmatpush3.msra.mxu1 %v3332_v45  ;;  %v9353_v43 = vld [vmem:[#allocation16 + $0x80] sm:$0xff] }
 0x9a6   :  { %6815 = vmatprep.subr.mxu0 %v3281_v46  ;;  %6850 = vmatprep.subr.mxu1 %v3377_v47  ;;  %v9356_v45 = vld [vmem:[#allocation16 + $0xa0] sm:$0xff]  ;;  %v9359_v46 = vld [vmem:[#allocation16 + $0x78] sm:$0xff]  ;;  %v9363_v47 = vld [vmem:[#allocation16 + $0x68] sm:$0xff] }
 0x9a7   :  { %6816 = vmatpush3.msra.mxu0 %v3233_v50  ;;  %6851 = vmatpush3.msra.mxu1 %v3329_v51  ;;  %v9366_v50 = vld [vmem:[#allocation16 + $0x88] sm:$0xff]  ;;  %v9369_v51 = vld [vmem:[#allocation16 + $0x60] sm:$0xff] }
 0x9a8   :  { %6817 = vmatprep.subr.mxu0 %v3278_v52  ;;  %6852 = vmatprep.subr.mxu1 %v3374_v53  ;;  %v9373_v52 = vld [vmem:[#allocation16 + $0x50] sm:$0xff] }
 0x9a9   :  { %6818 = vmatpush3.msra.mxu0 %v3230_v54  ;;  %6853 = vmatpush3.msra.mxu1 %v3326_v5  ;;  %v9376_v53 = vld [vmem:[#allocation16 + $0x70] sm:$0xff]  ;;  %v9379_v54 = vld [vmem:[#allocation16 + $0x48] sm:$0xff]  ;;  %v9383_v5 = vld [vmem:[#allocation16 + $0x38] sm:$0xff] }
 0x9aa   :  { %6819 = vmatprep.subr.mxu0 %v3275_v56  ;;  %6854 = vmatprep.subr.mxu1 %v3371_v57  ;;  %10901 = vst [vmem:[#allocation23_spill] sm:$0xff] %v9379_v54  ;;  %10902 = vst [vmem:[#allocation33_spill] sm:$0xff] %v9383_v5  ;;  %v9386_v56 = vld [vmem:[#allocation16 + $0x58] sm:$0xff]  ;;  %v9389_v57 = vld [vmem:[#allocation16 + $0x30] sm:$0xff] }
 0x9ab   :  { %6820 = vmatpush3.msra.mxu0 %v3227_v58  ;;  %6855 = vmatpush3.msra.mxu1 %v3323_v59  ;;  %10903 = vst [vmem:[#allocation24_spill] sm:$0xff] %v9386_v56  ;;  %10904 = vst [vmem:[#allocation25_spill] sm:$0xff] %v9389_v57  ;;  %v9393_v58 = vld [vmem:[#allocation16 + $0x20] sm:$0xff] }
 0x9ac   :  { %6821 = vmatprep.subr.mxu0 %v3272_v60  ;;  %6856 = vmatprep.subr.mxu1 %v3368_v61  ;;  %10905 = vst [vmem:[#allocation35_spill] sm:$0xff] %v9393_v58  ;;  %v9396_v59 = vld [vmem:[#allocation16 + $0x40] sm:$0xff]  ;;  %v9399_v60 = vld [vmem:[#allocation16 + $0x18] sm:$0xff]  ;;  %v9403_v61 = vld [vmem:[#allocation16 + $0x8] sm:$0xff] }
 0x9ad   :  { %6822 = vmatpush3.msra.mxu0 %v3224_v62  ;;  %6857 = vmatpush3.msra.mxu1 %v3320_v63  ;;  %10906 = vst [vmem:[#allocation26_spill] sm:$0xff] %v9396_v59  ;;  %10907 = vst [vmem:[#allocation37_spill] sm:$0xff] %v9399_v60  ;;  %v9406_v62 = vld [vmem:[#allocation16 + $0x28] sm:$0xff]  ;;  %v9409_v63 = vld [vmem:[#allocation16] sm:$0xff] }
 0x9ae   :  { %6823 = vmatprep.subr.mxu0 %v3269_v2  ;;  %6858 = vmatprep.subr.mxu1 %v3365_v12  ;;  %10908 = vst [vmem:[#allocation39_spill] sm:$0xff] %v9403_v61  ;;  %10909 = vst [vmem:[#allocation27_spill] sm:$0xff] %v9406_v62  ;;  %v9414_v2 = vld [vmem:[#allocation16 + $0x10] sm:$0xff] }
 0x9af   :  { %6824 = vmatpush3.msra.mxu0 %v3221_v18  ;;  %6859 = vmatpush3.msra.mxu1 %v3317_v3  ;;  %10910 = vst [vmem:[#allocation41_spill] sm:$0xff] %v9409_v63  ;;  %10911 = vst [vmem:[#allocation43_spill] sm:$0xff] %v9414_v2  ;;  %v3402_v18 = vld [vmem:[%s10669_s12] sm:$0x7] }
 0x9b0   :  { %6825 = vmatprep.subr.mxu0 %v3266_v29  ;;  %6860 = vmatprep.subr.mxu1 %v3362_v26  ;;  %v10912_v26 = vld [vmem:[#allocation66_spill] sm:$0xff] }
 0x9b1   :  { %6826 = vmatpush3.msra.mxu0 %v3218_v1  ;;  %6861 = vmatpush3.msra.mxu1 %v3314_v4  ;;  %v3407_v1 = vrot.slane %v3402_v18, %v10912_v26 }
 0x9b2   :  { %6827 = vmatprep.subr.mxu0 %v3263_v44  ;;  %6862 = vmatprep.subr.mxu1 %v3359_v11  ;;  %v3749_v11 = vld [vmem:[%s10670_s13] sm:$0x7] }
 0x9b3   :  { %6828 = vmatpush3.msra.mxu0 %v3215_v30  ;;  %6863 = vmatpush3.msra.mxu1 %v3311_v14 }
 0x9b4   :  { %6829 = vmatprep.subr.mxu0 %v3260_v39  ;;  %6864 = vmatprep.subr.mxu1 %v3356_v49  ;;  %v9502_v39 = vrot.slane %v3749_v11, %v10912_v26 }
 0x9b5   :  { %6830 = vmatpush3.msra.mxu0 %v3212_v6  ;;  %6865 = vmatpush3.msra.mxu1 %v3308_v48  ;;  %v10914_v6 = vld [vmem:[#allocation68_spill] sm:$0xff] }
 0x9b6   :  { %3626 = vmatmul.mubr.f32.vlgmr.msra.gmra.mxu0 %v9252_v16  ;;  %3696 = vmatmul.mubr.f32.vlgmr.msra.gmra.mxu1 %v9254_v21  ;;  %v9279_v16 = vld [vmem:[#allocation16 + $0x138] sm:$0xff]  ;;  %v9283_v21 = vld [vmem:[#allocation16 + $0x128] sm:$0xff]  ;;  %10913 = vst [vmem:[#allocation28_spill] sm:$0xff] %v9502_v39  ;;  %v3411_v48 = vrot.slane %v3402_v18, %v10914_v6 }
 0x9b7   :  { %3766 = vmatprep.subr.mxu0 %v9258_v17  ;;  %3830 = vmatprep.mubr.f32.mxu0 %v10802_v15 }
 0x9b8   :  { %3767 = vmatpush1.msra.mxu0 %v9260_v19  ;;  %7474 = vmatprep.subr.mxu1 %v10802_v15 }
 0x9b9   :  { %3768 = vmatprep.subr.mxu0 %v9264_v27  ;;  %7475 = vmatpush3.msra.mxu1 %v9266_v13 }
 0x9ba   :  { %3769 = vmatpush1.msra.mxu0 %v9269_v22  ;;  %7476 = vmatprep.subr.mxu1 %v10802_v15 }
 0x9bb   :  { %3770 = vmatprep.subr.mxu0 %v9273_v55  ;;  %7477 = vmatpush3.msra.mxu1 %v9276_v7 }
 0x9bc   :  { %3771 = vmatpush1.msra.mxu0 %v9279_v16  ;;  %7478 = vmatprep.subr.mxu1 %v10802_v15 }
 0x9bd   :  { %3772 = vmatprep.subr.mxu0 %v9283_v21  ;;  %7479 = vmatpush3.msra.mxu1 %v9286_v8 }
 0x9be   :  { %3773 = vmatpush1.msra.mxu0 %v9289_v9  ;;  %7480 = vmatprep.subr.mxu1 %v10802_v15 }
 0x9bf   :  { %3774 = vmatprep.subr.mxu0 %v9293_v10  ;;  %7481 = vmatpush3.msra.mxu1 %v9296_v20 }
 0x9c0   :  { %3775 = vmatpush1.msra.mxu0 %v9299_v0  ;;  %7482 = vmatprep.subr.mxu1 %v10802_v15 }
 0x9c1   :  { %3776 = vmatprep.subr.mxu0 %v9303_v23  ;;  %7483 = vmatpush3.msra.mxu1 %v9306_v24 }
 0x9c2   :  { %3777 = vmatpush1.msra.mxu0 %v9309_v25  ;;  %7484 = vmatprep.subr.mxu1 %v10802_v15 }
 0x9c3   :  { %3778 = vmatprep.subr.mxu0 %v9313_v28  ;;  %7485 = vmatpush3.msra.mxu1 %v9316_v31 }
 0x9c4   :  { %3779 = vmatpush1.msra.mxu0 %v9319_v32  ;;  %7486 = vmatprep.subr.mxu1 %v10802_v15 }
 0x9c5   :  { %3780 = vmatprep.subr.mxu0 %v9323_v33  ;;  %7487 = vmatpush3.msra.mxu1 %v9326_v34 }
 0x9c6   :  { %3781 = vmatpush1.msra.mxu0 %v9329_v35  ;;  %7488 = vmatprep.subr.mxu1 %v10802_v15 }
 0x9c7   :  { %3782 = vmatprep.subr.mxu0 %v9333_v36  ;;  %7489 = vmatpush3.msra.mxu1 %v9336_v37 }
 0x9c8   :  { %3783 = vmatpush1.msra.mxu0 %v9339_v38  ;;  %7490 = vmatprep.subr.mxu1 %v10802_v15 }
 0x9c9   :  { %3784 = vmatprep.subr.mxu0 %v9343_v40  ;;  %7491 = vmatpush3.msra.mxu1 %v9346_v41 }
 0x9ca   :  { %3785 = vmatpush1.msra.mxu0 %v9349_v42  ;;  %7492 = vmatprep.subr.mxu1 %v10802_v15 }
 0x9cb   :  { %3786 = vmatprep.subr.mxu0 %v9353_v43  ;;  %7493 = vmatpush3.msra.mxu1 %v9356_v45 }
 0x9cc   :  { %3787 = vmatpush1.msra.mxu0 %v9359_v46  ;;  %7494 = vmatprep.subr.mxu1 %v10802_v15 }
 0x9cd   :  { %3788 = vmatprep.subr.mxu0 %v9363_v47  ;;  %7495 = vmatpush3.msra.mxu1 %v9366_v50 }
 0x9ce   :  { %3789 = vmatpush1.msra.mxu0 %v9369_v51  ;;  %7496 = vmatprep.subr.mxu1 %v10802_v15 }
 0x9cf   :  { %3790 = vmatprep.subr.mxu0 %v9373_v52  ;;  %7497 = vmatpush3.msra.mxu1 %v9376_v53 }
 0x9d0   :  { %3791 = vmatpush1.msra.mxu0 %v9379_v54  ;;  %7498 = vmatprep.subr.mxu1 %v10802_v15 }
 0x9d1   :  { %3792 = vmatprep.subr.mxu0 %v9383_v5  ;;  %7499 = vmatpush3.msra.mxu1 %v9386_v56 }
 0x9d2   :  { %3793 = vmatpush1.msra.mxu0 %v9389_v57  ;;  %7500 = vmatprep.subr.mxu1 %v10802_v15 }
 0x9d3   :  { %3794 = vmatprep.subr.mxu0 %v9393_v58  ;;  %7501 = vmatpush3.msra.mxu1 %v9396_v59 }
 0x9d4   :  { %3795 = vmatpush1.msra.mxu0 %v9399_v60  ;;  %7502 = vmatprep.subr.mxu1 %v10802_v15 }
 0x9d5   :  { %3796 = vmatprep.subr.mxu0 %v9403_v61  ;;  %7503 = vmatpush3.msra.mxu1 %v9406_v62 }
 0x9d6   :  { %3797 = vmatpush1.msra.mxu0 %v9409_v63  ;;  %7504 = vmatprep.subr.mxu1 %v10802_v15 }
 0x9d7   :  { %3831 = vmatmul.mubr.f32.vlgmr.msra.gmra.mxu0 %v10802_v15  ;;  %7505 = vmatpush3.msra.mxu1 %v9414_v2 }
 0x9d8   :  { %7506 = vmatprep.mubr.msk.f32.mxu1 %vm8271_vm3, %v10802_v15  ;;  %3929 = vmatprep.subr.mxu0 %v9258_v17 }
 0x9d9   :  { %7507 = vmatmul.mubr.f32.vlgmr.msra.gmra.mxu1 %v10802_v15  ;;  %7509 = vmatprep.subr.mxu1 %v10802_v15 }
 0x9da   :  { %3930 = vmatpush1.msra.mxu0 %v9260_v19  ;;  %7510 = vmatpush3.msra.mxu1 %v9266_v13 }
 0x9db   :  { %3931 = vmatprep.subr.mxu0 %v9264_v27  ;;  %7511 = vmatprep.subr.mxu1 %v10802_v15 }
 0x9dc   :  { %3932 = vmatpush1.msra.mxu0 %v9269_v22  ;;  %7512 = vmatpush3.msra.mxu1 %v9276_v7 }
 0x9dd   :  { %3933 = vmatprep.subr.mxu0 %v9273_v55  ;;  %7513 = vmatprep.subr.mxu1 %v10802_v15 }
 0x9de   :  { %3934 = vmatpush1.msra.mxu0 %v9279_v16  ;;  %7514 = vmatpush3.msra.mxu1 %v9286_v8 }
 0x9df   :  { %3935 = vmatprep.subr.mxu0 %v9283_v21  ;;  %7515 = vmatprep.subr.mxu1 %v10802_v15 }
 0x9e0   :  { %3936 = vmatpush1.msra.mxu0 %v9289_v9  ;;  %7516 = vmatpush3.msra.mxu1 %v9296_v20 }
 0x9e1   :  { %3937 = vmatprep.subr.mxu0 %v9293_v10  ;;  %7517 = vmatprep.subr.mxu1 %v10802_v15 }
 0x9e2   :  { %3938 = vmatpush1.msra.mxu0 %v9299_v0  ;;  %7518 = vmatpush3.msra.mxu1 %v9306_v24 }
 0x9e3   :  { %3939 = vmatprep.subr.mxu0 %v9303_v23  ;;  %7519 = vmatprep.subr.mxu1 %v10802_v15 }
 0x9e4   :  { %3940 = vmatpush1.msra.mxu0 %v9309_v25  ;;  %7520 = vmatpush3.msra.mxu1 %v9316_v31 }
 0x9e5   :  { %3941 = vmatprep.subr.mxu0 %v9313_v28  ;;  %7521 = vmatprep.subr.mxu1 %v10802_v15 }
 0x9e6   :  { %3942 = vmatpush1.msra.mxu0 %v9319_v32  ;;  %7522 = vmatpush3.msra.mxu1 %v9326_v34 }
 0x9e7   :  { %3943 = vmatprep.subr.mxu0 %v9323_v33  ;;  %7523 = vmatprep.subr.mxu1 %v10802_v15 }
 0x9e8   :  { %3944 = vmatpush1.msra.mxu0 %v9329_v35  ;;  %7524 = vmatpush3.msra.mxu1 %v9336_v37 }
 0x9e9   :  { %3945 = vmatprep.subr.mxu0 %v9333_v36  ;;  %7525 = vmatprep.subr.mxu1 %v10802_v15 }
 0x9ea   :  { %3946 = vmatpush1.msra.mxu0 %v9339_v38  ;;  %7526 = vmatpush3.msra.mxu1 %v9346_v41 }
 0x9eb   :  { %3947 = vmatprep.subr.mxu0 %v9343_v40  ;;  %7527 = vmatprep.subr.mxu1 %v10802_v15 }
 0x9ec   :  { %3948 = vmatpush1.msra.mxu0 %v9349_v42  ;;  %7528 = vmatpush3.msra.mxu1 %v9356_v45 }
 0x9ed   :  { %3949 = vmatprep.subr.mxu0 %v9353_v43  ;;  %7529 = vmatprep.subr.mxu1 %v10802_v15 }
 0x9ee   :  { %3950 = vmatpush1.msra.mxu0 %v9359_v46  ;;  %7530 = vmatpush3.msra.mxu1 %v9366_v50 }
 0x9ef   :  { %3951 = vmatprep.subr.mxu0 %v9363_v47  ;;  %7531 = vmatprep.subr.mxu1 %v10802_v15 }
 0x9f0   :  { %3952 = vmatpush1.msra.mxu0 %v9369_v51  ;;  %7532 = vmatpush3.msra.mxu1 %v9376_v53 }
 0x9f1   :  { %3953 = vmatprep.subr.mxu0 %v9373_v52  ;;  %7533 = vmatprep.subr.mxu1 %v10802_v15 }
 0x9f2   :  { %3954 = vmatpush1.msra.mxu0 %v9379_v54  ;;  %7534 = vmatpush3.msra.mxu1 %v9386_v56 }
 0x9f3   :  { %3955 = vmatprep.subr.mxu0 %v9383_v5  ;;  %7535 = vmatprep.subr.mxu1 %v10802_v15 }
 0x9f4   :  { %3956 = vmatpush1.msra.mxu0 %v9389_v57  ;;  %7536 = vmatpush3.msra.mxu1 %v9396_v59 }
 0x9f5   :  { %3957 = vmatprep.subr.mxu0 %v9393_v58  ;;  %7537 = vmatprep.subr.mxu1 %v10802_v15 }
 0x9f6   :  { %3958 = vmatpush1.msra.mxu0 %v9399_v60  ;;  %7538 = vmatpush3.msra.mxu1 %v9406_v62  ;;  %v9509_v62 = vrot.slane %v3749_v11, %v10914_v6  ;;  %v10915_v6 = vld [vmem:[#allocation67_spill] sm:$0xff] }
 0x9f7   :  { %3959 = vmatprep.subr.mxu0 %v9403_v61  ;;  %7539 = vmatprep.subr.mxu1 %v10802_v15  ;;  %v3415_v56 = vrot.slane %v3402_v18, %v10915_v6 }
 0x9f8   :  { %3960 = vmatpush1.msra.mxu0 %v9409_v63  ;;  %3993 = vmatprep.mubr.f32.mxu0 %v10802_v15 }
 0x9f9   :  { %7540 = vmatpush3.msra.mxu1 %v9414_v2  ;;  %7541 = vmatprep.mubr.msk.f32.mxu1 %vm8271_vm3, %v10802_v15 }
 0x9fa   :  { %4107 = vmatprep.subr.mxu0 %v9258_v17  ;;  %7544 = vmatprep.subr.mxu1 %v10802_v15 }
 0xa55   :  { %v3485_v12 = vpop.f32.mrf.mxu0  ;;  %v3556_v3 = vpop.f32.mrf.mxu1 }
 0xa56   :  { %v3486_v14 = vadd.f32 %v3485_v12, %v3407_v1 }
 0xa57   :  { %v3487_v29 = vpop.f32.mrf.mxu0  ;;  %v3558_v4 = vpop.f32.mrf.mxu1 }
 0xa58   :  { %v9505_v63 = vadd.f32 %v3556_v3, %v3486_v14  ;;  %v3488_v59 = vadd.f32 %v3487_v29, %v3411_v48  ;;  %v9518_v29 = vrot.slane %v3749_v11, %v10915_v6 }
 0xa5a   :  { %v9513_v5 = vadd.f32 %v3558_v4, %v3488_v59 }
 0xa76   :  { %v6831_v44 = vpop.f32.mrf.mxu0  ;;  %v6866_v30 = vpop.f32.mrf.mxu1 }
 0xa78   :  { %v6832_v49 = vpop.f32.mrf.mxu0  ;;  %v6867_v17 = vpop.f32.mrf.mxu1 }
 0xa79   :  { %v6833_v54 = vadd.f32 %v6832_v49, %v6831_v44 }
 0xa7b   :  { %v3628_v48 = vadd.f32 %v6833_v54, %v3415_v56  ;;  %v10917_v54 = vld [vmem:[#allocation24_spill] sm:$0xff]  ;;  %v10918_v56 = vld [vmem:[#allocation33_spill] sm:$0xff] }
 0xa97   :  { %v3832_v2 = vpop.f32.mrf.mxu0 }
 0xa98   :  { %v3833_v61 = vadd.f32 %v3832_v2, %v9502_v39 }
 0xa99   :  { %v3834_v60 = vpop.f32.mrf.mxu0  ;;  %v3903_v58 = vpop.f32.mrf.mxu1 }
 0xa9a   :  { %v3907_v12 = vadd.f32 %v3833_v61, %v9505_v63  ;;  %v3835_v57 = vadd.f32 %v3834_v60, %v9509_v62  ;;  %v3904_v59 = vadd.f32 %v3903_v58, %v9518_v29  ;;  %v6868_v60 = vadd.f32 %v6867_v17, %v6866_v30  ;;  %v10916_v17 = vld [vmem:[#allocation23_spill] sm:$0xff]  ;;  %v10919_v58 = vld [vmem:[#allocation25_spill] sm:$0xff]  ;;  %v10920_v30 = vld [vmem:[#allocation26_spill] sm:$0xff] }
 0xa9b   :  { %v7508_v1 = vpop.f32.mrf.mxu1 }
 0xa9c   :  { %v6596_v26 = vmul.f32 -1.442695, %v3907_v12  ;;  %v3914_v3 = vadd.f32 %v3835_v57, %v9513_v5  ;;  %v9521_v4 = vadd.f32 %v6868_v60, %v3628_v48  ;;  %v10924_v48 = vld [vmem:[#allocation39_spill] sm:$0xff]  ;;  %v10927_v60 = vld [vmem:[#allocation22_spill] sm:$0xff] }
 0xa9e   :  { %8013 = vpow2.f32 %v6596_v26  ;;  %v6597_v14 = vmul.f32 -1.442695, %v3914_v3 }
 0xaa0   :  { %8015 = vpow2.f32 %v6597_v14  ;;  %v10921_v14 = vld [vmem:[#allocation35_spill] sm:$0xff] }
 0xaab   :  { %v8014_v2 = vpop.eup %8013 }
 0xaac   :  { %v3911_v39 = vadd.f32 1.0, %v8014_v2  ;;  %v10922_v2 = vld [vmem:[#allocation37_spill] sm:$0xff] }
 0xaad   :  { %v8016_v61 = vpop.eup %8015 }
 0xaae   :  { %8017 = vrcp.f32 %v3911_v39  ;;  %v3918_v12 = vadd.f32 1.0, %v8016_v61  ;;  %v10923_v61 = vld [vmem:[#allocation27_spill] sm:$0xff] }
 0xab0   :  { %8019 = vrcp.f32 %v3918_v12  ;;  %v10925_v12 = vld [vmem:[#allocation41_spill] sm:$0xff] }
 0xabb   :  { %v8018_v26 = vpop.eup %8017 }
 0xabc   :  { %v3921_v57 = vmul.f32 %v8018_v26, %v3904_v59  ;;  %v10926_v59 = vld [vmem:[#allocation43_spill] sm:$0xff] }
 0xabd   :  { %v8020_v39 = vpop.eup %8019 }
 0xabe   :  { %v3922_v1 = vadd.f32 %v3921_v57, %v9521_v4  ;;  %v3924_v18 = vsub.f32 1.0, %v8020_v39  ;;  %v3926_v11 = vmul.f32 0.0, %v8020_v39 }
 0xac0   :  { %8021 = vtanh.f32 %v3922_v1  ;;  %v10928_v1 = vld [vmem:[#allocation28_spill] sm:$0xff] }
 0xacd   :  { %v8022_v44 = vpop.eup %8021 }
 0xace   :  { %v3925_v49 = vmul.f32 %v8022_v44, %v3924_v18 }
 0xad0   :  { %v9524_v3 = vadd.f32 %v3926_v11, %v3925_v49 }
 0xad2   :  { %3928 = vst [vmem:[#allocation6] sm:$0x3] %v9524_v3  ;;  %3994 = vmatmul.mubr.f32.vlgmr.msra.gmra.mxu0 %v9524_v3  ;;  %7542 = vmatmul.mubr.f32.vlgmr.msra.gmra.mxu1 %v9524_v3 }
 0xad3   :  { %4108 = vmatpush1.msra.mxu0 %v9260_v19  ;;  %7545 = vmatpush3.msra.mxu1 %v9266_v13 }
 0xad4   :  { %4109 = vmatprep.subr.mxu0 %v9264_v27  ;;  %7546 = vmatprep.subr.mxu1 %v10802_v15 }
 0xad5   :  { %4110 = vmatpush1.msra.mxu0 %v9269_v22  ;;  %7547 = vmatpush3.msra.mxu1 %v9276_v7 }
 0xad6   :  { %4111 = vmatprep.subr.mxu0 %v9273_v55  ;;  %7548 = vmatprep.subr.mxu1 %v10802_v15 }
 0xad7   :  { %4112 = vmatpush1.msra.mxu0 %v9279_v16  ;;  %7549 = vmatpush3.msra.mxu1 %v9286_v8 }
 0xad8   :  { %4113 = vmatprep.subr.mxu0 %v9283_v21  ;;  %7550 = vmatprep.subr.mxu1 %v10802_v15 }
 0xad9   :  { %4114 = vmatpush1.msra.mxu0 %v9289_v9  ;;  %7551 = vmatpush3.msra.mxu1 %v9296_v20 }
 0xada   :  { %4115 = vmatprep.subr.mxu0 %v9293_v10  ;;  %7552 = vmatprep.subr.mxu1 %v10802_v15 }
 0xadb   :  { %4116 = vmatpush1.msra.mxu0 %v9299_v0  ;;  %7553 = vmatpush3.msra.mxu1 %v9306_v24 }
 0xadc   :  { %4117 = vmatprep.subr.mxu0 %v9303_v23  ;;  %7554 = vmatprep.subr.mxu1 %v10802_v15 }
 0xadd   :  { %4118 = vmatpush1.msra.mxu0 %v9309_v25  ;;  %7555 = vmatpush3.msra.mxu1 %v9316_v31 }
 0xade   :  { %4119 = vmatprep.subr.mxu0 %v9313_v28  ;;  %7556 = vmatprep.subr.mxu1 %v10802_v15 }
 0xadf   :  { %4120 = vmatpush1.msra.mxu0 %v9319_v32  ;;  %7557 = vmatpush3.msra.mxu1 %v9326_v34 }
 0xae0   :  { %4121 = vmatprep.subr.mxu0 %v9323_v33  ;;  %7558 = vmatprep.subr.mxu1 %v10802_v15 }
 0xae1   :  { %4122 = vmatpush1.msra.mxu0 %v9329_v35  ;;  %7559 = vmatpush3.msra.mxu1 %v9336_v37 }
 0xae2   :  { %4123 = vmatprep.subr.mxu0 %v9333_v36  ;;  %7560 = vmatprep.subr.mxu1 %v10802_v15 }
 0xae3   :  { %4124 = vmatpush1.msra.mxu0 %v9339_v38  ;;  %7561 = vmatpush3.msra.mxu1 %v9346_v41 }
 0xae4   :  { %4125 = vmatprep.subr.mxu0 %v9343_v40  ;;  %7562 = vmatprep.subr.mxu1 %v10802_v15 }
 0xae5   :  { %4126 = vmatpush1.msra.mxu0 %v9349_v42  ;;  %7563 = vmatpush3.msra.mxu1 %v9356_v45 }
 0xae6   :  { %4127 = vmatprep.subr.mxu0 %v9353_v43  ;;  %7564 = vmatprep.subr.mxu1 %v10802_v15 }
 0xae7   :  { %4128 = vmatpush1.msra.mxu0 %v9359_v46  ;;  %7565 = vmatpush3.msra.mxu1 %v9366_v50 }
 0xae8   :  { %4129 = vmatprep.subr.mxu0 %v9363_v47  ;;  %7566 = vmatprep.subr.mxu1 %v10802_v15 }
 0xae9   :  { %4130 = vmatpush1.msra.mxu0 %v9369_v51  ;;  %7567 = vmatpush3.msra.mxu1 %v9376_v53 }
 0xaea   :  { %4131 = vmatprep.subr.mxu0 %v9373_v52  ;;  %7568 = vmatprep.subr.mxu1 %v10802_v15 }
 0xaeb   :  { %4132 = vmatpush1.msra.mxu0 %v10916_v17  ;;  %7569 = vmatpush3.msra.mxu1 %v10917_v54 }
 0xaec   :  { %4133 = vmatprep.subr.mxu0 %v10918_v56  ;;  %7570 = vmatprep.subr.mxu1 %v10802_v15 }
 0xaed   :  { %4134 = vmatpush1.msra.mxu0 %v10919_v58  ;;  %7571 = vmatpush3.msra.mxu1 %v10920_v30 }
 0xaee   :  { %4135 = vmatprep.subr.mxu0 %v10921_v14  ;;  %7572 = vmatprep.subr.mxu1 %v10802_v15 }
 0xaef   :  { %4136 = vmatpush1.msra.mxu0 %v10922_v2  ;;  %7573 = vmatpush3.msra.mxu1 %v10923_v61 }
 0xaf0   :  { %4137 = vmatprep.subr.mxu0 %v10924_v48  ;;  %7574 = vmatprep.subr.mxu1 %v10802_v15 }
 0xaf1   :  { %4138 = vmatpush1.msra.mxu0 %v10925_v12  ;;  %4171 = vmatprep.mubr.f32.mxu0 %v10802_v15 }
 0xaf2   :  { %7575 = vmatpush3.msra.mxu1 %v10926_v59  ;;  %7576 = vmatprep.mubr.msk.f32.mxu1 %vm8271_vm3, %v10802_v15 }
 0xaf3   :  { %4284 = vmatprep.subr.mxu0 %v10927_v60  ;;  %7579 = vmatprep.subr.mxu1 %v10802_v15 }
 0xb92   :  { %v3995_v26 = vpop.f32.mrf.mxu0  ;;  %v4066_v57 = vpop.f32.mrf.mxu1 }
 0xb93   :  { %v3996_v39 = vadd.f32 %v3995_v26, %v10928_v1  ;;  %v4067_v26 = vadd.f32 %v4066_v57, %v9518_v29  ;;  %v4503_v57 = vld [vmem:[#allocation14 + $0x160] sm:$0xff] }
 0xb94   :  { %v3997_v18 = vpop.f32.mrf.mxu0  ;;  %v7543_v44 = vpop.f32.mrf.mxu1 }
 0xb95   :  { %v4071_v49 = vrot.slane %v3996_v39, 6  ;;  %v3998_v11 = vadd.f32 %v3997_v18, %v9509_v62  ;;  %v4091_v44 = vrot.slane %v4067_v26, 6  ;;  %v4500_v26 = vld [vmem:[#allocation14 + $0x148] sm:$0xff] }
 0xb97   :  { %v4073_v6 = vadd.f32 %v4071_v49, %v9505_v63  ;;  %v4081_v59 = vrot.slane %v3998_v11, 6 }
 0xb99   :  { %v6598_v12 = vmul.f32 -1.442695, %v4073_v6  ;;  %v4083_v48 = vadd.f32 %v4081_v59, %v9513_v5 }
 0xb9b   :  { %8023 = vpow2.f32 %v6598_v12  ;;  %v6599_v61 = vmul.f32 -1.442695, %v4083_v48  ;;  %v4099_v12 = vrot.slane %v9524_v3, 6 }
 0xb9d   :  { %8025 = vpow2.f32 %v6599_v61 }
 0xba8   :  { %v8024_v60 = vpop.eup %8023 }
 0xba9   :  { %v4077_v2 = vadd.f32 1.0, %v8024_v60  ;;  %v4496_v60 = vld [vmem:[#allocation14 + $0x128] sm:$0xff] }
 0xbaa   :  { %v8026_v14 = vpop.eup %8025 }
 0xbab   :  { %8027 = vrcp.f32 %v4077_v2  ;;  %v4087_v1 = vadd.f32 1.0, %v8026_v14  ;;  %v4499_v2 = vld [vmem:[#allocation14 + $0x140] sm:$0xff] }
 0xbad   :  { %8029 = vrcp.f32 %v4087_v1  ;;  %v4498_v1 = vld [vmem:[#allocation14 + $0x138] sm:$0xff] }
 0xbb8   :  { %v8028_v39 = vpop.eup %8027 }
 0xbb9   :  { %v4093_v30 = vmul.f32 %v8028_v39, %v4091_v44  ;;  %v4495_v44 = vld [vmem:[#allocation14 + $0x120] sm:$0xff]  ;;  %v4493_v39 = vld [vmem:[#allocation14 + $0x110] sm:$0xff] }
 0xbba   :  { %v8030_v6 = vpop.eup %8029 }
 0xbbb   :  { %v4094_v18 = vadd.f32 %v4093_v30, %v9521_v4  ;;  %v4096_v59 = vsub.f32 1.0, %v8030_v6  ;;  %v4101_v49 = vmul.f32 %v8030_v6, %v4099_v12  ;;  %v4501_v30 = vld [vmem:[#allocation14 + $0x150] sm:$0xff]  ;;  %v4492_v6 = vld [vmem:[#allocation14 + $0x108] sm:$0xff]  ;;  %v4490_v12 = vld [vmem:[#allocation14 + $0xf8] sm:$0xff] }
 0xbbd   :  { %8031 = vtanh.f32 %v4094_v18  ;;  %v4497_v18 = vld [vmem:[#allocation14 + $0x130] sm:$0xff] }
 0xbca   :  { %v8032_v48 = vpop.eup %8031 }
 0xbcb   :  { %v4097_v61 = vmul.f32 %v8032_v48, %v4096_v59  ;;  %v4494_v59 = vld [vmem:[#allocation14 + $0x118] sm:$0xff]  ;;  %v4489_v48 = vld [vmem:[#allocation14 + $0xf0] sm:$0xff] }
 0xbcd   :  { %v9603_v11 = vadd.f32 %v4101_v49, %v4097_v61  ;;  %v4487_v61 = vld [vmem:[#allocation14 + $0xe0] sm:$0xff] }
 0xbce   :  { %v4491_v49 = vld [vmem:[#allocation14 + $0x100] sm:$0xff] }
 0xbcf   :  { %4103 = vst [vmem:[#allocation6] sm:$0xc] %v9603_v11  ;;  %v4105_v14 = vrot.slane %v9603_v11, 2 }
 0xbd1   :  { %4172 = vmatmul.mubr.f32.vlgmr.msra.gmra.mxu0 %v4105_v14  ;;  %7577 = vmatmul.mubr.f32.vlgmr.msra.gmra.mxu1 %v4105_v14  ;;  %v4484_v14 = vld [vmem:[#allocation14 + $0xc8] sm:$0xff] }
 0xbd2   :  { %4285 = vmatpush1.msra.mxu0 %v9260_v19  ;;  %7580 = vmatpush3.msra.mxu1 %v9266_v13  ;;  %v10929_v19 = vld [vmem:[#allocation26_spill] sm:$0xff]  ;;  %v10931_v13 = vld [vmem:[#allocation37_spill] sm:$0xff] }
 0xbd3   :  { %4286 = vmatprep.subr.mxu0 %v9264_v27  ;;  %7581 = vmatprep.subr.mxu1 %v10802_v15  ;;  %v10930_v27 = vld [vmem:[#allocation35_spill] sm:$0xff] }
 0xbd4   :  { %4287 = vmatpush1.msra.mxu0 %v9269_v22  ;;  %7582 = vmatpush3.msra.mxu1 %v9276_v7  ;;  %v10932_v22 = vld [vmem:[#allocation27_spill] sm:$0xff]  ;;  %v10934_v7 = vld [vmem:[#allocation41_spill] sm:$0xff] }
 0xbd5   :  { %4288 = vmatprep.subr.mxu0 %v9273_v55  ;;  %7583 = vmatprep.subr.mxu1 %v10802_v15  ;;  %v10933_v55 = vld [vmem:[#allocation39_spill] sm:$0xff] }
 0xbd6   :  { %4289 = vmatpush1.msra.mxu0 %v9279_v16  ;;  %7584 = vmatpush3.msra.mxu1 %v9286_v8  ;;  %v10935_v16 = vld [vmem:[#allocation43_spill] sm:$0xff] }
 0xbd7   :  { %4290 = vmatprep.subr.mxu0 %v9283_v21  ;;  %7585 = vmatprep.subr.mxu1 %v10802_v15 }
 0xbd8   :  { %4291 = vmatpush1.msra.mxu0 %v9289_v9  ;;  %7586 = vmatpush3.msra.mxu1 %v9296_v20  ;;  %v10936_v9 = vld [vmem:[#allocation28_spill] sm:$0xff] }
 0xbd9   :  { %4292 = vmatprep.subr.mxu0 %v9293_v10  ;;  %7587 = vmatprep.subr.mxu1 %v10802_v15 }
 0xbda   :  { %4293 = vmatpush1.msra.mxu0 %v9299_v0  ;;  %7588 = vmatpush3.msra.mxu1 %v9306_v24 }
 0xbdb   :  { %4294 = vmatprep.subr.mxu0 %v9303_v23  ;;  %7589 = vmatprep.subr.mxu1 %v10802_v15 }
 0xbdc   :  { %4295 = vmatpush1.msra.mxu0 %v9309_v25  ;;  %7590 = vmatpush3.msra.mxu1 %v9316_v31 }
 0xbdd   :  { %4296 = vmatprep.subr.mxu0 %v9313_v28  ;;  %7591 = vmatprep.subr.mxu1 %v10802_v15 }
 0xbde   :  { %4297 = vmatpush1.msra.mxu0 %v9319_v32  ;;  %7592 = vmatpush3.msra.mxu1 %v9326_v34 }
 0xbdf   :  { %4298 = vmatprep.subr.mxu0 %v9323_v33  ;;  %7593 = vmatprep.subr.mxu1 %v10802_v15 }
 0xbe0   :  { %4299 = vmatpush1.msra.mxu0 %v9329_v35  ;;  %7594 = vmatpush3.msra.mxu1 %v9336_v37 }
 0xbe1   :  { %4300 = vmatprep.subr.mxu0 %v9333_v36  ;;  %7595 = vmatprep.subr.mxu1 %v10802_v15 }
 0xbe2   :  { %4301 = vmatpush1.msra.mxu0 %v9339_v38  ;;  %7596 = vmatpush3.msra.mxu1 %v9346_v41 }
 0xbe3   :  { %4302 = vmatprep.subr.mxu0 %v9343_v40  ;;  %7597 = vmatprep.subr.mxu1 %v10802_v15 }
 0xbe4   :  { %4303 = vmatpush1.msra.mxu0 %v9349_v42  ;;  %7598 = vmatpush3.msra.mxu1 %v9356_v45 }
 0xbe5   :  { %4304 = vmatprep.subr.mxu0 %v9353_v43  ;;  %7599 = vmatprep.subr.mxu1 %v10802_v15 }
 0xbe6   :  { %4305 = vmatpush1.msra.mxu0 %v9359_v46  ;;  %7600 = vmatpush3.msra.mxu1 %v9366_v50 }
 0xbe7   :  { %4306 = vmatprep.subr.mxu0 %v9363_v47  ;;  %7601 = vmatprep.subr.mxu1 %v10802_v15  ;;  %v4276_v47 = vrot.slane %v9603_v11, 6  ;;  %v4486_v11 = vld [vmem:[#allocation14 + $0xd8] sm:$0xff] }
 0xbe8   :  { %4307 = vmatpush1.msra.mxu0 %v9369_v51  ;;  %7602 = vmatpush3.msra.mxu1 %v9376_v53 }
 0xbe9   :  { %4308 = vmatprep.subr.mxu0 %v9373_v52  ;;  %7603 = vmatprep.subr.mxu1 %v10802_v15 }
 0xbea   :  { %4309 = vmatpush1.msra.mxu0 %v10916_v17  ;;  %7604 = vmatpush3.msra.mxu1 %v10917_v54  ;;  %v4505_v17 = vld [vmem:[#allocation14 + $0x170] sm:$0xff]  ;;  %v4504_v54 = vld [vmem:[#allocation14 + $0x168] sm:$0xff] }
 0xbeb   :  { %4310 = vmatprep.subr.mxu0 %v10918_v56  ;;  %7605 = vmatprep.subr.mxu1 %v10802_v15  ;;  %v4502_v56 = vld [vmem:[#allocation14 + $0x158] sm:$0xff] }
 0xbec   :  { %4311 = vmatpush1.msra.mxu0 %v10919_v58  ;;  %7606 = vmatpush3.msra.mxu1 %v10929_v19  ;;  %v4506_v58 = vld [vmem:[#allocation14 + $0x178] sm:$0xff]  ;;  %v4488_v19 = vld [vmem:[#allocation14 + $0xe8] sm:$0xff] }
 0xbed   :  { %4312 = vmatprep.subr.mxu0 %v10930_v27  ;;  %7607 = vmatprep.subr.mxu1 %v10802_v15  ;;  %v4483_v27 = vld [vmem:[#allocation14 + $0xc0] sm:$0xff] }
 0xbee   :  { %4313 = vmatpush1.msra.mxu0 %v10931_v13  ;;  %7608 = vmatpush3.msra.mxu1 %v10932_v22  ;;  %v4481_v13 = vld [vmem:[#allocation14 + $0xb0] sm:$0xff] }
 0xbef   :  { %4314 = vmatprep.subr.mxu0 %v10933_v55  ;;  %7609 = vmatprep.subr.mxu1 %v10802_v15  ;;  %v4485_v22 = vld [vmem:[#allocation14 + $0xd0] sm:$0xff]  ;;  %v4480_v55 = vld [vmem:[#allocation14 + $0xa8] sm:$0xff] }
 0xbf0   :  { %4315 = vmatpush1.msra.mxu0 %v10934_v7  ;;  %4348 = vmatprep.mubr.f32.mxu0 %v10802_v15  ;;  %v4478_v7 = vld [vmem:[#allocation14 + $0x98] sm:$0xff] }
 0xbf1   :  { %7610 = vmatpush3.msra.mxu1 %v10935_v16  ;;  %7611 = vmatprep.mubr.msk.f32.mxu1 %vm8271_vm3, %v10802_v15  ;;  %v4482_v16 = vld [vmem:[#allocation14 + $0xb8] sm:$0xff] }
 0xbf2   :  { %7614 = vmatprep.subr.mxu1 %v10802_v15  ;;  %4525 = vmatprep.subr.mxu0 %v4505_v17 }
 0xc91   :  { %v4173_v21 = vpop.f32.mrf.mxu0  ;;  %v4244_v8 = vpop.f32.mrf.mxu1 }
 0xc92   :  { %v4174_v10 = vadd.f32 %v4173_v21, %v10936_v9  ;;  %v4245_v37 = vadd.f32 %v4244_v8, %v9518_v29  ;;  %v4477_v21 = vld [vmem:[#allocation14 + $0x90] sm:$0xff]  ;;  %v4475_v8 = vld [vmem:[#allocation14 + $0x80] sm:$0xff] }
 0xc93   :  { %v4175_v20 = vpop.f32.mrf.mxu0  ;;  %v7578_v0 = vpop.f32.mrf.mxu1 }
 0xc94   :  { %v4249_v23 = vrot.slane %v4174_v10, 4  ;;  %v4176_v24 = vadd.f32 %v4175_v20, %v9509_v62  ;;  %v4269_v40 = vrot.slane %v4245_v37, 4  ;;  %v4479_v10 = vld [vmem:[#allocation14 + $0xa0] sm:$0xff]  ;;  %v4474_v20 = vld [vmem:[#allocation14 + $0x78] sm:$0xff]  ;;  %v4472_v0 = vld [vmem:[#allocation14 + $0x68] sm:$0xff] }
 0xc95   :  { %v4462_v37 = vld [vmem:[#allocation14 + $0x18] sm:$0xff] }
 0xc96   :  { %v4251_v25 = vadd.f32 %v4249_v23, %v9505_v63  ;;  %v4259_v31 = vrot.slane %v4176_v24, 4  ;;  %v4476_v23 = vld [vmem:[#allocation14 + $0x88] sm:$0xff]  ;;  %v4471_v24 = vld [vmem:[#allocation14 + $0x60] sm:$0xff] }
 0xc98   :  { %v6600_v28 = vmul.f32 -1.442695, %v4251_v25  ;;  %v4261_v32 = vadd.f32 %v4259_v31, %v9513_v5  ;;  %v4469_v25 = vld [vmem:[#allocation14 + $0x50] sm:$0xff]  ;;  %v4468_v31 = vld [vmem:[#allocation14 + $0x48] sm:$0xff] }
 0xc9a   :  { %8033 = vpow2.f32 %v6600_v28  ;;  %v6601_v33 = vmul.f32 -1.442695, %v4261_v32  ;;  %v4473_v28 = vld [vmem:[#allocation14 + $0x70] sm:$0xff]  ;;  %v4466_v32 = vld [vmem:[#allocation14 + $0x38] sm:$0xff] }
 0xc9c   :  { %8035 = vpow2.f32 %v6601_v33  ;;  %v4470_v33 = vld [vmem:[#allocation14 + $0x58] sm:$0xff] }
 0xca7   :  { %v8034_v34 = vpop.eup %8033 }
 0xca8   :  { %v4255_v35 = vadd.f32 1.0, %v8034_v34  ;;  %v4465_v34 = vld [vmem:[#allocation14 + $0x30] sm:$0xff] }
 0xca9   :  { %v8036_v36 = vpop.eup %8035 }
 0xcaa   :  { %8037 = vrcp.f32 %v4255_v35  ;;  %v4265_v38 = vadd.f32 1.0, %v8036_v36  ;;  %v4463_v35 = vld [vmem:[#allocation14 + $0x20] sm:$0xff] }
 0xcab   :  { %v4467_v36 = vld [vmem:[#allocation14 + $0x40] sm:$0xff] }
 0xcac   :  { %8039 = vrcp.f32 %v4265_v38  ;;  %v4460_v38 = vld [vmem:[#allocation14 + $0x8] sm:$0xff] }
 0xcb7   :  { %v8038_v41 = vpop.eup %8037 }
 0xcb8   :  { %v4271_v42 = vmul.f32 %v8038_v41, %v4269_v40  ;;  %v4464_v40 = vld [vmem:[#allocation14 + $0x28] sm:$0xff]  ;;  %v4459_v41 = vld [vmem:[#allocation14] sm:$0xff] }
 0xcb9   :  { %v8040_v45 = vpop.eup %8039 }
 0xcba   :  { %v4272_v43 = vadd.f32 %v4271_v42, %v9521_v4  ;;  %v4274_v46 = vsub.f32 1.0, %v8040_v45  ;;  %v4278_v52 = vmul.f32 %v8040_v45, %v4276_v47  ;;  %v4461_v42 = vld [vmem:[#allocation14 + $0x10] sm:$0xff] }
 0xcbc   :  { %8041 = vtanh.f32 %v4272_v43  ;;  %v9701_v43 = vld [vmem:[#allocation16 + $0x2f0] sm:$0xff] }
 0xcbd   :  { %10937 = vst [vmem:[#allocation45_spill] sm:$0xff] %v9701_v43 }
 0xcc9   :  { %v8042_v50 = vpop.eup %8041 }
 0xcca   :  { %v4275_v51 = vmul.f32 %v8042_v50, %v4274_v46 }
 0xccc   :  { %v9680_v53 = vadd.f32 %v4278_v52, %v4275_v51 }
 0xcce   :  { %4280 = vst [vmem:[#allocation6] sm:$0x30] %v9680_v53  ;;  %v4282_v3 = vrot.slane %v9680_v53, 4 }
 0xcd0   :  { %4349 = vmatmul.mubr.f32.vlgmr.msra.gmra.mxu0 %v4282_v3  ;;  %7612 = vmatmul.mubr.f32.vlgmr.msra.gmra.mxu1 %v4282_v3 }
 0xcd1   :  { %4589 = vmatprep.mubr.f32.mxu0 %v10802_v15  ;;  %7646 = vmatprep.mubr.msk.f32.mxu1 %vm8271_vm3, %v10802_v15 }
 0xcd2   :  { %4526 = vmatpush1.msra.mxu0 %v4504_v54  ;;  %7615 = vmatpush3.msra.mxu1 %v4506_v58 }
 0xcd3   :  { %4527 = vmatprep.subr.mxu0 %v4502_v56  ;;  %7616 = vmatprep.subr.mxu1 %v10802_v15 }
 0xcd4   :  { %4528 = vmatpush1.msra.mxu0 %v4501_v30  ;;  %7617 = vmatpush3.msra.mxu1 %v4503_v57 }
 0xcd5   :  { %4529 = vmatprep.subr.mxu0 %v4499_v2  ;;  %7618 = vmatprep.subr.mxu1 %v10802_v15 }
 0xcd6   :  { %4530 = vmatpush1.msra.mxu0 %v4498_v1  ;;  %7619 = vmatpush3.msra.mxu1 %v4500_v26 }
 0xcd7   :  { %4531 = vmatprep.subr.mxu0 %v4496_v60  ;;  %7620 = vmatprep.subr.mxu1 %v10802_v15 }
 0xcd8   :  { %4532 = vmatpush1.msra.mxu0 %v4495_v44  ;;  %7621 = vmatpush3.msra.mxu1 %v4497_v18  ;;  %v4453_v18 = vrot.slane %v9680_v53, 6  ;;  %v9722_v53 = vld [vmem:[#allocation16 + $0x2c0] sm:$0xff] }
 0xcd9   :  { %4533 = vmatprep.subr.mxu0 %v4493_v39  ;;  %7622 = vmatprep.subr.mxu1 %v10802_v15 }
 0xcda   :  { %4534 = vmatpush1.msra.mxu0 %v4492_v6  ;;  %7623 = vmatpush3.msra.mxu1 %v4494_v59 }
 0xcdb   :  { %4535 = vmatprep.subr.mxu0 %v4490_v12  ;;  %7624 = vmatprep.subr.mxu1 %v10802_v15 }
 0xcdc   :  { %4536 = vmatpush1.msra.mxu0 %v4489_v48  ;;  %7625 = vmatpush3.msra.mxu1 %v4491_v49  ;;  %v9715_v49 = vld [vmem:[#allocation16 + $0x2d8] sm:$0xff] }
 0xcdd   :  { %4537 = vmatprep.subr.mxu0 %v4487_v61  ;;  %7626 = vmatprep.subr.mxu1 %v10802_v15  ;;  %v9713_v61 = vld [vmem:[#allocation16 + $0x2e8] sm:$0xff] }
 0xcde   :  { %4538 = vmatpush1.msra.mxu0 %v4486_v11  ;;  %7627 = vmatpush3.msra.mxu1 %v4488_v19  ;;  %v9717_v11 = vld [vmem:[#allocation16 + $0x2f8] sm:$0xff] }
 0xcdf   :  { %4539 = vmatprep.subr.mxu0 %v4484_v14  ;;  %7628 = vmatprep.subr.mxu1 %v10802_v15  ;;  %v9725_v14 = vld [vmem:[#allocation16 + $0x2e0] sm:$0xff]  ;;  %v9728_v19 = vld [vmem:[#allocation16 + $0x2b8] sm:$0xff] }
 0xce0   :  { %4540 = vmatpush1.msra.mxu0 %v4483_v27  ;;  %7629 = vmatpush3.msra.mxu1 %v4485_v22  ;;  %v9732_v27 = vld [vmem:[#allocation16 + $0x2a8] sm:$0xff]  ;;  %v9738_v22 = vld [vmem:[#allocation16 + $0x2a0] sm:$0xff] }
 0xce1   :  { %4541 = vmatprep.subr.mxu0 %v4481_v13  ;;  %7630 = vmatprep.subr.mxu1 %v10802_v15  ;;  %v9735_v13 = vld [vmem:[#allocation16 + $0x2c8] sm:$0xff] }
 0xce2   :  { %4542 = vmatpush1.msra.mxu0 %v4480_v55  ;;  %7631 = vmatpush3.msra.mxu1 %v4482_v16  ;;  %v9742_v55 = vld [vmem:[#allocation16 + $0x290] sm:$0xff]  ;;  %v9748_v16 = vld [vmem:[#allocation16 + $0x288] sm:$0xff] }
 0xce3   :  { %4543 = vmatprep.subr.mxu0 %v4478_v7  ;;  %7632 = vmatprep.subr.mxu1 %v10802_v15  ;;  %v9745_v7 = vld [vmem:[#allocation16 + $0x2b0] sm:$0xff] }
 0xce4   :  { %4544 = vmatpush1.msra.mxu0 %v4477_v21  ;;  %7633 = vmatpush3.msra.mxu1 %v4479_v10  ;;  %v9752_v21 = vld [vmem:[#allocation16 + $0x278] sm:$0xff]  ;;  %v9758_v10 = vld [vmem:[#allocation16 + $0x270] sm:$0xff] }
 0xce5   :  { %4545 = vmatprep.subr.mxu0 %v4475_v8  ;;  %7634 = vmatprep.subr.mxu1 %v10802_v15  ;;  %v9755_v8 = vld [vmem:[#allocation16 + $0x298] sm:$0xff] }
 0xce6   :  { %4546 = vmatpush1.msra.mxu0 %v4474_v20  ;;  %7635 = vmatpush3.msra.mxu1 %v4476_v23  ;;  %v9762_v20 = vld [vmem:[#allocation16 + $0x260] sm:$0xff]  ;;  %v9768_v23 = vld [vmem:[#allocation16 + $0x258] sm:$0xff] }
 0xce7   :  { %4547 = vmatprep.subr.mxu0 %v4472_v0  ;;  %7636 = vmatprep.subr.mxu1 %v10802_v15  ;;  %v9765_v0 = vld [vmem:[#allocation16 + $0x280] sm:$0xff] }
 0xce8   :  { %4548 = vmatpush1.msra.mxu0 %v4471_v24  ;;  %7637 = vmatpush3.msra.mxu1 %v4473_v28  ;;  %v9772_v24 = vld [vmem:[#allocation16 + $0x248] sm:$0xff]  ;;  %v9778_v28 = vld [vmem:[#allocation16 + $0x240] sm:$0xff] }
 0xce9   :  { %4549 = vmatprep.subr.mxu0 %v4469_v25  ;;  %7638 = vmatprep.subr.mxu1 %v10802_v15  ;;  %v9775_v25 = vld [vmem:[#allocation16 + $0x268] sm:$0xff] }
 0xcea   :  { %4550 = vmatpush1.msra.mxu0 %v4468_v31  ;;  %7639 = vmatpush3.msra.mxu1 %v4470_v33  ;;  %v9782_v31 = vld [vmem:[#allocation16 + $0x230] sm:$0xff]  ;;  %v9788_v33 = vld [vmem:[#allocation16 + $0x228] sm:$0xff] }
 0xceb   :  { %4551 = vmatprep.subr.mxu0 %v4466_v32  ;;  %7640 = vmatprep.subr.mxu1 %v10802_v15  ;;  %v9785_v32 = vld [vmem:[#allocation16 + $0x250] sm:$0xff] }
 0xcec   :  { %4552 = vmatpush1.msra.mxu0 %v4465_v34  ;;  %7641 = vmatpush3.msra.mxu1 %v4467_v36  ;;  %v9792_v34 = vld [vmem:[#allocation16 + $0x218] sm:$0xff]  ;;  %v9798_v36 = vld [vmem:[#allocation16 + $0x210] sm:$0xff] }
 0xced   :  { %4553 = vmatprep.subr.mxu0 %v4463_v35  ;;  %7642 = vmatprep.subr.mxu1 %v10802_v15  ;;  %v9795_v35 = vld [vmem:[#allocation16 + $0x238] sm:$0xff] }
 0xcee   :  { %4554 = vmatpush1.msra.mxu0 %v4462_v37  ;;  %7643 = vmatpush3.msra.mxu1 %v4464_v40  ;;  %v9802_v37 = vld [vmem:[#allocation16 + $0x200] sm:$0xff]  ;;  %v9808_v40 = vld [vmem:[#allocation16 + $0x1f8] sm:$0xff] }
 0xcef   :  { %4555 = vmatprep.subr.mxu0 %v4460_v38  ;;  %7644 = vmatprep.subr.mxu1 %v10802_v15  ;;  %v9805_v38 = vld [vmem:[#allocation16 + $0x220] sm:$0xff] }
 0xcf0   :  { %4556 = vmatpush1.msra.mxu0 %v4459_v41  ;;  %7645 = vmatpush3.msra.mxu1 %v4461_v42  ;;  %v9812_v41 = vld [vmem:[#allocation16 + $0x1e8] sm:$0xff] }
 0xcf1   :  { %4733 = vmatprep.subr.mxu0 %v9701_v43  ;;  %7649 = vmatprep.subr.mxu1 %v10802_v15  ;;  %v9815_v42 = vld [vmem:[#allocation16 + $0x208] sm:$0xff] }
 0xd90   :  { %v4350_v45 = vpop.f32.mrf.mxu0  ;;  %v4421_v46 = vpop.f32.mrf.mxu1 }
 0xd91   :  { %v4351_v47 = vadd.f32 %v4350_v45, %v10936_v9  ;;  %v4422_v9 = vadd.f32 %v4421_v46, %v9518_v29  ;;  %v9818_v45 = vld [vmem:[#allocation16 + $0x1e0] sm:$0xff]  ;;  %v9822_v46 = vld [vmem:[#allocation16 + $0x1d0] sm:$0xff] }
 0xd92   :  { %v4352_v50 = vpop.f32.mrf.mxu0  ;;  %v7613_v51 = vpop.f32.mrf.mxu1 }
 0xd93   :  { %v4426_v52 = vrot.slane %v4351_v47, 2  ;;  %v4353_v3 = vadd.f32 %v4352_v50, %v9509_v62  ;;  %v4446_v26 = vrot.slane %v4422_v9, 2  ;;  %v9825_v47 = vld [vmem:[#allocation16 + $0x1f0] sm:$0xff]  ;;  %v9828_v50 = vld [vmem:[#allocation16 + $0x1c8] sm:$0xff]  ;;  %v9832_v51 = vld [vmem:[#allocation16 + $0x1b8] sm:$0xff] }
 0xd95   :  { %v4428_v17 = vadd.f32 %v4426_v52, %v9505_v63  ;;  %v4436_v56 = vrot.slane %v4353_v3, 2  ;;  %v9835_v52 = vld [vmem:[#allocation16 + $0x1d8] sm:$0xff]  ;;  %v9838_v3 = vld [vmem:[#allocation16 + $0x1b0] sm:$0xff] }
 0xd97   :  { %v6602_v54 = vmul.f32 -1.442695, %v4428_v17  ;;  %v4438_v58 = vadd.f32 %v4436_v56, %v9513_v5  ;;  %v9842_v17 = vld [vmem:[#allocation16 + $0x1a0] sm:$0xff]  ;;  %v9848_v56 = vld [vmem:[#allocation16 + $0x198] sm:$0xff] }
 0xd98   :  { %10938 = vst [vmem:[#allocation47_spill] sm:$0xff] %v9842_v17  ;;  %10940 = vst [vmem:[#allocation49_spill] sm:$0xff] %v9848_v56 }
 0xd99   :  { %8043 = vpow2.f32 %v6602_v54  ;;  %v6603_v30 = vmul.f32 -1.442695, %v4438_v58  ;;  %v9845_v54 = vld [vmem:[#allocation16 + $0x1c0] sm:$0xff]  ;;  %v9852_v58 = vld [vmem:[#allocation16 + $0x188] sm:$0xff] }
 0xd9a   :  { %10939 = vst [vmem:[#allocation29_spill] sm:$0xff] %v9845_v54  ;;  %10941 = vst [vmem:[#allocation51_spill] sm:$0xff] %v9852_v58 }
 0xd9b   :  { %8045 = vpow2.f32 %v6603_v30  ;;  %v9855_v30 = vld [vmem:[#allocation16 + $0x1a8] sm:$0xff] }
 0xd9c   :  { %10942 = vst [vmem:[#allocation30_spill] sm:$0xff] %v9855_v30 }
 0xda6   :  { %v8044_v2 = vpop.eup %8043 }
 0xda7   :  { %v4432_v57 = vadd.f32 1.0, %v8044_v2  ;;  %v9858_v2 = vld [vmem:[#allocation16 + $0x180] sm:$0xff] }
 0xda8   :  { %v8046_v1 = vpop.eup %8045  ;;  %10943 = vst [vmem:[#allocation53_spill] sm:$0xff] %v9858_v2 }
 0xda9   :  { %8047 = vrcp.f32 %v4432_v57  ;;  %v4442_v60 = vadd.f32 1.0, %v8046_v1  ;;  %v9863_v57 = vld [vmem:[#allocation16 + $0x190] sm:$0xff] }
 0xdaa   :  { %10944 = vst [vmem:[#allocation55_spill] sm:$0xff] %v9863_v57 }
 0xdab   :  { %8049 = vrcp.f32 %v4442_v60  ;;  %v6604_v60 = vld [vmem:[%s10669_s12 + $0x3] sm:$0x7] }
 0xdb6   :  { %v8048_v44 = vpop.eup %8047 }
 0xdb7   :  { %v4448_v39 = vmul.f32 %v8048_v44, %v4446_v26  ;;  %v6605_v44 = vld [vmem:[%s10670_s13 + $0x3] sm:$0x7] }
 0xdb8   :  { %v8050_v63 = vpop.eup %8049 }
 0xdb9   :  { %v4449_v62 = vadd.f32 %v4448_v39, %v9521_v4  ;;  %v4451_v5 = vsub.f32 1.0, %v8050_v63  ;;  %v4455_v59 = vmul.f32 %v8050_v63, %v4453_v18  ;;  %v9719_v4 = vld [vmem:[#allocation16 + $0x2d0] sm:$0xff]  ;;  %v10945_v39 = vld [vmem:[#allocation66_spill] sm:$0xff] }
 0xdba   :  { %v9951_v63 = vrot.slane %v6605_v44, %v10945_v39 }
 0xdbb   :  { %8051 = vtanh.f32 %v4449_v62  ;;  %v4513_v62 = vrot.slane %v6604_v60, %v10945_v39 }
 0xdbc   :  { %10946 = vst [vmem:[#allocation31_spill] sm:$0xff] %v9951_v63 }
 0xdc8   :  { %v8052_v6 = vpop.eup %8051 }
 0xdc9   :  { %v4452_v12 = vmul.f32 %v8052_v6, %v4451_v5 }
 0xdcb   :  { %v4456_v48 = vadd.f32 %v4455_v59, %v4452_v12  ;;  %v10947_v59 = vld [vmem:[#allocation68_spill] sm:$0xff] }
 0xdcd   :  { %4457 = vst [vmem:[#allocation6] sm:$0xc0] %v4456_v48  ;;  %v9957_v48 = vrot.slane %v6605_v44, %v10947_v59 }
 0xdd4   :  { %v4458_v29 = vld [vmem:[#allocation6] sm:$0xff] }
 0xdd5   :  { %4590 = vmatmul.mubr.f32.vlgmr.msra.gmra.mxu0 %v4458_v29  ;;  %7647 = vmatmul.mubr.f32.vlgmr.msra.gmra.mxu1 %v4458_v29 }
 0xdd6   :  { %4734 = vmatpush1.msra.mxu0 %v9713_v61  ;;  %4797 = vmatprep.mubr.f32.mxu0 %v10802_v15 }
 0xdd7   :  { %4735 = vmatprep.subr.mxu0 %v9715_v49  ;;  %7650 = vmatpush3.msra.mxu1 %v9717_v11 }
 0xdd8   :  { %4736 = vmatpush1.msra.mxu0 %v9719_v4  ;;  %7651 = vmatprep.subr.mxu1 %v10802_v15 }
 0xdd9   :  { %4737 = vmatprep.subr.mxu0 %v9722_v53  ;;  %7652 = vmatpush3.msra.mxu1 %v9725_v14 }
 0xdda   :  { %4738 = vmatpush1.msra.mxu0 %v9728_v19  ;;  %7653 = vmatprep.subr.mxu1 %v10802_v15 }
 0xddb   :  { %4739 = vmatprep.subr.mxu0 %v9732_v27  ;;  %7654 = vmatpush3.msra.mxu1 %v9735_v13 }
 0xddc   :  { %4740 = vmatpush1.msra.mxu0 %v9738_v22  ;;  %7655 = vmatprep.subr.mxu1 %v10802_v15 }
 0xddd   :  { %4741 = vmatprep.subr.mxu0 %v9742_v55  ;;  %7656 = vmatpush3.msra.mxu1 %v9745_v7 }
 0xdde   :  { %4742 = vmatpush1.msra.mxu0 %v9748_v16  ;;  %7657 = vmatprep.subr.mxu1 %v10802_v15 }
 0xddf   :  { %4743 = vmatprep.subr.mxu0 %v9752_v21  ;;  %7658 = vmatpush3.msra.mxu1 %v9755_v8 }
 0xde0   :  { %4744 = vmatpush1.msra.mxu0 %v9758_v10  ;;  %7659 = vmatprep.subr.mxu1 %v10802_v15 }
 0xde1   :  { %4745 = vmatprep.subr.mxu0 %v9762_v20  ;;  %7660 = vmatpush3.msra.mxu1 %v9765_v0 }
 0xde2   :  { %4746 = vmatpush1.msra.mxu0 %v9768_v23  ;;  %7661 = vmatprep.subr.mxu1 %v10802_v15 }
 0xde3   :  { %4747 = vmatprep.subr.mxu0 %v9772_v24  ;;  %7662 = vmatpush3.msra.mxu1 %v9775_v25 }
 0xde4   :  { %4748 = vmatpush1.msra.mxu0 %v9778_v28  ;;  %7663 = vmatprep.subr.mxu1 %v10802_v15 }
 0xde5   :  { %4749 = vmatprep.subr.mxu0 %v9782_v31  ;;  %7664 = vmatpush3.msra.mxu1 %v9785_v32 }
 0xde6   :  { %4750 = vmatpush1.msra.mxu0 %v9788_v33  ;;  %7665 = vmatprep.subr.mxu1 %v10802_v15 }
 0xde7   :  { %4751 = vmatprep.subr.mxu0 %v9792_v34  ;;  %7666 = vmatpush3.msra.mxu1 %v9795_v35 }
 0xde8   :  { %4752 = vmatpush1.msra.mxu0 %v9798_v36  ;;  %7667 = vmatprep.subr.mxu1 %v10802_v15 }
 0xde9   :  { %4753 = vmatprep.subr.mxu0 %v9802_v37  ;;  %7668 = vmatpush3.msra.mxu1 %v9805_v38 }
 0xdea   :  { %4754 = vmatpush1.msra.mxu0 %v9808_v40  ;;  %7669 = vmatprep.subr.mxu1 %v10802_v15 }
 0xdeb   :  { %4755 = vmatprep.subr.mxu0 %v9812_v41  ;;  %7670 = vmatpush3.msra.mxu1 %v9815_v42 }
 0xdec   :  { %4756 = vmatpush1.msra.mxu0 %v9818_v45  ;;  %7671 = vmatprep.subr.mxu1 %v10802_v15 }
 0xded   :  { %4757 = vmatprep.subr.mxu0 %v9822_v46  ;;  %7672 = vmatpush3.msra.mxu1 %v9825_v47 }
 0xdee   :  { %4758 = vmatpush1.msra.mxu0 %v9828_v50  ;;  %7673 = vmatprep.subr.mxu1 %v10802_v15 }
 0xdef   :  { %4759 = vmatprep.subr.mxu0 %v9832_v51  ;;  %7674 = vmatpush3.msra.mxu1 %v9835_v52 }
 0xdf0   :  { %4760 = vmatpush1.msra.mxu0 %v9838_v3  ;;  %7675 = vmatprep.subr.mxu1 %v10802_v15 }
 0xdf1   :  { %4761 = vmatprep.subr.mxu0 %v9842_v17  ;;  %7676 = vmatpush3.msra.mxu1 %v9845_v54 }
 0xdf2   :  { %4762 = vmatpush1.msra.mxu0 %v9848_v56  ;;  %7677 = vmatprep.subr.mxu1 %v10802_v15 }
 0xdf3   :  { %4763 = vmatprep.subr.mxu0 %v9852_v58  ;;  %7678 = vmatpush3.msra.mxu1 %v9855_v30 }
 0xdf4   :  { %4764 = vmatpush1.msra.mxu0 %v9858_v2  ;;  %7679 = vmatprep.subr.mxu1 %v10802_v15 }
 0xdf5   :  { %4798 = vmatmul.mubr.f32.vlgmr.msra.gmra.mxu0 %v10802_v15  ;;  %7680 = vmatpush3.msra.mxu1 %v9863_v57 }
 0xdf6   :  { %7681 = vmatprep.mubr.msk.f32.mxu1 %vm8271_vm3, %v10802_v15  ;;  %4896 = vmatprep.subr.mxu0 %v9701_v43 }
 0xdf7   :  { %7682 = vmatmul.mubr.f32.vlgmr.msra.gmra.mxu1 %v10802_v15  ;;  %7684 = vmatprep.subr.mxu1 %v10802_v15 }
 0xdf8   :  { %4897 = vmatpush1.msra.mxu0 %v9713_v61  ;;  %7685 = vmatpush3.msra.mxu1 %v9717_v11 }
 0xdf9   :  { %4898 = vmatprep.subr.mxu0 %v9715_v49  ;;  %7686 = vmatprep.subr.mxu1 %v10802_v15 }
 0xdfa   :  { %4899 = vmatpush1.msra.mxu0 %v9719_v4  ;;  %7687 = vmatpush3.msra.mxu1 %v9725_v14 }
 0xdfb   :  { %4900 = vmatprep.subr.mxu0 %v9722_v53  ;;  %7688 = vmatprep.subr.mxu1 %v10802_v15 }
 0xdfc   :  { %4901 = vmatpush1.msra.mxu0 %v9728_v19  ;;  %7689 = vmatpush3.msra.mxu1 %v9735_v13 }
 0xdfd   :  { %4902 = vmatprep.subr.mxu0 %v9732_v27  ;;  %7690 = vmatprep.subr.mxu1 %v10802_v15 }
 0xdfe   :  { %4903 = vmatpush1.msra.mxu0 %v9738_v22  ;;  %7691 = vmatpush3.msra.mxu1 %v9745_v7 }
 0xdff   :  { %4904 = vmatprep.subr.mxu0 %v9742_v55  ;;  %7692 = vmatprep.subr.mxu1 %v10802_v15 }
 0xe00   :  { %4905 = vmatpush1.msra.mxu0 %v9748_v16  ;;  %7693 = vmatpush3.msra.mxu1 %v9755_v8 }
 0xe01   :  { %4906 = vmatprep.subr.mxu0 %v9752_v21  ;;  %7694 = vmatprep.subr.mxu1 %v10802_v15 }
 0xe02   :  { %4907 = vmatpush1.msra.mxu0 %v9758_v10  ;;  %7695 = vmatpush3.msra.mxu1 %v9765_v0 }
 0xe03   :  { %4908 = vmatprep.subr.mxu0 %v9762_v20  ;;  %7696 = vmatprep.subr.mxu1 %v10802_v15 }
 0xe04   :  { %4909 = vmatpush1.msra.mxu0 %v9768_v23  ;;  %7697 = vmatpush3.msra.mxu1 %v9775_v25 }
 0xe05   :  { %4910 = vmatprep.subr.mxu0 %v9772_v24  ;;  %7698 = vmatprep.subr.mxu1 %v10802_v15 }
 0xe06   :  { %4911 = vmatpush1.msra.mxu0 %v9778_v28  ;;  %7699 = vmatpush3.msra.mxu1 %v9785_v32 }
 0xe07   :  { %4912 = vmatprep.subr.mxu0 %v9782_v31  ;;  %7700 = vmatprep.subr.mxu1 %v10802_v15 }
 0xe08   :  { %4913 = vmatpush1.msra.mxu0 %v9788_v33  ;;  %7701 = vmatpush3.msra.mxu1 %v9795_v35 }
 0xe09   :  { %4914 = vmatprep.subr.mxu0 %v9792_v34  ;;  %7702 = vmatprep.subr.mxu1 %v10802_v15 }
 0xe0a   :  { %4915 = vmatpush1.msra.mxu0 %v9798_v36  ;;  %7703 = vmatpush3.msra.mxu1 %v9805_v38 }
 0xe0b   :  { %4916 = vmatprep.subr.mxu0 %v9802_v37  ;;  %7704 = vmatprep.subr.mxu1 %v10802_v15 }
 0xe0c   :  { %4917 = vmatpush1.msra.mxu0 %v9808_v40  ;;  %7705 = vmatpush3.msra.mxu1 %v9815_v42 }
 0xe0d   :  { %4918 = vmatprep.subr.mxu0 %v9812_v41  ;;  %7706 = vmatprep.subr.mxu1 %v10802_v15 }
 0xe0e   :  { %4919 = vmatpush1.msra.mxu0 %v9818_v45  ;;  %7707 = vmatpush3.msra.mxu1 %v9825_v47 }
 0xe0f   :  { %4920 = vmatprep.subr.mxu0 %v9822_v46  ;;  %7708 = vmatprep.subr.mxu1 %v10802_v15 }
 0xe10   :  { %4921 = vmatpush1.msra.mxu0 %v9828_v50  ;;  %7709 = vmatpush3.msra.mxu1 %v9835_v52 }
 0xe11   :  { %4922 = vmatprep.subr.mxu0 %v9832_v51  ;;  %7710 = vmatprep.subr.mxu1 %v10802_v15 }
 0xe12   :  { %4923 = vmatpush1.msra.mxu0 %v9838_v3  ;;  %7711 = vmatpush3.msra.mxu1 %v9845_v54 }
 0xe13   :  { %4924 = vmatprep.subr.mxu0 %v9842_v17  ;;  %7712 = vmatprep.subr.mxu1 %v10802_v15 }
 0xe14   :  { %4925 = vmatpush1.msra.mxu0 %v9848_v56  ;;  %7713 = vmatpush3.msra.mxu1 %v9855_v30  ;;  %v10948_v56 = vld [vmem:[#allocation67_spill] sm:$0xff] }
 0xe15   :  { %4926 = vmatprep.subr.mxu0 %v9852_v58  ;;  %7714 = vmatprep.subr.mxu1 %v10802_v15  ;;  %v9966_v17 = vrot.slane %v6605_v44, %v10948_v56 }
 0xe16   :  { %4927 = vmatpush1.msra.mxu0 %v9858_v2  ;;  %4960 = vmatprep.mubr.f32.mxu0 %v10802_v15 }
 0xe17   :  { %7715 = vmatpush3.msra.mxu1 %v9863_v57  ;;  %7716 = vmatprep.mubr.msk.f32.mxu1 %vm8271_vm3, %v10802_v15 }
 0xe18   :  { %5074 = vmatprep.subr.mxu0 %v9701_v43  ;;  %7719 = vmatprep.subr.mxu1 %v10802_v15  ;;  %v4517_v43 = vrot.slane %v6604_v60, %v10947_v59 }
 0xe95   :  { %v4662_v1 = vpop.f32.mrf.mxu1  ;;  %v4591_v26 = vpop.f32.mrf.mxu0 }
 0xe96   :  { %v9953_v6 = vadd.f32 %v4591_v26, %v4513_v62 }
 0xe97   :  { %v7648_v9 = vpop.f32.mrf.mxu1  ;;  %v4593_v18 = vpop.f32.mrf.mxu0 }
 0xe98   :  { %v9962_v30 = vadd.f32 %v4593_v18, %v4517_v43 }
 0xeb5   :  { %v4799_v5 = vpop.f32.mrf.mxu0 }
 0xeb6   :  { %v4800_v12 = vadd.f32 %v4799_v5, %v9951_v63 }
 0xeb7   :  { %v4801_v29 = vpop.f32.mrf.mxu0  ;;  %v4870_v9 = vpop.f32.mrf.mxu1 }
 0xeb8   :  { %v4874_v57 = vadd.f32 %v4800_v12, %v9953_v6  ;;  %v4802_v39 = vadd.f32 %v4801_v29, %v9957_v48  ;;  %v4521_v12 = vrot.slane %v6604_v60, %v10948_v56  ;;  %v10950_v60 = vld [vmem:[#allocation49_spill] sm:$0xff] }
 0xeb9   :  { %v7683_v2 = vpop.f32.mrf.mxu1 }
 0xeba   :  { %v6606_v58 = vmul.f32 -1.442695, %v4874_v57  ;;  %v4881_v26 = vadd.f32 %v4802_v39, %v9962_v30  ;;  %v4871_v57 = vadd.f32 %v4870_v9, %v9966_v17  ;;  %v9970_v43 = vadd.f32 %v4662_v1, %v4521_v12  ;;  %v10949_v1 = vld [vmem:[#allocation47_spill] sm:$0xff]  ;;  %v10953_v12 = vld [vmem:[#allocation53_spill] sm:$0xff] }
 0xebb   :  { %v10952_v9 = vld [vmem:[#allocation51_spill] sm:$0xff] }
 0xebc   :  { %8053 = vpow2.f32 %v6606_v58  ;;  %v6607_v62 = vmul.f32 -1.442695, %v4881_v26 }
 0xebe   :  { %8055 = vpow2.f32 %v6607_v62 }
 0xec9   :  { %v8054_v5 = vpop.eup %8053 }
 0xeca   :  { %v4878_v63 = vadd.f32 1.0, %v8054_v5 }
 0xecb   :  { %v8056_v59 = vpop.eup %8055 }
 0xecc   :  { %8057 = vrcp.f32 %v4878_v63  ;;  %v4885_v2 = vadd.f32 1.0, %v8056_v59  ;;  %v10951_v59 = vld [vmem:[#allocation30_spill] sm:$0xff] }
 0xece   :  { %8059 = vrcp.f32 %v4885_v2  ;;  %v10954_v2 = vld [vmem:[#allocation55_spill] sm:$0xff] }
 0xed9   :  { %v8058_v29 = vpop.eup %8057 }
 0xeda   :  { %v4888_v58 = vmul.f32 %v8058_v29, %v4871_v57  ;;  %v10955_v57 = vld [vmem:[#allocation45_spill] sm:$0xff] }
 0xedb   :  { %v8060_v18 = vpop.eup %8059 }
 0xedc   :  { %v4889_v39 = vadd.f32 %v4888_v58, %v9970_v43  ;;  %v4891_v26 = vsub.f32 1.0, %v8060_v18  ;;  %v4893_v44 = vmul.f32 0.0, %v8060_v18 }
 0xede   :  { %8061 = vtanh.f32 %v4889_v39  ;;  %v10956_v39 = vld [vmem:[#allocation31_spill] sm:$0xff] }
 0xeeb   :  { %v8062_v63 = vpop.eup %8061 }
 0xeec   :  { %v4892_v62 = vmul.f32 %v8062_v63, %v4891_v26 }
 0xeee   :  { %v9973_v5 = vadd.f32 %v4893_v44, %v4892_v62 }
 0xef0   :  { %4895 = vst [vmem:[#allocation7] sm:$0x3] %v9973_v5  ;;  %4961 = vmatmul.mubr.f32.vlgmr.msra.gmra.mxu0 %v9973_v5  ;;  %7717 = vmatmul.mubr.f32.vlgmr.msra.gmra.mxu1 %v9973_v5 }
 0xef1   :  { %5075 = vmatpush1.msra.mxu0 %v9713_v61  ;;  %7720 = vmatpush3.msra.mxu1 %v9717_v11 }
 0xef2   :  { %5076 = vmatprep.subr.mxu0 %v9715_v49  ;;  %7721 = vmatprep.subr.mxu1 %v10802_v15 }
 0xef3   :  { %5077 = vmatpush1.msra.mxu0 %v9719_v4  ;;  %7722 = vmatpush3.msra.mxu1 %v9725_v14 }
 0xef4   :  { %5078 = vmatprep.subr.mxu0 %v9722_v53  ;;  %7723 = vmatprep.subr.mxu1 %v10802_v15 }
 0xef5   :  { %5079 = vmatpush1.msra.mxu0 %v9728_v19  ;;  %7724 = vmatpush3.msra.mxu1 %v9735_v13 }
 0xef6   :  { %5080 = vmatprep.subr.mxu0 %v9732_v27  ;;  %7725 = vmatprep.subr.mxu1 %v10802_v15 }
 0xef7   :  { %5081 = vmatpush1.msra.mxu0 %v9738_v22  ;;  %7726 = vmatpush3.msra.mxu1 %v9745_v7 }
 0xef8   :  { %5082 = vmatprep.subr.mxu0 %v9742_v55  ;;  %7727 = vmatprep.subr.mxu1 %v10802_v15 }
 0xef9   :  { %5083 = vmatpush1.msra.mxu0 %v9748_v16  ;;  %7728 = vmatpush3.msra.mxu1 %v9755_v8 }
 0xefa   :  { %5084 = vmatprep.subr.mxu0 %v9752_v21  ;;  %7729 = vmatprep.subr.mxu1 %v10802_v15 }
 0xefb   :  { %5085 = vmatpush1.msra.mxu0 %v9758_v10  ;;  %7730 = vmatpush3.msra.mxu1 %v9765_v0 }
 0xefc   :  { %5086 = vmatprep.subr.mxu0 %v9762_v20  ;;  %7731 = vmatprep.subr.mxu1 %v10802_v15 }
 0xefd   :  { %5087 = vmatpush1.msra.mxu0 %v9768_v23  ;;  %7732 = vmatpush3.msra.mxu1 %v9775_v25 }
 0xefe   :  { %5088 = vmatprep.subr.mxu0 %v9772_v24  ;;  %7733 = vmatprep.subr.mxu1 %v10802_v15 }
 0xeff   :  { %5089 = vmatpush1.msra.mxu0 %v9778_v28  ;;  %7734 = vmatpush3.msra.mxu1 %v9785_v32 }
 0xf00   :  { %5090 = vmatprep.subr.mxu0 %v9782_v31  ;;  %7735 = vmatprep.subr.mxu1 %v10802_v15 }
 0xf01   :  { %5091 = vmatpush1.msra.mxu0 %v9788_v33  ;;  %7736 = vmatpush3.msra.mxu1 %v9795_v35 }
 0xf02   :  { %5092 = vmatprep.subr.mxu0 %v9792_v34  ;;  %7737 = vmatprep.subr.mxu1 %v10802_v15 }
 0xf03   :  { %5093 = vmatpush1.msra.mxu0 %v9798_v36  ;;  %7738 = vmatpush3.msra.mxu1 %v9805_v38 }
 0xf04   :  { %5094 = vmatprep.subr.mxu0 %v9802_v37  ;;  %7739 = vmatprep.subr.mxu1 %v10802_v15 }
 0xf05   :  { %5095 = vmatpush1.msra.mxu0 %v9808_v40  ;;  %7740 = vmatpush3.msra.mxu1 %v9815_v42 }
 0xf06   :  { %5096 = vmatprep.subr.mxu0 %v9812_v41  ;;  %7741 = vmatprep.subr.mxu1 %v10802_v15 }
 0xf07   :  { %5097 = vmatpush1.msra.mxu0 %v9818_v45  ;;  %7742 = vmatpush3.msra.mxu1 %v9825_v47 }
 0xf08   :  { %5098 = vmatprep.subr.mxu0 %v9822_v46  ;;  %7743 = vmatprep.subr.mxu1 %v10802_v15 }
 0xf09   :  { %5099 = vmatpush1.msra.mxu0 %v9828_v50  ;;  %7744 = vmatpush3.msra.mxu1 %v9835_v52 }
 0xf0a   :  { %5100 = vmatprep.subr.mxu0 %v9832_v51  ;;  %7745 = vmatprep.subr.mxu1 %v10802_v15 }
 0xf0b   :  { %5101 = vmatpush1.msra.mxu0 %v9838_v3  ;;  %7746 = vmatpush3.msra.mxu1 %v9845_v54 }
 0xf0c   :  { %5102 = vmatprep.subr.mxu0 %v10949_v1  ;;  %7747 = vmatprep.subr.mxu1 %v10802_v15 }
 0xf0d   :  { %5103 = vmatpush1.msra.mxu0 %v10950_v60  ;;  %7748 = vmatpush3.msra.mxu1 %v10951_v59 }
 0xf0e   :  { %5104 = vmatprep.subr.mxu0 %v10952_v9  ;;  %7749 = vmatprep.subr.mxu1 %v10802_v15 }
 0xf0f   :  { %5105 = vmatpush1.msra.mxu0 %v10953_v12  ;;  %5138 = vmatprep.mubr.f32.mxu0 %v10802_v15 }
 0xf10   :  { %7750 = vmatpush3.msra.mxu1 %v10954_v2  ;;  %7751 = vmatprep.mubr.msk.f32.mxu1 %vm8271_vm3, %v10802_v15 }
 0xf11   :  { %5251 = vmatprep.subr.mxu0 %v10955_v57  ;;  %7754 = vmatprep.subr.mxu1 %v10802_v15 }
 0xfb0   :  { %v4962_v29 = vpop.f32.mrf.mxu0  ;;  %v5033_v58 = vpop.f32.mrf.mxu1 }
 0xfb1   :  { %v4963_v18 = vadd.f32 %v4962_v29, %v10956_v39  ;;  %v5034_v29 = vadd.f32 %v5033_v58, %v9966_v17  ;;  %v5471_v58 = vld [vmem:[#allocation14 + $0x2e0] sm:$0xff] }
 0xfb2   :  { %v4964_v26 = vpop.f32.mrf.mxu0  ;;  %v7718_v63 = vpop.f32.mrf.mxu1 }
 0xfb3   :  { %v5038_v62 = vrot.slane %v4963_v18, 6  ;;  %v4965_v44 = vadd.f32 %v4964_v26, %v9957_v48  ;;  %v5058_v63 = vrot.slane %v5034_v29, 6  ;;  %v5468_v29 = vld [vmem:[#allocation14 + $0x2c8] sm:$0xff] }
 0xfb5   :  { %v5040_v56 = vadd.f32 %v5038_v62, %v9953_v6  ;;  %v5048_v2 = vrot.slane %v4965_v44, 6 }
 0xfb7   :  { %v6608_v12 = vmul.f32 -1.442695, %v5040_v56  ;;  %v5050_v9 = vadd.f32 %v5048_v2, %v9962_v30 }
 0xfb9   :  { %8063 = vpow2.f32 %v6608_v12  ;;  %v6609_v59 = vmul.f32 -1.442695, %v5050_v9  ;;  %v5066_v12 = vrot.slane %v9973_v5, 6  ;;  %v5469_v5 = vld [vmem:[#allocation14 + $0x2d0] sm:$0xff] }
 0xfbb   :  { %8065 = vpow2.f32 %v6609_v59 }
 0xfc6   :  { %v8064_v57 = vpop.eup %8063 }
 0xfc7   :  { %v5044_v60 = vadd.f32 1.0, %v8064_v57  ;;  %v5464_v57 = vld [vmem:[#allocation14 + $0x2a8] sm:$0xff] }
 0xfc8   :  { %v8066_v1 = vpop.eup %8065 }
 0xfc9   :  { %8067 = vrcp.f32 %v5044_v60  ;;  %v5054_v39 = vadd.f32 1.0, %v8066_v1  ;;  %v5467_v60 = vld [vmem:[#allocation14 + $0x2c0] sm:$0xff] }
 0xfcb   :  { %8069 = vrcp.f32 %v5054_v39  ;;  %v5466_v39 = vld [vmem:[#allocation14 + $0x2b8] sm:$0xff] }
 0xfd6   :  { %v8068_v18 = vpop.eup %8067 }
 0xfd7   :  { %v5060_v54 = vmul.f32 %v8068_v18, %v5058_v63  ;;  %v5463_v63 = vld [vmem:[#allocation14 + $0x2a0] sm:$0xff]  ;;  %v5461_v18 = vld [vmem:[#allocation14 + $0x290] sm:$0xff] }
 0xfd8   :  { %v8070_v56 = vpop.eup %8069 }
 0xfd9   :  { %v5061_v26 = vadd.f32 %v5060_v54, %v9970_v43  ;;  %v5063_v2 = vsub.f32 1.0, %v8070_v56  ;;  %v5068_v62 = vmul.f32 %v8070_v56, %v5066_v12  ;;  %v5474_v54 = vld [vmem:[#allocation14 + $0x2f8] sm:$0xff]  ;;  %v5460_v56 = vld [vmem:[#allocation14 + $0x288] sm:$0xff] }
 0xfda   :  { %v5458_v12 = vld [vmem:[#allocation14 + $0x278] sm:$0xff] }
 0xfdb   :  { %8071 = vtanh.f32 %v5061_v26  ;;  %v5465_v26 = vld [vmem:[#allocation14 + $0x2b0] sm:$0xff] }
 0xfe8   :  { %v8072_v9 = vpop.eup %8071 }
 0xfe9   :  { %v5064_v59 = vmul.f32 %v8072_v9, %v5063_v2  ;;  %v5462_v2 = vld [vmem:[#allocation14 + $0x298] sm:$0xff]  ;;  %v5457_v9 = vld [vmem:[#allocation14 + $0x270] sm:$0xff] }
 0xfeb   :  { %v10052_v44 = vadd.f32 %v5068_v62, %v5064_v59  ;;  %v5455_v59 = vld [vmem:[#allocation14 + $0x260] sm:$0xff] }
 0xfec   :  { %v5459_v62 = vld [vmem:[#allocation14 + $0x280] sm:$0xff] }
 0xfed   :  { %5070 = vst [vmem:[#allocation7] sm:$0xc] %v10052_v44  ;;  %v5072_v1 = vrot.slane %v10052_v44, 2 }
 0xfef   :  { %5139 = vmatmul.mubr.f32.vlgmr.msra.gmra.mxu0 %v5072_v1  ;;  %7752 = vmatmul.mubr.f32.vlgmr.msra.gmra.mxu1 %v5072_v1  ;;  %v5452_v1 = vld [vmem:[#allocation14 + $0x248] sm:$0xff] }
 0xff0   :  { %5252 = vmatpush1.msra.mxu0 %v9713_v61  ;;  %7755 = vmatpush3.msra.mxu1 %v9717_v11  ;;  %v10957_v61 = vld [vmem:[#allocation29_spill] sm:$0xff] }
 0xff1   :  { %5253 = vmatprep.subr.mxu0 %v9715_v49  ;;  %7756 = vmatprep.subr.mxu1 %v10802_v15  ;;  %v10958_v49 = vld [vmem:[#allocation47_spill] sm:$0xff]  ;;  %v10959_v11 = vld [vmem:[#allocation49_spill] sm:$0xff] }
 0xff2   :  { %5254 = vmatpush1.msra.mxu0 %v9719_v4  ;;  %7757 = vmatpush3.msra.mxu1 %v9725_v14  ;;  %v10960_v4 = vld [vmem:[#allocation30_spill] sm:$0xff]  ;;  %v10962_v14 = vld [vmem:[#allocation53_spill] sm:$0xff] }
 0xff3   :  { %5255 = vmatprep.subr.mxu0 %v9722_v53  ;;  %7758 = vmatprep.subr.mxu1 %v10802_v15  ;;  %v10961_v53 = vld [vmem:[#allocation51_spill] sm:$0xff] }
 0xff4   :  { %5256 = vmatpush1.msra.mxu0 %v9728_v19  ;;  %7759 = vmatpush3.msra.mxu1 %v9735_v13  ;;  %v10963_v19 = vld [vmem:[#allocation55_spill] sm:$0xff] }
 0xff5   :  { %5257 = vmatprep.subr.mxu0 %v9732_v27  ;;  %7760 = vmatprep.subr.mxu1 %v10802_v15 }
 0xff6   :  { %5258 = vmatpush1.msra.mxu0 %v9738_v22  ;;  %7761 = vmatpush3.msra.mxu1 %v9745_v7  ;;  %v10964_v22 = vld [vmem:[#allocation31_spill] sm:$0xff] }
 0xff7   :  { %5259 = vmatprep.subr.mxu0 %v9742_v55  ;;  %7762 = vmatprep.subr.mxu1 %v10802_v15 }
 0xff8   :  { %5260 = vmatpush1.msra.mxu0 %v9748_v16  ;;  %7763 = vmatpush3.msra.mxu1 %v9755_v8 }
 0xff9   :  { %5261 = vmatprep.subr.mxu0 %v9752_v21  ;;  %7764 = vmatprep.subr.mxu1 %v10802_v15 }
 0xffa   :  { %5262 = vmatpush1.msra.mxu0 %v9758_v10  ;;  %7765 = vmatpush3.msra.mxu1 %v9765_v0 }
 0xffb   :  { %5263 = vmatprep.subr.mxu0 %v9762_v20  ;;  %7766 = vmatprep.subr.mxu1 %v10802_v15 }
 0xffc   :  { %5264 = vmatpush1.msra.mxu0 %v9768_v23  ;;  %7767 = vmatpush3.msra.mxu1 %v9775_v25 }
 0xffd   :  { %5265 = vmatprep.subr.mxu0 %v9772_v24  ;;  %7768 = vmatprep.subr.mxu1 %v10802_v15 }
 0xffe   :  { %5266 = vmatpush1.msra.mxu0 %v9778_v28  ;;  %7769 = vmatpush3.msra.mxu1 %v9785_v32 }
 0xfff   :  { %5267 = vmatprep.subr.mxu0 %v9782_v31  ;;  %7770 = vmatprep.subr.mxu1 %v10802_v15 }
0x1000   :  { %5268 = vmatpush1.msra.mxu0 %v9788_v33  ;;  %7771 = vmatpush3.msra.mxu1 %v9795_v35 }
0x1001   :  { %5269 = vmatprep.subr.mxu0 %v9792_v34  ;;  %7772 = vmatprep.subr.mxu1 %v10802_v15 }
0x1002   :  { %5270 = vmatpush1.msra.mxu0 %v9798_v36  ;;  %7773 = vmatpush3.msra.mxu1 %v9805_v38 }
0x1003   :  { %5271 = vmatprep.subr.mxu0 %v9802_v37  ;;  %7774 = vmatprep.subr.mxu1 %v10802_v15 }
0x1004   :  { %5272 = vmatpush1.msra.mxu0 %v9808_v40  ;;  %7775 = vmatpush3.msra.mxu1 %v9815_v42 }
0x1005   :  { %5273 = vmatprep.subr.mxu0 %v9812_v41  ;;  %7776 = vmatprep.subr.mxu1 %v10802_v15  ;;  %v5243_v41 = vrot.slane %v10052_v44, 6  ;;  %v5454_v44 = vld [vmem:[#allocation14 + $0x258] sm:$0xff] }
0x1006   :  { %5274 = vmatpush1.msra.mxu0 %v9818_v45  ;;  %7777 = vmatpush3.msra.mxu1 %v9825_v47 }
0x1007   :  { %5275 = vmatprep.subr.mxu0 %v9822_v46  ;;  %7778 = vmatprep.subr.mxu1 %v10802_v15 }
0x1008   :  { %5276 = vmatpush1.msra.mxu0 %v9828_v50  ;;  %7779 = vmatpush3.msra.mxu1 %v9835_v52  ;;  %v5472_v52 = vld [vmem:[#allocation14 + $0x2e8] sm:$0xff] }
0x1009   :  { %5277 = vmatprep.subr.mxu0 %v9832_v51  ;;  %7780 = vmatprep.subr.mxu1 %v10802_v15  ;;  %v5473_v51 = vld [vmem:[#allocation14 + $0x2f0] sm:$0xff] }
0x100a   :  { %5278 = vmatpush1.msra.mxu0 %v9838_v3  ;;  %7781 = vmatpush3.msra.mxu1 %v10957_v61  ;;  %v5470_v3 = vld [vmem:[#allocation14 + $0x2d8] sm:$0xff]  ;;  %v5456_v61 = vld [vmem:[#allocation14 + $0x268] sm:$0xff] }
0x100b   :  { %5279 = vmatprep.subr.mxu0 %v10958_v49  ;;  %7782 = vmatprep.subr.mxu1 %v10802_v15  ;;  %v5451_v49 = vld [vmem:[#allocation14 + $0x240] sm:$0xff] }
0x100c   :  { %5280 = vmatpush1.msra.mxu0 %v10959_v11  ;;  %7783 = vmatpush3.msra.mxu1 %v10960_v4  ;;  %v5449_v11 = vld [vmem:[#allocation14 + $0x230] sm:$0xff] }
0x100d   :  { %5281 = vmatprep.subr.mxu0 %v10961_v53  ;;  %7784 = vmatprep.subr.mxu1 %v10802_v15  ;;  %v5453_v4 = vld [vmem:[#allocation14 + $0x250] sm:$0xff]  ;;  %v5448_v53 = vld [vmem:[#allocation14 + $0x228] sm:$0xff] }
0x100e   :  { %5282 = vmatpush1.msra.mxu0 %v10962_v14  ;;  %5315 = vmatprep.mubr.f32.mxu0 %v10802_v15  ;;  %v5446_v14 = vld [vmem:[#allocation14 + $0x218] sm:$0xff] }
0x100f   :  { %7785 = vmatpush3.msra.mxu1 %v10963_v19  ;;  %7786 = vmatprep.mubr.msk.f32.mxu1 %vm8271_vm3, %v10802_v15  ;;  %v5450_v19 = vld [vmem:[#allocation14 + $0x238] sm:$0xff] }
0x1010   :  { %7789 = vmatprep.subr.mxu1 %v10802_v15  ;;  %5493 = vmatprep.subr.mxu0 %v5473_v51 }
0x10af   :  { %v5140_v27 = vpop.f32.mrf.mxu0  ;;  %v5211_v13 = vpop.f32.mrf.mxu1 }
0x10b0   :  { %v5141_v55 = vadd.f32 %v5140_v27, %v10964_v22  ;;  %v5212_v32 = vadd.f32 %v5211_v13, %v9966_v17  ;;  %v5445_v27 = vld [vmem:[#allocation14 + $0x210] sm:$0xff]  ;;  %v5443_v13 = vld [vmem:[#allocation14 + $0x200] sm:$0xff] }
0x10b1   :  { %v5142_v7 = vpop.f32.mrf.mxu0  ;;  %v7753_v16 = vpop.f32.mrf.mxu1 }
0x10b2   :  { %v5216_v21 = vrot.slane %v5141_v55, 4  ;;  %v5143_v8 = vadd.f32 %v5142_v7, %v9957_v48  ;;  %v5236_v34 = vrot.slane %v5212_v32, 4  ;;  %v5447_v55 = vld [vmem:[#allocation14 + $0x220] sm:$0xff]  ;;  %v5442_v7 = vld [vmem:[#allocation14 + $0x1f8] sm:$0xff]  ;;  %v5440_v16 = vld [vmem:[#allocation14 + $0x1e8] sm:$0xff] }
0x10b3   :  { %v5430_v32 = vld [vmem:[#allocation14 + $0x198] sm:$0xff] }
0x10b4   :  { %v5218_v10 = vadd.f32 %v5216_v21, %v9953_v6  ;;  %v5226_v0 = vrot.slane %v5143_v8, 4  ;;  %v5444_v21 = vld [vmem:[#allocation14 + $0x208] sm:$0xff]  ;;  %v5439_v8 = vld [vmem:[#allocation14 + $0x1e0] sm:$0xff] }
0x10b6   :  { %v6610_v20 = vmul.f32 -1.442695, %v5218_v10  ;;  %v5228_v23 = vadd.f32 %v5226_v0, %v9962_v30  ;;  %v5437_v10 = vld [vmem:[#allocation14 + $0x1d0] sm:$0xff]  ;;  %v5436_v0 = vld [vmem:[#allocation14 + $0x1c8] sm:$0xff] }
0x10b8   :  { %8073 = vpow2.f32 %v6610_v20  ;;  %v6611_v24 = vmul.f32 -1.442695, %v5228_v23  ;;  %v5441_v20 = vld [vmem:[#allocation14 + $0x1f0] sm:$0xff]  ;;  %v5434_v23 = vld [vmem:[#allocation14 + $0x1b8] sm:$0xff] }
0x10ba   :  { %8075 = vpow2.f32 %v6611_v24  ;;  %v5438_v24 = vld [vmem:[#allocation14 + $0x1d8] sm:$0xff] }
0x10c5   :  { %v8074_v25 = vpop.eup %8073 }
0x10c6   :  { %v5222_v28 = vadd.f32 1.0, %v8074_v25  ;;  %v5433_v25 = vld [vmem:[#allocation14 + $0x1b0] sm:$0xff] }
0x10c7   :  { %v8076_v31 = vpop.eup %8075 }
0x10c8   :  { %8077 = vrcp.f32 %v5222_v28  ;;  %v5232_v33 = vadd.f32 1.0, %v8076_v31  ;;  %v5431_v28 = vld [vmem:[#allocation14 + $0x1a0] sm:$0xff] }
0x10c9   :  { %v5435_v31 = vld [vmem:[#allocation14 + $0x1c0] sm:$0xff] }
0x10ca   :  { %8079 = vrcp.f32 %v5232_v33  ;;  %v5428_v33 = vld [vmem:[#allocation14 + $0x188] sm:$0xff] }
0x10d5   :  { %v8078_v35 = vpop.eup %8077 }
0x10d6   :  { %v5238_v36 = vmul.f32 %v8078_v35, %v5236_v34  ;;  %v5432_v34 = vld [vmem:[#allocation14 + $0x1a8] sm:$0xff]  ;;  %v5427_v35 = vld [vmem:[#allocation14 + $0x180] sm:$0xff] }
0x10d7   :  { %v8080_v38 = vpop.eup %8079 }
0x10d8   :  { %v5239_v37 = vadd.f32 %v5238_v36, %v9970_v43  ;;  %v5241_v40 = vsub.f32 1.0, %v8080_v38  ;;  %v5245_v46 = vmul.f32 %v8080_v38, %v5243_v41  ;;  %v5429_v36 = vld [vmem:[#allocation14 + $0x190] sm:$0xff] }
0x10da   :  { %8081 = vtanh.f32 %v5239_v37  ;;  %v10150_v37 = vld [vmem:[#allocation16 + $0x470] sm:$0xff] }
0x10db   :  { %10965 = vst [vmem:[#allocation57_spill] sm:$0xff] %v10150_v37 }
0x10e7   :  { %v8082_v42 = vpop.eup %8081 }
0x10e8   :  { %v5242_v45 = vmul.f32 %v8082_v42, %v5241_v40 }
0x10ea   :  { %v10129_v47 = vadd.f32 %v5245_v46, %v5242_v45 }
0x10ec   :  { %5247 = vst [vmem:[#allocation7] sm:$0x30] %v10129_v47  ;;  %v5249_v50 = vrot.slane %v10129_v47, 4 }
0x10ee   :  { %5316 = vmatmul.mubr.f32.vlgmr.msra.gmra.mxu0 %v5249_v50  ;;  %7787 = vmatmul.mubr.f32.vlgmr.msra.gmra.mxu1 %v5249_v50 }
0x10ef   :  { %5557 = vmatprep.mubr.f32.mxu0 %v10802_v15  ;;  %7821 = vmatprep.mubr.msk.f32.mxu1 %vm8271_vm3, %v10802_v15 }
0x10f0   :  { %5494 = vmatpush1.msra.mxu0 %v5472_v52  ;;  %7790 = vmatpush3.msra.mxu1 %v5474_v54 }
0x10f1   :  { %5495 = vmatprep.subr.mxu0 %v5470_v3  ;;  %7791 = vmatprep.subr.mxu1 %v10802_v15 }
0x10f2   :  { %5496 = vmatpush1.msra.mxu0 %v5469_v5  ;;  %7792 = vmatpush3.msra.mxu1 %v5471_v58 }
0x10f3   :  { %5497 = vmatprep.subr.mxu0 %v5467_v60  ;;  %7793 = vmatprep.subr.mxu1 %v10802_v15 }
0x10f4   :  { %5498 = vmatpush1.msra.mxu0 %v5466_v39  ;;  %7794 = vmatpush3.msra.mxu1 %v5468_v29 }
0x10f5   :  { %5499 = vmatprep.subr.mxu0 %v5464_v57  ;;  %7795 = vmatprep.subr.mxu1 %v10802_v15 }
0x10f6   :  { %5500 = vmatpush1.msra.mxu0 %v5463_v63  ;;  %7796 = vmatpush3.msra.mxu1 %v5465_v26  ;;  %v5420_v26 = vrot.slane %v10129_v47, 6  ;;  %v10171_v47 = vld [vmem:[#allocation16 + $0x440] sm:$0xff] }
0x10f7   :  { %5501 = vmatprep.subr.mxu0 %v5461_v18  ;;  %7797 = vmatprep.subr.mxu1 %v10802_v15 }
0x10f8   :  { %5502 = vmatpush1.msra.mxu0 %v5460_v56  ;;  %7798 = vmatpush3.msra.mxu1 %v5462_v2 }
0x10f9   :  { %5503 = vmatprep.subr.mxu0 %v5458_v12  ;;  %7799 = vmatprep.subr.mxu1 %v10802_v15 }
0x10fa   :  { %5504 = vmatpush1.msra.mxu0 %v5457_v9  ;;  %7800 = vmatpush3.msra.mxu1 %v5459_v62  ;;  %v10164_v62 = vld [vmem:[#allocation16 + $0x458] sm:$0xff] }
0x10fb   :  { %5505 = vmatprep.subr.mxu0 %v5455_v59  ;;  %7801 = vmatprep.subr.mxu1 %v10802_v15  ;;  %v10162_v59 = vld [vmem:[#allocation16 + $0x468] sm:$0xff] }
0x10fc   :  { %5506 = vmatpush1.msra.mxu0 %v5454_v44  ;;  %7802 = vmatpush3.msra.mxu1 %v5456_v61  ;;  %v10166_v44 = vld [vmem:[#allocation16 + $0x478] sm:$0xff] }
0x10fd   :  { %5507 = vmatprep.subr.mxu0 %v5452_v1  ;;  %7803 = vmatprep.subr.mxu1 %v10802_v15  ;;  %v10174_v1 = vld [vmem:[#allocation16 + $0x460] sm:$0xff]  ;;  %v10177_v61 = vld [vmem:[#allocation16 + $0x438] sm:$0xff] }
0x10fe   :  { %5508 = vmatpush1.msra.mxu0 %v5451_v49  ;;  %7804 = vmatpush3.msra.mxu1 %v5453_v4  ;;  %v10181_v49 = vld [vmem:[#allocation16 + $0x428] sm:$0xff]  ;;  %v10187_v4 = vld [vmem:[#allocation16 + $0x420] sm:$0xff] }
0x10ff   :  { %5509 = vmatprep.subr.mxu0 %v5449_v11  ;;  %7805 = vmatprep.subr.mxu1 %v10802_v15  ;;  %v10184_v11 = vld [vmem:[#allocation16 + $0x448] sm:$0xff] }
0x1100   :  { %5510 = vmatpush1.msra.mxu0 %v5448_v53  ;;  %7806 = vmatpush3.msra.mxu1 %v5450_v19  ;;  %v10191_v53 = vld [vmem:[#allocation16 + $0x410] sm:$0xff]  ;;  %v10197_v19 = vld [vmem:[#allocation16 + $0x408] sm:$0xff] }
0x1101   :  { %5511 = vmatprep.subr.mxu0 %v5446_v14  ;;  %7807 = vmatprep.subr.mxu1 %v10802_v15  ;;  %v10194_v14 = vld [vmem:[#allocation16 + $0x430] sm:$0xff] }
0x1102   :  { %5512 = vmatpush1.msra.mxu0 %v5445_v27  ;;  %7808 = vmatpush3.msra.mxu1 %v5447_v55  ;;  %v10201_v27 = vld [vmem:[#allocation16 + $0x3f8] sm:$0xff]  ;;  %v10207_v55 = vld [vmem:[#allocation16 + $0x3f0] sm:$0xff] }
0x1103   :  { %5513 = vmatprep.subr.mxu0 %v5443_v13  ;;  %7809 = vmatprep.subr.mxu1 %v10802_v15  ;;  %v10204_v13 = vld [vmem:[#allocation16 + $0x418] sm:$0xff] }
0x1104   :  { %5514 = vmatpush1.msra.mxu0 %v5442_v7  ;;  %7810 = vmatpush3.msra.mxu1 %v5444_v21  ;;  %v10211_v7 = vld [vmem:[#allocation16 + $0x3e0] sm:$0xff]  ;;  %v10217_v21 = vld [vmem:[#allocation16 + $0x3d8] sm:$0xff] }
0x1105   :  { %5515 = vmatprep.subr.mxu0 %v5440_v16  ;;  %7811 = vmatprep.subr.mxu1 %v10802_v15  ;;  %v10214_v16 = vld [vmem:[#allocation16 + $0x400] sm:$0xff] }
0x1106   :  { %5516 = vmatpush1.msra.mxu0 %v5439_v8  ;;  %7812 = vmatpush3.msra.mxu1 %v5441_v20  ;;  %v10221_v8 = vld [vmem:[#allocation16 + $0x3c8] sm:$0xff]  ;;  %v10227_v20 = vld [vmem:[#allocation16 + $0x3c0] sm:$0xff] }
0x1107   :  { %5517 = vmatprep.subr.mxu0 %v5437_v10  ;;  %7813 = vmatprep.subr.mxu1 %v10802_v15  ;;  %v10224_v10 = vld [vmem:[#allocation16 + $0x3e8] sm:$0xff] }
0x1108   :  { %5518 = vmatpush1.msra.mxu0 %v5436_v0  ;;  %7814 = vmatpush3.msra.mxu1 %v5438_v24  ;;  %v10231_v0 = vld [vmem:[#allocation16 + $0x3b0] sm:$0xff]  ;;  %v10237_v24 = vld [vmem:[#allocation16 + $0x3a8] sm:$0xff] }
0x1109   :  { %5519 = vmatprep.subr.mxu0 %v5434_v23  ;;  %7815 = vmatprep.subr.mxu1 %v10802_v15  ;;  %v10234_v23 = vld [vmem:[#allocation16 + $0x3d0] sm:$0xff] }
0x110a   :  { %5520 = vmatpush1.msra.mxu0 %v5433_v25  ;;  %7816 = vmatpush3.msra.mxu1 %v5435_v31  ;;  %v10241_v25 = vld [vmem:[#allocation16 + $0x398] sm:$0xff]  ;;  %v10247_v31 = vld [vmem:[#allocation16 + $0x390] sm:$0xff] }
0x110b   :  { %5521 = vmatprep.subr.mxu0 %v5431_v28  ;;  %7817 = vmatprep.subr.mxu1 %v10802_v15  ;;  %v10244_v28 = vld [vmem:[#allocation16 + $0x3b8] sm:$0xff] }
0x110c   :  { %5522 = vmatpush1.msra.mxu0 %v5430_v32  ;;  %7818 = vmatpush3.msra.mxu1 %v5432_v34  ;;  %v10251_v32 = vld [vmem:[#allocation16 + $0x380] sm:$0xff]  ;;  %v10257_v34 = vld [vmem:[#allocation16 + $0x378] sm:$0xff] }
0x110d   :  { %5523 = vmatprep.subr.mxu0 %v5428_v33  ;;  %7819 = vmatprep.subr.mxu1 %v10802_v15  ;;  %v10254_v33 = vld [vmem:[#allocation16 + $0x3a0] sm:$0xff] }
0x110e   :  { %5524 = vmatpush1.msra.mxu0 %v5427_v35  ;;  %7820 = vmatpush3.msra.mxu1 %v5429_v36  ;;  %v10261_v35 = vld [vmem:[#allocation16 + $0x368] sm:$0xff] }
0x110f   :  { %5701 = vmatprep.subr.mxu0 %v10150_v37  ;;  %7824 = vmatprep.subr.mxu1 %v10802_v15  ;;  %v10264_v36 = vld [vmem:[#allocation16 + $0x388] sm:$0xff] }
0x11ae   :  { %v5317_v38 = vpop.f32.mrf.mxu0  ;;  %v5388_v40 = vpop.f32.mrf.mxu1 }
0x11af   :  { %v5318_v41 = vadd.f32 %v5317_v38, %v10964_v22  ;;  %v5389_v22 = vadd.f32 %v5388_v40, %v9966_v17  ;;  %v10267_v38 = vld [vmem:[#allocation16 + $0x360] sm:$0xff]  ;;  %v10271_v40 = vld [vmem:[#allocation16 + $0x350] sm:$0xff] }
0x11b0   :  { %v5319_v42 = vpop.f32.mrf.mxu0  ;;  %v7788_v45 = vpop.f32.mrf.mxu1 }
0x11b1   :  { %v5393_v46 = vrot.slane %v5318_v41, 2  ;;  %v5320_v50 = vadd.f32 %v5319_v42, %v9957_v48  ;;  %v5413_v29 = vrot.slane %v5389_v22, 2  ;;  %v10274_v41 = vld [vmem:[#allocation16 + $0x370] sm:$0xff]  ;;  %v10277_v42 = vld [vmem:[#allocation16 + $0x348] sm:$0xff]  ;;  %v10281_v45 = vld [vmem:[#allocation16 + $0x338] sm:$0xff] }
0x11b3   :  { %v5395_v51 = vadd.f32 %v5393_v46, %v9953_v6  ;;  %v5403_v3 = vrot.slane %v5320_v50, 2  ;;  %v10284_v46 = vld [vmem:[#allocation16 + $0x358] sm:$0xff]  ;;  %v10287_v50 = vld [vmem:[#allocation16 + $0x330] sm:$0xff] }
0x11b5   :  { %v6612_v52 = vmul.f32 -1.442695, %v5395_v51  ;;  %v5405_v54 = vadd.f32 %v5403_v3, %v9962_v30  ;;  %v10291_v51 = vld [vmem:[#allocation16 + $0x320] sm:$0xff]  ;;  %v10297_v3 = vld [vmem:[#allocation16 + $0x318] sm:$0xff] }
0x11b6   :  { %10966 = vst [vmem:[#allocation59_spill] sm:$0xff] %v10291_v51  ;;  %10968 = vst [vmem:[#allocation61_spill] sm:$0xff] %v10297_v3 }
0x11b7   :  { %8083 = vpow2.f32 %v6612_v52  ;;  %v6613_v5 = vmul.f32 -1.442695, %v5405_v54  ;;  %v10294_v52 = vld [vmem:[#allocation16 + $0x340] sm:$0xff]  ;;  %v10301_v54 = vld [vmem:[#allocation16 + $0x308] sm:$0xff] }
0x11b8   :  { %10967 = vst [vmem:[#allocation32_spill] sm:$0xff] %v10294_v52  ;;  %10969 = vst [vmem:[#allocation34_spill] sm:$0xff] %v10301_v54 }
0x11b9   :  { %8085 = vpow2.f32 %v6613_v5  ;;  %v10304_v5 = vld [vmem:[#allocation16 + $0x328] sm:$0xff] }
0x11ba   :  { %10970 = vst [vmem:[#allocation36_spill] sm:$0xff] %v10304_v5 }
0x11c4   :  { %v8084_v60 = vpop.eup %8083 }
0x11c5   :  { %v5399_v58 = vadd.f32 1.0, %v8084_v60  ;;  %v10307_v60 = vld [vmem:[#allocation16 + $0x300] sm:$0xff] }
0x11c6   :  { %v8086_v39 = vpop.eup %8085  ;;  %10971 = vst [vmem:[#allocation63_spill] sm:$0xff] %v10307_v60 }
0x11c7   :  { %8087 = vrcp.f32 %v5399_v58  ;;  %v5409_v57 = vadd.f32 1.0, %v8086_v39  ;;  %v10312_v58 = vld [vmem:[#allocation16 + $0x310] sm:$0xff] }
0x11c8   :  { %10972 = vst [vmem:[#allocation38_spill] sm:$0xff] %v10312_v58 }
0x11c9   :  { %8089 = vrcp.f32 %v5409_v57  ;;  %v6614_v57 = vld [vmem:[%s10669_s12 + $0x6] sm:$0x7] }
0x11d4   :  { %v8088_v63 = vpop.eup %8087 }
0x11d5   :  { %v5415_v18 = vmul.f32 %v8088_v63, %v5413_v29  ;;  %v6615_v63 = vld [vmem:[%s10670_s13 + $0x6] sm:$0x7] }
0x11d6   :  { %v8090_v48 = vpop.eup %8089 }
0x11d7   :  { %v5416_v6 = vadd.f32 %v5415_v18, %v9970_v43  ;;  %v5418_v30 = vsub.f32 1.0, %v8090_v48  ;;  %v5422_v2 = vmul.f32 %v8090_v48, %v5420_v26  ;;  %v10168_v43 = vld [vmem:[#allocation16 + $0x450] sm:$0xff]  ;;  %v10973_v18 = vld [vmem:[#allocation66_spill] sm:$0xff] }
0x11d8   :  { %v10400_v48 = vrot.slane %v6615_v63, %v10973_v18 }
0x11d9   :  { %8091 = vtanh.f32 %v5416_v6  ;;  %v5481_v6 = vrot.slane %v6614_v57, %v10973_v18 }
0x11da   :  { %10974 = vst [vmem:[#allocation40_spill] sm:$0xff] %v10400_v48 }
0x11e6   :  { %v8092_v56 = vpop.eup %8091 }
0x11e7   :  { %v5419_v12 = vmul.f32 %v8092_v56, %v5418_v30 }
0x11e9   :  { %v5423_v9 = vadd.f32 %v5422_v2, %v5419_v12  ;;  %v10975_v2 = vld [vmem:[#allocation68_spill] sm:$0xff] }
0x11eb   :  { %5424 = vst [vmem:[#allocation7] sm:$0xc0] %v5423_v9  ;;  %v10406_v9 = vrot.slane %v6615_v63, %v10975_v2 }
0x11f2   :  { %v5425_v17 = vld [vmem:[#allocation7] sm:$0xff] }
0x11f3   :  { %5558 = vmatmul.mubr.f32.vlgmr.msra.gmra.mxu0 %v5425_v17  ;;  %7822 = vmatmul.mubr.f32.vlgmr.msra.gmra.mxu1 %v5425_v17 }
0x11f4   :  { %5702 = vmatpush1.msra.mxu0 %v10162_v59  ;;  %5765 = vmatprep.mubr.f32.mxu0 %v10802_v15 }
0x11f5   :  { %5703 = vmatprep.subr.mxu0 %v10164_v62  ;;  %7825 = vmatpush3.msra.mxu1 %v10166_v44 }
0x11f6   :  { %5704 = vmatpush1.msra.mxu0 %v10168_v43  ;;  %7826 = vmatprep.subr.mxu1 %v10802_v15 }
0x11f7   :  { %5705 = vmatprep.subr.mxu0 %v10171_v47  ;;  %7827 = vmatpush3.msra.mxu1 %v10174_v1 }
0x11f8   :  { %5706 = vmatpush1.msra.mxu0 %v10177_v61  ;;  %7828 = vmatprep.subr.mxu1 %v10802_v15 }
0x11f9   :  { %5707 = vmatprep.subr.mxu0 %v10181_v49  ;;  %7829 = vmatpush3.msra.mxu1 %v10184_v11 }
0x11fa   :  { %5708 = vmatpush1.msra.mxu0 %v10187_v4  ;;  %7830 = vmatprep.subr.mxu1 %v10802_v15 }
0x11fb   :  { %5709 = vmatprep.subr.mxu0 %v10191_v53  ;;  %7831 = vmatpush3.msra.mxu1 %v10194_v14 }
0x11fc   :  { %5710 = vmatpush1.msra.mxu0 %v10197_v19  ;;  %7832 = vmatprep.subr.mxu1 %v10802_v15 }
0x11fd   :  { %5711 = vmatprep.subr.mxu0 %v10201_v27  ;;  %7833 = vmatpush3.msra.mxu1 %v10204_v13 }
0x11fe   :  { %5712 = vmatpush1.msra.mxu0 %v10207_v55  ;;  %7834 = vmatprep.subr.mxu1 %v10802_v15 }
0x11ff   :  { %5713 = vmatprep.subr.mxu0 %v10211_v7  ;;  %7835 = vmatpush3.msra.mxu1 %v10214_v16 }
0x1200   :  { %5714 = vmatpush1.msra.mxu0 %v10217_v21  ;;  %7836 = vmatprep.subr.mxu1 %v10802_v15 }
0x1201   :  { %5715 = vmatprep.subr.mxu0 %v10221_v8  ;;  %7837 = vmatpush3.msra.mxu1 %v10224_v10 }
0x1202   :  { %5716 = vmatpush1.msra.mxu0 %v10227_v20  ;;  %7838 = vmatprep.subr.mxu1 %v10802_v15 }
0x1203   :  { %5717 = vmatprep.subr.mxu0 %v10231_v0  ;;  %7839 = vmatpush3.msra.mxu1 %v10234_v23 }
0x1204   :  { %5718 = vmatpush1.msra.mxu0 %v10237_v24  ;;  %7840 = vmatprep.subr.mxu1 %v10802_v15 }
0x1205   :  { %5719 = vmatprep.subr.mxu0 %v10241_v25  ;;  %7841 = vmatpush3.msra.mxu1 %v10244_v28 }
0x1206   :  { %5720 = vmatpush1.msra.mxu0 %v10247_v31  ;;  %7842 = vmatprep.subr.mxu1 %v10802_v15 }
0x1207   :  { %5721 = vmatprep.subr.mxu0 %v10251_v32  ;;  %7843 = vmatpush3.msra.mxu1 %v10254_v33 }
0x1208   :  { %5722 = vmatpush1.msra.mxu0 %v10257_v34  ;;  %7844 = vmatprep.subr.mxu1 %v10802_v15 }
0x1209   :  { %5723 = vmatprep.subr.mxu0 %v10261_v35  ;;  %7845 = vmatpush3.msra.mxu1 %v10264_v36 }
0x120a   :  { %5724 = vmatpush1.msra.mxu0 %v10267_v38  ;;  %7846 = vmatprep.subr.mxu1 %v10802_v15 }
0x120b   :  { %5725 = vmatprep.subr.mxu0 %v10271_v40  ;;  %7847 = vmatpush3.msra.mxu1 %v10274_v41 }
0x120c   :  { %5726 = vmatpush1.msra.mxu0 %v10277_v42  ;;  %7848 = vmatprep.subr.mxu1 %v10802_v15 }
0x120d   :  { %5727 = vmatprep.subr.mxu0 %v10281_v45  ;;  %7849 = vmatpush3.msra.mxu1 %v10284_v46 }
0x120e   :  { %5728 = vmatpush1.msra.mxu0 %v10287_v50  ;;  %7850 = vmatprep.subr.mxu1 %v10802_v15 }
0x120f   :  { %5729 = vmatprep.subr.mxu0 %v10291_v51  ;;  %7851 = vmatpush3.msra.mxu1 %v10294_v52 }
0x1210   :  { %5730 = vmatpush1.msra.mxu0 %v10297_v3  ;;  %7852 = vmatprep.subr.mxu1 %v10802_v15 }
0x1211   :  { %5731 = vmatprep.subr.mxu0 %v10301_v54  ;;  %7853 = vmatpush3.msra.mxu1 %v10304_v5 }
0x1212   :  { %5732 = vmatpush1.msra.mxu0 %v10307_v60  ;;  %7854 = vmatprep.subr.mxu1 %v10802_v15 }
0x1213   :  { %5766 = vmatmul.mubr.f32.vlgmr.msra.gmra.mxu0 %v10802_v15  ;;  %7855 = vmatpush3.msra.mxu1 %v10312_v58 }
0x1214   :  { %7856 = vmatprep.mubr.msk.f32.mxu1 %vm8271_vm3, %v10802_v15  ;;  %5863 = vmatprep.subr.mxu0 %v10150_v37 }
0x1215   :  { %7857 = vmatmul.mubr.f32.vlgmr.msra.gmra.mxu1 %v10802_v15  ;;  %7859 = vmatprep.subr.mxu1 %v10802_v15 }
0x1216   :  { %5864 = vmatpush1.msra.mxu0 %v10162_v59  ;;  %7860 = vmatpush3.msra.mxu1 %v10166_v44 }
0x1217   :  { %5865 = vmatprep.subr.mxu0 %v10164_v62  ;;  %7861 = vmatprep.subr.mxu1 %v10802_v15 }
0x1218   :  { %5866 = vmatpush1.msra.mxu0 %v10168_v43  ;;  %7862 = vmatpush3.msra.mxu1 %v10174_v1 }
0x1219   :  { %5867 = vmatprep.subr.mxu0 %v10171_v47  ;;  %7863 = vmatprep.subr.mxu1 %v10802_v15 }
0x121a   :  { %5868 = vmatpush1.msra.mxu0 %v10177_v61  ;;  %7864 = vmatpush3.msra.mxu1 %v10184_v11 }
0x121b   :  { %5869 = vmatprep.subr.mxu0 %v10181_v49  ;;  %7865 = vmatprep.subr.mxu1 %v10802_v15 }
0x121c   :  { %5870 = vmatpush1.msra.mxu0 %v10187_v4  ;;  %7866 = vmatpush3.msra.mxu1 %v10194_v14 }
0x121d   :  { %5871 = vmatprep.subr.mxu0 %v10191_v53  ;;  %7867 = vmatprep.subr.mxu1 %v10802_v15 }
0x121e   :  { %5872 = vmatpush1.msra.mxu0 %v10197_v19  ;;  %7868 = vmatpush3.msra.mxu1 %v10204_v13 }
0x121f   :  { %5873 = vmatprep.subr.mxu0 %v10201_v27  ;;  %7869 = vmatprep.subr.mxu1 %v10802_v15 }
0x1220   :  { %5874 = vmatpush1.msra.mxu0 %v10207_v55  ;;  %7870 = vmatpush3.msra.mxu1 %v10214_v16 }
0x1221   :  { %5875 = vmatprep.subr.mxu0 %v10211_v7  ;;  %7871 = vmatprep.subr.mxu1 %v10802_v15 }
0x1222   :  { %5876 = vmatpush1.msra.mxu0 %v10217_v21  ;;  %7872 = vmatpush3.msra.mxu1 %v10224_v10 }
0x1223   :  { %5877 = vmatprep.subr.mxu0 %v10221_v8  ;;  %7873 = vmatprep.subr.mxu1 %v10802_v15 }
0x1224   :  { %5878 = vmatpush1.msra.mxu0 %v10227_v20  ;;  %7874 = vmatpush3.msra.mxu1 %v10234_v23 }
0x1225   :  { %5879 = vmatprep.subr.mxu0 %v10231_v0  ;;  %7875 = vmatprep.subr.mxu1 %v10802_v15 }
0x1226   :  { %5880 = vmatpush1.msra.mxu0 %v10237_v24  ;;  %7876 = vmatpush3.msra.mxu1 %v10244_v28 }
0x1227   :  { %5881 = vmatprep.subr.mxu0 %v10241_v25  ;;  %7877 = vmatprep.subr.mxu1 %v10802_v15 }
0x1228   :  { %5882 = vmatpush1.msra.mxu0 %v10247_v31  ;;  %7878 = vmatpush3.msra.mxu1 %v10254_v33 }
0x1229   :  { %5883 = vmatprep.subr.mxu0 %v10251_v32  ;;  %7879 = vmatprep.subr.mxu1 %v10802_v15 }
0x122a   :  { %5884 = vmatpush1.msra.mxu0 %v10257_v34  ;;  %7880 = vmatpush3.msra.mxu1 %v10264_v36 }
0x122b   :  { %5885 = vmatprep.subr.mxu0 %v10261_v35  ;;  %7881 = vmatprep.subr.mxu1 %v10802_v15 }
0x122c   :  { %5886 = vmatpush1.msra.mxu0 %v10267_v38  ;;  %7882 = vmatpush3.msra.mxu1 %v10274_v41 }
0x122d   :  { %5887 = vmatprep.subr.mxu0 %v10271_v40  ;;  %7883 = vmatprep.subr.mxu1 %v10802_v15 }
0x122e   :  { %5888 = vmatpush1.msra.mxu0 %v10277_v42  ;;  %7884 = vmatpush3.msra.mxu1 %v10284_v46 }
0x122f   :  { %5889 = vmatprep.subr.mxu0 %v10281_v45  ;;  %7885 = vmatprep.subr.mxu1 %v10802_v15 }
0x1230   :  { %5890 = vmatpush1.msra.mxu0 %v10287_v50  ;;  %7886 = vmatpush3.msra.mxu1 %v10294_v52 }
0x1231   :  { %5891 = vmatprep.subr.mxu0 %v10291_v51  ;;  %7887 = vmatprep.subr.mxu1 %v10802_v15 }
0x1232   :  { %5892 = vmatpush1.msra.mxu0 %v10297_v3  ;;  %7888 = vmatpush3.msra.mxu1 %v10304_v5  ;;  %v10976_v3 = vld [vmem:[#allocation67_spill] sm:$0xff] }
0x1233   :  { %5893 = vmatprep.subr.mxu0 %v10301_v54  ;;  %7889 = vmatprep.subr.mxu1 %v10802_v15  ;;  %v10415_v51 = vrot.slane %v6615_v63, %v10976_v3 }
0x1234   :  { %5894 = vmatpush1.msra.mxu0 %v10307_v60  ;;  %5927 = vmatprep.mubr.f32.mxu0 %v10802_v15 }
0x1235   :  { %7890 = vmatpush3.msra.mxu1 %v10312_v58  ;;  %7891 = vmatprep.mubr.msk.f32.mxu1 %vm8271_vm3, %v10802_v15 }
0x1236   :  { %6040 = vmatprep.subr.mxu0 %v10150_v37  ;;  %7894 = vmatprep.subr.mxu1 %v10802_v15  ;;  %v5485_v37 = vrot.slane %v6614_v57, %v10975_v2 }
0x12b3   :  { %v5630_v39 = vpop.f32.mrf.mxu1  ;;  %v5559_v29 = vpop.f32.mrf.mxu0 }
0x12b4   :  { %v10402_v56 = vadd.f32 %v5559_v29, %v5481_v6 }
0x12b5   :  { %v7823_v22 = vpop.f32.mrf.mxu1  ;;  %v5561_v26 = vpop.f32.mrf.mxu0 }
0x12b6   :  { %v10411_v5 = vadd.f32 %v5561_v26, %v5485_v37 }
0x12d3   :  { %v5767_v30 = vpop.f32.mrf.mxu0 }
0x12d4   :  { %v5768_v12 = vadd.f32 %v5767_v30, %v10400_v48 }
0x12d5   :  { %v5769_v17 = vpop.f32.mrf.mxu0  ;;  %v5838_v22 = vpop.f32.mrf.mxu1 }
0x12d6   :  { %v5842_v58 = vadd.f32 %v5768_v12, %v10402_v56  ;;  %v5770_v18 = vadd.f32 %v5769_v17, %v10406_v9  ;;  %v5489_v12 = vrot.slane %v6614_v57, %v10976_v3  ;;  %v10977_v3 = vld [vmem:[#allocation59_spill] sm:$0xff]  ;;  %v10979_v57 = vld [vmem:[#allocation36_spill] sm:$0xff] }
0x12d7   :  { %v7858_v60 = vpop.f32.mrf.mxu1 }
0x12d8   :  { %v6616_v54 = vmul.f32 -1.442695, %v5842_v58  ;;  %v5849_v29 = vadd.f32 %v5770_v18, %v10411_v5  ;;  %v5839_v58 = vadd.f32 %v5838_v22, %v10415_v51  ;;  %v10419_v37 = vadd.f32 %v5630_v39, %v5489_v12  ;;  %v10978_v39 = vld [vmem:[#allocation61_spill] sm:$0xff]  ;;  %v10980_v22 = vld [vmem:[#allocation34_spill] sm:$0xff] }
0x12d9   :  { %v10982_v12 = vld [vmem:[#allocation38_spill] sm:$0xff] }
0x12da   :  { %8093 = vpow2.f32 %v6616_v54  ;;  %v6617_v6 = vmul.f32 -1.442695, %v5849_v29 }
0x12dc   :  { %8095 = vpow2.f32 %v6617_v6 }
0x12e7   :  { %v8094_v30 = vpop.eup %8093 }
0x12e8   :  { %v5846_v48 = vadd.f32 1.0, %v8094_v30 }
0x12e9   :  { %v8096_v2 = vpop.eup %8095 }
0x12ea   :  { %8097 = vrcp.f32 %v5846_v48  ;;  %v5853_v60 = vadd.f32 1.0, %v8096_v2  ;;  %v10981_v2 = vld [vmem:[#allocation63_spill] sm:$0xff] }
0x12ec   :  { %8099 = vrcp.f32 %v5853_v60  ;;  %v10983_v60 = vld [vmem:[#allocation57_spill] sm:$0xff] }
0x12f7   :  { %v8098_v17 = vpop.eup %8097 }
0x12f8   :  { %v5856_v54 = vmul.f32 %v8098_v17, %v5839_v58 }
0x12f9   :  { %v8100_v18 = vpop.eup %8099 }
0x12fa   :  { %v5857_v26 = vadd.f32 %v5856_v54, %v10419_v37  ;;  %v5859_v29 = vsub.f32 1.0, %v8100_v18  ;;  %v5861_v63 = vmul.f32 0.0, %v8100_v18  ;;  %v10984_v54 = vld [vmem:[#allocation40_spill] sm:$0xff] }
0x12fc   :  { %8101 = vtanh.f32 %v5857_v26 }
0x1309   :  { %v8102_v48 = vpop.eup %8101 }
0x130a   :  { %v5860_v6 = vmul.f32 %v8102_v48, %v5859_v29 }
0x130c   :  { %v10422_v30 = vadd.f32 %v5861_v63, %v5860_v6 }
0x130e   :  { %5928 = vmatmul.mubr.f32.vlgmr.msra.gmra.mxu0 %v10422_v30  ;;  %7892 = vmatmul.mubr.f32.vlgmr.msra.gmra.mxu1 %v10422_v30 }
0x130f   :  { %6041 = vmatpush1.msra.mxu0 %v10162_v59  ;;  %7895 = vmatpush3.msra.mxu1 %v10166_v44 }
0x1310   :  { %6042 = vmatprep.subr.mxu0 %v10164_v62  ;;  %7896 = vmatprep.subr.mxu1 %v10802_v15 }
0x1311   :  { %6043 = vmatpush1.msra.mxu0 %v10168_v43  ;;  %7897 = vmatpush3.msra.mxu1 %v10174_v1 }
0x1312   :  { %6044 = vmatprep.subr.mxu0 %v10171_v47  ;;  %7898 = vmatprep.subr.mxu1 %v10802_v15 }
0x1313   :  { %6045 = vmatpush1.msra.mxu0 %v10177_v61  ;;  %7899 = vmatpush3.msra.mxu1 %v10184_v11 }
0x1314   :  { %6046 = vmatprep.subr.mxu0 %v10181_v49  ;;  %7900 = vmatprep.subr.mxu1 %v10802_v15 }
0x1315   :  { %6047 = vmatpush1.msra.mxu0 %v10187_v4  ;;  %7901 = vmatpush3.msra.mxu1 %v10194_v14 }
0x1316   :  { %6048 = vmatprep.subr.mxu0 %v10191_v53  ;;  %7902 = vmatprep.subr.mxu1 %v10802_v15 }
0x1317   :  { %6049 = vmatpush1.msra.mxu0 %v10197_v19  ;;  %7903 = vmatpush3.msra.mxu1 %v10204_v13 }
0x1318   :  { %6050 = vmatprep.subr.mxu0 %v10201_v27  ;;  %7904 = vmatprep.subr.mxu1 %v10802_v15 }
0x1319   :  { %6051 = vmatpush1.msra.mxu0 %v10207_v55  ;;  %7905 = vmatpush3.msra.mxu1 %v10214_v16 }
0x131a   :  { %6052 = vmatprep.subr.mxu0 %v10211_v7  ;;  %7906 = vmatprep.subr.mxu1 %v10802_v15 }
0x131b   :  { %6053 = vmatpush1.msra.mxu0 %v10217_v21  ;;  %7907 = vmatpush3.msra.mxu1 %v10224_v10 }
0x131c   :  { %6054 = vmatprep.subr.mxu0 %v10221_v8  ;;  %7908 = vmatprep.subr.mxu1 %v10802_v15 }
0x131d   :  { %6055 = vmatpush1.msra.mxu0 %v10227_v20  ;;  %7909 = vmatpush3.msra.mxu1 %v10234_v23 }
0x131e   :  { %6056 = vmatprep.subr.mxu0 %v10231_v0  ;;  %7910 = vmatprep.subr.mxu1 %v10802_v15 }
0x131f   :  { %6057 = vmatpush1.msra.mxu0 %v10237_v24  ;;  %7911 = vmatpush3.msra.mxu1 %v10244_v28 }
0x1320   :  { %6058 = vmatprep.subr.mxu0 %v10241_v25  ;;  %7912 = vmatprep.subr.mxu1 %v10802_v15 }
0x1321   :  { %6059 = vmatpush1.msra.mxu0 %v10247_v31  ;;  %7913 = vmatpush3.msra.mxu1 %v10254_v33 }
0x1322   :  { %6060 = vmatprep.subr.mxu0 %v10251_v32  ;;  %7914 = vmatprep.subr.mxu1 %v10802_v15 }
0x1323   :  { %6061 = vmatpush1.msra.mxu0 %v10257_v34  ;;  %7915 = vmatpush3.msra.mxu1 %v10264_v36 }
0x1324   :  { %6062 = vmatprep.subr.mxu0 %v10261_v35  ;;  %7916 = vmatprep.subr.mxu1 %v10802_v15 }
0x1325   :  { %6063 = vmatpush1.msra.mxu0 %v10267_v38  ;;  %7917 = vmatpush3.msra.mxu1 %v10274_v41 }
0x1326   :  { %6064 = vmatprep.subr.mxu0 %v10271_v40  ;;  %7918 = vmatprep.subr.mxu1 %v10802_v15 }
0x1327   :  { %6065 = vmatpush1.msra.mxu0 %v10277_v42  ;;  %7919 = vmatpush3.msra.mxu1 %v10284_v46 }
0x1328   :  { %6066 = vmatprep.subr.mxu0 %v10281_v45  ;;  %7920 = vmatprep.subr.mxu1 %v10802_v15 }
0x1329   :  { %6067 = vmatpush1.msra.mxu0 %v10287_v50  ;;  %7921 = vmatpush3.msra.mxu1 %v10294_v52 }
0x132a   :  { %6068 = vmatprep.subr.mxu0 %v10977_v3  ;;  %7922 = vmatprep.subr.mxu1 %v10802_v15 }
0x132b   :  { %6069 = vmatpush1.msra.mxu0 %v10978_v39  ;;  %7923 = vmatpush3.msra.mxu1 %v10979_v57 }
0x132c   :  { %6070 = vmatprep.subr.mxu0 %v10980_v22  ;;  %7924 = vmatprep.subr.mxu1 %v10802_v15 }
0x132d   :  { %6071 = vmatpush1.msra.mxu0 %v10981_v2  ;;  %6104 = vmatprep.mubr.f32.mxu0 %v10802_v15 }
0x132e   :  { %7925 = vmatpush3.msra.mxu1 %v10982_v12  ;;  %7926 = vmatprep.mubr.msk.f32.mxu1 %vm8271_vm3, %v10802_v15 }
0x132f   :  { %6216 = vmatprep.subr.mxu0 %v10983_v60  ;;  %7929 = vmatprep.subr.mxu1 %v10802_v15 }
0x13ce   :  { %v5929_v58 = vpop.f32.mrf.mxu0  ;;  %v6000_v17 = vpop.f32.mrf.mxu1 }
0x13cf   :  { %v5930_v26 = vadd.f32 %v5929_v58, %v10984_v54  ;;  %v6001_v58 = vadd.f32 %v6000_v17, %v10415_v51  ;;  %v6398_v17 = vld [vmem:[%s10671_s14 + $0x48] sm:$0xff] }
0x13d0   :  { %v5931_v18 = vpop.f32.mrf.mxu0  ;;  %v7893_v29 = vpop.f32.mrf.mxu1 }
0x13d1   :  { %v6005_v48 = vrot.slane %v5930_v26, 6  ;;  %v5932_v6 = vadd.f32 %v5931_v18, %v10406_v9  ;;  %v6025_v29 = vrot.slane %v6001_v58, 6  ;;  %v6395_v58 = vld [vmem:[%s10671_s14 + $0x30] sm:$0xff] }
0x13d3   :  { %v6007_v63 = vadd.f32 %v6005_v48, %v10402_v56  ;;  %v6015_v12 = vrot.slane %v5932_v6, 6 }
0x13d5   :  { %v6618_v2 = vmul.f32 -1.442695, %v6007_v63  ;;  %v6017_v22 = vadd.f32 %v6015_v12, %v10411_v5 }
0x13d7   :  { %8103 = vpow2.f32 %v6618_v2  ;;  %v6619_v57 = vmul.f32 -1.442695, %v6017_v22  ;;  %v6033_v2 = vrot.slane %v10422_v30, 6  ;;  %v6400_v30 = vld [vmem:[%s10671_s14 + $0x58] sm:$0xff] }
0x13d9   :  { %8105 = vpow2.f32 %v6619_v57 }
0x13e4   :  { %v8104_v60 = vpop.eup %8103 }
0x13e5   :  { %v6011_v39 = vadd.f32 1.0, %v8104_v60  ;;  %v6396_v60 = vld [vmem:[%s10671_s14 + $0x38] sm:$0xff] }
0x13e6   :  { %v8106_v3 = vpop.eup %8105 }
0x13e7   :  { %8107 = vrcp.f32 %v6011_v39  ;;  %v6021_v54 = vadd.f32 1.0, %v8106_v3  ;;  %v6399_v3 = vld [vmem:[%s10671_s14 + $0x50] sm:$0xff] }
0x13e9   :  { %8109 = vrcp.f32 %v6021_v54  ;;  %v6397_v54 = vld [vmem:[%s10671_s14 + $0x40] sm:$0xff] }
0x13f4   :  { %v8108_v26 = vpop.eup %8107 }
0x13f5   :  { %v6027_v52 = vmul.f32 %v8108_v26, %v6025_v29  ;;  %v6394_v29 = vld [vmem:[%s10671_s14 + $0x28] sm:$0xff]  ;;  %v6393_v26 = vld [vmem:[%s10671_s14 + $0x20] sm:$0xff] }
0x13f6   :  { %v8110_v48 = vpop.eup %8109 }
0x13f7   :  { %v6028_v18 = vadd.f32 %v6027_v52, %v10419_v37  ;;  %v6030_v12 = vsub.f32 1.0, %v8110_v48  ;;  %v6035_v6 = vmul.f32 %v8110_v48, %v6033_v2  ;;  %v6401_v52 = vld [vmem:[%s10671_s14 + $0x60] sm:$0xff]  ;;  %v6391_v48 = vld [vmem:[%s10671_s14 + $0x10] sm:$0xff]  ;;  %v6390_v2 = vld [vmem:[%s10671_s14 + $0x8] sm:$0xff] }
0x13f9   :  { %8111 = vtanh.f32 %v6028_v18  ;;  %v6392_v18 = vld [vmem:[%s10671_s14 + $0x18] sm:$0xff] }
0x1406   :  { %v8112_v22 = vpop.eup %8111 }
0x1407   :  { %v6031_v57 = vmul.f32 %v8112_v22, %v6030_v12  ;;  %v6389_v12 = vld [vmem:[%s10671_s14] sm:$0xff] }
0x1409   :  { %v10500_v63 = vadd.f32 %v6035_v6, %v6031_v57 }
0x140b   :  { %v6038_v39 = vrot.slane %v10500_v63, 2 }
0x140d   :  { %6105 = vmatmul.mubr.f32.vlgmr.msra.gmra.mxu0 %v6038_v39  ;;  %7927 = vmatmul.mubr.f32.vlgmr.msra.gmra.mxu1 %v6038_v39 }
0x140e   :  { %6217 = vmatpush1.msra.mxu0 %v10162_v59  ;;  %7930 = vmatpush3.msra.mxu1 %v10166_v44  ;;  %v10985_v59 = vld [vmem:[#allocation32_spill] sm:$0xff]  ;;  %v10987_v44 = vld [vmem:[#allocation61_spill] sm:$0xff] }
0x140f   :  { %6218 = vmatprep.subr.mxu0 %v10164_v62  ;;  %7931 = vmatprep.subr.mxu1 %v10802_v15  ;;  %v10986_v62 = vld [vmem:[#allocation59_spill] sm:$0xff] }
0x1410   :  { %6219 = vmatpush1.msra.mxu0 %v10168_v43  ;;  %7932 = vmatpush3.msra.mxu1 %v10174_v1  ;;  %v10988_v43 = vld [vmem:[#allocation36_spill] sm:$0xff]  ;;  %v10990_v1 = vld [vmem:[#allocation63_spill] sm:$0xff] }
0x1411   :  { %6220 = vmatprep.subr.mxu0 %v10171_v47  ;;  %7933 = vmatprep.subr.mxu1 %v10802_v15  ;;  %v10989_v47 = vld [vmem:[#allocation34_spill] sm:$0xff] }
0x1412   :  { %6221 = vmatpush1.msra.mxu0 %v10177_v61  ;;  %7934 = vmatpush3.msra.mxu1 %v10184_v11  ;;  %v10991_v61 = vld [vmem:[#allocation38_spill] sm:$0xff] }
0x1413   :  { %6222 = vmatprep.subr.mxu0 %v10181_v49  ;;  %7935 = vmatprep.subr.mxu1 %v10802_v15 }
0x1414   :  { %6223 = vmatpush1.msra.mxu0 %v10187_v4  ;;  %7936 = vmatpush3.msra.mxu1 %v10194_v14  ;;  %v10992_v4 = vld [vmem:[#allocation40_spill] sm:$0xff] }
0x1415   :  { %6224 = vmatprep.subr.mxu0 %v10191_v53  ;;  %7937 = vmatprep.subr.mxu1 %v10802_v15 }
0x1416   :  { %6225 = vmatpush1.msra.mxu0 %v10197_v19  ;;  %7938 = vmatpush3.msra.mxu1 %v10204_v13 }
0x1417   :  { %6226 = vmatprep.subr.mxu0 %v10201_v27  ;;  %7939 = vmatprep.subr.mxu1 %v10802_v15 }
0x1418   :  { %6227 = vmatpush1.msra.mxu0 %v10207_v55  ;;  %7940 = vmatpush3.msra.mxu1 %v10214_v16 }
0x1419   :  { %6228 = vmatprep.subr.mxu0 %v10211_v7  ;;  %7941 = vmatprep.subr.mxu1 %v10802_v15 }
0x141a   :  { %6229 = vmatpush1.msra.mxu0 %v10217_v21  ;;  %7942 = vmatpush3.msra.mxu1 %v10224_v10 }
0x141b   :  { %6230 = vmatprep.subr.mxu0 %v10221_v8  ;;  %7943 = vmatprep.subr.mxu1 %v10802_v15 }
0x141c   :  { %6231 = vmatpush1.msra.mxu0 %v10227_v20  ;;  %7944 = vmatpush3.msra.mxu1 %v10234_v23 }
0x141d   :  { %6232 = vmatprep.subr.mxu0 %v10231_v0  ;;  %7945 = vmatprep.subr.mxu1 %v10802_v15 }
0x141e   :  { %6233 = vmatpush1.msra.mxu0 %v10237_v24  ;;  %7946 = vmatpush3.msra.mxu1 %v10244_v28 }
0x141f   :  { %6234 = vmatprep.subr.mxu0 %v10241_v25  ;;  %7947 = vmatprep.subr.mxu1 %v10802_v15 }
0x1420   :  { %6235 = vmatpush1.msra.mxu0 %v10247_v31  ;;  %7948 = vmatpush3.msra.mxu1 %v10254_v33 }
0x1421   :  { %6236 = vmatprep.subr.mxu0 %v10251_v32  ;;  %7949 = vmatprep.subr.mxu1 %v10802_v15 }
0x1422   :  { %6237 = vmatpush1.msra.mxu0 %v10257_v34  ;;  %7950 = vmatpush3.msra.mxu1 %v10264_v36  ;;  %v6209_v34 = vrot.slane %v10500_v63, 6 }
0x1423   :  { %6238 = vmatprep.subr.mxu0 %v10261_v35  ;;  %7951 = vmatprep.subr.mxu1 %v10802_v15 }
0x1424   :  { %6239 = vmatpush1.msra.mxu0 %v10267_v38  ;;  %7952 = vmatpush3.msra.mxu1 %v10274_v41 }
0x1425   :  { %6240 = vmatprep.subr.mxu0 %v10271_v40  ;;  %7953 = vmatprep.subr.mxu1 %v10802_v15 }
0x1426   :  { %6241 = vmatpush1.msra.mxu0 %v10277_v42  ;;  %7954 = vmatpush3.msra.mxu1 %v10284_v46  ;;  %v6403_v46 = vld [vmem:[%s10671_s14 + $0x70] sm:$0xff] }
0x1427   :  { %6242 = vmatprep.subr.mxu0 %v10281_v45  ;;  %7955 = vmatprep.subr.mxu1 %v10802_v15  ;;  %v6404_v45 = vld [vmem:[%s10671_s14 + $0x78] sm:$0xff] }
0x1428   :  { %6243 = vmatpush1.msra.mxu0 %v10287_v50  ;;  %7956 = vmatpush3.msra.mxu1 %v10985_v59  ;;  %v6402_v50 = vld [vmem:[%s10671_s14 + $0x68] sm:$0xff] }
0x1429   :  { %6244 = vmatprep.subr.mxu0 %v10986_v62  ;;  %7957 = vmatprep.subr.mxu1 %v10802_v15 }
0x142a   :  { %6245 = vmatpush1.msra.mxu0 %v10987_v44  ;;  %7958 = vmatpush3.msra.mxu1 %v10988_v43 }
0x142b   :  { %6246 = vmatprep.subr.mxu0 %v10989_v47  ;;  %7959 = vmatprep.subr.mxu1 %v10802_v15 }
0x142c   :  { %6247 = vmatpush1.msra.mxu0 %v10990_v1  ;;  %6280 = vmatprep.mubr.f32.mxu0 %v10802_v15 }
0x142d   :  { %7960 = vmatpush3.msra.mxu1 %v10991_v61  ;;  %7961 = vmatprep.mubr.msk.f32.mxu1 %vm8271_vm3, %v10802_v15 }
0x142e   :  { %7964 = vmatprep.subr.mxu0 %v10802_v15 }
0x14cd   :  { %v6106_v49 = vpop.f32.mrf.mxu0  ;;  %v6177_v11 = vpop.f32.mrf.mxu1 }
0x14ce   :  { %v6107_v53 = vadd.f32 %v6106_v49, %v10992_v4  ;;  %v6178_v23 = vadd.f32 %v6177_v11, %v10415_v51 }
0x14cf   :  { %v6108_v14 = vpop.f32.mrf.mxu0  ;;  %v7928_v19 = vpop.f32.mrf.mxu1 }
0x14d0   :  { %v6182_v27 = vrot.slane %v6107_v53, 4  ;;  %v6109_v13 = vadd.f32 %v6108_v14, %v10406_v9  ;;  %v6202_v25 = vrot.slane %v6178_v23, 4 }
0x14d2   :  { %v6184_v55 = vadd.f32 %v6182_v27, %v10402_v56  ;;  %v6192_v16 = vrot.slane %v6109_v13, 4 }
0x14d4   :  { %v6620_v7 = vmul.f32 -1.442695, %v6184_v55  ;;  %v6194_v21 = vadd.f32 %v6192_v16, %v10411_v5 }
0x14d6   :  { %8113 = vpow2.f32 %v6620_v7  ;;  %v6621_v8 = vmul.f32 -1.442695, %v6194_v21 }
0x14d8   :  { %8115 = vpow2.f32 %v6621_v8 }
0x14e3   :  { %v8114_v10 = vpop.eup %8113 }
0x14e4   :  { %v6188_v20 = vadd.f32 1.0, %v8114_v10 }
0x14e5   :  { %v8116_v0 = vpop.eup %8115 }
0x14e6   :  { %8117 = vrcp.f32 %v6188_v20  ;;  %v6198_v24 = vadd.f32 1.0, %v8116_v0 }
0x14e8   :  { %8119 = vrcp.f32 %v6198_v24 }
0x14f3   :  { %v8118_v28 = vpop.eup %8117 }
0x14f4   :  { %v6204_v31 = vmul.f32 %v8118_v28, %v6202_v25 }
0x14f5   :  { %v8120_v33 = vpop.eup %8119 }
0x14f6   :  { %v6205_v32 = vadd.f32 %v6204_v31, %v10419_v37  ;;  %v6207_v35 = vsub.f32 1.0, %v8120_v33  ;;  %v6211_v40 = vmul.f32 %v8120_v33, %v6209_v34 }
0x14f8   :  { %8121 = vtanh.f32 %v6205_v32 }
0x1505   :  { %v8122_v36 = vpop.eup %8121 }
0x1506   :  { %v6208_v38 = vmul.f32 %v8122_v36, %v6207_v35 }
0x1508   :  { %v10576_v41 = vadd.f32 %v6211_v40, %v6208_v38 }
0x150a   :  { %v6214_v42 = vrot.slane %v10576_v41, 4  ;;  %v6385_v13 = vrot.slane %v10576_v41, 6 }
0x150c   :  { %6281 = vmatmul.mubr.f32.vlgmr.msra.gmra.mxu0 %v6214_v42  ;;  %7962 = vmatmul.mubr.f32.vlgmr.msra.gmra.mxu1 %v6214_v42 }
0x150d   :  { %7996 = vmatprep.mubr.msk.f32.mxu0 %vm8271_vm3, %v10802_v15  ;;  %7965 = vmatpush3.msra.mxu0 %v6404_v45 }
0x150e   :  { %7966 = vmatprep.subr.mxu0 %v10802_v15 }
0x150f   :  { %7967 = vmatpush3.msra.mxu0 %v6403_v46 }
0x1510   :  { %7968 = vmatprep.subr.mxu0 %v10802_v15 }
0x1511   :  { %7969 = vmatpush3.msra.mxu0 %v6402_v50 }
0x1512   :  { %7970 = vmatprep.subr.mxu0 %v10802_v15 }
0x1513   :  { %7971 = vmatpush3.msra.mxu0 %v6401_v52 }
0x1514   :  { %7972 = vmatprep.subr.mxu0 %v10802_v15 }
0x1515   :  { %7973 = vmatpush3.msra.mxu0 %v6400_v30 }
0x1516   :  { %7974 = vmatprep.subr.mxu0 %v10802_v15 }
0x1517   :  { %7975 = vmatpush3.msra.mxu0 %v6399_v3 }
0x1518   :  { %7976 = vmatprep.subr.mxu0 %v10802_v15 }
0x1519   :  { %7977 = vmatpush3.msra.mxu0 %v6398_v17 }
0x151a   :  { %7978 = vmatprep.subr.mxu0 %v10802_v15 }
0x151b   :  { %7979 = vmatpush3.msra.mxu0 %v6397_v54 }
0x151c   :  { %7980 = vmatprep.subr.mxu0 %v10802_v15 }
0x151d   :  { %7981 = vmatpush3.msra.mxu0 %v6396_v60 }
0x151e   :  { %7982 = vmatprep.subr.mxu0 %v10802_v15 }
0x151f   :  { %7983 = vmatpush3.msra.mxu0 %v6395_v58 }
0x1520   :  { %7984 = vmatprep.subr.mxu0 %v10802_v15 }
0x1521   :  { %7985 = vmatpush3.msra.mxu0 %v6394_v29 }
0x1522   :  { %7986 = vmatprep.subr.mxu0 %v10802_v15 }
0x1523   :  { %7987 = vmatpush3.msra.mxu0 %v6393_v26 }
0x1524   :  { %7988 = vmatprep.subr.mxu0 %v10802_v15 }
0x1525   :  { %7989 = vmatpush3.msra.mxu0 %v6392_v18 }
0x1526   :  { %7990 = vmatprep.subr.mxu0 %v10802_v15 }
0x1527   :  { %7991 = vmatpush3.msra.mxu0 %v6391_v48 }
0x1528   :  { %7992 = vmatprep.subr.mxu0 %v10802_v15 }
0x1529   :  { %7993 = vmatpush3.msra.mxu0 %v6390_v2 }
0x152a   :  { %7994 = vmatprep.subr.mxu0 %v10802_v15 }
0x152b   :  { %7995 = vmatpush3.msra.mxu0 %v6389_v12 }
0x15cc   :  { %v6282_v22 = vpop.f32.mrf.mxu0  ;;  %v6353_v57 = vpop.f32.mrf.mxu1 }
0x15cd   :  { %v6283_v6 = vadd.f32 %v6282_v22, %v10992_v4  ;;  %v6354_v4 = vadd.f32 %v6353_v57, %v10415_v51  ;;  %v6624_v51 = vld [vmem:[%s10672_s15] ss:$0 sm:$0xff] }
0x15ce   :  { %v6284_v63 = vpop.f32.mrf.mxu0  ;;  %v7963_v39 = vpop.f32.mrf.mxu1 }
0x15cf   :  { %v6358_v59 = vrot.slane %v6283_v6, 2  ;;  %v6285_v62 = vadd.f32 %v6284_v63, %v10406_v9  ;;  %v6378_v14 = vrot.slane %v6354_v4, 2 }
0x15d1   :  { %v6360_v44 = vadd.f32 %v6358_v59, %v10402_v56  ;;  %v6368_v47 = vrot.slane %v6285_v62, 2 }
0x15d3   :  { %v6622_v43 = vmul.f32 -1.442695, %v6360_v44  ;;  %v6370_v1 = vadd.f32 %v6368_v47, %v10411_v5 }
0x15d5   :  { %8123 = vpow2.f32 %v6622_v43  ;;  %v6623_v61 = vmul.f32 -1.442695, %v6370_v1 }
0x15d7   :  { %8125 = vpow2.f32 %v6623_v61 }
0x15e2   :  { %v8124_v15 = vpop.eup %8123 }
0x15e3   :  { %v6364_v49 = vadd.f32 1.0, %v8124_v15 }
0x15e4   :  { %v8126_v11 = vpop.eup %8125 }
0x15e5   :  { %8127 = vrcp.f32 %v6364_v49  ;;  %v6374_v53 = vadd.f32 1.0, %v8126_v11 }
0x15e7   :  { %8129 = vrcp.f32 %v6374_v53 }
0x15f2   :  { %v8128_v19 = vpop.eup %8127 }
0x15f3   :  { %v6380_v27 = vmul.f32 %v8128_v19, %v6378_v14 }
0x15f4   :  { %v8130_v9 = vpop.eup %8129 }
0x15f5   :  { %v6381_v56 = vadd.f32 %v6380_v27, %v10419_v37  ;;  %v6383_v5 = vsub.f32 1.0, %v8130_v9  ;;  %v6387_v16 = vmul.f32 %v8130_v9, %v6385_v13 }
0x15f7   :  { %8131 = vtanh.f32 %v6381_v56 }
0x1604   :  { %v8132_v55 = vpop.eup %8131 }
0x1605   :  { %v6384_v7 = vmul.f32 %v8132_v55, %v6383_v5 }
0x1607   :  { %v6388_v21 = vadd.f32 %v6387_v16, %v6384_v7 }
0x1609   :  { %v6413_v8 = vrot.slane %v6388_v21, 6 }
0x160b   :  { %7997 = vmatmul.mubr.f32.vlgmr.msra.gmra.mxu0 %v6413_v8 }
0x16cb   :  { %v6481_v10 = vpop.f32.mrf.mxu0 }
0x16cc   :  { %v6482_v37 = vadd.f32 %v6624_v51, %v6481_v10 }
0x16cd   :  { %v7998_v20 = vpop.f32.mrf.mxu0 }
0x16ce   :  { %6486 = vst.msk [vmem:[#allocation17] sm:$0x3] %vm6485_vm11, %v6482_v37 }
0x16cf   :  { %8244 = shalt.err (!%p8241_p1)
}
0x16d0   :  { %6496 = dma.vmem_to_hbm [thread:$0]  %s6494_s21, 32, %s10673_s16, [#allocation10]  }
0x16d1   :  { %8259 = dma.done.wait [#allocation10], 32  }
0x16d2   :  { %8260 = vsyncadd [#allocation10], 4294967264 }
0x16d3   :  { %6500 = vsyncpa [#allocation9], 1 }
0x16d4   :  { %6501 = vsyncpa [#allocation12], 1 }
0x16d5   :  { %6502 = vsyncpa [#allocation15], 1 }
0x16d6   :  { %6503 = vsyncpa [#allocation10], 1 }

</bundles_post_ra>
